<compile_context>
chip_gen: v7x
topology: tpu7x:2x2x1
jax: 0.10.0
libtpu: 0.0.40
codegen_flags: <defaults>
</compile_context>

<pallas_src>
import math

import jax
import jax.numpy as jnp
from jax import lax
from jax.experimental import pallas as pl
from jax.experimental.pallas import tpu as pltpu


# ----------------------------------------------------------------------------
# numerically-safe activation helpers (usable inside Pallas kernels)
# ----------------------------------------------------------------------------
def _sigmoid(x):
    return 1.0 / (1.0 + jnp.exp(-x))


def _softplus(x):
    return jnp.maximum(x, 0.0) + jnp.log(1.0 + jnp.exp(-jnp.abs(x)))


def _selu(x):
    alpha = 1.6732632423543772
    scale = 1.0507009873554805
    return scale * jnp.where(x > 0, x, alpha * (jnp.exp(x) - 1.0))


# ----------------------------------------------------------------------------
# Kernel A: fused per-sequence Mamba pipeline (grid over batch, parallel).
#   x (L, 12) -> initial_conv -> in_proj -> depthwise causal conv + SiLU
#   -> projections -> selective scan -> gate -> out_proj + SELU -> final_conv
#   -> (L, 12)
# ----------------------------------------------------------------------------
def _mamba_seq_kernel(x_ref, w_init_ref, w_in_x_ref, w_in_z_ref,
                      w_conv_ref, b_conv_ref,
                      w_dt_ref, b_dt_ref, w_xb_ref, w_xc_ref,
                      tile_ref, a_log_ref, d_ref,
                      w_out_ref, w_final_ref,
                      o_ref):
    f32 = jnp.float32
    x = x_ref[...].astype(f32)                                        # (L, 12)

    # initial 1x1 conv (pointwise matmul) + in_proj split into x / z halves
    h0 = jnp.dot(x, w_init_ref[...], preferred_element_type=f32)      # (L, d_model)
    x_in = jnp.dot(h0, w_in_x_ref[...], preferred_element_type=f32)   # (L, d_inner)
    z = jnp.dot(h0, w_in_z_ref[...], preferred_element_type=f32)      # (L, d_inner)

    L, d_inner = x_in.shape
    K = w_conv_ref.shape[0]
    n_state = w_xc_ref.shape[1]

    # depthwise causal conv (padding K-1, truncated to L) + bias + SiLU
    wc = w_conv_ref[...].astype(f32)                                  # (K, d_inner)
    t_idx = lax.broadcasted_iota(jnp.int32, (L, 1), 0)
    conv = x_in * wc[K - 1:K, :]                                      # tap with shift 0
    for k in range(K - 1):                                            # static, K == d_conv
        s = K - 1 - k
        shifted = pltpu.roll(x_in, shift=s, axis=0)                   # [t] <- x_in[t - s]
        shifted = jnp.where(t_idx >= s, shifted, 0.0)                 # causal zero pad
        conv = conv + shifted * wc[k:k + 1, :]
    conv = conv + b_conv_ref[...]
    u = conv * _sigmoid(conv)                                         # SiLU, (L, d_inner)

    # x_proj / dt_proj (dt path pre-folded into one (d_inner, d_inner) weight)
    dt_raw = jnp.dot(u, w_dt_ref[...], preferred_element_type=f32) + b_dt_ref[...]
    delta = _softplus(dt_raw)                                         # (L, d_inner)
    c_mat = jnp.dot(u, w_xc_ref[...], preferred_element_type=f32)     # (L, N)

    # flat lane-dense SSM state layout: j = n * d_inner + d
    a_neg = -jnp.exp(a_log_ref[...])                                  # (1, N*d_inner)
    delta_t = jnp.dot(delta, tile_ref[...], preferred_element_type=f32)     # (L, N*d_inner)
    dtu_t = jnp.dot(delta * u, tile_ref[...], preferred_element_type=f32)   # (L, N*d_inner)
    b_exp = jnp.dot(u, w_xb_ref[...], preferred_element_type=f32)           # (L, N*d_inner)

    dA = jnp.exp(delta_t * a_neg)                                     # (L, N*d_inner)
    dBu = dtu_t * b_exp                                               # (L, N*d_inner)

    # Hillis–Steele associative scan over time:
    #   h_t = dA_t * h_{t-1} + dBu_t ,  h_{-1} = 0
    # ceil(log2(L)) fully-vectorized steps; no serial dependency chain, no
    # per-timestep scratch stores.  (A, B) composition: later segment (a, b)
    # absorbing earlier (a_p, b_p) -> (a*a_p, a*b_p + b).
    a_sc = dA
    b_sc = dBu
    off = 1
    while off < L:                                                    # static trip count
        valid = t_idx >= off
        a_prev = jnp.where(valid, pltpu.roll(a_sc, shift=off, axis=0), 1.0)
        b_prev = jnp.where(valid, pltpu.roll(b_sc, shift=off, axis=0), 0.0)
        b_sc = a_sc * b_prev + b_sc
        a_sc = a_sc * a_prev
        off *= 2
    hist = b_sc                                                       # (L, N*d_inner), h_t

    # y_t = C_t . h_t + D * u_t, computed vectorized after the scan
    y = d_ref[...] * u
    for n in range(n_state):                                          # static, N small
        y = y + hist[:, n * d_inner:(n + 1) * d_inner] * c_mat[:, n:n + 1]
    y = y * (z * _sigmoid(z))                                         # gate with SiLU(z)

    # out_proj -> SELU -> (dropout) -> final 1x1 conv
    # TODO(synk): nn.AlphaDropout treated as identity (inference semantics).
    y = jnp.dot(y, w_out_ref[...], preferred_element_type=f32)        # (L, d_model)
    y = _selu(y)
    out = jnp.dot(y, w_final_ref[...], preferred_element_type=f32)    # (L, 12)
    o_ref[...] = out.astype(o_ref.dtype)


# ----------------------------------------------------------------------------
# Kernel B: fused classifier head fc1..fc4 (no intermediate HBM round-trips).
# ----------------------------------------------------------------------------
def _head_kernel(x_ref, w1_ref, b1_ref, w2_ref, b2_ref,
                 w3_ref, b3_ref, w4_ref, b4_ref, o_ref):
    f32 = jnp.float32
    h = jnp.dot(x_ref[...].astype(f32), w1_ref[...],
                preferred_element_type=f32) + b1_ref[...]
    h = jnp.dot(h, w2_ref[...], preferred_element_type=f32) + b2_ref[...]
    h = jnp.dot(h, w3_ref[...], preferred_element_type=f32) + b3_ref[...]
    h = jnp.dot(h, w4_ref[...], preferred_element_type=f32) + b4_ref[...]
    o_ref[...] = h.astype(o_ref.dtype)


# ----------------------------------------------------------------------------
# Full model forward (MambaClass.forward)
# ----------------------------------------------------------------------------
def mamba_class_forward(params, x_ncl):
    B, c_in, L = x_ncl.shape
    d_model = params["w_init"].shape[1]
    d_inner = params["w_conv"].shape[1]
    d_state = params["A_log"].shape[1]
    dt_rank = params["w_dt_proj"].shape[0]
    K = params["w_conv"].shape[0]
    n_cls = params["w_fc4"].shape[1]
    f32 = jnp.float32

    # ---- parameter prep: pure layout changes / algebraic weight folds ----
    w_in_x = params["w_in_proj"][:, :d_inner]
    w_in_z = params["w_in_proj"][:, d_inner:]
    w_x_dt = params["w_x_proj"][:, :dt_rank]
    w_xb = params["w_x_proj"][:, dt_rank:dt_rank + d_state]
    w_xc = params["w_x_proj"][:, dt_rank + d_state:]
    # fold x_proj(dt slice) @ dt_proj into one (d_inner, d_inner) weight
    w_dt_full = (w_x_dt @ params["w_dt_proj"]).astype(f32)
    # expand the B projection so the SSM state lives in a flat lane-dense layout
    # (flat index j = n * d_inner + d)
    w_xb_exp = jnp.repeat(w_xb, d_inner, axis=1)                        # (d_inner, N*d_inner)
    tile_mat = jnp.tile(jnp.eye(d_inner, dtype=f32), (1, d_state))      # (d_inner, N*d_inner)
    a_log_flat = params["A_log"].T.reshape(1, d_state * d_inner)        # [0, n*d_inner+d]
    # permute fc1 rows from channel-major (c*L + l) to time-major (l*12 + c)
    # so the NCL flatten needs no activation transpose.
    w_fc1_perm = params["w_fc1"].reshape(c_in, L, -1).transpose(1, 0, 2)
    w_fc1_perm = w_fc1_perm.reshape(c_in * L, -1)

    x_lc = jnp.transpose(x_ncl, (0, 2, 1))                              # (B, L, 12)

    out_final = pl.pallas_call(
        _mamba_seq_kernel,
        out_shape=jax.ShapeDtypeStruct((B, L, c_in), x_ncl.dtype),
        grid=(B,),
        in_specs=[
            pl.BlockSpec((None, L, c_in), lambda i: (i, 0, 0)),            # x
            pl.BlockSpec((c_in, d_model), lambda i: (0, 0)),               # w_init
            pl.BlockSpec((d_model, d_inner), lambda i: (0, 0)),            # w_in_x
            pl.BlockSpec((d_model, d_inner), lambda i: (0, 0)),            # w_in_z
            pl.BlockSpec((K, d_inner), lambda i: (0, 0)),                  # w_conv
            pl.BlockSpec((1, d_inner), lambda i: (0, 0)),                  # b_conv
            pl.BlockSpec((d_inner, d_inner), lambda i: (0, 0)),            # w_dt_full
            pl.BlockSpec((1, d_inner), lambda i: (0, 0)),                  # b_dt
            pl.BlockSpec((d_inner, d_state * d_inner), lambda i: (0, 0)),  # w_xb_exp
            pl.BlockSpec((d_inner, d_state), lambda i: (0, 0)),            # w_xc
            pl.BlockSpec((d_inner, d_state * d_inner), lambda i: (0, 0)),  # tile_mat
            pl.BlockSpec((1, d_state * d_inner), lambda i: (0, 0)),        # A_log (flat)
            pl.BlockSpec((1, d_inner), lambda i: (0, 0)),                  # D
            pl.BlockSpec((d_inner, d_model), lambda i: (0, 0)),            # w_out_proj
            pl.BlockSpec((d_model, c_in), lambda i: (0, 0)),               # w_final
        ],
        out_specs=pl.BlockSpec((None, L, c_in), lambda i: (i, 0, 0)),
        compiler_params=pltpu.CompilerParams(dimension_semantics=("parallel",)),
    )(x_lc, params["w_init"], w_in_x, w_in_z,
      params["w_conv"], params["b_conv"].reshape(1, d_inner),
      w_dt_full, params["b_dt_proj"].reshape(1, d_inner),
      w_xb_exp, w_xc, tile_mat, a_log_flat,
      params["D"].reshape(1, d_inner),
      params["w_out_proj"], params["w_final"])

    # contiguous reshape only (no transpose): columns ordered as l*12 + c,
    # which matches the permuted fc1 weight above.
    flat = out_final.reshape(B, L * c_in)

    h1 = params["w_fc2"].shape[0]
    h2 = params["w_fc3"].shape[0]
    h3 = params["w_fc4"].shape[0]
    logits = pl.pallas_call(
        _head_kernel,
        out_shape=jax.ShapeDtypeStruct((B, n_cls), x_ncl.dtype),
        grid=(1,),
        in_specs=[
            pl.BlockSpec((B, L * c_in), lambda i: (0, 0)),
            pl.BlockSpec((L * c_in, h1), lambda i: (0, 0)),
            pl.BlockSpec((1, h1), lambda i: (0, 0)),
            pl.BlockSpec((h1, h2), lambda i: (0, 0)),
            pl.BlockSpec((1, h2), lambda i: (0, 0)),
            pl.BlockSpec((h2, h3), lambda i: (0, 0)),
            pl.BlockSpec((1, h3), lambda i: (0, 0)),
            pl.BlockSpec((h3, n_cls), lambda i: (0, 0)),
            pl.BlockSpec((1, n_cls), lambda i: (0, 0)),
        ],
        out_specs=pl.BlockSpec((B, n_cls), lambda i: (0, 0)),
        compiler_params=pltpu.CompilerParams(dimension_semantics=("arbitrary",)),
    )(flat, w_fc1_perm, params["b_fc1"].reshape(1, h1),
      params["w_fc2"], params["b_fc2"].reshape(1, h2),
      params["w_fc3"], params["b_fc3"].reshape(1, h3),
      params["w_fc4"], params["b_fc4"].reshape(1, n_cls))
    return logits


# ----------------------------------------------------------------------------
# deterministic parameter construction (module-shaped parameters)
# ----------------------------------------------------------------------------
def init_params(key, *, d_model, d_state, d_conv, num_classes, seq_len):
    expand = 2
    d_inner = expand * d_model
    dt_rank = math.ceil(d_model / 16)
    fc1_in = 12 * seq_len

    def nrm(k, shape, scale=0.05):
        return scale * jax.random.normal(k, shape, jnp.float32)

    ks = jax.random.split(key, 16)
    params = {
        # 1x1 convs stored as (in, out) matmul weights
        "w_init": nrm(ks[0], (12, d_model)),
        "w_final": nrm(ks[1], (d_model, 12)),
        # Mamba block
        "w_in_proj": nrm(ks[2], (d_model, 2 * d_inner)),
        "w_conv": nrm(ks[3], (d_conv, d_inner)),
        "b_conv": nrm(ks[4], (d_inner,)),
        "w_x_proj": nrm(ks[5], (d_inner, dt_rank + 2 * d_state)),
        "w_dt_proj": nrm(ks[6], (dt_rank, d_inner), scale=0.5),
        "b_dt_proj": nrm(ks[7], (d_inner,), scale=0.5),
        "A_log": jnp.log(
            jnp.broadcast_to(jnp.arange(1, d_state + 1, dtype=jnp.float32),
                             (d_inner, d_state))
        ),
        "D": jnp.ones((d_inner,), jnp.float32),
        # classifier head (nn.Linear with bias)
        "w_out_proj": nrm(ks[8], (d_inner, d_model)),
        "w_fc1": nrm(ks[9], (fc1_in, 512), scale=0.02),
        "b_fc1": nrm(ks[10], (512,), scale=0.02),
        "w_fc2": nrm(ks[11], (512, 256), scale=0.02),
        "b_fc2": nrm(ks[12], (256,), scale=0.02),
        "w_fc3": nrm(ks[13], (256, 64), scale=0.02),
        "b_fc3": nrm(ks[14], (64,), scale=0.02),
        "w_fc4": nrm(ks[15], (64, num_classes), scale=0.02),
        "b_fc4": jnp.zeros((num_classes,), jnp.float32),
    }
    return params


if __name__ == "__main__":
    # small shapes consistent with the module: x is (batch, 12, seq_len)
    B, C_IN, L = 2, 12, 64
    D_MODEL, D_STATE, D_CONV, NUM_CLASSES = 32, 8, 4, 4

    key = jax.random.PRNGKey(0)
    k_param, k_x = jax.random.split(key)
    params = init_params(k_param, d_model=D_MODEL, d_state=D_STATE,
                         d_conv=D_CONV, num_classes=NUM_CLASSES, seq_len=L)
    x = jax.random.normal(k_x, (B, C_IN, L), jnp.float32)

    fwd = jax.jit(mamba_class_forward)
    logits = fwd(params, x)
    logits = jax.block_until_ready(logits)
    assert logits.shape == (B, NUM_CLASSES)
    assert bool(jnp.all(jnp.isfinite(logits)))
    print("KERNEL_OK")
</pallas_src>

<mosaic_0001>
module attributes {stable_mosaic.version = 11 : i64} {
  func.func @_mamba_seq_kernel(%arg0: i32, %arg1: memref<1x64x12xf32, #tpu.memory_space<vmem>>, %arg2: memref<12x32xf32, #tpu.memory_space<vmem>>, %arg3: memref<32x64xf32, #tpu.memory_space<vmem>>, %arg4: memref<32x64xf32, #tpu.memory_space<vmem>>, %arg5: memref<4x64xf32, #tpu.memory_space<vmem>>, %arg6: memref<1x64xf32, #tpu.memory_space<vmem>>, %arg7: memref<64x64xf32, #tpu.memory_space<vmem>>, %arg8: memref<1x64xf32, #tpu.memory_space<vmem>>, %arg9: memref<64x512xf32, #tpu.memory_space<vmem>>, %arg10: memref<64x8xf32, #tpu.memory_space<vmem>>, %arg11: memref<64x512xf32, #tpu.memory_space<vmem>>, %arg12: memref<1x512xf32, #tpu.memory_space<vmem>>, %arg13: memref<1x64xf32, #tpu.memory_space<vmem>>, %arg14: memref<64x32xf32, #tpu.memory_space<vmem>>, %arg15: memref<32x12xf32, #tpu.memory_space<vmem>>, %arg16: memref<1x64x12xf32, #tpu.memory_space<vmem>>) attributes {dimension_semantics = [#tpu.dimension_semantics<parallel>], iteration_bounds = array<i64: 2>, scalar_prefetch = 0 : i64, scratch_operands = 0 : i64, tpu.core_type = #tpu.core_type<tc>, window_params = [{transform_indices = @transform_0, window_bounds = array<i64: 1, 64, 12>}, {pipeline_mode = #tpu.pipeline_mode<synchronous>, transform_indices = @transform_1, window_bounds = array<i64: 12, 32>}, {pipeline_mode = #tpu.pipeline_mode<synchronous>, transform_indices = @transform_2, window_bounds = array<i64: 32, 64>}, {pipeline_mode = #tpu.pipeline_mode<synchronous>, transform_indices = @transform_3, window_bounds = array<i64: 32, 64>}, {pipeline_mode = #tpu.pipeline_mode<synchronous>, transform_indices = @transform_4, window_bounds = array<i64: 4, 64>}, {pipeline_mode = #tpu.pipeline_mode<synchronous>, transform_indices = @transform_5, window_bounds = array<i64: 1, 64>}, {pipeline_mode = #tpu.pipeline_mode<synchronous>, transform_indices = @transform_6, window_bounds = array<i64: 64, 64>}, {pipeline_mode = #tpu.pipeline_mode<synchronous>, transform_indices = @transform_7, window_bounds = array<i64: 1, 64>}, {pipeline_mode = #tpu.pipeline_mode<synchronous>, transform_indices = @transform_8, window_bounds = array<i64: 64, 512>}, {pipeline_mode = #tpu.pipeline_mode<synchronous>, transform_indices = @transform_9, window_bounds = array<i64: 64, 8>}, {pipeline_mode = #tpu.pipeline_mode<synchronous>, transform_indices = @transform_10, window_bounds = array<i64: 64, 512>}, {pipeline_mode = #tpu.pipeline_mode<synchronous>, transform_indices = @transform_11, window_bounds = array<i64: 1, 512>}, {pipeline_mode = #tpu.pipeline_mode<synchronous>, transform_indices = @transform_12, window_bounds = array<i64: 1, 64>}, {pipeline_mode = #tpu.pipeline_mode<synchronous>, transform_indices = @transform_13, window_bounds = array<i64: 64, 32>}, {pipeline_mode = #tpu.pipeline_mode<synchronous>, transform_indices = @transform_14, window_bounds = array<i64: 32, 12>}, {transform_indices = @transform_15, window_bounds = array<i64: 1, 64, 12>}]} {
    %c0 = arith.constant 0 : index
    %c0_0 = arith.constant 0 : index
    %c0_1 = arith.constant 0 : index
    %0 = vector.load %arg1[%c0, %c0_0, %c0_1] : memref<1x64x12xf32, #tpu.memory_space<vmem>>, vector<1x64x12xf32>
    %1 = vector.shape_cast %0 : vector<1x64x12xf32> to vector<64x12xf32>
    %c0_2 = arith.constant 0 : index
    %c0_3 = arith.constant 0 : index
    %2 = vector.load %arg2[%c0_2, %c0_3] : memref<12x32xf32, #tpu.memory_space<vmem>>, vector<12x32xf32>
    %cst = arith.constant dense<0.000000e+00> : vector<64x32xf32>
    %3 = tpu.matmul %1, %2, %cst {dimension_numbers = #tpu.dot_dimension_numbers<[1], [0], [0], [1], [0, 0, 1, 1], [], []>} : vector<64x12xf32>, vector<12x32xf32>, vector<64x32xf32> -> vector<64x32xf32>
    %c0_4 = arith.constant 0 : index
    %c0_5 = arith.constant 0 : index
    %4 = vector.load %arg3[%c0_4, %c0_5] : memref<32x64xf32, #tpu.memory_space<vmem>>, vector<32x64xf32>
    %cst_6 = arith.constant dense<0.000000e+00> : vector<64x64xf32>
    %5 = tpu.matmul %3, %4, %cst_6 {dimension_numbers = #tpu.dot_dimension_numbers<[1], [0], [0], [1], [0, 0, 1, 1], [], []>} : vector<64x32xf32>, vector<32x64xf32>, vector<64x64xf32> -> vector<64x64xf32>
    %c0_7 = arith.constant 0 : index
    %c0_8 = arith.constant 0 : index
    %6 = vector.load %arg4[%c0_7, %c0_8] : memref<32x64xf32, #tpu.memory_space<vmem>>, vector<32x64xf32>
    %cst_9 = arith.constant dense<0.000000e+00> : vector<64x64xf32>
    %7 = tpu.matmul %3, %6, %cst_9 {dimension_numbers = #tpu.dot_dimension_numbers<[1], [0], [0], [1], [0, 0, 1, 1], [], []>} : vector<64x32xf32>, vector<32x64xf32>, vector<64x64xf32> -> vector<64x64xf32>
    %c0_10 = arith.constant 0 : index
    %c0_11 = arith.constant 0 : index
    %8 = vector.load %arg5[%c0_10, %c0_11] : memref<4x64xf32, #tpu.memory_space<vmem>>, vector<4x64xf32>
    %9 = tpu.iota {dimensions = array<i32: 0>} : vector<64x1xi32>
    %10 = vector.extract_strided_slice %8 {offsets = [3, 0], sizes = [1, 64], strides = [1, 1]} : vector<4x64xf32> to vector<1x64xf32>
    %11 = vector.broadcast %10 : vector<1x64xf32> to vector<64x64xf32>
    %12 = arith.mulf %5, %11 : vector<64x64xf32>
    %c3_i32 = arith.constant 3 : i32
    %13 = tpu.dynamic_rotate %5 by %c3_i32 dim 0 : vector<64x64xf32>, i32 -> vector<64x64xf32>
    %c3_i32_12 = arith.constant 3 : i32
    %14 = vector.broadcast %c3_i32_12 : i32 to vector<64x1xi32>
    %15 = arith.cmpi sge, %9, %14 : vector<64x1xi32>
    %cst_13 = arith.constant 0.000000e+00 : f32
    %16 = vector.shape_cast %15 : vector<64x1xi1> to vector<64x1xi1>
    %17 = vector.broadcast %16 : vector<64x1xi1> to vector<64x64xi1>
    %18 = vector.broadcast %cst_13 : f32 to vector<64x64xf32>
    %19 = arith.select %17, %13, %18 : vector<64x64xi1>, vector<64x64xf32>
    %20 = vector.extract_strided_slice %8 {offsets = [0, 0], sizes = [1, 64], strides = [1, 1]} : vector<4x64xf32> to vector<1x64xf32>
    %21 = vector.broadcast %20 : vector<1x64xf32> to vector<64x64xf32>
    %22 = arith.mulf %19, %21 : vector<64x64xf32>
    %23 = arith.addf %12, %22 : vector<64x64xf32>
    %c2_i32 = arith.constant 2 : i32
    %24 = tpu.dynamic_rotate %5 by %c2_i32 dim 0 : vector<64x64xf32>, i32 -> vector<64x64xf32>
    %c2_i32_14 = arith.constant 2 : i32
    %25 = vector.broadcast %c2_i32_14 : i32 to vector<64x1xi32>
    %26 = arith.cmpi sge, %9, %25 : vector<64x1xi32>
    %cst_15 = arith.constant 0.000000e+00 : f32
    %27 = vector.shape_cast %26 : vector<64x1xi1> to vector<64x1xi1>
    %28 = vector.broadcast %27 : vector<64x1xi1> to vector<64x64xi1>
    %29 = vector.broadcast %cst_15 : f32 to vector<64x64xf32>
    %30 = arith.select %28, %24, %29 : vector<64x64xi1>, vector<64x64xf32>
    %31 = vector.extract_strided_slice %8 {offsets = [1, 0], sizes = [1, 64], strides = [1, 1]} : vector<4x64xf32> to vector<1x64xf32>
    %32 = vector.broadcast %31 : vector<1x64xf32> to vector<64x64xf32>
    %33 = arith.mulf %30, %32 : vector<64x64xf32>
    %34 = arith.addf %23, %33 : vector<64x64xf32>
    %c1_i32 = arith.constant 1 : i32
    %35 = tpu.dynamic_rotate %5 by %c1_i32 dim 0 : vector<64x64xf32>, i32 -> vector<64x64xf32>
    %c1_i32_16 = arith.constant 1 : i32
    %36 = vector.broadcast %c1_i32_16 : i32 to vector<64x1xi32>
    %37 = arith.cmpi sge, %9, %36 : vector<64x1xi32>
    %cst_17 = arith.constant 0.000000e+00 : f32
    %38 = vector.shape_cast %37 : vector<64x1xi1> to vector<64x1xi1>
    %39 = vector.broadcast %38 : vector<64x1xi1> to vector<64x64xi1>
    %40 = vector.broadcast %cst_17 : f32 to vector<64x64xf32>
    %41 = arith.select %39, %35, %40 : vector<64x64xi1>, vector<64x64xf32>
    %42 = vector.extract_strided_slice %8 {offsets = [2, 0], sizes = [1, 64], strides = [1, 1]} : vector<4x64xf32> to vector<1x64xf32>
    %43 = vector.broadcast %42 : vector<1x64xf32> to vector<64x64xf32>
    %44 = arith.mulf %41, %43 : vector<64x64xf32>
    %45 = arith.addf %34, %44 : vector<64x64xf32>
    %c0_18 = arith.constant 0 : index
    %c0_19 = arith.constant 0 : index
    %46 = vector.load %arg6[%c0_18, %c0_19] : memref<1x64xf32, #tpu.memory_space<vmem>>, vector<1x64xf32>
    %47 = vector.broadcast %46 : vector<1x64xf32> to vector<64x64xf32>
    %48 = arith.addf %45, %47 : vector<64x64xf32>
    %cst_20 = arith.constant 0.000000e+00 : f32
    %49 = vector.broadcast %cst_20 : f32 to vector<64x64xf32>
    %50 = arith.subf %49, %48 : vector<64x64xf32>
    %51 = math.exp %50 : vector<64x64xf32>
    %cst_21 = arith.constant 1.000000e+00 : f32
    %52 = vector.broadcast %cst_21 : f32 to vector<64x64xf32>
    %53 = arith.addf %52, %51 : vector<64x64xf32>
    %cst_22 = arith.constant 1.000000e+00 : f32
    %54 = vector.broadcast %cst_22 : f32 to vector<64x64xf32>
    %55 = arith.divf %54, %53 : vector<64x64xf32>
    %56 = arith.mulf %48, %55 : vector<64x64xf32>
    %c0_23 = arith.constant 0 : index
    %c0_24 = arith.constant 0 : index
    %57 = vector.load %arg7[%c0_23, %c0_24] : memref<64x64xf32, #tpu.memory_space<vmem>>, vector<64x64xf32>
    %cst_25 = arith.constant dense<0.000000e+00> : vector<64x64xf32>
    %58 = tpu.matmul %56, %57, %cst_25 {dimension_numbers = #tpu.dot_dimension_numbers<[1], [0], [0], [1], [0, 0, 1, 1], [], []>} : vector<64x64xf32>, vector<64x64xf32>, vector<64x64xf32> -> vector<64x64xf32>
    %c0_26 = arith.constant 0 : index
    %c0_27 = arith.constant 0 : index
    %59 = vector.load %arg8[%c0_26, %c0_27] : memref<1x64xf32, #tpu.memory_space<vmem>>, vector<1x64xf32>
    %60 = vector.broadcast %59 : vector<1x64xf32> to vector<64x64xf32>
    %61 = arith.addf %58, %60 : vector<64x64xf32>
    %cst_28 = arith.constant 0.000000e+00 : f32
    %62 = vector.broadcast %cst_28 : f32 to vector<64x64xf32>
    %63 = arith.maximumf %61, %62 : vector<64x64xf32>
    %64 = math.absf %61 : vector<64x64xf32>
    %cst_29 = arith.constant 0.000000e+00 : f32
    %65 = vector.broadcast %cst_29 : f32 to vector<64x64xf32>
    %66 = arith.subf %65, %64 : vector<64x64xf32>
    %67 = math.exp %66 : vector<64x64xf32>
    %cst_30 = arith.constant 1.000000e+00 : f32
    %68 = vector.broadcast %cst_30 : f32 to vector<64x64xf32>
    %69 = arith.addf %68, %67 : vector<64x64xf32>
    %70 = math.log %69 : vector<64x64xf32>
    %71 = arith.addf %63, %70 : vector<64x64xf32>
    %c0_31 = arith.constant 0 : index
    %c0_32 = arith.constant 0 : index
    %72 = vector.load %arg10[%c0_31, %c0_32] : memref<64x8xf32, #tpu.memory_space<vmem>>, vector<64x8xf32>
    %cst_33 = arith.constant dense<0.000000e+00> : vector<64x8xf32>
    %73 = tpu.matmul %56, %72, %cst_33 {dimension_numbers = #tpu.dot_dimension_numbers<[1], [0], [0], [1], [0, 0, 1, 1], [], []>} : vector<64x64xf32>, vector<64x8xf32>, vector<64x8xf32> -> vector<64x8xf32>
    %c0_34 = arith.constant 0 : index
    %c0_35 = arith.constant 0 : index
    %74 = vector.load %arg12[%c0_34, %c0_35] : memref<1x512xf32, #tpu.memory_space<vmem>>, vector<1x512xf32>
    %75 = math.exp %74 : vector<1x512xf32>
    %cst_36 = arith.constant 0.000000e+00 : f32
    %76 = vector.broadcast %cst_36 : f32 to vector<1x512xf32>
    %77 = arith.subf %76, %75 : vector<1x512xf32>
    %c0_37 = arith.constant 0 : index
    %c0_38 = arith.constant 0 : index
    %78 = vector.load %arg11[%c0_37, %c0_38] : memref<64x512xf32, #tpu.memory_space<vmem>>, vector<64x512xf32>
    %cst_39 = arith.constant dense<0.000000e+00> : vector<64x512xf32>
    %79 = tpu.matmul %71, %78, %cst_39 {dimension_numbers = #tpu.dot_dimension_numbers<[1], [0], [0], [1], [0, 0, 1, 1], [], []>} : vector<64x64xf32>, vector<64x512xf32>, vector<64x512xf32> -> vector<64x512xf32>
    %80 = arith.mulf %71, %56 : vector<64x64xf32>
    %c0_40 = arith.constant 0 : index
    %c0_41 = arith.constant 0 : index
    %81 = vector.load %arg11[%c0_40, %c0_41] : memref<64x512xf32, #tpu.memory_space<vmem>>, vector<64x512xf32>
    %cst_42 = arith.constant dense<0.000000e+00> : vector<64x512xf32>
    %82 = tpu.matmul %80, %81, %cst_42 {dimension_numbers = #tpu.dot_dimension_numbers<[1], [0], [0], [1], [0, 0, 1, 1], [], []>} : vector<64x64xf32>, vector<64x512xf32>, vector<64x512xf32> -> vector<64x512xf32>
    %c0_43 = arith.constant 0 : index
    %c0_44 = arith.constant 0 : index
    %83 = vector.load %arg9[%c0_43, %c0_44] : memref<64x512xf32, #tpu.memory_space<vmem>>, vector<64x512xf32>
    %cst_45 = arith.constant dense<0.000000e+00> : vector<64x512xf32>
    %84 = tpu.matmul %56, %83, %cst_45 {dimension_numbers = #tpu.dot_dimension_numbers<[1], [0], [0], [1], [0, 0, 1, 1], [], []>} : vector<64x64xf32>, vector<64x512xf32>, vector<64x512xf32> -> vector<64x512xf32>
    %85 = vector.broadcast %77 : vector<1x512xf32> to vector<64x512xf32>
    %86 = arith.mulf %79, %85 : vector<64x512xf32>
    %87 = math.exp %86 : vector<64x512xf32>
    %88 = arith.mulf %82, %84 : vector<64x512xf32>
    %c1_i32_46 = arith.constant 1 : i32
    %89 = vector.broadcast %c1_i32_46 : i32 to vector<64x1xi32>
    %90 = arith.cmpi sge, %9, %89 : vector<64x1xi32>
    %c1_i32_47 = arith.constant 1 : i32
    %91 = tpu.dynamic_rotate %87 by %c1_i32_47 dim 0 : vector<64x512xf32>, i32 -> vector<64x512xf32>
    %cst_48 = arith.constant 1.000000e+00 : f32
    %92 = vector.shape_cast %90 : vector<64x1xi1> to vector<64x1xi1>
    %93 = vector.broadcast %92 : vector<64x1xi1> to vector<64x512xi1>
    %94 = vector.broadcast %cst_48 : f32 to vector<64x512xf32>
    %95 = arith.select %93, %91, %94 : vector<64x512xi1>, vector<64x512xf32>
    %c1_i32_49 = arith.constant 1 : i32
    %96 = tpu.dynamic_rotate %88 by %c1_i32_49 dim 0 : vector<64x512xf32>, i32 -> vector<64x512xf32>
    %cst_50 = arith.constant 0.000000e+00 : f32
    %97 = vector.shape_cast %90 : vector<64x1xi1> to vector<64x1xi1>
    %98 = vector.broadcast %97 : vector<64x1xi1> to vector<64x512xi1>
    %99 = vector.broadcast %cst_50 : f32 to vector<64x512xf32>
    %100 = arith.select %98, %96, %99 : vector<64x512xi1>, vector<64x512xf32>
    %101 = arith.mulf %87, %100 : vector<64x512xf32>
    %102 = arith.addf %101, %88 : vector<64x512xf32>
    %103 = arith.mulf %87, %95 : vector<64x512xf32>
    %c2_i32_51 = arith.constant 2 : i32
    %104 = vector.broadcast %c2_i32_51 : i32 to vector<64x1xi32>
    %105 = arith.cmpi sge, %9, %104 : vector<64x1xi32>
    %c2_i32_52 = arith.constant 2 : i32
    %106 = tpu.dynamic_rotate %103 by %c2_i32_52 dim 0 : vector<64x512xf32>, i32 -> vector<64x512xf32>
    %cst_53 = arith.constant 1.000000e+00 : f32
    %107 = vector.shape_cast %105 : vector<64x1xi1> to vector<64x1xi1>
    %108 = vector.broadcast %107 : vector<64x1xi1> to vector<64x512xi1>
    %109 = vector.broadcast %cst_53 : f32 to vector<64x512xf32>
    %110 = arith.select %108, %106, %109 : vector<64x512xi1>, vector<64x512xf32>
    %c2_i32_54 = arith.constant 2 : i32
    %111 = tpu.dynamic_rotate %102 by %c2_i32_54 dim 0 : vector<64x512xf32>, i32 -> vector<64x512xf32>
    %cst_55 = arith.constant 0.000000e+00 : f32
    %112 = vector.shape_cast %105 : vector<64x1xi1> to vector<64x1xi1>
    %113 = vector.broadcast %112 : vector<64x1xi1> to vector<64x512xi1>
    %114 = vector.broadcast %cst_55 : f32 to vector<64x512xf32>
    %115 = arith.select %113, %111, %114 : vector<64x512xi1>, vector<64x512xf32>
    %116 = arith.mulf %103, %115 : vector<64x512xf32>
    %117 = arith.addf %116, %102 : vector<64x512xf32>
    %118 = arith.mulf %103, %110 : vector<64x512xf32>
    %c4_i32 = arith.constant 4 : i32
    %119 = vector.broadcast %c4_i32 : i32 to vector<64x1xi32>
    %120 = arith.cmpi sge, %9, %119 : vector<64x1xi32>
    %c4_i32_56 = arith.constant 4 : i32
    %121 = tpu.dynamic_rotate %118 by %c4_i32_56 dim 0 : vector<64x512xf32>, i32 -> vector<64x512xf32>
    %cst_57 = arith.constant 1.000000e+00 : f32
    %122 = vector.shape_cast %120 : vector<64x1xi1> to vector<64x1xi1>
    %123 = vector.broadcast %122 : vector<64x1xi1> to vector<64x512xi1>
    %124 = vector.broadcast %cst_57 : f32 to vector<64x512xf32>
    %125 = arith.select %123, %121, %124 : vector<64x512xi1>, vector<64x512xf32>
    %c4_i32_58 = arith.constant 4 : i32
    %126 = tpu.dynamic_rotate %117 by %c4_i32_58 dim 0 : vector<64x512xf32>, i32 -> vector<64x512xf32>
    %cst_59 = arith.constant 0.000000e+00 : f32
    %127 = vector.shape_cast %120 : vector<64x1xi1> to vector<64x1xi1>
    %128 = vector.broadcast %127 : vector<64x1xi1> to vector<64x512xi1>
    %129 = vector.broadcast %cst_59 : f32 to vector<64x512xf32>
    %130 = arith.select %128, %126, %129 : vector<64x512xi1>, vector<64x512xf32>
    %131 = arith.mulf %118, %130 : vector<64x512xf32>
    %132 = arith.addf %131, %117 : vector<64x512xf32>
    %133 = arith.mulf %118, %125 : vector<64x512xf32>
    %c8_i32 = arith.constant 8 : i32
    %134 = vector.broadcast %c8_i32 : i32 to vector<64x1xi32>
    %135 = arith.cmpi sge, %9, %134 : vector<64x1xi32>
    %c8_i32_60 = arith.constant 8 : i32
    %136 = tpu.dynamic_rotate %133 by %c8_i32_60 dim 0 : vector<64x512xf32>, i32 -> vector<64x512xf32>
    %cst_61 = arith.constant 1.000000e+00 : f32
    %137 = vector.shape_cast %135 : vector<64x1xi1> to vector<64x1xi1>
    %138 = vector.broadcast %137 : vector<64x1xi1> to vector<64x512xi1>
    %139 = vector.broadcast %cst_61 : f32 to vector<64x512xf32>
    %140 = arith.select %138, %136, %139 : vector<64x512xi1>, vector<64x512xf32>
    %c8_i32_62 = arith.constant 8 : i32
    %141 = tpu.dynamic_rotate %132 by %c8_i32_62 dim 0 : vector<64x512xf32>, i32 -> vector<64x512xf32>
    %cst_63 = arith.constant 0.000000e+00 : f32
    %142 = vector.shape_cast %135 : vector<64x1xi1> to vector<64x1xi1>
    %143 = vector.broadcast %142 : vector<64x1xi1> to vector<64x512xi1>
    %144 = vector.broadcast %cst_63 : f32 to vector<64x512xf32>
    %145 = arith.select %143, %141, %144 : vector<64x512xi1>, vector<64x512xf32>
    %146 = arith.mulf %133, %145 : vector<64x512xf32>
    %147 = arith.addf %146, %132 : vector<64x512xf32>
    %148 = arith.mulf %133, %140 : vector<64x512xf32>
    %c16_i32 = arith.constant 16 : i32
    %149 = vector.broadcast %c16_i32 : i32 to vector<64x1xi32>
    %150 = arith.cmpi sge, %9, %149 : vector<64x1xi32>
    %c16_i32_64 = arith.constant 16 : i32
    %151 = tpu.dynamic_rotate %148 by %c16_i32_64 dim 0 : vector<64x512xf32>, i32 -> vector<64x512xf32>
    %cst_65 = arith.constant 1.000000e+00 : f32
    %152 = vector.shape_cast %150 : vector<64x1xi1> to vector<64x1xi1>
    %153 = vector.broadcast %152 : vector<64x1xi1> to vector<64x512xi1>
    %154 = vector.broadcast %cst_65 : f32 to vector<64x512xf32>
    %155 = arith.select %153, %151, %154 : vector<64x512xi1>, vector<64x512xf32>
    %c16_i32_66 = arith.constant 16 : i32
    %156 = tpu.dynamic_rotate %147 by %c16_i32_66 dim 0 : vector<64x512xf32>, i32 -> vector<64x512xf32>
    %cst_67 = arith.constant 0.000000e+00 : f32
    %157 = vector.shape_cast %150 : vector<64x1xi1> to vector<64x1xi1>
    %158 = vector.broadcast %157 : vector<64x1xi1> to vector<64x512xi1>
    %159 = vector.broadcast %cst_67 : f32 to vector<64x512xf32>
    %160 = arith.select %158, %156, %159 : vector<64x512xi1>, vector<64x512xf32>
    %161 = arith.mulf %148, %160 : vector<64x512xf32>
    %162 = arith.addf %161, %147 : vector<64x512xf32>
    %163 = arith.mulf %148, %155 : vector<64x512xf32>
    %c32_i32 = arith.constant 32 : i32
    %164 = vector.broadcast %c32_i32 : i32 to vector<64x1xi32>
    %165 = arith.cmpi sge, %9, %164 : vector<64x1xi32>
    %c32_i32_68 = arith.constant 32 : i32
    %166 = tpu.dynamic_rotate %162 by %c32_i32_68 dim 0 : vector<64x512xf32>, i32 -> vector<64x512xf32>
    %cst_69 = arith.constant 0.000000e+00 : f32
    %167 = vector.shape_cast %165 : vector<64x1xi1> to vector<64x1xi1>
    %168 = vector.broadcast %167 : vector<64x1xi1> to vector<64x512xi1>
    %169 = vector.broadcast %cst_69 : f32 to vector<64x512xf32>
    %170 = arith.select %168, %166, %169 : vector<64x512xi1>, vector<64x512xf32>
    %171 = arith.mulf %163, %170 : vector<64x512xf32>
    %172 = arith.addf %171, %162 : vector<64x512xf32>
    %c0_70 = arith.constant 0 : index
    %c0_71 = arith.constant 0 : index
    %173 = vector.load %arg13[%c0_70, %c0_71] : memref<1x64xf32, #tpu.memory_space<vmem>>, vector<1x64xf32>
    %174 = vector.broadcast %173 : vector<1x64xf32> to vector<64x64xf32>
    %175 = arith.mulf %174, %56 : vector<64x64xf32>
    %176 = vector.extract_strided_slice %172 {offsets = [0, 0], sizes = [64, 64], strides = [1, 1]} : vector<64x512xf32> to vector<64x64xf32>
    %177 = vector.extract_strided_slice %73 {offsets = [0, 0], sizes = [64, 1], strides = [1, 1]} : vector<64x8xf32> to vector<64x1xf32>
    %178 = vector.broadcast %177 : vector<64x1xf32> to vector<64x64xf32>
    %179 = arith.mulf %176, %178 : vector<64x64xf32>
    %180 = arith.addf %175, %179 : vector<64x64xf32>
    %181 = vector.extract_strided_slice %172 {offsets = [0, 64], sizes = [64, 64], strides = [1, 1]} : vector<64x512xf32> to vector<64x64xf32>
    %182 = vector.extract_strided_slice %73 {offsets = [0, 1], sizes = [64, 1], strides = [1, 1]} : vector<64x8xf32> to vector<64x1xf32>
    %183 = vector.broadcast %182 : vector<64x1xf32> to vector<64x64xf32>
    %184 = arith.mulf %181, %183 : vector<64x64xf32>
    %185 = arith.addf %180, %184 : vector<64x64xf32>
    %186 = vector.extract_strided_slice %172 {offsets = [0, 128], sizes = [64, 64], strides = [1, 1]} : vector<64x512xf32> to vector<64x64xf32>
    %187 = vector.extract_strided_slice %73 {offsets = [0, 2], sizes = [64, 1], strides = [1, 1]} : vector<64x8xf32> to vector<64x1xf32>
    %188 = vector.broadcast %187 : vector<64x1xf32> to vector<64x64xf32>
    %189 = arith.mulf %186, %188 : vector<64x64xf32>
    %190 = arith.addf %185, %189 : vector<64x64xf32>
    %191 = vector.extract_strided_slice %172 {offsets = [0, 192], sizes = [64, 64], strides = [1, 1]} : vector<64x512xf32> to vector<64x64xf32>
    %192 = vector.extract_strided_slice %73 {offsets = [0, 3], sizes = [64, 1], strides = [1, 1]} : vector<64x8xf32> to vector<64x1xf32>
    %193 = vector.broadcast %192 : vector<64x1xf32> to vector<64x64xf32>
    %194 = arith.mulf %191, %193 : vector<64x64xf32>
    %195 = arith.addf %190, %194 : vector<64x64xf32>
    %196 = vector.extract_strided_slice %172 {offsets = [0, 256], sizes = [64, 64], strides = [1, 1]} : vector<64x512xf32> to vector<64x64xf32>
    %197 = vector.extract_strided_slice %73 {offsets = [0, 4], sizes = [64, 1], strides = [1, 1]} : vector<64x8xf32> to vector<64x1xf32>
    %198 = vector.broadcast %197 : vector<64x1xf32> to vector<64x64xf32>
    %199 = arith.mulf %196, %198 : vector<64x64xf32>
    %200 = arith.addf %195, %199 : vector<64x64xf32>
    %201 = vector.extract_strided_slice %172 {offsets = [0, 320], sizes = [64, 64], strides = [1, 1]} : vector<64x512xf32> to vector<64x64xf32>
    %202 = vector.extract_strided_slice %73 {offsets = [0, 5], sizes = [64, 1], strides = [1, 1]} : vector<64x8xf32> to vector<64x1xf32>
    %203 = vector.broadcast %202 : vector<64x1xf32> to vector<64x64xf32>
    %204 = arith.mulf %201, %203 : vector<64x64xf32>
    %205 = arith.addf %200, %204 : vector<64x64xf32>
    %206 = vector.extract_strided_slice %172 {offsets = [0, 384], sizes = [64, 64], strides = [1, 1]} : vector<64x512xf32> to vector<64x64xf32>
    %207 = vector.extract_strided_slice %73 {offsets = [0, 6], sizes = [64, 1], strides = [1, 1]} : vector<64x8xf32> to vector<64x1xf32>
    %208 = vector.broadcast %207 : vector<64x1xf32> to vector<64x64xf32>
    %209 = arith.mulf %206, %208 : vector<64x64xf32>
    %210 = arith.addf %205, %209 : vector<64x64xf32>
    %211 = vector.extract_strided_slice %172 {offsets = [0, 448], sizes = [64, 64], strides = [1, 1]} : vector<64x512xf32> to vector<64x64xf32>
    %212 = vector.extract_strided_slice %73 {offsets = [0, 7], sizes = [64, 1], strides = [1, 1]} : vector<64x8xf32> to vector<64x1xf32>
    %213 = vector.broadcast %212 : vector<64x1xf32> to vector<64x64xf32>
    %214 = arith.mulf %211, %213 : vector<64x64xf32>
    %215 = arith.addf %210, %214 : vector<64x64xf32>
    %cst_72 = arith.constant 0.000000e+00 : f32
    %216 = vector.broadcast %cst_72 : f32 to vector<64x64xf32>
    %217 = arith.subf %216, %7 : vector<64x64xf32>
    %218 = math.exp %217 : vector<64x64xf32>
    %cst_73 = arith.constant 1.000000e+00 : f32
    %219 = vector.broadcast %cst_73 : f32 to vector<64x64xf32>
    %220 = arith.addf %219, %218 : vector<64x64xf32>
    %cst_74 = arith.constant 1.000000e+00 : f32
    %221 = vector.broadcast %cst_74 : f32 to vector<64x64xf32>
    %222 = arith.divf %221, %220 : vector<64x64xf32>
    %223 = arith.mulf %7, %222 : vector<64x64xf32>
    %224 = arith.mulf %215, %223 : vector<64x64xf32>
    %c0_75 = arith.constant 0 : index
    %c0_76 = arith.constant 0 : index
    %225 = vector.load %arg14[%c0_75, %c0_76] : memref<64x32xf32, #tpu.memory_space<vmem>>, vector<64x32xf32>
    %cst_77 = arith.constant dense<0.000000e+00> : vector<64x32xf32>
    %226 = tpu.matmul %224, %225, %cst_77 {dimension_numbers = #tpu.dot_dimension_numbers<[1], [0], [0], [1], [0, 0, 1, 1], [], []>} : vector<64x64xf32>, vector<64x32xf32>, vector<64x32xf32> -> vector<64x32xf32>
    %cst_78 = arith.constant 0.000000e+00 : f32
    %227 = vector.broadcast %cst_78 : f32 to vector<64x32xf32>
    %228 = arith.cmpf ogt, %226, %227 : vector<64x32xf32>
    %229 = math.exp %226 : vector<64x32xf32>
    %cst_79 = arith.constant 1.000000e+00 : f32
    %230 = vector.broadcast %cst_79 : f32 to vector<64x32xf32>
    %231 = arith.subf %229, %230 : vector<64x32xf32>
    %cst_80 = arith.constant 1.67326319 : f32
    %232 = vector.broadcast %cst_80 : f32 to vector<64x32xf32>
    %233 = arith.mulf %232, %231 : vector<64x32xf32>
    %234 = arith.select %228, %226, %233 : vector<64x32xi1>, vector<64x32xf32>
    %cst_81 = arith.constant 1.05070102 : f32
    %235 = vector.broadcast %cst_81 : f32 to vector<64x32xf32>
    %236 = arith.mulf %235, %234 : vector<64x32xf32>
    %c0_82 = arith.constant 0 : index
    %c0_83 = arith.constant 0 : index
    %237 = vector.load %arg15[%c0_82, %c0_83] : memref<32x12xf32, #tpu.memory_space<vmem>>, vector<32x12xf32>
    %cst_84 = arith.constant dense<0.000000e+00> : vector<64x12xf32>
    %238 = tpu.matmul %236, %237, %cst_84 {dimension_numbers = #tpu.dot_dimension_numbers<[1], [0], [0], [1], [0, 0, 1, 1], [], []>} : vector<64x32xf32>, vector<32x12xf32>, vector<64x12xf32> -> vector<64x12xf32>
    %c0_85 = arith.constant 0 : index
    %c0_86 = arith.constant 0 : index
    %c0_87 = arith.constant 0 : index
    %239 = vector.load %arg16[%c0_85, %c0_86, %c0_87] : memref<1x64x12xf32, #tpu.memory_space<vmem>>, vector<1x64x12xf32>
    %240 = vector.shape_cast %239 : vector<1x64x12xf32> to vector<64x12xf32>
    %241 = vector.shape_cast %238 : vector<64x12xf32> to vector<1x64x12xf32>
    tpu.vector_store %arg16[%c0_85, %c0_86, %c0_87], %241 {strides = array<i32>} : memref<1x64x12xf32, #tpu.memory_space<vmem>>, vector<1x64x12xf32>,
    return
  }
  func.func @transform_0(%arg0: i32) -> (i32, i32, i32) {
    %c0_i32 = arith.constant 0 : i32
    %c0_i32_0 = arith.constant 0 : i32
    %c0_i32_1 = arith.constant 0 : i32
    return %arg0, %c0_i32, %c0_i32_0 : i32, i32, i32
  }
  func.func @transform_1(%arg0: i32) -> (i32, i32) {
    %c0_i32 = arith.constant 0 : i32
    %c0_i32_0 = arith.constant 0 : i32
    %c0_i32_1 = arith.constant 0 : i32
    return %c0_i32, %c0_i32_0 : i32, i32
  }
  func.func @transform_2(%arg0: i32) -> (i32, i32) {
    %c0_i32 = arith.constant 0 : i32
    %c0_i32_0 = arith.constant 0 : i32
    %c0_i32_1 = arith.constant 0 : i32
    return %c0_i32, %c0_i32_0 : i32, i32
  }
  func.func @transform_3(%arg0: i32) -> (i32, i32) {
    %c0_i32 = arith.constant 0 : i32
    %c0_i32_0 = arith.constant 0 : i32
    %c0_i32_1 = arith.constant 0 : i32
    return %c0_i32, %c0_i32_0 : i32, i32
  }
  func.func @transform_4(%arg0: i32) -> (i32, i32) {
    %c0_i32 = arith.constant 0 : i32
    %c0_i32_0 = arith.constant 0 : i32
    %c0_i32_1 = arith.constant 0 : i32
    return %c0_i32, %c0_i32_0 : i32, i32
  }
  func.func @transform_5(%arg0: i32) -> (i32, i32) {
    %c0_i32 = arith.constant 0 : i32
    %c0_i32_0 = arith.constant 0 : i32
    %c0_i32_1 = arith.constant 0 : i32
    return %c0_i32, %c0_i32_0 : i32, i32
  }
  func.func @transform_6(%arg0: i32) -> (i32, i32) {
    %c0_i32 = arith.constant 0 : i32
    %c0_i32_0 = arith.constant 0 : i32
    %c0_i32_1 = arith.constant 0 : i32
    return %c0_i32, %c0_i32_0 : i32, i32
  }
  func.func @transform_7(%arg0: i32) -> (i32, i32) {
    %c0_i32 = arith.constant 0 : i32
    %c0_i32_0 = arith.constant 0 : i32
    %c0_i32_1 = arith.constant 0 : i32
    return %c0_i32, %c0_i32_0 : i32, i32
  }
  func.func @transform_8(%arg0: i32) -> (i32, i32) {
    %c0_i32 = arith.constant 0 : i32
    %c0_i32_0 = arith.constant 0 : i32
    %c0_i32_1 = arith.constant 0 : i32
    return %c0_i32, %c0_i32_0 : i32, i32
  }
  func.func @transform_9(%arg0: i32) -> (i32, i32) {
    %c0_i32 = arith.constant 0 : i32
    %c0_i32_0 = arith.constant 0 : i32
    %c0_i32_1 = arith.constant 0 : i32
    return %c0_i32, %c0_i32_0 : i32, i32
  }
  func.func @transform_10(%arg0: i32) -> (i32, i32) {
    %c0_i32 = arith.constant 0 : i32
    %c0_i32_0 = arith.constant 0 : i32
    %c0_i32_1 = arith.constant 0 : i32
    return %c0_i32, %c0_i32_0 : i32, i32
  }
  func.func @transform_11(%arg0: i32) -> (i32, i32) {
    %c0_i32 = arith.constant 0 : i32
    %c0_i32_0 = arith.constant 0 : i32
    %c0_i32_1 = arith.constant 0 : i32
    return %c0_i32, %c0_i32_0 : i32, i32
  }
  func.func @transform_12(%arg0: i32) -> (i32, i32) {
    %c0_i32 = arith.constant 0 : i32
    %c0_i32_0 = arith.constant 0 : i32
    %c0_i32_1 = arith.constant 0 : i32
    return %c0_i32, %c0_i32_0 : i32, i32
  }
  func.func @transform_13(%arg0: i32) -> (i32, i32) {
    %c0_i32 = arith.constant 0 : i32
    %c0_i32_0 = arith.constant 0 : i32
    %c0_i32_1 = arith.constant 0 : i32
    return %c0_i32, %c0_i32_0 : i32, i32
  }
  func.func @transform_14(%arg0: i32) -> (i32, i32) {
    %c0_i32 = arith.constant 0 : i32
    %c0_i32_0 = arith.constant 0 : i32
    %c0_i32_1 = arith.constant 0 : i32
    return %c0_i32, %c0_i32_0 : i32, i32
  }
  func.func @transform_15(%arg0: i32) -> (i32, i32, i32) {
    %c0_i32 = arith.constant 0 : i32
    %c0_i32_0 = arith.constant 0 : i32
    %c0_i32_1 = arith.constant 0 : i32
    return %arg0, %c0_i32, %c0_i32_0 : i32, i32, i32
  }
}

module attributes {stable_mosaic.version = 11 : i64} {
  func.func @_head_kernel(%arg0: i32, %arg1: memref<2x768xf32, #tpu.memory_space<vmem>>, %arg2: memref<768x512xf32, #tpu.memory_space<vmem>>, %arg3: memref<1x512xf32, #tpu.memory_space<vmem>>, %arg4: memref<512x256xf32, #tpu.memory_space<vmem>>, %arg5: memref<1x256xf32, #tpu.memory_space<vmem>>, %arg6: memref<256x64xf32, #tpu.memory_space<vmem>>, %arg7: memref<1x64xf32, #tpu.memory_space<vmem>>, %arg8: memref<64x4xf32, #tpu.memory_space<vmem>>, %arg9: memref<1x4xf32, #tpu.memory_space<vmem>>, %arg10: memref<2x4xf32, #tpu.memory_space<vmem>>) attributes {dimension_semantics = [#tpu.dimension_semantics<arbitrary>], iteration_bounds = array<i64: 1>, scalar_prefetch = 0 : i64, scratch_operands = 0 : i64, tpu.core_type = #tpu.core_type<tc>, window_params = [{pipeline_mode = #tpu.pipeline_mode<synchronous>, transform_indices = @transform_0, window_bounds = array<i64: 2, 768>}, {pipeline_mode = #tpu.pipeline_mode<synchronous>, transform_indices = @transform_1, window_bounds = array<i64: 768, 512>}, {pipeline_mode = #tpu.pipeline_mode<synchronous>, transform_indices = @transform_2, window_bounds = array<i64: 1, 512>}, {pipeline_mode = #tpu.pipeline_mode<synchronous>, transform_indices = @transform_3, window_bounds = array<i64: 512, 256>}, {pipeline_mode = #tpu.pipeline_mode<synchronous>, transform_indices = @transform_4, window_bounds = array<i64: 1, 256>}, {pipeline_mode = #tpu.pipeline_mode<synchronous>, transform_indices = @transform_5, window_bounds = array<i64: 256, 64>}, {pipeline_mode = #tpu.pipeline_mode<synchronous>, transform_indices = @transform_6, window_bounds = array<i64: 1, 64>}, {pipeline_mode = #tpu.pipeline_mode<synchronous>, transform_indices = @transform_7, window_bounds = array<i64: 64, 4>}, {pipeline_mode = #tpu.pipeline_mode<synchronous>, transform_indices = @transform_8, window_bounds = array<i64: 1, 4>}, {pipeline_mode = #tpu.pipeline_mode<synchronous>, transform_indices = @transform_9, window_bounds = array<i64: 2, 4>}]} {
    %c0 = arith.constant 0 : index
    %c0_0 = arith.constant 0 : index
    %0 = vector.load %arg1[%c0, %c0_0] : memref<2x768xf32, #tpu.memory_space<vmem>>, vector<2x768xf32>
    %c0_1 = arith.constant 0 : index
    %c0_2 = arith.constant 0 : index
    %1 = vector.load %arg2[%c0_1, %c0_2] : memref<768x512xf32, #tpu.memory_space<vmem>>, vector<768x512xf32>
    %cst = arith.constant dense<0.000000e+00> : vector<2x512xf32>
    %2 = tpu.matmul %0, %1, %cst {dimension_numbers = #tpu.dot_dimension_numbers<[1], [0], [0], [1], [0, 0, 1, 1], [], []>} : vector<2x768xf32>, vector<768x512xf32>, vector<2x512xf32> -> vector<2x512xf32>
    %c0_3 = arith.constant 0 : index
    %c0_4 = arith.constant 0 : index
    %3 = vector.load %arg3[%c0_3, %c0_4] : memref<1x512xf32, #tpu.memory_space<vmem>>, vector<1x512xf32>
    %4 = vector.broadcast %3 : vector<1x512xf32> to vector<2x512xf32>
    %5 = arith.addf %2, %4 : vector<2x512xf32>
    %c0_5 = arith.constant 0 : index
    %c0_6 = arith.constant 0 : index
    %6 = vector.load %arg4[%c0_5, %c0_6] : memref<512x256xf32, #tpu.memory_space<vmem>>, vector<512x256xf32>
    %cst_7 = arith.constant dense<0.000000e+00> : vector<2x256xf32>
    %7 = tpu.matmul %5, %6, %cst_7 {dimension_numbers = #tpu.dot_dimension_numbers<[1], [0], [0], [1], [0, 0, 1, 1], [], []>} : vector<2x512xf32>, vector<512x256xf32>, vector<2x256xf32> -> vector<2x256xf32>
    %c0_8 = arith.constant 0 : index
    %c0_9 = arith.constant 0 : index
    %8 = vector.load %arg5[%c0_8, %c0_9] : memref<1x256xf32, #tpu.memory_space<vmem>>, vector<1x256xf32>
    %9 = vector.broadcast %8 : vector<1x256xf32> to vector<2x256xf32>
    %10 = arith.addf %7, %9 : vector<2x256xf32>
    %c0_10 = arith.constant 0 : index
    %c0_11 = arith.constant 0 : index
    %11 = vector.load %arg6[%c0_10, %c0_11] : memref<256x64xf32, #tpu.memory_space<vmem>>, vector<256x64xf32>
    %cst_12 = arith.constant dense<0.000000e+00> : vector<2x64xf32>
    %12 = tpu.matmul %10, %11, %cst_12 {dimension_numbers = #tpu.dot_dimension_numbers<[1], [0], [0], [1], [0, 0, 1, 1], [], []>} : vector<2x256xf32>, vector<256x64xf32>, vector<2x64xf32> -> vector<2x64xf32>
    %c0_13 = arith.constant 0 : index
    %c0_14 = arith.constant 0 : index
    %13 = vector.load %arg7[%c0_13, %c0_14] : memref<1x64xf32, #tpu.memory_space<vmem>>, vector<1x64xf32>
    %14 = vector.broadcast %13 : vector<1x64xf32> to vector<2x64xf32>
    %15 = arith.addf %12, %14 : vector<2x64xf32>
    %c0_15 = arith.constant 0 : index
    %c0_16 = arith.constant 0 : index
    %16 = vector.load %arg8[%c0_15, %c0_16] : memref<64x4xf32, #tpu.memory_space<vmem>>, vector<64x4xf32>
    %cst_17 = arith.constant dense<0.000000e+00> : vector<2x4xf32>
    %17 = tpu.matmul %15, %16, %cst_17 {dimension_numbers = #tpu.dot_dimension_numbers<[1], [0], [0], [1], [0, 0, 1, 1], [], []>} : vector<2x64xf32>, vector<64x4xf32>, vector<2x4xf32> -> vector<2x4xf32>
    %c0_18 = arith.constant 0 : index
    %c0_19 = arith.constant 0 : index
    %18 = vector.load %arg9[%c0_18, %c0_19] : memref<1x4xf32, #tpu.memory_space<vmem>>, vector<1x4xf32>
    %19 = vector.broadcast %18 : vector<1x4xf32> to vector<2x4xf32>
    %20 = arith.addf %17, %19 : vector<2x4xf32>
    %c0_20 = arith.constant 0 : index
    %c0_21 = arith.constant 0 : index
    %21 = vector.load %arg10[%c0_20, %c0_21] : memref<2x4xf32, #tpu.memory_space<vmem>>, vector<2x4xf32>
    tpu.vector_store %arg10[%c0_20, %c0_21], %20 {strides = array<i32>} : memref<2x4xf32, #tpu.memory_space<vmem>>, vector<2x4xf32>,
    return
  }
  func.func @transform_0(%arg0: i32) -> (i32, i32) {
    %c0_i32 = arith.constant 0 : i32
    %c0_i32_0 = arith.constant 0 : i32
    %c0_i32_1 = arith.constant 0 : i32
    return %c0_i32, %c0_i32_0 : i32, i32
  }
  func.func @transform_1(%arg0: i32) -> (i32, i32) {
    %c0_i32 = arith.constant 0 : i32
    %c0_i32_0 = arith.constant 0 : i32
    %c0_i32_1 = arith.constant 0 : i32
    return %c0_i32, %c0_i32_0 : i32, i32
  }
  func.func @transform_2(%arg0: i32) -> (i32, i32) {
    %c0_i32 = arith.constant 0 : i32
    %c0_i32_0 = arith.constant 0 : i32
    %c0_i32_1 = arith.constant 0 : i32
    return %c0_i32, %c0_i32_0 : i32, i32
  }
  func.func @transform_3(%arg0: i32) -> (i32, i32) {
    %c0_i32 = arith.constant 0 : i32
    %c0_i32_0 = arith.constant 0 : i32
    %c0_i32_1 = arith.constant 0 : i32
    return %c0_i32, %c0_i32_0 : i32, i32
  }
  func.func @transform_4(%arg0: i32) -> (i32, i32) {
    %c0_i32 = arith.constant 0 : i32
    %c0_i32_0 = arith.constant 0 : i32
    %c0_i32_1 = arith.constant 0 : i32
    return %c0_i32, %c0_i32_0 : i32, i32
  }
  func.func @transform_5(%arg0: i32) -> (i32, i32) {
    %c0_i32 = arith.constant 0 : i32
    %c0_i32_0 = arith.constant 0 : i32
    %c0_i32_1 = arith.constant 0 : i32
    return %c0_i32, %c0_i32_0 : i32, i32
  }
  func.func @transform_6(%arg0: i32) -> (i32, i32) {
    %c0_i32 = arith.constant 0 : i32
    %c0_i32_0 = arith.constant 0 : i32
    %c0_i32_1 = arith.constant 0 : i32
    return %c0_i32, %c0_i32_0 : i32, i32
  }
  func.func @transform_7(%arg0: i32) -> (i32, i32) {
    %c0_i32 = arith.constant 0 : i32
    %c0_i32_0 = arith.constant 0 : i32
    %c0_i32_1 = arith.constant 0 : i32
    return %c0_i32, %c0_i32_0 : i32, i32
  }
  func.func @transform_8(%arg0: i32) -> (i32, i32) {
    %c0_i32 = arith.constant 0 : i32
    %c0_i32_0 = arith.constant 0 : i32
    %c0_i32_1 = arith.constant 0 : i32
    return %c0_i32, %c0_i32_0 : i32, i32
  }
  func.func @transform_9(%arg0: i32) -> (i32, i32) {
    %c0_i32 = arith.constant 0 : i32
    %c0_i32_0 = arith.constant 0 : i32
    %c0_i32_1 = arith.constant 0 : i32
    return %c0_i32, %c0_i32_0 : i32, i32
  }
}

</mosaic_0001>

<bundles_post_ra>
// kernel: mamba_class_forward.2
= control target key start
LH: loop header
LB: loop body
LE: loop exit
PB: predicated region body
PF: predicated region fallthrough
CT: control target
= control target key end

     0   :  { %s5748_s18 = smov 0   ;;  %s9527_s0 = inlined_call_operand.vmem [shape: f32[2,64,12], index: 0, kind: input, shape index: {}]   ;;  %s9528_s1 = inlined_call_operand.vmem [shape: f32[12,32], index: 1, kind: input, shape index: {}]   ;;  %s9529_s2 = inlined_call_operand.vmem [shape: f32[32,64], index: 2, kind: input, shape index: {}]   ;;  %s9530_s3 = inlined_call_operand.vmem [shape: f32[32,64], index: 3, kind: input, shape index: {}]   ;;  %s9531_s4 = inlined_call_operand.vmem [shape: f32[4,64], index: 4, kind: input, shape index: {}]   ;;  %s9532_s5 = inlined_call_operand.vmem [shape: f32[1,64], index: 5, kind: input, shape index: {}]   ;;  %s9533_s6 = inlined_call_operand.vmem [shape: f32[64,64], index: 6, kind: input, shape index: {}]   ;;  %s9534_s7 = inlined_call_operand.vmem [shape: f32[1,64], index: 7, kind: input, shape index: {}]   ;;  %s9535_s8 = inlined_call_operand.vmem [shape: f32[64,512], index: 8, kind: input, shape index: {}]   ;;  %s9536_s9 = inlined_call_operand.vmem [shape: f32[64,8], index: 9, kind: input, shape index: {}]   ;;  %s9537_s10 = inlined_call_operand.vmem [shape: f32[64,512], index: 10, kind: input, shape index: {}]   ;;  %s9538_s11 = inlined_call_operand.vmem [shape: f32[1,512], index: 11, kind: input, shape index: {}]   ;;  %s9539_s12 = inlined_call_operand.vmem [shape: f32[1,64], index: 12, kind: input, shape index: {}]   ;;  %s9540_s13 = inlined_call_operand.vmem [shape: f32[64,32], index: 13, kind: input, shape index: {}]   ;;  %s9541_s14 = inlined_call_operand.vmem [shape: f32[32,12], index: 14, kind: input, shape index: {}]   ;;  %s9542_s15 = inlined_call_operand.vmem [shape: f32[2,64,12], index: 15, kind: output, shape index: {}]  }
   0x1 LB: > { %s4828_s19 = sadd.s32 4294967295, %s5655_s18   ;;  %p4832_p0 = scmp.ge.s32.totalorder %s5655_s18, 1  ;;  %s5655_s18 = sphi %s5748_s18, %s25_s18  }
   0x2   : > { %p437_p1 = scmp.lt.s32.totalorder %s5655_s18, 3 }
   0x4   : > { %p438_p2 = pnand %p4832_p0, %p437_p1 }
   0x6   : > { %441 = sbr.rel (%p438_p2) target bundleno = 1885 (0x75d), region = 80 }
   0xd   : > { %v503_v0 = vld [vmem:[%s9528_s1] sm:$0xff]  ;;  %v504_v1 = vld [vmem:[%s9528_s1 + $0x8] sm:$0xf]  ;;  %vm530_vm0 = vcmask 1043456   ;;  %p485_p3 = scmp.lt.s32.totalorder %s4828_s19, 1  ;;  %vm5657_vm1 = vmmov 1   ;;  %v883_v57 = vlaneseq }
   0xe   : > { %v5211_v2 = vpack.c.bf16 %v504_v1, %v503_v0  ;;  %vm5212_vm2 = vmpackc.low %vm530_vm0, %vm5657_vm1  ;;  %v639_v3 = vld [vmem:[%s9529_s2] sm:$0xff]  ;;  %v640_v4 = vld [vmem:[%s9529_s2 + $0x8] sm:$0xff]  ;;  %vm505_vm3 = vcmask 97280   ;;  %vm643_vm4 = vcmask 261120   ;;  %v5658_v55 = vmov 3   ;;  %s5667_s16 = smov 64  }
   0xf   : > { %s10378_s19 = smov (!%p485_p3, %s4828_s19), 1  ;;  %v5217_v5 = vpack.c.bf16 %v640_v4, %v639_v3  ;;  %v773_v6 = vld [vmem:[%s9530_s3] sm:$0xff]  ;;  %v774_v7 = vld [vmem:[%s9530_s3 + $0x8] sm:$0xff]  ;;  %v641_v9 = vld [vmem:[%s9529_s2 + $0x10] sm:$0xff]  ;;  %5407 = vset.pattern.permute.xlu1 %v5658_v55  ;;  %v5659_v56 = vmov 1   ;;  %v5868_v58 = vshrl.u32 %v883_v57, 7 }
  0x10   : > { %5213 = vmatprep.subr.msk.bf16.mxu0 %vm5212_vm2, %v5211_v2  ;;  %5385 = vmatprep.subr.msk.bf16.mxu1 %vm5212_vm2, %v5211_v2  ;;  %v5225_v8 = vpack.c.bf16 %v774_v7, %v773_v6  ;;  %s4955_s17 = sshll.u32 %s10378_s19, 6  ;;  %v642_v10 = vld [vmem:[%s9529_s2 + $0x18] sm:$0xff]  ;;  %v775_v11 = vld [vmem:[%s9530_s3 + $0x10] sm:$0xff]  ;;  %v1182_v31 = vld [vmem:[%s9533_s6] sm:$0xff]  ;;  %vm1197_vm11 = vcmask 523264  }
  0x11   : > { %5216 = vmatpush3.bf16.msk.msra.mxu0 %vm5212_vm2, %v5211_v2  ;;  %5386 = vmatpush3.bf16.msk.msra.mxu1 %vm5212_vm2, %v5211_v2  ;;  %s489_s26 = scalar_lea.vmem %s9527_s0, %s4955_s17  ;;  %v776_v12 = vld [vmem:[%s9530_s3 + $0x18] sm:$0xff]  ;;  %v5221_v18 = vpack.c.bf16 %v642_v10, %v641_v9  ;;  %v1183_v32 = vld [vmem:[%s9533_s6 + $0x8] sm:$0xff]  ;;  %v1399_v33 = vld [vmem:[%s9536_s9] sm:$0xff]  ;;  %v9543_v59 = vsub.s32 3, %v5868_v58  ;;  %v9546_v60 = vsub.s32 0, %v5868_v58  ;;  %v9544_v62 = vsub.s32 1, %v5868_v58  ;;  %s494_s25 = scalar_lea.vmem %s9542_s15, %s4955_s17 }
  0x12   : > { %5218 = vmatprep.subr.bf16.mxu1 %v5217_v5  ;;  %5226 = vmatprep.subr.bf16.mxu0 %v5225_v8  ;;  %v495_v13 = vld [vmem:[%s489_s26] sm:$0xff]  ;;  %v496_v14 = vld [vmem:[%s489_s26 + $0x8] sm:$0xff]  ;;  %v497_v15 = vld [vmem:[%s489_s26 + $0x10] sm:$0xff]  ;;  %v5229_v20 = vpack.c.bf16 %v776_v12, %v775_v11  ;;  %v5233_v34 = vpack.c.bf16 %v1183_v32, %v1182_v31  ;;  %vm912_vm5 = vcmp.lt.s32.totalorder %v5868_v58, 3  ;;  %v9545_v3 = vsub.s32 2, %v5868_v58 }
  0x13   : > { %5055 = vmatprep.mubr.msk.f32.mxu0 %vm505_vm3, %v495_v13  ;;  %v499_v16 = vld [vmem:[%s489_s26 + $0x20] sm:$0xff]  ;;  %v500_v17 = vld [vmem:[%s489_s26 + $0x28] sm:$0xff]  ;;  %v501_v19 = vld [vmem:[%s489_s26 + $0x30] sm:$0xff]  ;;  %5406 = vset.pattern.permute.xlu0 %v5659_v56  ;;  %vm981_vm6 = vcmp.lt.s32.totalorder %v5868_v58, 2  ;;  %vm1050_vm7 = vcmp.lt.s32.totalorder %v5868_v58, 1  ;;  %vm921_vm8 = vcmp.ge.s32.totalorder %v5868_v58, 3 }
  0x14   : > { %5056 = vmatmul.mubr.msk.f32.vlgmr.msra.gmra.mrb[0].mxu0 %vm505_vm3, %v496_v14  ;;  %5061 = vmatprep.mubr.msk.f32.mxu1 %vm505_vm3, %v499_v16  ;;  %v498_v21 = vld [vmem:[%s489_s26 + $0x18] sm:$0xff]  ;;  %v1400_v35 = vld [vmem:[%s9536_s9 + $0x8] sm:$0xff]  ;;  %v1184_v37 = vld [vmem:[%s9533_s6 + $0x10] sm:$0xff]  ;;  %vm990_vm9 = vcmp.ge.s32.totalorder %v5868_v58, 2  ;;  %vm1059_vm10 = vcmp.ge.s32.totalorder %v5868_v58, 1  ;;  %vm3079_vm12 = vcmp.lt.s32.totalorder %v5868_v58, 4 }
  0x15   : > { %5058 = vmatprep.mubr.msk.f32.mxu0 %vm505_vm3, %v497_v15  ;;  %5062 = vmatmul.mubr.msk.f32.vlgmr.msra.gmra.mrb[0].mxu1 %vm505_vm3, %v500_v17  ;;  %v502_v22 = vld [vmem:[%s489_s26 + $0x38] sm:$0xff]  ;;  %v5249_v36 = vpack.c.bf16 %v1400_v35, %v1399_v33  ;;  %v1401_v39 = vld [vmem:[%s9536_s9 + $0x10] sm:$0xff]  ;;  %v1186_v43 = vld [vmem:[%s9533_s6 + $0x20] sm:$0xff]  ;;  %vm3039_vm13 = vcmp.ge.s32.totalorder %v5868_v58, 4 }
  0x16   : > { %5064 = vmatprep.mubr.msk.f32.mxu1 %vm505_vm3, %v501_v19  ;;  %5220 = vmatpush3.bf16.msra.mxu1 %v5217_v5  ;;  %v1185_v38 = vld [vmem:[%s9533_s6 + $0x18] sm:$0xff]  ;;  %v1187_v44 = vld [vmem:[%s9533_s6 + $0x28] sm:$0xff]  ;;  %v1403_v45 = vld [vmem:[%s9536_s9 + $0x20] sm:$0xff] }
  0x17   : > { %5228 = vmatpush3.bf16.msra.mxu0 %v5225_v8  ;;  %5222 = vmatprep.subr.bf16.mxu1 %v5221_v18  ;;  %v5237_v40 = vpack.c.bf16 %v1185_v38, %v1184_v37  ;;  %v1402_v41 = vld [vmem:[%s9536_s9 + $0x18] sm:$0xff]  ;;  %v5241_v46 = vpack.c.bf16 %v1187_v44, %v1186_v43  ;;  %v1404_v47 = vld [vmem:[%s9536_s9 + $0x28] sm:$0xff]  ;;  %v1188_v49 = vld [vmem:[%s9533_s6 + $0x30] sm:$0xff] }
  0x18   : > { %5059 = vmatmul.mubr.msk.f32.gmra.mrb[2].mxu0 %vm505_vm3, %v498_v21  ;;  %5230 = vmatprep.subr.bf16.mxu0 %v5229_v20  ;;  %v5253_v42 = vpack.c.bf16 %v1402_v41, %v1401_v39  ;;  %v5257_v48 = vpack.c.bf16 %v1404_v47, %v1403_v45  ;;  %v1189_v50 = vld [vmem:[%s9533_s6 + $0x38] sm:$0xff]  ;;  %v1405_v51 = vld [vmem:[%s9536_s9 + $0x30] sm:$0xff]  ;;  %v882_v61 = vld [vmem:[%s9531_s4] sm:$0xf] }
  0x19   : > { %5065 = vmatmul.mubr.msk.f32.gmra.mrb[2].mxu1 %vm505_vm3, %v502_v22  ;;  %v5245_v52 = vpack.c.bf16 %v1189_v50, %v1188_v49  ;;  %v1406_v53 = vld [vmem:[%s9536_s9 + $0x38] sm:$0xff]  ;;  %v5878_v0 = vrot.slane %v882_v61, %v9543_v59  ;;  %v5885_v2 = vrot.slane %v882_v61, %v9546_v60  ;;  %v5898_v11 = vrot.slane %v882_v61, %v9544_v62 }
  0x1a   : > { %5224 = vmatpush3.bf16.msra.mxu1 %v5221_v18  ;;  %v5261_v54 = vpack.c.bf16 %v1406_v53, %v1405_v51 }
  0x1b   : > { %5232 = vmatpush3.bf16.msra.mxu0 %v5229_v20  ;;  %5234 = vmatprep.subr.bf16.mxu1 %v5233_v34  ;;  %v5921_v20 = vrot.slane %v882_v61, %v9545_v3 }
  0x1c   : > { %5250 = vmatprep.subr.bf16.mxu0 %v5249_v36 }
  0xe7   : > { %v5057_v23 = vpop.f32.mrb[0].mxu0 }
  0xe8   : > { %v600_v24 = vpop.f32.mrb[1].mxu0  ;;  %v5063_v25 = vpop.f32.mrb[0].mxu1 }
  0xe9   : > { %5075 = vmatprep.mubr.msk.f32.mxu1 %vm643_vm4, %v600_v24  ;;  %5095 = vmatprep.mubr.msk.f32.mxu0 %vm643_vm4, %v600_v24  ;;  %v620_v26 = vpop.f32.mrb[1].mxu1 }
  0xea   : > { %5076 = vmatmul.mubr.msk.f32.vlgmr.msra.gmra.mrb[4].mxu1 %vm643_vm4, %v5057_v23  ;;  %5096 = vmatmul.mubr.msk.f32.vlgmr.msra.gmra.mrb[4].mxu0 %vm643_vm4, %v5057_v23 }
  0xeb   : > { %v5060_v27 = vpop.f32.mrb[2].mxu0  ;;  %5236 = vmatpush3.bf16.msra.mxu1 %v5233_v34  ;;  %5252 = vmatpush3.bf16.msra.mxu0 %v5249_v36 }
  0xec   : > { %v610_v28 = vpop.f32.mrb[3].mxu0  ;;  %v5066_v29 = vpop.f32.mrb[2].mxu1  ;;  %5238 = vmatprep.subr.bf16.mxu1 %v5237_v40  ;;  %5254 = vmatprep.subr.bf16.mxu0 %v5253_v42 }
  0xed   : > { %5078 = vmatprep.mubr.msk.f32.mxu1 %vm643_vm4, %v610_v28  ;;  %5098 = vmatprep.mubr.msk.f32.mxu0 %vm643_vm4, %v610_v28  ;;  %v630_v30 = vpop.f32.mrb[3].mxu1 }
  0xee   : > { %5079 = vmatmul.mubr.msk.f32.gmra.mrb[6].mxu1 %vm643_vm4, %v5060_v27  ;;  %5099 = vmatmul.mubr.msk.f32.gmra.mrb[6].mxu0 %vm643_vm4, %v5060_v27 }
  0xef   : > { %5081 = vmatprep.mubr.msk.f32.mxu1 %vm643_vm4, %v620_v26  ;;  %5101 = vmatprep.mubr.msk.f32.mxu0 %vm643_vm4, %v620_v26 }
  0xf0   : > { %5240 = vmatpush3.bf16.msra.mxu1 %v5237_v40  ;;  %5256 = vmatpush3.bf16.msra.mxu0 %v5253_v42 }
  0xf1   : > { %5242 = vmatprep.subr.bf16.mxu1 %v5241_v46  ;;  %5258 = vmatprep.subr.bf16.mxu0 %v5257_v48 }
  0xf2   : > { %5082 = vmatmul.mubr.msk.f32.gmra.mrb[8].mxu1 %vm643_vm4, %v5063_v25  ;;  %5102 = vmatmul.mubr.msk.f32.gmra.mrb[8].mxu0 %vm643_vm4, %v5063_v25 }
  0xf3   : > { %5084 = vmatprep.mubr.msk.f32.mxu1 %vm643_vm4, %v630_v30  ;;  %5104 = vmatprep.mubr.msk.f32.mxu0 %vm643_vm4, %v630_v30 }
  0xf4   : > { %5244 = vmatpush3.bf16.msra.mxu1 %v5241_v46  ;;  %5260 = vmatpush3.bf16.msra.mxu0 %v5257_v48 }
  0xf5   : > { %5246 = vmatprep.subr.bf16.mxu1 %v5245_v52  ;;  %5262 = vmatprep.subr.bf16.mxu0 %v5261_v54 }
  0xf6   : > { %5085 = vmatmul.mubr.msk.f32.gmra.mrb[10].mxu1 %vm643_vm4, %v5066_v29  ;;  %5105 = vmatmul.mubr.msk.f32.gmra.mrb[10].mxu0 %vm643_vm4, %v5066_v29 }
  0xf8   : > { %5248 = vmatpush3.bf16.msra.mxu1 %v5245_v52  ;;  %5264 = vmatpush3.bf16.msra.mxu0 %v5261_v54 }
 0x1bd   : > { %v5077_v63 = vpop.f32.mrb[4].mxu1  ;;  %v5880_v1 = vpop.f32.mrb[4].mxu0 }
 0x1be   : > { %9773 = vst [vmem:[#allocation2_spill] sm:$0xff] %v5880_v1  ;;  %v905_v4 = vrot.slane %v5077_v63, 5  ;;  %v974_v5 = vrot.slane %v5077_v63, 6  ;;  %v1043_v6 = vrot.slane %v5077_v63, 7  ;;  %v5888_v7 = vpop.f32.mrb[5].mxu1  ;;  %v5891_v8 = vpop.f32.mrb[5].mxu0  ;;  %v897_v17 = vmul.f32 %v5077_v63, %v5878_v0 }
 0x1bf   : > { %9774 = vst [vmem:[#allocation3_spill] sm:$0xff] %v5891_v8  ;;  %v904_v9 = vrot.slane %v5888_v7, 5  ;;  %v973_v10 = vrot.slane %v5888_v7, 6  ;;  %v1042_v12 = vrot.slane %v5888_v7, 7 }
 0x1c1   : > { %v919_v13 = vsel %vm912_vm5, %v904_v9, %v905_v4  ;;  %v988_v14 = vsel %vm981_vm6, %v973_v10, %v974_v5  ;;  %v5909_v15 = vpop.f32.mrb[6].mxu1  ;;  %v5911_v16 = vpop.f32.mrb[6].mxu0  ;;  %v1057_v19 = vsel %vm1050_vm7, %v1042_v12, %v1043_v6 }
 0x1c2   : > { %9775 = vst [vmem:[#allocation4_spill] sm:$0xff] %v5911_v16  ;;  %v958_v18 = vmul.f32 %v5885_v2, %v919_v13  ;;  %v744_v21 = vpop.f32.mrb[7].mxu1  ;;  %v5923_v22 = vpop.f32.mrb[7].mxu0  ;;  %v907_v23 = vrot.slane %v5909_v15, 5  ;;  %v1027_v25 = vmul.f32 %v5898_v11, %v988_v14  ;;  %v976_v26 = vrot.slane %v5909_v15, 6 }
 0x1c3   : > { %9776 = vst [vmem:[#allocation5_spill] sm:$0xff] %v5923_v22  ;;  %v1045_v27 = vrot.slane %v5909_v15, 7  ;;  %v906_v28 = vrot.slane %v744_v21, 5  ;;  %v975_v29 = vrot.slane %v744_v21, 6  ;;  %v1096_v33 = vmul.f32 %v5921_v20, %v1057_v19 }
 0x1c4   : > { %v966_v24 = vadd.f32 %v958_v18, %v897_v17  ;;  %v899_v34 = vmul.f32 %v5909_v15, %v5878_v0  ;;  %v1044_v35 = vrot.slane %v744_v21, 7  ;;  %v898_v38 = vmul.f32 %v5878_v0, %v744_v21 }
 0x1c5   : > { %v5929_v30 = vpop.f32.mrb[8].mxu1  ;;  %v5931_v31 = vpop.f32.mrb[8].mxu0  ;;  %v917_v39 = vsel %vm912_vm5, %v906_v28, %v907_v23  ;;  %v918_v40 = vsel %vm912_vm5, %v905_v4, %v906_v28  ;;  %v986_v41 = vsel %vm981_vm6, %v975_v29, %v976_v26  ;;  %v987_v45 = vsel %vm981_vm6, %v974_v5, %v975_v29 }
 0x1c6   : > { %9777 = vst [vmem:[#allocation6_spill] sm:$0xff] %v5931_v31  ;;  %v1035_v32 = vadd.f32 %v1027_v25, %v966_v24  ;;  %v754_v36 = vpop.f32.mrb[9].mxu1  ;;  %v5936_v37 = vpop.f32.mrb[9].mxu0  ;;  %v959_v43 = vmul.f32 %v5885_v2, %v918_v40  ;;  %v960_v44 = vmul.f32 %v5885_v2, %v917_v39  ;;  %v1028_v46 = vmul.f32 %v5898_v11, %v987_v45 }
 0x1c7   : > { %9778 = vst [vmem:[#allocation7_spill] sm:$0xff] %v5936_v37  ;;  %v1055_v47 = vsel %vm1050_vm7, %v1044_v35, %v1045_v27  ;;  %v1029_v52 = vmul.f32 %v5898_v11, %v986_v41  ;;  %v1056_v53 = vsel %vm1050_vm7, %v1043_v6, %v1044_v35  ;;  %v909_v13 = vrot.slane %v5929_v30, 5 }
 0x1c8   : > { %v1104_v42 = vadd.f32 %v1096_v33, %v1035_v32  ;;  %v967_v50 = vadd.f32 %v959_v43, %v898_v38  ;;  %v968_v51 = vadd.f32 %v960_v44, %v899_v34  ;;  %v1097_v4 = vmul.f32 %v5921_v20, %v1056_v53  ;;  %v5983_v33 = vld [vmem:[%s9532_s5] ss:$0 sm:$0xff] }
 0x1c9   : > { %v5952_v48 = vpop.f32.mrb[10].mxu1  ;;  %v5954_v49 = vpop.f32.mrb[10].mxu0  ;;  %v1098_v5 = vmul.f32 %v5921_v20, %v1055_v47  ;;  %v978_v14 = vrot.slane %v5929_v30, 6  ;;  %v908_v18 = vrot.slane %v754_v36, 5  ;;  %v977_v19 = vrot.slane %v754_v36, 6 }
 0x1ca   : > { %9779 = vst [vmem:[#allocation8_spill] sm:$0xff] %v5954_v49  ;;  %v5959_v54 = vpop.f32.mrb[11].mxu1  ;;  %v5961_v57 = vpop.f32.mrb[11].mxu0  ;;  %v1036_v61 = vadd.f32 %v1028_v46, %v967_v50  ;;  %v1037_v63 = vadd.f32 %v1029_v52, %v968_v51  ;;  %v1047_v6 = vrot.slane %v5929_v30, 7  ;;  %v1046_v28 = vrot.slane %v754_v36, 7 }
 0x1cb   : > { %9780 = vst [vmem:[#allocation9_spill] sm:$0xff] %v5961_v57  ;;  %v915_v21 = vsel %vm912_vm5, %v908_v18, %v909_v13  ;;  %v916_v24 = vsel %vm912_vm5, %v907_v23, %v908_v18  ;;  %v984_v25 = vsel %vm981_vm6, %v977_v19, %v978_v14  ;;  %v900_v29 = vmul.f32 %v5878_v0, %v754_v36 }
 0x1cc   : > { %v1105_v15 = vadd.f32 %v1097_v4, %v1036_v61  ;;  %v1106_v17 = vadd.f32 %v1098_v5, %v1037_v63  ;;  %v961_v32 = vmul.f32 %v5885_v2, %v916_v24  ;;  %v901_v34 = vmul.f32 %v5929_v30, %v5878_v0 }
 0x1cd   : > { %v962_v23 = vmul.f32 %v5885_v2, %v915_v21  ;;  %v985_v35 = vsel %vm981_vm6, %v976_v26, %v977_v19  ;;  %v1031_v39 = vmul.f32 %v5898_v11, %v984_v25  ;;  %v1053_v41 = vsel %vm1050_vm7, %v1046_v28, %v1047_v6 }
 0x1ce   : > { %v969_v38 = vadd.f32 %v961_v32, %v900_v29  ;;  %v1030_v36 = vmul.f32 %v5898_v11, %v985_v35  ;;  %v1054_v43 = vsel %vm1050_vm7, %v1045_v27, %v1046_v28  ;;  %v5999_v44 = vadd.f32 %v5983_v33, %v1104_v42 }
 0x1cf   : > { %v970_v40 = vadd.f32 %v962_v23, %v901_v34  ;;  %v1099_v26 = vmul.f32 %v5921_v20, %v1054_v43  ;;  %v1100_v47 = vmul.f32 %v5921_v20, %v1053_v41  ;;  %v6004_v50 = vadd.f32 %v5983_v33, %v1105_v15 }
 0x1d0   : > { %v1038_v45 = vadd.f32 %v1030_v36, %v969_v38  ;;  %v911_v51 = vrot.slane %v5952_v48, 5  ;;  %v980_v27 = vrot.slane %v5952_v48, 6  ;;  %v1049_v42 = vrot.slane %v5952_v48, 7 }
 0x1d1   : > { %v1039_v46 = vadd.f32 %v1031_v39, %v970_v40  ;;  %v1127_v61 = vsub.f32 0.0, %v5999_v44  ;;  %v6016_v4 = vadd.f32 %v5983_v33, %v1106_v17  ;;  %v1128_v5 = vsub.f32 0.0, %v6004_v50 }
 0x1d2   : > { %v1107_v52 = vadd.f32 %v1099_v26, %v1038_v45  ;;  %v920_v63 = vsel %vm912_vm5, %v911_v51, %v904_v9  ;;  %v989_v18 = vsel %vm981_vm6, %v980_v27, %v973_v10  ;;  %v1058_v9 = vsel %vm1050_vm7, %v1049_v42, %v1042_v12 }
 0x1d3   : > { %v1108_v53 = vadd.f32 %v1100_v47, %v1039_v46  ;;  %v945_v15 = vsel %vm921_vm8, %v920_v63, 0.0  ;;  %v896_v17 = vmul.f32 %v5878_v0, %v5888_v7  ;;  %v1136_v21 = vmul.f32 1.442695, %v1127_v61 }
 0x1d4   : > { %v957_v19 = vmul.f32 %v5885_v2, %v945_v15  ;;  %v6033_v24 = vadd.f32 %v5983_v33, %v1107_v52  ;;  %v1014_v25 = vsel %vm990_vm9, %v989_v18, 0.0  ;;  %v1083_v10 = vsel %vm1059_vm10, %v1058_v9, 0.0 }
 0x1d5   : > { %v1129_v28 = vsub.f32 0.0, %v6016_v4  ;;  %v1026_v12 = vmul.f32 %v5898_v11, %v1014_v25  ;;  %v1138_v32 = vmul.f32 1.442695, %v1128_v5  ;;  %v910_v7 = vrot.slane %v5959_v54, 5 }
 0x1d6   : > { %v965_v29 = vadd.f32 %v957_v19, %v896_v17  ;;  %v6043_v34 = vadd.f32 %v5983_v33, %v1108_v53  ;;  %v1095_v35 = vmul.f32 %v5921_v20, %v1083_v10  ;;  %v979_v38 = vrot.slane %v5959_v54, 6 }
 0x1d7   : > { %5471 = vpow2.f32 %v1136_v21  ;;  %v1130_v39 = vsub.f32 0.0, %v6033_v24  ;;  %v913_v40 = vsel %vm912_vm5, %v910_v7, %v911_v51  ;;  %v914_v36 = vsel %vm912_vm5, %v909_v13, %v910_v7 }
 0x1d8   : > { %v1034_v23 = vadd.f32 %v1026_v12, %v965_v29  ;;  %v1140_v41 = vmul.f32 1.442695, %v1129_v28  ;;  %v902_v45 = vmul.f32 %v5878_v0, %v5959_v54  ;;  %v963_v46 = vmul.f32 %v5885_v2, %v914_v36 }
 0x1d9   : > { %v903_v26 = vmul.f32 %v5952_v48, %v5878_v0  ;;  %v964_v47 = vmul.f32 %v5885_v2, %v913_v40  ;;  %v982_v51 = vsel %vm981_vm6, %v979_v38, %v980_v27  ;;  %v983_v13 = vsel %vm981_vm6, %v978_v14, %v979_v38 }
 0x1da   : > { %v1103_v43 = vadd.f32 %v1095_v35, %v1034_v23  ;;  %5473 = vpow2.f32 %v1138_v32  ;;  %v1131_v52 = vsub.f32 0.0, %v6043_v34  ;;  %v971_v61 = vadd.f32 %v963_v46, %v902_v45 }
 0x1db   : > { %v1142_v63 = vmul.f32 1.442695, %v1130_v39  ;;  %v972_v5 = vadd.f32 %v964_v47, %v903_v26  ;;  %v1032_v0 = vmul.f32 %v5898_v11, %v983_v13  ;;  %v1033_v2 = vmul.f32 %v5898_v11, %v982_v51 }
 0x1dc   : > { %v1118_v53 = vadd.f32 %v5983_v33, %v1103_v43  ;;  %v1048_v27 = vrot.slane %v5959_v54, 7  ;;  %5475 = vpow2.f32 %v1140_v41  ;;  %v1144_v19 = vmul.f32 1.442695, %v1131_v52 }
 0x1dd   : > { %v1040_v15 = vadd.f32 %v1032_v0, %v971_v61  ;;  %v1041_v18 = vadd.f32 %v1033_v2, %v972_v5  ;;  %5477 = vpow2.f32 %v1142_v63 }
 0x1de   : > { %v1126_v48 = vsub.f32 0.0, %v1118_v53  ;;  %v1051_v14 = vsel %vm1050_vm7, %v1048_v27, %v1049_v42  ;;  %v1052_v17 = vsel %vm1050_vm7, %v1047_v6, %v1048_v27 }
 0x1df   : > { %v1101_v21 = vmul.f32 %v5921_v20, %v1052_v17  ;;  %v1102_v11 = vmul.f32 %v5921_v20, %v1051_v14  ;;  %v1516_v14 = vld [vmem:[%s9537_s10] sm:$0xff] }
 0x1e0   : > { %v1134_v9 = vmul.f32 1.442695, %v1126_v48  ;;  %v1520_v17 = vld [vmem:[%s9537_s10 + $0x20] sm:$0xff] }
 0x1e1   : > { %v5472_v54 = vpop.eup %5471  ;;  %v1109_v25 = vadd.f32 %v1101_v21, %v1040_v15  ;;  %v1110_v10 = vadd.f32 %v1102_v11, %v1041_v18  ;;  %v1521_v15 = vld [vmem:[%s9537_s10 + $0x28] sm:$0xff]  ;;  %v1519_v18 = vld [vmem:[%s9537_s10 + $0x18] sm:$0xff]  ;;  %v6152_v21 = vpack.c.bf16 %v1520_v17, %v1516_v14  ;;  %v1542_v17 = vld [vmem:[%s9537_s10 + $0xd0] sm:$0xff] }
 0x1e2   : > { %5479 = vpow2.f32 %v1134_v9  ;;  %v1151_v32 = vadd.f32 1.0, %v5472_v54  ;;  %v1518_v54 = vld [vmem:[%s9537_s10 + $0x10] sm:$0xff] }
 0x1e3   : > { %5481 = vpow2.f32 %v1144_v19  ;;  %v1124_v28 = vadd.f32 %v5983_v33, %v1109_v25  ;;  %v1125_v42 = vadd.f32 %v5983_v33, %v1110_v10  ;;  %v1523_v19 = vld [vmem:[%s9537_s10 + $0x38] sm:$0xff]  ;;  %v1522_v25 = vld [vmem:[%s9537_s10 + $0x30] sm:$0xff] }
 0x1e4   : > { %v5474_v29 = vpop.eup %5473  ;;  %v5281_v11 = vpack.c.bf16 %v1523_v19, %v1519_v18  ;;  %v6160_v10 = vpack.c.bf16 %v1522_v25, %v1518_v54  ;;  %v1546_v19 = vld [vmem:[%s9537_s10 + $0xf0] sm:$0xff]  ;;  %v9549_v25 = vmov 0.0  }
 0x1e5   : > { %v1132_v30 = vsub.f32 0.0, %v1124_v28  ;;  %v1133_v12 = vsub.f32 0.0, %v1125_v42  ;;  %v1152_v35 = vadd.f32 1.0, %v5474_v29  ;;  %v1527_v29 = vld [vmem:[%s9537_s10 + $0x58] sm:$0xff]  ;;  %v6267_v54 = vpack.c.bf16 %v1546_v19, %v1542_v17 }
 0x1e6   : > { %v5476_v23 = vpop.eup %5475  ;;  %5282 = vmatprep.subr.bf16.mxu0 %v5281_v11 }
 0x1e7   : > { %v1146_v6 = vmul.f32 1.442695, %v1132_v30  ;;  %v1148_v7 = vmul.f32 1.442695, %v1133_v12  ;;  %v5478_v38 = vpop.eup %5477  ;;  %v1153_v40 = vadd.f32 1.0, %v5476_v23  ;;  %v1531_v12 = vld [vmem:[%s9537_s10 + $0x78] sm:$0xff] }
 0x1e8   : > { %v1154_v41 = vadd.f32 1.0, %v5478_v38  ;;  %v1530_v38 = vld [vmem:[%s9537_s10 + $0x70] sm:$0xff] }
 0x1e9   : > { %5483 = vpow2.f32 %v1146_v6  ;;  %v1528_v6 = vld [vmem:[%s9537_s10 + $0x60] sm:$0xff] }
 0x1ea   : > { %5485 = vpow2.f32 %v1148_v7  ;;  %v6184_v7 = vpack.c.bf16 %v1531_v12, %v1527_v29 }
 0x1eb   : > { %5487 = vrcp.f32 %v1151_v32  ;;  %v1524_v32 = vld [vmem:[%s9537_s10 + $0x40] sm:$0xff] }
 0x1ec   : > { %v5480_v20 = vpop.eup %5479  ;;  %5489 = vrcp.f32 %v1152_v35  ;;  %v6186_v23 = vpack.c.bf16 %v1528_v6, %v1524_v32  ;;  %v1526_v35 = vld [vmem:[%s9537_s10 + $0x50] sm:$0xff] }
 0x1ed   : > { %v1150_v39 = vadd.f32 1.0, %v5480_v20  ;;  %v5482_v36 = vpop.eup %5481  ;;  %v6195_v20 = vpack.c.bf16 %v1530_v38, %v1526_v35 }
 0x1ee   : > { %v1155_v33 = vadd.f32 1.0, %v5482_v36  ;;  %v1535_v36 = vld [vmem:[%s9537_s10 + $0x98] sm:$0xff] }
 0x1ef   : > { %5491 = vrcp.f32 %v1150_v39  ;;  %v1533_v39 = vld [vmem:[%s9537_s10 + $0x88] sm:$0xff] }
 0x1f0   : > { %5493 = vrcp.f32 %v1153_v40  ;;  %v1537_v40 = vld [vmem:[%s9537_s10 + $0xa8] sm:$0xff] }
 0x1f1   : > { %5495 = vrcp.f32 %v1154_v41  ;;  %v6209_v41 = vpack.c.bf16 %v1537_v40, %v1533_v39 }
 0x1f2   : > { %5497 = vrcp.f32 %v1155_v33  ;;  %v1539_v33 = vld [vmem:[%s9537_s10 + $0xb8] sm:$0xff] }
 0x1f3   : > { %v5484_v43 = vpop.eup %5483 }
 0x1f4   : > { %v5486_v45 = vpop.eup %5485  ;;  %v1156_v46 = vadd.f32 1.0, %v5484_v43  ;;  %v1532_v43 = vld [vmem:[%s9537_s10 + $0x80] sm:$0xff] }
 0x1f5   : > { %v5488_v26 = vpop.eup %5487  ;;  %v1157_v47 = vadd.f32 1.0, %v5486_v45  ;;  %v1536_v45 = vld [vmem:[%s9537_s10 + $0xa0] sm:$0xff] }
 0x1f6   : > { %v5490_v51 = vpop.eup %5489  ;;  %5499 = vrcp.f32 %v1156_v46  ;;  %v6084_v61 = vmul.f32 %v5488_v26, %v5999_v44  ;;  %v6220_v46 = vpack.c.bf16 %v1539_v33, %v1535_v36  ;;  %v6222_v26 = vpack.c.bf16 %v1536_v45, %v1532_v43 }
 0x1f7   : > { %5501 = vrcp.f32 %v1157_v47  ;;  %v6087_v5 = vmul.f32 %v5490_v51, %v6004_v50  ;;  %v1534_v47 = vld [vmem:[%s9537_s10 + $0x90] sm:$0xff]  ;;  %v9551_v33 = vmov 0   ;;  %v5662_v43 = vmov 5  }
 0x1f8   : > { %9782 = vst [vmem:[#allocation11_spill] sm:$0xff] %v6084_v61  ;;  %v1538_v51 = vld [vmem:[%s9537_s10 + $0xb0] sm:$0xff] }
 0x1f9   : > { %v5492_v13 = vpop.eup %5491  ;;  %9783 = vst [vmem:[#allocation12_spill] sm:$0xff] %v6087_v5 }
 0x1fa   : > { %v6081_v52 = vmul.f32 %v5492_v13, %v1118_v53  ;;  %v5494_v63 = vpop.eup %5493  ;;  %v6231_v13 = vpack.c.bf16 %v1538_v51, %v1534_v47 }
 0x1fb   : > { %v5496_v0 = vpop.eup %5495  ;;  %v6102_v44 = vmul.f32 %v5494_v63, %v6016_v4  ;;  %v1541_v63 = vld [vmem:[%s9537_s10 + $0xc8] sm:$0xff] }
 0x1fc   : > { %9781 = vst [vmem:[#allocation10_spill] sm:$0xff] %v6081_v52  ;;  %5123 = vmatprep.mubr.msk.f32.mxu1 %vm1197_vm11, %v6081_v52  ;;  %5151 = vmatprep.mubr.msk.f32.mxu0 %vm1197_vm11, %v6081_v52  ;;  %v5498_v50 = vpop.eup %5497  ;;  %v6105_v53 = vmul.f32 %v5496_v0, %v6033_v24  ;;  %v1545_v0 = vld [vmem:[%s9537_s10 + $0xe8] sm:$0xff] }
 0x1fd   : > { %5124 = vmatmul.mubr.msk.f32.vlgmr.msra.gmra.mrb[12].mxu1 %vm1197_vm11, %v6084_v61  ;;  %5152 = vmatmul.mubr.msk.f32.vlgmr.msra.gmra.mrb[12].mxu0 %vm1197_vm11, %v6084_v61  ;;  %9784 = vst [vmem:[#allocation13_spill] sm:$0xff] %v6102_v44  ;;  %v6116_v4 = vmul.f32 %v5498_v50, %v6043_v34  ;;  %v1517_v34 = vld [vmem:[%s9537_s10 + $0x8] sm:$0xff]  ;;  %v1543_v50 = vld [vmem:[%s9537_s10 + $0xd8] sm:$0xff] }
 0x1fe   : > { %5126 = vmatprep.mubr.msk.f32.mxu1 %vm1197_vm11, %v6087_v5  ;;  %5154 = vmatprep.mubr.msk.f32.mxu0 %vm1197_vm11, %v6087_v5  ;;  %9785 = vst [vmem:[#allocation14_spill] sm:$0xff] %v6105_v53  ;;  %v5265_v9 = vpack.c.bf16 %v1521_v15, %v1517_v34  ;;  %v1544_v34 = vld [vmem:[%s9537_s10 + $0xe0] sm:$0xff]  ;;  %v1547_v15 = vld [vmem:[%s9537_s10 + $0xf8] sm:$0xff] }
 0x1ff   : > { %9786 = vst [vmem:[#allocation15_spill] sm:$0xff] %v6116_v4  ;;  %5284 = vmatpush1.bf16.msra.mxu0 %v6160_v10  ;;  %v6258_v14 = vpack.c.bf16 %v1547_v15, %v1543_v50 }
 0x200   : > { %v5500_v2 = vpop.eup %5499  ;;  %5266 = vmatprep.subr.bf16.mxu1 %v5265_v9  ;;  %5286 = vmatprep.subr.bf16.mxu0 %v6184_v7 }
 0x201   : > { %5127 = vmatmul.mubr.msk.f32.gmra.mrb[14].mxu1 %vm1197_vm11, %v6102_v44  ;;  %5155 = vmatmul.mubr.msk.f32.gmra.mrb[14].mxu0 %vm1197_vm11, %v6102_v44  ;;  %v5502_v48 = vpop.eup %5501  ;;  %v6118_v27 = vmul.f32 %v5500_v2, %v1124_v28  ;;  %v1525_v28 = vld [vmem:[%s9537_s10 + $0x48] sm:$0xff]  ;;  %v6245_v2 = vpack.c.bf16 %v1545_v0, %v1541_v63 }
 0x202   : > { %5129 = vmatprep.mubr.msk.f32.mxu1 %vm1197_vm11, %v6105_v53  ;;  %5157 = vmatprep.mubr.msk.f32.mxu0 %vm1197_vm11, %v6105_v53  ;;  %v6128_v24 = vmul.f32 %v5502_v48, %v1125_v42  ;;  %v1529_v42 = vld [vmem:[%s9537_s10 + $0x68] sm:$0xff]  ;;  %v1540_v48 = vld [vmem:[%s9537_s10 + $0xc0] sm:$0xff] }
 0x203   : > { %9787 = vst [vmem:[#allocation16_spill] sm:$0xff] %v6118_v27  ;;  %5268 = vmatpush1.bf16.msra.mxu1 %v6152_v21  ;;  %v6173_v30 = vpack.c.bf16 %v1529_v42, %v1525_v28  ;;  %5288 = vmatpush1.bf16.msra.mxu0 %v6195_v20  ;;  %v6256_v18 = vpack.c.bf16 %v1544_v34, %v1540_v48  ;;  %v6277_v28 = vld [vmem:[%s9534_s7] ss:$0 sm:$0xff] }
 0x204   : > { %9788 = vst [vmem:[#allocation17_spill] sm:$0xff] %v6128_v24  ;;  %5290 = vmatprep.subr.bf16.mxu0 %v6220_v46 }
 0x205   : > { %5130 = vmatmul.mubr.msk.f32.gmra.mrb[16].mxu1 %vm1197_vm11, %v6116_v4  ;;  %5158 = vmatmul.mubr.msk.f32.gmra.mrb[16].mxu0 %vm1197_vm11, %v6116_v4 }
 0x206   : > { %5132 = vmatprep.mubr.msk.f32.mxu1 %vm1197_vm11, %v6118_v27  ;;  %5160 = vmatprep.mubr.msk.f32.mxu0 %vm1197_vm11, %v6118_v27 }
 0x207   : > { %5270 = vmatprep.subr.bf16.mxu1 %v6173_v30  ;;  %5292 = vmatpush1.bf16.msra.mxu0 %v6231_v13 }
 0x208   : > { %5272 = vmatpush1.bf16.msra.mxu1 %v6186_v23  ;;  %5294 = vmatprep.subr.bf16.mxu0 %v6258_v14 }
 0x209   : > { %5133 = vmatmul.mubr.msk.f32.gmra.mrb[18].mxu1 %vm1197_vm11, %v6128_v24  ;;  %5161 = vmatmul.mubr.msk.f32.gmra.mrb[18].mxu0 %vm1197_vm11, %v6128_v24 }
 0x20a   : > { %5274 = vmatprep.subr.bf16.mxu1 %v6209_v41  ;;  %1636 = vmatprep.mubr.f32.mxu1 %v9549_v25 }
 0x20b   : > { %5296 = vmatpush1.bf16.msra.mxu0 %v6267_v54  ;;  %1749 = vmatprep.mubr.f32.mxu0 %v9549_v25 }
 0x20c   : > { %5276 = vmatpush1.bf16.msra.mxu1 %v6222_v26  ;;  %5314 = vmatprep.subr.bf16.mxu0 %v5281_v11 }
 0x20d   : > { %5278 = vmatprep.subr.bf16.mxu1 %v6245_v2 }
 0x210   : > { %5280 = vmatpush1.bf16.msra.mxu1 %v6256_v18 }
 0x211   : > { %5298 = vmatprep.subr.bf16.mxu1 %v5265_v9 }
 0x2d0   : > { %v5125_v42 = vpop.f32.mrb[12].mxu1  ;;  %v6279_v29 = vpop.f32.mrb[12].mxu0 }
 0x2d1   : > { %v6282_v12 = vadd.f32 %v5125_v42, %v6277_v28  ;;  %4044 = vperm.xlu1 %5407, %v6279_v29   ;;  %3916 = vperm.xlu0 %5406, %v6279_v29   ;;  %v1288_v9 = vpop.f32.mrb[13].mxu1  ;;  %v6286_v32 = vpop.f32.mrb[13].mxu0 }
 0x2d2   : > { %v6289_v11 = vadd.f32 %v6277_v28, %v1288_v9 }
 0x2d3   : > { %v1336_v6 = vand.u32 2147483647, %v6282_v12 }
 0x2d4   : > { %v1335_v35 = vand.u32 2147483647, %v6289_v11  ;;  %v5128_v38 = vpop.f32.mrb[14].mxu1  ;;  %v6293_v39 = vpop.f32.mrb[14].mxu0 }
 0x2d5   : > { %v1344_v40 = vsub.f32 0.0, %v1336_v6  ;;  %v6296_v36 = vadd.f32 %v5128_v38, %v6277_v28  ;;  %5410 = vset.pattern.permute.xlu1 %v9551_v33  ;;  %5408 = vset.pattern.permute.xlu0 %v5662_v43  ;;  %v1298_v45 = vpop.f32.mrb[15].mxu1  ;;  %v6300_v47 = vpop.f32.mrb[15].mxu0  ;;  %v5666_v33 = vmov 6  }
 0x2d6   : > { %v1343_v51 = vsub.f32 0.0, %v1335_v35  ;;  %v6303_v63 = vadd.f32 %v6277_v28, %v1298_v45  ;;  %3862 = vperm.xlu1 %5410, %v6279_v29   ;;  %4172 = vperm.xlu0 %5408, %v6279_v29   ;;  %v9553_v45 = vmov 7  }
 0x2d7   : > { %v1353_v0 = vmul.f32 1.442695, %v1344_v40  ;;  %v1338_v50 = vand.u32 2147483647, %v6296_v36  ;;  %v9547_v40 = vmov 2  }
 0x2d8   : > { %v1351_v48 = vmul.f32 1.442695, %v1343_v51  ;;  %v1337_v34 = vand.u32 2147483647, %v6303_v63  ;;  %v5131_v15 = vpop.f32.mrb[16].mxu1  ;;  %v6312_v42 = vpop.f32.mrb[16].mxu0 }
 0x2d9   : > { %5503 = vpow2.f32 %v1353_v0  ;;  %v1346_v17 = vsub.f32 0.0, %v1338_v50  ;;  %v6310_v19 = vadd.f32 %v5131_v15, %v6277_v28  ;;  %v1308_v9 = vpop.f32.mrb[17].mxu1  ;;  %v6317_v38 = vpop.f32.mrb[17].mxu0 }
 0x2da   : > { %5505 = vpow2.f32 %v1351_v48  ;;  %v1345_v6 = vsub.f32 0.0, %v1337_v34  ;;  %v6315_v35 = vadd.f32 %v6277_v28, %v1308_v9  ;;  %5411 = vset.pattern.permute.xlu1 %v9547_v40  ;;  %5409 = vset.pattern.permute.xlu0 %v9553_v45 }
 0x2db   : > { %v1357_v51 = vmul.f32 1.442695, %v1346_v17  ;;  %v1340_v0 = vand.u32 2147483647, %v6310_v19  ;;  %3996 = vperm.xlu1 %5411, %v6279_v29   ;;  %4300 = vperm.xlu0 %5409, %v6279_v29   ;;  %v5665_v17 = vmov 4  }
 0x2dc   : > { %v1355_v50 = vmul.f32 1.442695, %v1345_v6  ;;  %v1339_v48 = vand.u32 2147483647, %v6315_v35  ;;  %v5134_v34 = vpop.f32.mrb[18].mxu1  ;;  %v6325_v15 = vpop.f32.mrb[18].mxu0 }
 0x2dd   : > { %v1318_v9 = vpop.f32.mrb[19].mxu1  ;;  %v6330_v3 = vpop.f32.mrb[19].mxu0  ;;  %v1348_v6 = vsub.f32 0.0, %v1340_v0 }
 0x2de   : > { %5507 = vpow2.f32 %v1355_v50  ;;  %v1347_v59 = vsub.f32 0.0, %v1339_v48  ;;  %v6328_v62 = vadd.f32 %v6277_v28, %v1318_v9  ;;  %v6338_v48 = vadd.f32 %v5134_v34, %v6277_v28 }
 0x2df   : > { %5509 = vpow2.f32 %v1357_v51  ;;  %5415 = vset.pattern.permute.xlu1 %v5658_v55  ;;  %5412 = vset.pattern.permute.xlu0 %v5665_v17  ;;  %v1361_v25 = vmul.f32 1.442695, %v1348_v6 }
 0x2e0   : > { %v1359_v60 = vmul.f32 1.442695, %v1347_v59  ;;  %4124 = vperm.xlu0 %5412, %v6279_v29   ;;  %4040 = vperm.xlu1 %5415, %v6286_v32   ;;  %v1341_v50 = vand.u32 2147483647, %v6328_v62  ;;  %v1342_v28 = vand.u32 2147483647, %v6338_v48 }
 0x2e2   : > { %5511 = vpow2.f32 %v1359_v60  ;;  %v1349_v0 = vsub.f32 0.0, %v1341_v50 }
 0x2e3   : > { %v5504_v9 = vpop.eup %5503 }
 0x2e4   : > { %v5506_v40 = vpop.eup %5505  ;;  %v1368_v51 = vadd.f32 1.0, %v5504_v9  ;;  %5413 = vset.pattern.permute.xlu0 %v5666_v33  ;;  %5417 = vset.pattern.permute.xlu1 %v9553_v45  ;;  %v1363_v6 = vmul.f32 1.442695, %v1349_v0  ;;  %v1350_v45 = vsub.f32 0.0, %v1342_v28  ;;  %v1327_v28 = vmax.f32 %v6289_v11, 0.0 }
 0x2e5   : > { %v1367_v59 = vadd.f32 1.0, %v5506_v40  ;;  %4252 = vperm.xlu0 %5413, %v6279_v29   ;;  %4296 = vperm.xlu1 %5417, %v6286_v32  }
 0x2e6   : > { %5513 = vlog2.f32 %v1368_v51  ;;  %v1365_v50 = vmul.f32 1.442695, %v1350_v45  ;;  %v9789_v45 = vmov 0  }
 0x2e7   : > { %5515 = vlog2.f32 %v1367_v59 }
 0x2e8   : > { %v5508_v34 = vpop.eup %5507  ;;  %5517 = vpow2.f32 %v1361_v25 }
 0x2e9   : > { %v5510_v60 = vpop.eup %5509  ;;  %v1369_v9 = vadd.f32 1.0, %v5508_v34  ;;  %5414 = vset.pattern.permute.xlu0 %v5659_v56  ;;  %5420 = vset.pattern.permute.xlu1 %v5665_v17 }
 0x2ea   : > { %4120 = vperm.xlu1 %5420, %v6286_v32   ;;  %3912 = vperm.xlu0 %5414, %v6286_v32   ;;  %v1370_v29 = vadd.f32 1.0, %v5510_v60 }
 0x2eb   : > { %5519 = vlog2.f32 %v1369_v9 }
 0x2ec   : > { %v5512_v40 = vpop.eup %5511  ;;  %5521 = vpow2.f32 %v1363_v6 }
 0x2ed   : > { %5523 = vlog2.f32 %v1370_v29  ;;  %v1371_v51 = vadd.f32 1.0, %v5512_v40  ;;  %v1328_v40 = vmax.f32 %v6282_v12, 0.0 }
 0x2ee   : > { %5421 = vset.pattern.permute.xlu1 %v5666_v33  ;;  %5416 = vset.pattern.permute.xlu0 %v5662_v43  ;;  %5525 = vpow2.f32 %v1365_v50  ;;  %v9790_v50 = vmov 0.0  }
 0x2ef   : > { %4248 = vperm.xlu1 %5421, %v6286_v32   ;;  %4168 = vperm.xlu0 %5416, %v6286_v32   ;;  %5527 = vlog2.f32 %v1371_v51  ;;  %v9791_v51 = vmov 2  }
 0x2f0   : > { %v5514_v25 = vpop.eup %5513 }
 0x2f1   : > { %v5516_v59 = vpop.eup %5515  ;;  %v1378_v60 = vmul.f32 0.6931472, %v5514_v25 }
 0x2f2   : > { %v5518_v0 = vpop.eup %5517  ;;  %v1376_v34 = vmul.f32 0.6931472, %v5516_v59 }
 0x2f3   : > { %5423 = vset.pattern.permute.xlu1 %v5658_v55  ;;  %5418 = vset.pattern.permute.xlu0 %v9789_v45  ;;  %v1372_v6 = vadd.f32 1.0, %v5518_v0  ;;  %v6367_v25 = vadd.f32 %v1378_v60, %v1328_v40  ;;  %v9792_v60 = vmov 7  }
 0x2f4   : > { %v6356_v9 = vadd.f32 %v1376_v34, %v1327_v28  ;;  %3857 = vperm.xlu0 %5418, %v6286_v32   ;;  %4052 = vperm.xlu1 %5423, %v6293_v39  }
 0x2f5   : > { %v5520_v29 = vpop.eup %5519  ;;  %5529 = vlog2.f32 %v1372_v6 }
 0x2f6   : > { %4880 = vmatmul.mubr.msk.f32.vlgmr.msra.gmra.mrb[20].mxu1 %vm1197_vm11, %v6356_v9  ;;  %4888 = vmatmul.mubr.msk.f32.vlgmr.msra.gmra.mrb[20].mxu0 %vm1197_vm11, %v6356_v9  ;;  %v5522_v11 = vpop.eup %5521  ;;  %v1380_v59 = vmul.f32 0.6931472, %v5520_v29 }
 0x2f7   : > { %5300 = vmatpush1.bf16.msra.mxu1 %v6152_v21  ;;  %1642 = vmatprep.mubr.f32.mxu1 %v9790_v50  ;;  %v5524_v12 = vpop.eup %5523  ;;  %v1373_v0 = vadd.f32 1.0, %v5522_v11  ;;  %v1329_v21 = vmax.f32 %v6303_v63, 0.0  ;;  %v1330_v63 = vmax.f32 %v6296_v36, 0.0  ;;  %v1331_v36 = vmax.f32 %v6315_v35, 0.0 }
 0x2f8   : > { %5419 = vset.pattern.permute.xlu0 %v9791_v51  ;;  %5424 = vset.pattern.permute.xlu1 %v5662_v43  ;;  %v5526_v28 = vpop.eup %5525  ;;  %v1332_v11 = vmax.f32 %v6310_v19, 0.0  ;;  %v1333_v19 = vmax.f32 %v6328_v62, 0.0  ;;  %v1334_v62 = vmax.f32 %v6338_v48, 0.0  ;;  %v2060_v48 = vld [vmem:[%s9535_s8 + $0x20] sm:$0xff] }
 0x2f9   : > { %3992 = vperm.xlu0 %5419, %v6286_v32   ;;  %4180 = vperm.xlu1 %5424, %v6293_v39   ;;  %v1382_v32 = vmul.f32 0.6931472, %v5524_v12  ;;  %v6382_v34 = vadd.f32 %v1380_v59, %v1329_v21  ;;  %v5528_v6 = vpop.eup %5527  ;;  %5531 = vlog2.f32 %v1373_v0  ;;  %v1374_v29 = vadd.f32 1.0, %v5526_v28  ;;  %v2061_v12 = vld [vmem:[%s9535_s8 + $0x28] sm:$0xff]  ;;  %v2059_v28 = vld [vmem:[%s9535_s8 + $0x18] sm:$0xff] }
 0x2fa   : > { %1755 = vmatprep.mubr.f32.mxu0 %v9790_v50  ;;  %4881 = vmatmul.mubr.msk.f32.gmra.mrb[22].mxu1 %vm1197_vm11, %v6367_v25  ;;  %v1384_v40 = vmul.f32 0.6931472, %v5528_v6  ;;  %v2062_v6 = vld [vmem:[%s9535_s8 + $0x30] sm:$0xff] }
 0x2fb   : > { %4889 = vmatmul.mubr.msk.f32.gmra.mrb[22].mxu0 %vm1197_vm11, %v6367_v25  ;;  %1648 = vmatprep.mubr.f32.mxu1 %v9790_v50  ;;  %5533 = vlog2.f32 %v1374_v29  ;;  %v2065_v29 = vld [vmem:[%s9535_s8 + $0x48] sm:$0xff] }
 0x2fc   : > { %5316 = vmatpush1.bf16.msra.mxu0 %v6160_v10  ;;  %1761 = vmatprep.mubr.f32.mxu0 %v9790_v50  ;;  %v6395_v10 = vadd.f32 %v1382_v32, %v1330_v63  ;;  %v2058_v32 = vld [vmem:[%s9535_s8 + $0x10] sm:$0xff] }
 0x2fd   : > { %5422 = vset.pattern.permute.xlu0 %v5659_v56  ;;  %5425 = vset.pattern.permute.xlu1 %v9792_v60  ;;  %v5347_v63 = vpack.c.bf16 %v2062_v6, %v2058_v32  ;;  %v2074_v32 = vld [vmem:[%s9535_s8 + $0x90] sm:$0xff] }
 0x2fe   : > { %5302 = vmatprep.subr.bf16.mxu1 %v6173_v30  ;;  %4308 = vperm.xlu1 %5425, %v6293_v39   ;;  %v2078_v6 = vld [vmem:[%s9535_s8 + $0xb0] sm:$0xff] }
 0x2ff   : > { %3924 = vperm.xlu0 %5422, %v6293_v39   ;;  %4882 = vmatmul.mubr.msk.f32.gmra.mrb[24].mxu1 %vm1197_vm11, %v6382_v34  ;;  %v5530_v30 = vpop.eup %5529 }
 0x300   : > { %4890 = vmatmul.mubr.msk.f32.gmra.mrb[24].mxu0 %vm1197_vm11, %v6382_v34  ;;  %5304 = vmatpush1.bf16.msra.mxu1 %v6186_v23  ;;  %v6408_v23 = vadd.f32 %v1384_v40, %v1331_v36  ;;  %v2069_v40 = vld [vmem:[%s9535_s8 + $0x68] sm:$0xff] }
 0x301   : > { %1654 = vmatprep.mubr.f32.mxu1 %v9790_v50  ;;  %1767 = vmatprep.mubr.f32.mxu0 %v9790_v50  ;;  %v5333_v36 = vpack.c.bf16 %v2069_v40, %v2065_v29  ;;  %v2080_v29 = vld [vmem:[%s9535_s8 + $0xc0] sm:$0xff] }
 0x302   : > { %5318 = vmatprep.subr.bf16.mxu0 %v6184_v7  ;;  %5426 = vset.pattern.permute.xlu1 %v9789_v45  ;;  %v1386_v7 = vmul.f32 0.6931472, %v5530_v30  ;;  %v2064_v30 = vld [vmem:[%s9535_s8 + $0x40] sm:$0xff] }
 0x303   : > { %5433 = vset.pattern.permute.xlu0 %v9792_v60  ;;  %4883 = vmatmul.mubr.msk.f32.gmra.mrb[26].mxu1 %vm1197_vm11, %v6395_v10  ;;  %v5532_v35 = vpop.eup %5531  ;;  %v2084_v40 = vld [vmem:[%s9535_s8 + $0xe0] sm:$0xff] }
 0x304   : > { %4891 = vmatmul.mubr.msk.f32.gmra.mrb[26].mxu0 %vm1197_vm11, %v6395_v10  ;;  %3872 = vperm.xlu1 %5426, %v6293_v39  }
 0x305   : > { %5320 = vmatpush1.bf16.msra.mxu0 %v6195_v20  ;;  %4304 = vperm.xlu0 %5433, %v6300_v47   ;;  %v6423_v20 = vadd.f32 %v1386_v7, %v1332_v11  ;;  %v2067_v11 = vld [vmem:[%s9535_s8 + $0x58] sm:$0xff] }
 0x306   : > { %1660 = vmatprep.mubr.f32.mxu1 %v9790_v50  ;;  %1773 = vmatprep.mubr.f32.mxu0 %v9790_v50 }
 0x307   : > { %5306 = vmatprep.subr.bf16.mxu1 %v6209_v41  ;;  %4884 = vmatmul.mubr.msk.f32.gmra.mrb[28].mxu1 %vm1197_vm11, %v6408_v23  ;;  %v1388_v41 = vmul.f32 0.6931472, %v5532_v35  ;;  %v1800_v35 = vmul.f32 %v6382_v34, %v6087_v5  ;;  %v2070_v34 = vld [vmem:[%s9535_s8 + $0x70] sm:$0xff] }
 0x308   : > { %4892 = vmatmul.mubr.msk.f32.gmra.mrb[28].mxu0 %vm1197_vm11, %v6408_v23  ;;  %5308 = vmatpush1.bf16.msra.mxu1 %v6222_v26  ;;  %v5534_v26 = vpop.eup %5533 }
 0x309   : > { %5427 = vset.pattern.permute.xlu1 %v9791_v51  ;;  %5436 = vset.pattern.permute.xlu0 %v5665_v17  ;;  %v6438_v59 = vadd.f32 %v1388_v41, %v1333_v19  ;;  %v2071_v41 = vld [vmem:[%s9535_s8 + $0x78] sm:$0xff] }
 0x30a   : > { %4004 = vperm.xlu1 %5427, %v6293_v39   ;;  %4128 = vperm.xlu0 %5436, %v6300_v47   ;;  %v5349_v19 = vpack.c.bf16 %v2071_v41, %v2067_v11 }
 0x30b   : > { %1666 = vmatprep.mubr.f32.mxu1 %v9790_v50  ;;  %1779 = vmatprep.mubr.f32.mxu0 %v9790_v50 }
 0x30c   : > { %5322 = vmatprep.subr.bf16.mxu0 %v6220_v46  ;;  %4885 = vmatmul.mubr.msk.f32.gmra.mrb[30].mxu1 %vm1197_vm11, %v6423_v20  ;;  %v1390_v46 = vmul.f32 0.6931472, %v5534_v26  ;;  %v2066_v26 = vld [vmem:[%s9535_s8 + $0x50] sm:$0xff] }
 0x30d   : > { %4893 = vmatmul.mubr.msk.f32.gmra.mrb[30].mxu0 %vm1197_vm11, %v6423_v20  ;;  %1672 = vmatprep.mubr.f32.mxu1 %v9790_v50 }
 0x30e   : > { %5324 = vmatpush1.bf16.msra.mxu0 %v6231_v13  ;;  %5428 = vset.pattern.permute.xlu1 %v5665_v17  ;;  %v2057_v13 = vld [vmem:[%s9535_s8 + $0x8] sm:$0xff] }
 0x30f   : > { %5437 = vset.pattern.permute.xlu0 %v5666_v33  ;;  %4132 = vperm.xlu1 %5428, %v6293_v39   ;;  %v5329_v0 = vpack.c.bf16 %v2061_v12, %v2057_v13  ;;  %v1801_v13 = vmul.f32 %v6395_v10, %v6102_v44  ;;  %v5351_v12 = vpack.c.bf16 %v2070_v34, %v2066_v26  ;;  %v2075_v10 = vld [vmem:[%s9535_s8 + $0x98] sm:$0xff] }
 0x310   : > { %4256 = vperm.xlu0 %5437, %v6300_v47   ;;  %1785 = vmatprep.mubr.f32.mxu0 %v9790_v50 }
 0x311   : > { %5310 = vmatprep.subr.bf16.mxu1 %v6245_v2  ;;  %4886 = vmatmul.mubr.msk.f32.gmra.mrb[32].mxu1 %vm1197_vm11, %v6438_v59  ;;  %v6459_v2 = vadd.f32 %v1390_v46, %v1334_v62  ;;  %v2073_v46 = vld [vmem:[%s9535_s8 + $0x88] sm:$0xff] }
 0x312   : > { %4894 = vmatmul.mubr.msk.f32.gmra.mrb[32].mxu0 %vm1197_vm11, %v6438_v59  ;;  %5312 = vmatpush1.bf16.msra.mxu1 %v6256_v18  ;;  %v2056_v18 = vld [vmem:[%s9535_s8] sm:$0xff]  ;;  %v2077_v62 = vld [vmem:[%s9535_s8 + $0xa8] sm:$0xff] }
 0x313   : > { %5429 = vset.pattern.permute.xlu1 %v5666_v33  ;;  %1678 = vmatprep.mubr.f32.mxu1 %v9790_v50  ;;  %v5331_v21 = vpack.c.bf16 %v2060_v48, %v2056_v18  ;;  %v2072_v18 = vld [vmem:[%s9535_s8 + $0x80] sm:$0xff]  ;;  %v1805_v11 = vmul.f32 %v6459_v2, %v6128_v24 }
 0x314   : > { %5440 = vset.pattern.permute.xlu0 %v5662_v43  ;;  %1791 = vmatprep.mubr.f32.mxu0 %v9790_v50  ;;  %v2076_v48 = vld [vmem:[%s9535_s8 + $0xa0] sm:$0xff] }
 0x315   : > { %5326 = vmatprep.subr.bf16.mxu0 %v6258_v14  ;;  %4260 = vperm.xlu1 %5429, %v6293_v39   ;;  %v2063_v14 = vld [vmem:[%s9535_s8 + $0x38] sm:$0xff]  ;;  %v1798_v39 = vmul.f32 %v6356_v9, %v6081_v52 }
 0x316   : > { %4188 = vperm.xlu0 %5440, %v6312_v42   ;;  %4887 = vmatmul.mubr.msk.f32.gmra.mrb[34].mxu1 %vm1197_vm11, %v6459_v2  ;;  %v5345_v9 = vpack.c.bf16 %v2063_v14, %v2059_v28  ;;  %v5339_v28 = vpack.c.bf16 %v2076_v48, %v2072_v18  ;;  %v1802_v14 = vmul.f32 %v6408_v23, %v6105_v53  ;;  %v2081_v23 = vld [vmem:[%s9535_s8 + $0xc8] sm:$0xff] }
 0x317   : > { %4895 = vmatmul.mubr.msk.f32.gmra.mrb[34].mxu0 %vm1197_vm11, %v6459_v2  ;;  %1894 = vmatprep.mubr.f32.mxu1 %v9790_v50 }
 0x318   : > { %5328 = vmatpush1.bf16.msra.mxu0 %v6267_v54  ;;  %2007 = vmatprep.mubr.f32.mxu0 %v9790_v50  ;;  %v1799_v54 = vmul.f32 %v6367_v25, %v6084_v61  ;;  %v2068_v25 = vld [vmem:[%s9535_s8 + $0x60] sm:$0xff] }
 0x319   : > { %5330 = vmatprep.subr.bf16.mxu1 %v5329_v0  ;;  %5430 = vset.pattern.permute.xlu1 %v5659_v56  ;;  %v5335_v7 = vpack.c.bf16 %v2068_v25, %v2064_v30  ;;  %v5337_v0 = vpack.c.bf16 %v2077_v62, %v2073_v46  ;;  %v1804_v25 = vmul.f32 %v6438_v59, %v6118_v27  ;;  %v2086_v59 = vld [vmem:[%s9535_s8 + $0xf0] sm:$0xff] }
 0x31a   : > { %5442 = vset.pattern.permute.xlu0 %v9789_v45  ;;  %4896 = vmatmul.mubr.msk.f32.vlgmr.msra.gmra.mrb[36].mxu1 %vm1197_vm11, %v1798_v39 }
 0x31b   : > { %4904 = vmatmul.mubr.msk.f32.vlgmr.msra.gmra.mrb[36].mxu0 %vm1197_vm11, %v1798_v39  ;;  %5332 = vmatpush1.bf16.msra.mxu1 %v5331_v21  ;;  %v2079_v21 = vld [vmem:[%s9535_s8 + $0xb8] sm:$0xff] }
 0x31c   : > { %3920 = vperm.xlu1 %5430, %v6300_v47   ;;  %3882 = vperm.xlu0 %5442, %v6312_v42   ;;  %v5353_v39 = vpack.c.bf16 %v2079_v21, %v2075_v10 }
 0x31d   : > { %1900 = vmatprep.mubr.f32.mxu1 %v9790_v50  ;;  %2013 = vmatprep.mubr.f32.mxu0 %v9790_v50 }
 0x31e   : > { %5346 = vmatprep.subr.bf16.mxu0 %v5345_v9  ;;  %4897 = vmatmul.mubr.msk.f32.gmra.mrb[38].mxu1 %vm1197_vm11, %v1799_v54  ;;  %v2085_v9 = vld [vmem:[%s9535_s8 + $0xe8] sm:$0xff] }
 0x31f   : > { %4905 = vmatmul.mubr.msk.f32.gmra.mrb[38].mxu0 %vm1197_vm11, %v1799_v54  ;;  %1906 = vmatprep.mubr.f32.mxu1 %v9790_v50  ;;  %v1803_v54 = vmul.f32 %v6423_v20, %v6116_v4  ;;  %v5341_v30 = vpack.c.bf16 %v2085_v9, %v2081_v23  ;;  %v5343_v20 = vpack.c.bf16 %v2084_v40, %v2080_v29 }
 0x320   : > { %5348 = vmatpush1.bf16.msra.mxu0 %v5347_v63  ;;  %5431 = vset.pattern.permute.xlu1 %v5658_v55  ;;  %v5355_v63 = vpack.c.bf16 %v2078_v6, %v2074_v32 }
 0x321   : > { %5444 = vset.pattern.permute.xlu0 %v5665_v17  ;;  %4048 = vperm.xlu1 %5431, %v6300_v47  }
 0x322   : > { %4140 = vperm.xlu0 %5444, %v6312_v42   ;;  %2019 = vmatprep.mubr.f32.mxu0 %v9790_v50 }
 0x323   : > { %5334 = vmatprep.subr.bf16.mxu1 %v5333_v36  ;;  %4898 = vmatmul.mubr.msk.f32.gmra.mrb[40].mxu1 %vm1197_vm11, %v1800_v35  ;;  %v2083_v36 = vld [vmem:[%s9535_s8 + $0xd8] sm:$0xff] }
 0x324   : > { %4906 = vmatmul.mubr.msk.f32.gmra.mrb[40].mxu0 %vm1197_vm11, %v1800_v35  ;;  %5336 = vmatpush1.bf16.msra.mxu1 %v5335_v7  ;;  %v2087_v7 = vld [vmem:[%s9535_s8 + $0xf8] sm:$0xff] }
 0x325   : > { %5432 = vset.pattern.permute.xlu1 %v5662_v43  ;;  %1912 = vmatprep.mubr.f32.mxu1 %v9790_v50  ;;  %v5357_v35 = vpack.c.bf16 %v2087_v7, %v2083_v36 }
 0x326   : > { %5446 = vset.pattern.permute.xlu0 %v5659_v56  ;;  %4176 = vperm.xlu1 %5432, %v6300_v47  }
 0x327   : > { %3928 = vperm.xlu0 %5446, %v6317_v38   ;;  %2025 = vmatprep.mubr.f32.mxu0 %v9790_v50 }
 0x328   : > { %5350 = vmatprep.subr.bf16.mxu0 %v5349_v19  ;;  %4899 = vmatmul.mubr.msk.f32.gmra.mrb[42].mxu1 %vm1197_vm11, %v1801_v13 }
 0x329   : > { %4907 = vmatmul.mubr.msk.f32.gmra.mrb[42].mxu0 %vm1197_vm11, %v1801_v13  ;;  %1918 = vmatprep.mubr.f32.mxu1 %v9790_v50 }
 0x32a   : > { %5352 = vmatpush1.bf16.msra.mxu0 %v5351_v12  ;;  %5434 = vset.pattern.permute.xlu1 %v9789_v45 }
 0x32b   : > { %5447 = vset.pattern.permute.xlu0 %v5658_v55  ;;  %2031 = vmatprep.mubr.f32.mxu0 %v9790_v50 }
 0x32c   : > { %5338 = vmatprep.subr.bf16.mxu1 %v5337_v0  ;;  %3867 = vperm.xlu1 %5434, %v6300_v47  }
 0x32d   : > { %4056 = vperm.xlu0 %5447, %v6317_v38   ;;  %4900 = vmatmul.mubr.msk.f32.gmra.mrb[44].mxu1 %vm1197_vm11, %v1802_v14 }
 0x32e   : > { %4908 = vmatmul.mubr.msk.f32.gmra.mrb[44].mxu0 %vm1197_vm11, %v1802_v14  ;;  %5340 = vmatpush1.bf16.msra.mxu1 %v5339_v28 }
 0x32f   : > { %1924 = vmatprep.mubr.f32.mxu1 %v9790_v50  ;;  %2037 = vmatprep.mubr.f32.mxu0 %v9790_v50 }
 0x330   : > { %5354 = vmatprep.subr.bf16.mxu0 %v5353_v39  ;;  %5435 = vset.pattern.permute.xlu1 %v9791_v51 }
 0x331   : > { %5449 = vset.pattern.permute.xlu0 %v9792_v60  ;;  %4901 = vmatmul.mubr.msk.f32.gmra.mrb[46].mxu1 %vm1197_vm11, %v1803_v54 }
 0x332   : > { %4909 = vmatmul.mubr.msk.f32.gmra.mrb[46].mxu0 %vm1197_vm11, %v1803_v54  ;;  %4000 = vperm.xlu1 %5435, %v6300_v47   ;;  %v2082_v47 = vld [vmem:[%s9535_s8 + $0xd0] sm:$0xff] }
 0x333   : > { %5356 = vmatpush1.bf16.msra.mxu0 %v5355_v63  ;;  %4312 = vperm.xlu0 %5449, %v6317_v38   ;;  %v5359_v41 = vpack.c.bf16 %v2086_v59, %v2082_v47 }
 0x334   : > { %1930 = vmatprep.mubr.f32.mxu1 %v9790_v50  ;;  %2043 = vmatprep.mubr.f32.mxu0 %v9790_v50 }
 0x335   : > { %5342 = vmatprep.subr.bf16.mxu1 %v5341_v30  ;;  %4902 = vmatmul.mubr.msk.f32.gmra.mrb[48].mxu1 %vm1197_vm11, %v1804_v25 }
 0x336   : > { %4910 = vmatmul.mubr.msk.f32.gmra.mrb[48].mxu0 %vm1197_vm11, %v1804_v25  ;;  %5344 = vmatpush1.bf16.msra.mxu1 %v5343_v20 }
 0x337   : > { %5438 = vset.pattern.permute.xlu1 %v5659_v56  ;;  %5450 = vset.pattern.permute.xlu0 %v9789_v45 }
 0x338   : > { %3932 = vperm.xlu1 %5438, %v6312_v42   ;;  %3877 = vperm.xlu0 %5450, %v6317_v38  }
 0x339   : > { %1936 = vmatprep.mubr.f32.mxu1 %v9790_v50  ;;  %2049 = vmatprep.mubr.f32.mxu0 %v9790_v50 }
 0x33a   : > { %5358 = vmatprep.subr.bf16.mxu0 %v5357_v35  ;;  %4903 = vmatmul.mubr.msk.f32.gmra.mrb[50].mxu1 %vm1197_vm11, %v1805_v11 }
 0x33b   : > { %4911 = vmatmul.mubr.msk.f32.gmra.mrb[50].mxu0 %vm1197_vm11, %v1805_v11  ;;  %2152 = vmatprep.mubr.f32.mxu1 %v9790_v50 }
 0x33c   : > { %5360 = vmatpush1.bf16.msra.mxu0 %v5359_v41  ;;  %5439 = vset.pattern.permute.xlu1 %v5658_v55 }
 0x33d   : > { %5453 = vset.pattern.permute.xlu0 %v5666_v33  ;;  %4060 = vperm.xlu1 %5439, %v6312_v42  }
 0x33e   : > { %4264 = vperm.xlu0 %5453, %v6317_v38   ;;  %2265 = vmatprep.mubr.f32.mxu0 %v9790_v50 }
 0x33f   : > { %4912 = vmatmul.mubr.msk.f32.vlgmr.msra.gmra.mrb[52].mxu1 %vm1197_vm11, %v6081_v52  ;;  %4920 = vmatmul.mubr.msk.f32.vlgmr.msra.gmra.mrb[52].mxu0 %vm1197_vm11, %v6081_v52 }
 0x340   : > { %2158 = vmatprep.mubr.f32.mxu1 %v9790_v50  ;;  %2271 = vmatprep.mubr.f32.mxu0 %v9790_v50 }
 0x341   : > { %5441 = vset.pattern.permute.xlu1 %v9792_v60 }
 0x342   : > { %5454 = vset.pattern.permute.xlu0 %v5659_v56  ;;  %4316 = vperm.xlu1 %5441, %v6312_v42  }
 0x343   : > { %3940 = vperm.xlu0 %5454, %v6325_v15   ;;  %4913 = vmatmul.mubr.msk.f32.gmra.mrb[54].mxu1 %vm1197_vm11, %v6084_v61 }
 0x344   : > { %4921 = vmatmul.mubr.msk.f32.gmra.mrb[54].mxu0 %vm1197_vm11, %v6084_v61  ;;  %2164 = vmatprep.mubr.f32.mxu1 %v9790_v50 }
 0x345   : > { %2277 = vmatprep.mubr.f32.mxu0 %v9790_v50 }
 0x346   : > { %5443 = vset.pattern.permute.xlu1 %v9791_v51 }
 0x347   : > { %5458 = vset.pattern.permute.xlu0 %v9789_v45  ;;  %4914 = vmatmul.mubr.msk.f32.gmra.mrb[56].mxu1 %vm1197_vm11, %v6087_v5 }
 0x348   : > { %4922 = vmatmul.mubr.msk.f32.gmra.mrb[56].mxu0 %vm1197_vm11, %v6087_v5  ;;  %4012 = vperm.xlu1 %5443, %v6312_v42  }
 0x349   : > { %3892 = vperm.xlu0 %5458, %v6325_v15   ;;  %2170 = vmatprep.mubr.f32.mxu1 %v9790_v50 }
 0x34a   : > { %2283 = vmatprep.mubr.f32.mxu0 %v9790_v50 }
 0x34b   : > { %4915 = vmatmul.mubr.msk.f32.gmra.mrb[58].mxu1 %vm1197_vm11, %v6102_v44 }
 0x34c   : > { %4923 = vmatmul.mubr.msk.f32.gmra.mrb[58].mxu0 %vm1197_vm11, %v6102_v44  ;;  %5445 = vset.pattern.permute.xlu1 %v5666_v33 }
 0x34d   : > { %5465 = vset.pattern.permute.xlu0 %v9792_v60  ;;  %4268 = vperm.xlu1 %5445, %v6312_v42  }
 0x34e   : > { %4320 = vperm.xlu0 %5465, %v6330_v3   ;;  %2176 = vmatprep.mubr.f32.mxu1 %v9790_v50 }
 0x34f   : > { %2289 = vmatprep.mubr.f32.mxu0 %v9790_v50  ;;  %4916 = vmatmul.mubr.msk.f32.gmra.mrb[60].mxu1 %vm1197_vm11, %v6105_v53 }
 0x350   : > { %4924 = vmatmul.mubr.msk.f32.gmra.mrb[60].mxu0 %vm1197_vm11, %v6105_v53  ;;  %2182 = vmatprep.mubr.f32.mxu1 %v9790_v50 }
 0x351   : > { %5448 = vset.pattern.permute.xlu1 %v5662_v43  ;;  %2295 = vmatprep.mubr.f32.mxu0 %v9790_v50 }
 0x352   : > { %5468 = vset.pattern.permute.xlu0 %v5665_v17  ;;  %4184 = vperm.xlu1 %5448, %v6317_v38  }
 0x353   : > { %4144 = vperm.xlu0 %5468, %v6330_v3   ;;  %4917 = vmatmul.mubr.msk.f32.gmra.mrb[62].mxu1 %vm1197_vm11, %v6116_v4 }
 0x354   : > { %4925 = vmatmul.mubr.msk.f32.gmra.mrb[62].mxu0 %vm1197_vm11, %v6116_v4  ;;  %2188 = vmatprep.mubr.f32.mxu1 %v9790_v50 }
 0x355   : > { %2301 = vmatprep.mubr.f32.mxu0 %v9790_v50 }
 0x356   : > { %5451 = vset.pattern.permute.xlu1 %v9791_v51 }
 0x357   : > { %4008 = vperm.xlu1 %5451, %v6317_v38   ;;  %4918 = vmatmul.mubr.msk.f32.gmra.mrb[64].mxu1 %vm1197_vm11, %v6118_v27 }
 0x358   : > { %4926 = vmatmul.mubr.msk.f32.gmra.mrb[64].mxu0 %vm1197_vm11, %v6118_v27  ;;  %2194 = vmatprep.mubr.f32.mxu1 %v9790_v50 }
 0x359   : > { %2307 = vmatprep.mubr.f32.mxu0 %v9790_v50  ;;  %5470 = vset.pattern.permute.xlu0 %v9792_v60 }
 0x35b   : > { %5452 = vset.pattern.permute.xlu1 %v5665_v17  ;;  %4919 = vmatmul.mubr.msk.f32.gmra.mrb[66].mxu1 %vm1197_vm11, %v6128_v24 }
 0x35c   : > { %4927 = vmatmul.mubr.msk.f32.gmra.mrb[66].mxu0 %vm1197_vm11, %v6128_v24  ;;  %4136 = vperm.xlu1 %5452, %v6317_v38   ;;  %v9793_v38 = vsub.s32 0, %v5868_v58 }
 0x360   : > { %5455 = vset.pattern.permute.xlu1 %v5658_v55 }
 0x361   : > { %4068 = vperm.xlu1 %5455, %v6325_v15  }
 0x365   : > { %5456 = vset.pattern.permute.xlu1 %v5662_v43 }
 0x366   : > { %4196 = vperm.xlu1 %5456, %v6325_v15  }
 0x36a   : > { %5457 = vset.pattern.permute.xlu1 %v9792_v60 }
 0x36b   : > { %4324 = vperm.xlu1 %5457, %v6325_v15  }
 0x36f   : > { %5459 = vset.pattern.permute.xlu1 %v9791_v51 }
 0x370   : > { %4020 = vperm.xlu1 %5459, %v6325_v15  }
 0x374   : > { %5460 = vset.pattern.permute.xlu1 %v5665_v17  ;;  %v9794_v17 = vsub.s32 2, %v5868_v58 }
 0x375   : > { %4148 = vperm.xlu1 %5460, %v6325_v15  }
 0x379   : > { %5461 = vset.pattern.permute.xlu1 %v5666_v33 }
 0x37a   : > { %4276 = vperm.xlu1 %5461, %v6325_v15  }
 0x37e   : > { %5462 = vset.pattern.permute.xlu1 %v5659_v56 }
 0x37f   : > { %3936 = vperm.xlu1 %5462, %v6330_v3  }
 0x383   : > { %5463 = vset.pattern.permute.xlu1 %v5658_v55  ;;  %v1512_v55 = vld [vmem:[%s9538_s11] sm:$0xf] }
 0x384   : > { %4064 = vperm.xlu1 %5463, %v6330_v3   ;;  %v1513_v56 = vmul.f32 1.442695, %v1512_v55 }
 0x386   : > { %5535 = vpow2.f32 %v1513_v56 }
 0x388   : > { %5464 = vset.pattern.permute.xlu1 %v5662_v43 }
 0x389   : > { %4192 = vperm.xlu1 %5464, %v6330_v3  }
 0x38d   : > { %5466 = vset.pattern.permute.xlu1 %v9789_v45 }
 0x38e   : > { %3887 = vperm.xlu1 %5466, %v6330_v3  }
 0x390   : > { %v5536_v43 = vpop.eup %5535 }
 0x391   : > { %v1515_v42 = vsub.f32 0.0, %v5536_v43 }
 0x392   : > { %5467 = vset.pattern.permute.xlu1 %v9791_v51 }
 0x393   : > { %4016 = vperm.xlu1 %5467, %v6330_v3   ;;  %v6735_v15 = vrot.slane %v1515_v42, %v9793_v38  ;;  %v6739_v45 = vrot.slane %v1515_v42, %v9794_v17 }
 0x397   : > { %5469 = vset.pattern.permute.xlu1 %v5666_v33  ;;  %v9795_v33 = vsub.s32 1, %v5868_v58 }
 0x398   : > { %4272 = vperm.xlu1 %5469, %v6330_v3   ;;  %v9796_v3 = vsub.s32 3, %v5868_v58 }
 0x399   : > { %v6743_v50 = vrot.slane %v1515_v42, %v9795_v33 }
 0x39a   : > { %v6747_v51 = vrot.slane %v1515_v42, %v9796_v3 }
 0x3c9   : > { %v1638_v60 = vpop.f32.mrb[20].mxu1  ;;  %v1751_v2 = vpop.f32.mrb[20].mxu0 }
 0x3ca   : > { %v2335_v26 = vmul.f32 %v6735_v15, %v1638_v60  ;;  %v2337_v34 = vmul.f32 %v6739_v45, %v1751_v2  ;;  %v1640_v19 = vpop.f32.mrb[21].mxu1  ;;  %v1753_v46 = vpop.f32.mrb[21].mxu0 }
 0x3cb   : > { %v2336_v62 = vmul.f32 %v6743_v50, %v1640_v19  ;;  %v2338_v13 = vmul.f32 %v6747_v51, %v1753_v46 }
 0x3cc   : > { %v2367_v12 = vmul.f32 1.442695, %v2335_v26  ;;  %v2371_v18 = vmul.f32 1.442695, %v2337_v34 }
 0x3cd   : > { %v2369_v48 = vmul.f32 1.442695, %v2336_v62  ;;  %v2373_v0 = vmul.f32 1.442695, %v2338_v13  ;;  %v1644_v10 = vpop.f32.mrb[22].mxu1 }
 0x3ce   : > { %5537 = vpow2.f32 %v2367_v12  ;;  %v2339_v21 = vmul.f32 %v6735_v15, %v1644_v10  ;;  %v1757_v28 = vpop.f32.mrb[22].mxu0  ;;  %v1646_v14 = vpop.f32.mrb[23].mxu1 }
 0x3cf   : > { %5539 = vpow2.f32 %v2371_v18  ;;  %v2341_v39 = vmul.f32 %v6739_v45, %v1757_v28  ;;  %v2340_v32 = vmul.f32 %v6743_v50, %v1646_v14  ;;  %v1759_v6 = vpop.f32.mrb[23].mxu0 }
 0x3d0   : > { %5541 = vpow2.f32 %v2369_v48  ;;  %v2375_v23 = vmul.f32 1.442695, %v2339_v21  ;;  %v2342_v9 = vmul.f32 %v6747_v51, %v1759_v6 }
 0x3d1   : > { %5543 = vpow2.f32 %v2373_v0  ;;  %v2379_v54 = vmul.f32 1.442695, %v2341_v39  ;;  %v2377_v63 = vmul.f32 1.442695, %v2340_v32 }
 0x3d2   : > { %5545 = vpow2.f32 %v2375_v23  ;;  %v2381_v29 = vmul.f32 1.442695, %v2342_v9  ;;  %v1650_v40 = vpop.f32.mrb[24].mxu1 }
 0x3d3   : > { %5547 = vpow2.f32 %v2379_v54  ;;  %v2343_v30 = vmul.f32 %v6735_v15, %v1650_v40  ;;  %v1763_v20 = vpop.f32.mrb[24].mxu0  ;;  %v1652_v25 = vpop.f32.mrb[25].mxu1 }
 0x3d4   : > { %5549 = vpow2.f32 %v2377_v63  ;;  %v2345_v36 = vmul.f32 %v6739_v45, %v1763_v20  ;;  %v2344_v7 = vmul.f32 %v6743_v50, %v1652_v25  ;;  %v1765_v47 = vpop.f32.mrb[25].mxu0 }
 0x3d5   : > { %v2383_v59 = vmul.f32 1.442695, %v2343_v30  ;;  %v2346_v35 = vmul.f32 %v6747_v51, %v1765_v47  ;;  %5551 = vpow2.f32 %v2381_v29 }
 0x3d6   : > { %v2387_v11 = vmul.f32 1.442695, %v2345_v36  ;;  %v2385_v41 = vmul.f32 1.442695, %v2344_v7  ;;  %v1656_v55 = vpop.f32.mrb[26].mxu1 }
 0x3d7   : > { %5553 = vpow2.f32 %v2383_v59  ;;  %v2389_v56 = vmul.f32 1.442695, %v2346_v35  ;;  %v2347_v43 = vmul.f32 %v6735_v15, %v1656_v55  ;;  %v1769_v42 = vpop.f32.mrb[26].mxu0  ;;  %v1658_v38 = vpop.f32.mrb[27].mxu1 }
 0x3d8   : > { %v6762_v17 = vpop.eup %5537  ;;  %5555 = vpow2.f32 %v2387_v11  ;;  %v2349_v33 = vmul.f32 %v6739_v45, %v1769_v42  ;;  %v2348_v3 = vmul.f32 %v6743_v50, %v1658_v38  ;;  %v1771_v60 = vpop.f32.mrb[27].mxu0 }
 0x3d9   : > { %9797 = vst [vmem:[#allocation18_spill] sm:$0xff] %v6762_v17  ;;  %v6766_v2 = vpop.eup %5539  ;;  %5557 = vpow2.f32 %v2385_v41  ;;  %v2391_v26 = vmul.f32 1.442695, %v2347_v43  ;;  %v2350_v34 = vmul.f32 %v6747_v51, %v1771_v60  ;;  %v9556_v12 = vrot.slane %v6762_v17, 7 }
 0x3da   : > { %9798 = vst [vmem:[#allocation19_spill] sm:$0xff] %v6766_v2  ;;  %v6769_v19 = vpop.eup %5541  ;;  %5559 = vpow2.f32 %v2389_v56  ;;  %v2395_v46 = vmul.f32 1.442695, %v2349_v33  ;;  %v2393_v62 = vmul.f32 1.442695, %v2348_v3  ;;  %v1662_v13 = vpop.f32.mrb[28].mxu1 }
 0x3db   : > { %9799 = vst [vmem:[#allocation20_spill] sm:$0xff] %v6769_v19  ;;  %v6772_v18 = vpop.eup %5543  ;;  %5561 = vpow2.f32 %v2391_v26  ;;  %v2397_v48 = vmul.f32 1.442695, %v2350_v34  ;;  %v2351_v0 = vmul.f32 %v6735_v15, %v1662_v13  ;;  %v1775_v10 = vpop.f32.mrb[28].mxu0  ;;  %v9555_v21 = vrot.slane %v6766_v2, 7 }
 0x3dc   : > { %9800 = vst [vmem:[#allocation21_spill] sm:$0xff] %v6772_v18  ;;  %v6776_v28 = vpop.eup %5545  ;;  %5563 = vpow2.f32 %v2395_v46  ;;  %v2353_v14 = vmul.f32 %v6739_v45, %v1775_v10  ;;  %v1664_v39 = vpop.f32.mrb[29].mxu1  ;;  %v9557_v6 = vrot.slane %v6769_v19, 7 }
 0x3dd   : > { %v1777_v32 = vpop.f32.mrb[29].mxu0  ;;  %v6781_v9 = vpop.eup %5547  ;;  %5565 = vpow2.f32 %v2393_v62  ;;  %v2399_v54 = vmul.f32 1.442695, %v2351_v0  ;;  %v2352_v63 = vmul.f32 %v6743_v50, %v1664_v39  ;;  %v2467_v20 = vrot.slane %v6776_v28, 7 }
 0x3de   : > { %v2354_v29 = vmul.f32 %v6747_v51, %v1777_v32  ;;  %v6785_v40 = vpop.eup %5549  ;;  %5567 = vpow2.f32 %v2397_v48  ;;  %v2403_v30 = vmul.f32 1.442695, %v2353_v14  ;;  %v2469_v25 = vrot.slane %v6781_v9, 7 }
 0x3df   : > { %5569 = vpow2.f32 %v2399_v54  ;;  %v2401_v36 = vmul.f32 1.442695, %v2352_v63  ;;  %v1668_v47 = vpop.f32.mrb[30].mxu1  ;;  %v9562_v59 = vrot.slane %v6785_v40, 7  ;;  %v6790_v35 = vpop.eup %5551  ;;  %v2519_v55 = vsel %vm1050_vm7, %v9556_v12, %v2467_v20 }
 0x3e0   : > { %v2405_v7 = vmul.f32 1.442695, %v2354_v29  ;;  %5571 = vpow2.f32 %v2403_v30  ;;  %v2355_v11 = vmul.f32 %v6735_v15, %v1668_v47  ;;  %v1781_v41 = vpop.f32.mrb[30].mxu0  ;;  %v2521_v56 = vsel %vm1050_vm7, %v9555_v21, %v2469_v25  ;;  %v1670_v38 = vpop.f32.mrb[31].mxu1 }
 0x3e1   : > { %v6801_v43 = vpop.eup %5553  ;;  %5573 = vpow2.f32 %v2401_v36  ;;  %v2357_v42 = vmul.f32 %v6739_v45, %v1781_v41  ;;  %v1783_v33 = vpop.f32.mrb[31].mxu0  ;;  %v6805_v3 = vmul.f32 %v6776_v28, %v2519_v55  ;;  %v6808_v60 = vmul.f32 %v6781_v9, %v2521_v56 }
 0x3e2   : > { %v6810_v26 = vpop.eup %5555  ;;  %5575 = vpow2.f32 %v2405_v7  ;;  %v2407_v34 = vmul.f32 1.442695, %v2355_v11  ;;  %v2356_v46 = vmul.f32 %v6743_v50, %v1670_v38  ;;  %v2358_v62 = vmul.f32 %v6747_v51, %v1783_v33 }
 0x3e3   : > { %9801 = vst [vmem:[#allocation22_spill] sm:$0xff] %v6805_v3  ;;  %9802 = vst [vmem:[#allocation23_spill] sm:$0xff] %v6808_v60  ;;  %v6814_v13 = vpop.eup %5557  ;;  %v2411_v48 = vmul.f32 1.442695, %v2357_v42  ;;  %v9559_v0 = vrot.slane %v6801_v43, 7  ;;  %v9560_v10 = vrot.slane %v6805_v3, 6 }
 0x3e4   : > { %v9558_v14 = vrot.slane %v6810_v26, 7  ;;  %v6819_v39 = vpop.eup %5559  ;;  %5577 = vpow2.f32 %v2407_v34  ;;  %v2409_v32 = vmul.f32 1.442695, %v2356_v46  ;;  %v2413_v54 = vmul.f32 1.442695, %v2358_v62  ;;  %v1674_v63 = vpop.f32.mrb[32].mxu1 }
 0x3e5   : > { %9803 = vst [vmem:[#allocation24_spill] sm:$0xff] %v6819_v39  ;;  %v9563_v29 = vrot.slane %v6808_v60, 6  ;;  %v6822_v30 = vpop.eup %5561  ;;  %5579 = vpow2.f32 %v2411_v48  ;;  %v2359_v36 = vmul.f32 %v6735_v15, %v1674_v63  ;;  %v1787_v7 = vpop.f32.mrb[32].mxu0  ;;  %v2515_v47 = vsel %vm1050_vm7, %v2467_v20, %v9559_v0 }
 0x3e6   : > { %9804 = vst [vmem:[#allocation25_spill] sm:$0xff] %v6822_v30  ;;  %v2517_v11 = vsel %vm1050_vm7, %v2469_v25, %v9558_v14  ;;  %v6833_v41 = vpop.eup %5563  ;;  %5581 = vpow2.f32 %v2409_v32  ;;  %v2361_v55 = vmul.f32 %v6739_v45, %v1787_v7  ;;  %v1676_v56 = vpop.f32.mrb[33].mxu1  ;;  %v6837_v38 = vmul.f32 %v6801_v43, %v2515_v47 }
 0x3e7   : > { %9805 = vst [vmem:[#allocation26_spill] sm:$0xff] %v6833_v41  ;;  %v1789_v42 = vpop.f32.mrb[33].mxu0  ;;  %v6840_v33 = vmul.f32 %v6810_v26, %v2517_v11  ;;  %v6842_v34 = vpop.eup %5565  ;;  %5583 = vpow2.f32 %v2413_v54  ;;  %v2415_v20 = vmul.f32 1.442695, %v2359_v36  ;;  %v2360_v46 = vmul.f32 %v6743_v50, %v1676_v56 }
 0x3e8   : > { %9806 = vst [vmem:[#allocation27_spill] sm:$0xff] %v6837_v38  ;;  %9808 = vst [vmem:[#allocation29_spill] sm:$0xff] %v6842_v34  ;;  %v2362_v25 = vmul.f32 %v6747_v51, %v1789_v42  ;;  %v6846_v62 = vpop.eup %5567  ;;  %v2419_v48 = vmul.f32 1.442695, %v2361_v55  ;;  %v9561_v32 = vrot.slane %v6837_v38, 6  ;;  %v9565_v7 = vrot.slane %v6814_v13, 7 }
 0x3e9   : > { %9807 = vst [vmem:[#allocation28_spill] sm:$0xff] %v6840_v33  ;;  %v9564_v63 = vrot.slane %v6840_v33, 6  ;;  %v6851_v47 = vpop.eup %5569  ;;  %5585 = vpow2.f32 %v2415_v20  ;;  %v2417_v11 = vmul.f32 1.442695, %v2360_v46  ;;  %v1680_v54 = vpop.f32.mrb[34].mxu1  ;;  %v2520_v36 = vsel %vm1050_vm7, %v9557_v6, %v9562_v59 }
 0x3ea   : > { %9809 = vst [vmem:[#allocation30_spill] sm:$0xff] %v6851_v47  ;;  %v2421_v21 = vmul.f32 1.442695, %v2362_v25  ;;  %v6859_v55 = vpop.eup %5571  ;;  %5587 = vpow2.f32 %v2419_v48  ;;  %v2363_v42 = vmul.f32 %v6735_v15, %v1680_v54  ;;  %v1793_v12 = vpop.f32.mrb[34].mxu0  ;;  %v2803_v20 = vsel %vm981_vm6, %v9560_v10, %v9561_v32 }
 0x3eb   : > { %9810 = vst [vmem:[#allocation31_spill] sm:$0xff] %v6859_v55  ;;  %v6869_v46 = vpop.eup %5573  ;;  %5589 = vpow2.f32 %v2417_v11  ;;  %v2365_v6 = vmul.f32 %v6739_v45, %v1793_v12  ;;  %v1682_v14 = vpop.f32.mrb[35].mxu1  ;;  %v6874_v48 = vmul.f32 %v2803_v20, %v6837_v38  ;;  %v6915_v45 = vmul.f32 %v6785_v40, %v2520_v36 }
 0x3ec   : > { %9811 = vst [vmem:[#allocation32_spill] sm:$0xff] %v6869_v46  ;;  %v1795_v0 = vpop.f32.mrb[35].mxu0  ;;  %v6876_v15 = vpop.eup %5575  ;;  %5591 = vpow2.f32 %v2421_v21  ;;  %v2423_v56 = vmul.f32 1.442695, %v2363_v42  ;;  %v2364_v10 = vmul.f32 %v6743_v50, %v1682_v14  ;;  %v2805_v50 = vsel %vm981_vm6, %v9563_v29, %v9564_v63 }
 0x3ed   : > { %9812 = vst [vmem:[#allocation33_spill] sm:$0xff] %v6874_v48  ;;  %9813 = vst [vmem:[#allocation34_spill] sm:$0xff] %v6876_v15  ;;  %v2427_v23 = vmul.f32 1.442695, %v2365_v6  ;;  %v2366_v11 = vmul.f32 %v6747_v51, %v1795_v0  ;;  %v6882_v25 = vpop.f32.mrb[36].mxu1  ;;  %v9815_v51 = vrot.slane %v6785_v40, 7 }
 0x3ee   : > { %v6885_v12 = vpop.eup %5577  ;;  %5593 = vpow2.f32 %v2423_v56  ;;  %v2425_v20 = vmul.f32 1.442695, %v2364_v10  ;;  %v6887_v59 = vpop.f32.mrb[36].mxu0  ;;  %v6909_v56 = vmul.f32 %v2805_v50, %v6840_v33  ;;  %9819 = vst [vmem:[#allocation39_spill] sm:$0xff] %v6915_v45  ;;  %v2470_v0 = vrot.slane %v6790_v35, 7 }
 0x3ef   : > { %9814 = vst [vmem:[#allocation35_spill] sm:$0xff] %v6885_v12  ;;  %v6889_v54 = vpop.f32.mrb[37].mxu1  ;;  %v2516_v21 = vsel %vm1050_vm7, %v9815_v51, %v9565_v7  ;;  %v6903_v6 = vpop.eup %5579  ;;  %5595 = vpow2.f32 %v2427_v23  ;;  %v2429_v10 = vmul.f32 1.442695, %v2366_v11  ;;  %v9822_v50 = vrot.slane %v6772_v18, 7 }
 0x3f0   : > { %9816 = vst [vmem:[#allocation36_spill] sm:$0xff] %v6903_v6  ;;  %v6906_v14 = vpop.f32.mrb[37].mxu0  ;;  %9817 = vst [vmem:[#allocation37_spill] sm:$0xff] %v6909_v56  ;;  %v6911_v42 = vpop.eup %5581  ;;  %5597 = vpow2.f32 %v2425_v20  ;;  %v6918_v51 = vmul.f32 %v6814_v13, %v2516_v21  ;;  %v2475_v29 = vrot.slane %v6822_v30, 7  ;;  %v2477_v27 = vrot.slane %v6833_v41, 7 }
 0x3f1   : > { %9818 = vst [vmem:[#allocation38_spill] sm:$0xff] %v6911_v42  ;;  %v6920_v32 = vpop.eup %5583  ;;  %5599 = vpow2.f32 %v2429_v10  ;;  %v6923_v11 = vpop.f32.mrb[38].mxu1  ;;  %v2522_v24 = vsel %vm1050_vm7, %v9822_v50, %v2470_v0  ;;  %v2476_v4 = vrot.slane %v6842_v34, 7  ;;  %v9825_v57 = vrot.slane %v6915_v45, 6 }
 0x3f2   : > { %9820 = vst [vmem:[#allocation40_spill] sm:$0xff] %v6920_v32  ;;  %v6928_v20 = vpop.f32.mrb[38].mxu0  ;;  %v6930_v36 = vpop.f32.mrb[39].mxu1  ;;  %v9824_v7 = vrot.slane %v6918_v51, 6  ;;  %v9826_v49 = vrot.slane %v6819_v39, 7  ;;  %v6960_v53 = vmul.f32 %v6790_v35, %v2522_v24  ;;  %v9838_v61 = vrot.slane %v6869_v46, 7 }
 0x3f3   : > { %v6935_v23 = vpop.eup %5585  ;;  %v6937_v10 = vpop.f32.mrb[39].mxu0  ;;  %v9846_v19 = vrot.slane %v6814_v13, 7 }
 0x3f4   : > { %9821 = vst [vmem:[#allocation41_spill] sm:$0xff] %v6935_v23  ;;  %v6946_v21 = vpop.eup %5587  ;;  %v2804_v44 = vsel %vm981_vm6, %v9825_v57, %v9824_v7  ;;  %v2518_v50 = vsel %vm1050_vm7, %v2470_v0, %v9826_v49  ;;  %9827 = vst [vmem:[#allocation43_spill] sm:$0xff] %v6960_v53  ;;  %v9830_v57 = vrot.slane %v6851_v47, 7 }
 0x3f5   : > { %9823 = vst [vmem:[#allocation42_spill] sm:$0xff] %v6946_v21  ;;  %v6962_v31 = vpop.eup %5589  ;;  %v6966_v63 = vmul.f32 %v2804_v44, %v6918_v51  ;;  %v6969_v37 = vmul.f32 %v6819_v39, %v2518_v50  ;;  %v9832_v44 = vrot.slane %v6801_v43, 7 }
 0x3f6   : > { %9828 = vst [vmem:[#allocation44_spill] sm:$0xff] %v6962_v31  ;;  %v2507_v7 = vsel %vm1050_vm7, %v2475_v29, %v9830_v57  ;;  %v6976_v49 = vpop.eup %5591  ;;  %v6979_v0 = vpop.f32.mrb[40].mxu1  ;;  %v9837_v57 = vrot.slane %v6810_v26, 7 }
 0x3f7   : > { %9829 = vst [vmem:[#allocation45_spill] sm:$0xff] %v6966_v63  ;;  %9831 = vst [vmem:[#allocation46_spill] sm:$0xff] %v6976_v49  ;;  %v2511_v50 = vsel %vm1050_vm7, %v9832_v44, %v2475_v29  ;;  %v6987_v16 = vmul.f32 %v6851_v47, %v2507_v7  ;;  %v6990_v22 = vpop.f32.mrb[40].mxu0  ;;  %v6992_v52 = vpop.f32.mrb[41].mxu1  ;;  %v9836_v7 = vrot.slane %v6859_v55, 7  ;;  %v9840_v60 = vrot.slane %v6969_v37, 6 }
 0x3f8   : > { %v6997_v5 = vmul.f32 %v6822_v30, %v2511_v50  ;;  %v6999_v1 = vpop.eup %5593  ;;  %v7001_v8 = vpop.f32.mrb[41].mxu0  ;;  %v2513_v24 = vsel %vm1050_vm7, %v9837_v57, %v2477_v27  ;;  %v2508_v50 = vsel %vm1050_vm7, %v2476_v4, %v9838_v61  ;;  %v9841_v29 = vrot.slane %v6960_v53, 6 }
 0x3f9   : > { %9833 = vst [vmem:[#allocation47_spill] sm:$0xff] %v6987_v16  ;;  %9835 = vst [vmem:[#allocation49_spill] sm:$0xff] %v6999_v1  ;;  %v2509_v44 = vsel %vm1050_vm7, %v2477_v27, %v9836_v7  ;;  %v7016_v45 = vpop.eup %5595  ;;  %v7026_v18 = vmul.f32 %v6833_v41, %v2513_v24  ;;  %v2512_v53 = vsel %vm1050_vm7, %v9846_v19, %v2476_v4  ;;  %v9848_v17 = vrot.slane %v6987_v16, 6 }
 0x3fa   : > { %9834 = vst [vmem:[#allocation48_spill] sm:$0xff] %v6997_v5  ;;  %9839 = vst [vmem:[#allocation50_spill] sm:$0xff] %v7016_v45  ;;  %v2806_v3 = vsel %vm981_vm6, %v9841_v29, %v9840_v60  ;;  %v2763_v7 = vrot.slane %v6997_v5, 6  ;;  %v7029_v27 = vmul.f32 %v6859_v55, %v2509_v44  ;;  %v7031_v57 = vpop.eup %5597  ;;  %v7041_v60 = vmul.f32 %v6869_v46, %v2508_v50 }
 0x3fb   : > { %9842 = vst [vmem:[#allocation51_spill] sm:$0xff] %v7026_v18  ;;  %9844 = vst [vmem:[#allocation53_spill] sm:$0xff] %v7031_v57  ;;  %v7034_v61 = vmul.f32 %v2806_v3, %v6969_v37  ;;  %v2478_v29 = vrot.slane %v6846_v62, 7  ;;  %v7044_v24 = vpop.eup %5599  ;;  %v7047_v2 = vpop.f32.mrb[42].mxu1  ;;  %v9849_v45 = vrot.slane %v6837_v38, 6  ;;  %v2765_v19 = vrot.slane %v7026_v18, 6 }
 0x3fc   : > { %9843 = vst [vmem:[#allocation52_spill] sm:$0xff] %v7029_v27  ;;  %9847 = vst [vmem:[#allocation55_spill] sm:$0xff] %v7044_v24  ;;  %v2795_v3 = vsel %vm981_vm6, %v2763_v7, %v9848_v17  ;;  %v7059_v1 = vpop.f32.mrb[42].mxu0  ;;  %v7061_v41 = vpop.f32.mrb[43].mxu1  ;;  %v9859_v44 = vrot.slane %v6819_v39, 7 }
 0x3fd   : > { %9845 = vst [vmem:[#allocation54_spill] sm:$0xff] %v7034_v61  ;;  %v2799_v4 = vsel %vm981_vm6, %v9849_v45, %v2763_v7  ;;  %9850 = vst [vmem:[#allocation56_spill] sm:$0xff] %v7059_v1  ;;  %v7068_v17 = vmul.f32 %v2795_v3, %v6987_v16  ;;  %v7070_v38 = vpop.f32.mrb[43].mxu0  ;;  %v9854_v7 = vrot.slane %v6840_v33, 6  ;;  %v7078_v1 = vmul.f32 %v6842_v34, %v2512_v53 }
 0x3fe   : > { %9851 = vst [vmem:[#allocation57_spill] sm:$0xff] %v7061_v41  ;;  %v7065_v30 = vmul.f32 %v2799_v4, %v6997_v5  ;;  %9853 = vst [vmem:[#allocation59_spill] sm:$0xff] %v7070_v38  ;;  %v9857_v38 = vrot.slane %v6876_v15, 7  ;;  %v9858_v33 = vrot.slane %v7029_v27, 6  ;;  %v2514_v5 = vsel %vm1050_vm7, %v9859_v44, %v2478_v29 }
 0x3ff   : > { %v2801_v50 = vsel %vm981_vm6, %v9854_v7, %v2765_v19  ;;  %9855 = vst [vmem:[#allocation60_spill] sm:$0xff] %v7078_v1  ;;  %v2764_v7 = vrot.slane %v7078_v1, 6  ;;  %v9862_v34 = vrot.slane %v7068_v17, 4  ;;  %v9863_v41 = vrot.slane %v6874_v48, 4 }
 0x400   : > { %9852 = vst [vmem:[#allocation58_spill] sm:$0xff] %v7065_v30  ;;  %v3059_v4 = vrot.slane %v7065_v30, 4  ;;  %v7084_v3 = vmul.f32 %v2801_v50, %v7026_v18  ;;  %v2510_v45 = vsel %vm1050_vm7, %v2478_v29, %v9857_v38  ;;  %v2797_v53 = vsel %vm981_vm6, %v2765_v19, %v9858_v33  ;;  %v7102_v18 = vpop.f32.mrb[44].mxu1 }
 0x401   : > { %v7100_v50 = vmul.f32 %v6876_v15, %v2510_v45  ;;  %9861 = vst [vmem:[#allocation63_spill] sm:$0xff] %v7102_v18  ;;  %v7113_v19 = vmul.f32 %v2797_v53, %v7029_v27  ;;  %v7116_v44 = vpop.f32.mrb[44].mxu0  ;;  %v7118_v45 = vpop.f32.mrb[45].mxu1 }
 0x402   : > { %9856 = vst [vmem:[#allocation61_spill] sm:$0xff] %v7084_v3  ;;  %v3092_v38 = vsel %vm3079_vm12, %v3059_v4, %v9862_v34  ;;  %v3096_v33 = vsel %vm3079_vm12, %v9863_v41, %v3059_v4  ;;  %v3061_v29 = vrot.slane %v7084_v3, 4  ;;  %9864 = vst [vmem:[#allocation64_spill] sm:$0xff] %v7118_v45  ;;  %v9867_v34 = vrot.slane %v7041_v60, 6  ;;  %v7134_v48 = vpop.f32.mrb[45].mxu0 }
 0x403   : > { %9860 = vst [vmem:[#allocation62_spill] sm:$0xff] %v7100_v50  ;;  %v7121_v18 = vmul.f32 %v3096_v33, %v7065_v30  ;;  %v7124_v39 = vmul.f32 %v3092_v38, %v7068_v17  ;;  %v9868_v4 = vrot.slane %v6918_v51, 6  ;;  %v9869_v33 = vrot.slane %v6909_v56, 4 }
 0x404   : > { %v2796_v41 = vsel %vm981_vm6, %v2764_v7, %v9867_v34  ;;  %v9871_v45 = vrot.slane %v6885_v12, 7  ;;  %v9872_v56 = vrot.slane %v6851_v47, 7  ;;  %v7162_v30 = vpop.f32.mrb[46].mxu1 }
 0x405   : > { %9865 = vst [vmem:[#allocation65_spill] sm:$0xff] %v7121_v18  ;;  %9866 = vst [vmem:[#allocation66_spill] sm:$0xff] %v7124_v39  ;;  %v2800_v53 = vsel %vm981_vm6, %v9868_v4, %v2764_v7  ;;  %v3098_v38 = vsel %vm3079_vm12, %v9869_v33, %v3061_v29  ;;  %v7145_v39 = vmul.f32 %v2796_v41, %v7041_v60  ;;  %v2770_v4 = vrot.slane %v7100_v50, 6  ;;  %v7173_v47 = vpop.f32.mrb[46].mxu0 }
 0x406   : > { %v7142_v18 = vmul.f32 %v2800_v53, %v7078_v1  ;;  %v7148_v34 = vmul.f32 %v3098_v38, %v7084_v3  ;;  %v7151_v7 = vmul.f32 %v6846_v62, %v2514_v5  ;;  %v2503_v33 = vsel %vm1050_vm7, %v9872_v56, %v9871_v45  ;;  %v7160_v53 = vpop.permute.xlu1 %4044  ;;  %9874 = vst [vmem:[#allocation69_spill] sm:$0xff] %v7162_v30  ;;  %v7175_v1 = vpop.f32.mrb[47].mxu1 }
 0x407   : > { %9873 = vst [vmem:[#allocation68_spill] sm:$0xff] %v7160_v53  ;;  %v9875_v41 = vrot.slane %v7113_v19, 4  ;;  %v7171_v3 = vmul.f32 %v6885_v12, %v2503_v33  ;;  %9877 = vst [vmem:[#allocation71_spill] sm:$0xff] %v7173_v47  ;;  %v9880_v53 = vrot.slane %v6903_v6, 7  ;;  %v9883_v33 = vrot.slane %v6869_v46, 7 }
 0x408   : > { %9870 = vst [vmem:[#allocation67_spill] sm:$0xff] %v7148_v34  ;;  %v3060_v5 = vrot.slane %v7142_v18, 4  ;;  %9878 = vst [vmem:[#allocation72_spill] sm:$0xff] %v7175_v1  ;;  %v2766_v45 = vrot.slane %v7151_v7, 6  ;;  %v9882_v34 = vrot.slane %v6911_v42, 7  ;;  %v7193_v1 = vpop.f32.mrb[47].mxu0 }
 0x409   : > { %v3094_v38 = vsel %vm3079_vm12, %v3061_v29, %v9875_v41  ;;  %9876 = vst [vmem:[#allocation70_spill] sm:$0xff] %v7171_v3  ;;  %v9881_v29 = vrot.slane %v6859_v55, 7  ;;  %9884 = vst [vmem:[#allocation74_spill] sm:$0xff] %v7193_v1  ;;  %v7232_v1 = vpop.f32.mrb[48].mxu0 }
 0x40a   : > { %v7178_v56 = vmul.f32 %v3094_v38, %v7113_v19  ;;  %v2504_v47 = vsel %vm1050_vm7, %v9883_v33, %v9882_v34  ;;  %v9885_v38 = vrot.slane %v7145_v39, 4  ;;  %v2798_v33 = vsel %vm981_vm6, %v2766_v45, %v2770_v4  ;;  %9893 = vst [vmem:[#allocation79_spill] sm:$0xff] %v7232_v1  ;;  %v7254_v1 = vpop.f32.mrb[49].mxu0 }
 0x40b   : > { %v2505_v41 = vsel %vm1050_vm7, %v9881_v29, %v9880_v53  ;;  %v2771_v53 = vrot.slane %v7171_v3, 6  ;;  %9901 = vst [vmem:[#allocation83_spill] sm:$0xff] %v7254_v1 }
 0x40c   : > { %9879 = vst [vmem:[#allocation73_spill] sm:$0xff] %v7178_v56  ;;  %v3093_v30 = vsel %vm3079_vm12, %v3060_v5, %v9885_v38  ;;  %v9886_v56 = vrot.slane %v6966_v63, 4  ;;  %v7205_v29 = vmul.f32 %v6903_v6, %v2505_v41  ;;  %v9889_v38 = vrot.slane %v6969_v37, 6 }
 0x40d   : > { %v7211_v34 = vmul.f32 %v3093_v30, %v7145_v39  ;;  %v7225_v41 = vmul.f32 %v2798_v33, %v7100_v50  ;;  %v9897_v33 = vrot.slane %v6920_v32, 7  ;;  %v9903_v50 = vrot.slane %v7029_v27, 6 }
 0x40e   : > { %v3097_v55 = vsel %vm3079_vm12, %v9886_v56, %v3060_v5  ;;  %v2802_v63 = vsel %vm981_vm6, %v9889_v38, %v2766_v45  ;;  %v7219_v5 = vpop.f32.mrb[48].mxu1  ;;  %v9898_v38 = vrot.slane %v6876_v15, 7 }
 0x40f   : > { %v7208_v46 = vmul.f32 %v3097_v55, %v7142_v18  ;;  %9888 = vst [vmem:[#allocation76_spill] sm:$0xff] %v7211_v34  ;;  %9890 = vst [vmem:[#allocation77_spill] sm:$0xff] %v7219_v5  ;;  %v7222_v56 = vmul.f32 %v2802_v63, %v7151_v7  ;;  %v9892_v55 = vrot.slane %v6987_v16, 6  ;;  %v7234_v34 = vpop.f32.mrb[49].mxu1  ;;  %v7240_v63 = vmul.f32 %v6911_v42, %v2504_v47 }
 0x410   : > { %9891 = vst [vmem:[#allocation78_spill] sm:$0xff] %v7225_v41  ;;  %9894 = vst [vmem:[#allocation80_spill] sm:$0xff] %v7234_v34  ;;  %v2506_v5 = vsel %vm1050_vm7, %v9898_v38, %v9897_v33  ;;  %v3066_v47 = vrot.slane %v7225_v41, 4  ;;  %v7290_v16 = vpop.f32.mrb[50].mxu1 }
 0x411   : > { %9887 = vst [vmem:[#allocation75_spill] sm:$0xff] %v7208_v46  ;;  %v2791_v30 = vsel %vm981_vm6, %v9892_v55, %v2771_v53  ;;  %9896 = vst [vmem:[#allocation82_spill] sm:$0xff] %v7240_v63  ;;  %v9899_v55 = vrot.slane %v6935_v23, 7  ;;  %v9900_v46 = vrot.slane %v6885_v12, 7  ;;  %v7265_v38 = vmul.f32 %v6920_v32, %v2506_v5  ;;  %v7267_v12 = vpop.permute.xlu1 %3862  ;;  %v7303_v5 = vpop.f32.mrb[50].mxu0 }
 0x412   : > { %v7237_v45 = vmul.f32 %v2791_v30, %v7171_v3  ;;  %v3062_v30 = vrot.slane %v7222_v56, 4  ;;  %v9902_v3 = vrot.slane %v7205_v29, 6  ;;  %9905 = vst [vmem:[#allocation85_spill] sm:$0xff] %v7267_v12  ;;  %v9909_v12 = vrot.slane %v6946_v21, 7  ;;  %9911 = vst [vmem:[#allocation88_spill] sm:$0xff] %v7290_v16 }
 0x413   : > { %v2499_v34 = vsel %vm1050_vm7, %v9900_v46, %v9899_v55  ;;  %9904 = vst [vmem:[#allocation84_spill] sm:$0xff] %v7265_v38  ;;  %9914 = vst [vmem:[#allocation90_spill] sm:$0xff] %v7303_v5  ;;  %v7321_v5 = vpop.f32.mrb[51].mxu0 }
 0x414   : > { %9895 = vst [vmem:[#allocation81_spill] sm:$0xff] %v7237_v45  ;;  %v2793_v33 = vsel %vm981_vm6, %v9903_v50, %v9902_v3  ;;  %v3067_v46 = vrot.slane %v7237_v45, 4  ;;  %v7275_v15 = vmul.f32 %v6935_v23, %v2499_v34  ;;  %v3095_v27 = vsel %vm3079_vm12, %v3062_v30, %v3066_v47  ;;  %9920 = vst [vmem:[#allocation93_spill] sm:$0xff] %v7321_v5 }
 0x415   : > { %v7271_v55 = vmul.f32 %v2793_v33, %v7205_v29  ;;  %v9908_v3 = vrot.slane %v7034_v61, 4  ;;  %v9910_v33 = vrot.slane %v6903_v6, 7  ;;  %v7296_v23 = vmul.f32 %v3095_v27, %v7225_v41  ;;  %v7305_v6 = vpop.f32.mrb[51].mxu1 }
 0x416   : > { %9907 = vst [vmem:[#allocation87_spill] sm:$0xff] %v7275_v15  ;;  %v9913_v61 = vrot.slane %v7068_v17, 4  ;;  %9915 = vst [vmem:[#allocation91_spill] sm:$0xff] %v7305_v6  ;;  %v9926_v5 = vrot.slane %v7031_v57, 7  ;;  %v2154_v41 = vpop.f32.mrb[52].mxu1 }
 0x417   : > { %9906 = vst [vmem:[#allocation86_spill] sm:$0xff] %v7271_v55  ;;  %v3099_v50 = vsel %vm3079_vm12, %v9908_v3, %v3062_v30  ;;  %v2501_v1 = vsel %vm1050_vm7, %v9910_v33, %v9909_v12  ;;  %v9918_v33 = vrot.slane %v7041_v60, 6  ;;  %v9641_v3 = vrot.slane %v7275_v15, 6 }
 0x418   : > { %v7293_v34 = vmul.f32 %v3099_v50, %v7222_v56  ;;  %v3088_v30 = vsel %vm3079_vm12, %v9913_v61, %v3067_v46  ;;  %v9917_v50 = vrot.slane %v7240_v63, 6  ;;  %v9921_v6 = vrot.slane %v7271_v55, 4 }
 0x419   : > { %v7308_v12 = vmul.f32 %v3088_v30, %v7237_v45  ;;  %v9922_v30 = vrot.slane %v7113_v19, 4 }
 0x41a   : > { %9912 = vst [vmem:[#allocation89_spill] sm:$0xff] %v7293_v34  ;;  %v2792_v27 = vsel %vm981_vm6, %v9918_v33, %v9917_v50  ;;  %v9919_v34 = vrot.slane %v7265_v38, 6  ;;  %v7336_v33 = vmul.f32 %v6946_v21, %v2501_v1  ;;  %v9929_v1 = vrot.slane %v6911_v42, 7 }
 0x41b   : > { %9916 = vst [vmem:[#allocation92_spill] sm:$0xff] %v7308_v12  ;;  %v3090_v16 = vsel %vm3079_vm12, %v9922_v30, %v9921_v6  ;;  %v7330_v45 = vmul.f32 %v2792_v27, %v7240_v63  ;;  %v9927_v6 = vrot.slane %v6962_v31, 7  ;;  %v7357_v30 = vpop.permute.xlu1 %3996 }
 0x41c   : > { %v2794_v61 = vsel %vm981_vm6, %v2770_v4, %v9919_v34  ;;  %9924 = vst [vmem:[#allocation95_spill] sm:$0xff] %v7336_v33  ;;  %v7339_v4 = vmul.f32 %v3090_v16, %v7271_v55  ;;  %v2787_v34 = vsel %vm981_vm6, %v2771_v53, %v9641_v3  ;;  %9930 = vst [vmem:[#allocation97_spill] sm:$0xff] %v7357_v30  ;;  %v2267_v30 = vpop.f32.mrb[52].mxu0 }
 0x41d   : > { %v7333_v50 = vmul.f32 %v2794_v61, %v7265_v38  ;;  %v2496_v27 = vsel %vm1050_vm7, %v9927_v6, %v9926_v5  ;;  %v9928_v61 = vmov %v9927_v6  ;;  %v7362_v3 = vmul.f32 %v2787_v34, %v7275_v15 }
 0x41e   : > { %9925 = vst [vmem:[#allocation96_spill] sm:$0xff] %v7339_v4  ;;  %v2500_v16 = vsel %vm1050_vm7, %v9929_v1, %v9928_v61  ;;  %v7369_v6 = vmul.f32 %v7031_v57, %v2496_v27  ;;  %v9933_v61 = vrot.slane %v7044_v24, 7  ;;  %v9934_v1 = vrot.slane %v6976_v49, 7  ;;  %v2156_v27 = vpop.f32.mrb[53].mxu1 }
 0x41f   : > { %9923 = vst [vmem:[#allocation94_spill] sm:$0xff] %v7333_v50  ;;  %9931 = vst [vmem:[#allocation98_spill] sm:$0xff] %v7362_v3  ;;  %v7366_v5 = vmul.f32 %v6962_v31, %v2500_v16  ;;  %v9936_v34 = vrot.slane %v6920_v32, 7  ;;  %v7384_v16 = vmul.f32 %v2154_v41, %v6882_v25  ;;  %v9938_v57 = vrot.slane %v7330_v45, 4  ;;  %v2269_v41 = vpop.f32.mrb[53].mxu0 }
 0x420   : > { %9932 = vst [vmem:[#allocation99_spill] sm:$0xff] %v7369_v6  ;;  %v2498_v21 = vsel %vm1050_vm7, %v9934_v1, %v9933_v61  ;;  %v9935_v53 = vmov %v9934_v1  ;;  %v9939_v31 = vrot.slane %v7145_v39, 4  ;;  %v9940_v61 = vrot.slane %v7333_v50, 4 }
 0x421   : > { %v2502_v38 = vsel %vm1050_vm7, %v9936_v34, %v9935_v53  ;;  %9937 = vst [vmem:[#allocation100_spill] sm:$0xff] %v7384_v16  ;;  %v9652_v32 = vrot.slane %v7362_v3, 4  ;;  %v7398_v53 = vmul.f32 %v2267_v30, %v6887_v59  ;;  %v7401_v25 = vmul.f32 %v2156_v27, %v6889_v54 }
 0x422   : > { %v3089_v15 = vsel %vm3079_vm12, %v9939_v31, %v9938_v57  ;;  %v3091_v1 = vsel %vm3079_vm12, %v3066_v47, %v9940_v61  ;;  %v7411_v57 = vmul.f32 %v2269_v41, %v6906_v14  ;;  %v9946_v54 = vrot.slane %v7336_v33, 6  ;;  %v2160_v61 = vpop.f32.mrb[54].mxu1  ;;  %v7431_v41 = vpop.permute.xlu1 %4040 }
 0x423   : > { %9941 = vst [vmem:[#allocation101_spill] sm:$0xff] %v7398_v53  ;;  %9942 = vst [vmem:[#allocation102_spill] sm:$0xff] %v7401_v25  ;;  %v7404_v34 = vmul.f32 %v3089_v15, %v7330_v45  ;;  %v7407_v42 = vmul.f32 %v3091_v1, %v7333_v50  ;;  %v3084_v59 = vsel %vm3079_vm12, %v3067_v46, %v9652_v32  ;;  %v9947_v47 = vrot.slane %v7205_v29, 6  ;;  %v2273_v31 = vpop.f32.mrb[54].mxu0  ;;  %v2162_v30 = vpop.f32.mrb[55].mxu1 }
 0x424   : > { %9945 = vst [vmem:[#allocation105_spill] sm:$0xff] %v7411_v57  ;;  %v7426_v14 = vmul.f32 %v3084_v59, %v7362_v3  ;;  %9949 = vst [vmem:[#allocation107_spill] sm:$0xff] %v7431_v41  ;;  %v2435_v32 = vmul.f32 %v2160_v61, %v6923_v11  ;;  %v2437_v27 = vmul.f32 %v2273_v31, %v6928_v20  ;;  %v2275_v50 = vpop.f32.mrb[55].mxu0  ;;  %v2166_v3 = vpop.f32.mrb[56].mxu1 }
 0x425   : > { %9943 = vst [vmem:[#allocation103_spill] sm:$0xff] %v7404_v34  ;;  %9944 = vst [vmem:[#allocation104_spill] sm:$0xff] %v7407_v42  ;;  %v2789_v15 = vsel %vm981_vm6, %v9947_v47, %v9946_v54  ;;  %v2776_v54 = vrot.slane %v7366_v5, 6  ;;  %v9659_v47 = vrot.slane %v7369_v6, 6  ;;  %v7443_v41 = vmul.f32 %v7044_v24, %v2498_v21 }
 0x426   : > { %9948 = vst [vmem:[#allocation106_spill] sm:$0xff] %v7426_v14  ;;  %v7429_v1 = vmul.f32 %v2789_v15, %v7336_v33  ;;  %v7440_v15 = vmul.f32 %v6976_v49, %v2502_v38  ;;  %v2563_v46 = vrot.slane %v2435_v32, 7  ;;  %v2436_v11 = vmul.f32 %v2162_v30, %v6930_v36 }
 0x427   : > { %v2438_v61 = vmul.f32 %v2275_v50, %v6937_v10  ;;  %v2784_v20 = vsel %vm981_vm6, %v2776_v54, %v9659_v47  ;;  %v2565_v31 = vrot.slane %v2437_v27, 7  ;;  %v9950_v38 = vrot.slane %v7271_v55, 4 }
 0x428   : > { %v9663_v59 = vrot.slane %v7429_v1, 4  ;;  %v9951_v24 = vrot.slane %v7240_v63, 6  ;;  %v7466_v10 = vmul.f32 %v2784_v20, %v7369_v6  ;;  %v9952_v50 = vrot.slane %v7384_v16, 7  ;;  %v9969_v63 = vld [vmem:[#allocation26_spill] sm:$0xff] }
 0x429   : > { %v2564_v47 = vrot.slane %v2436_v11, 7  ;;  %v2566_v49 = vrot.slane %v2438_v61, 7  ;;  %v7473_v33 = vmul.f32 %v2166_v3, %v6979_v0  ;;  %v9954_v0 = vrot.slane %v7401_v25, 7 }
 0x42a   : > { %v7457_v21 = vsel %vm3079_vm12, %v9950_v38, %v9663_v59  ;;  %v7463_v36 = vsel %vm981_vm6, %v9951_v24, %v2776_v54  ;;  %v2615_v30 = vsel %vm1050_vm7, %v9952_v50, %v2563_v46  ;;  %v2279_v38 = vpop.f32.mrb[56].mxu0  ;;  %v2168_v59 = vpop.f32.mrb[57].mxu1  ;;  %v9953_v24 = vrot.slane %v7398_v53, 7 }
 0x42b   : > { %v2659_v14 = vmul.f32 %v6776_v28, %v2615_v30  ;;  %v2441_v20 = vmul.f32 %v2279_v38, %v6990_v22  ;;  %v7482_v6 = vmul.f32 %v2168_v59, %v6992_v52  ;;  %v2281_v50 = vpop.f32.mrb[57].mxu0  ;;  %v2616_v3 = vsel %vm1050_vm7, %v9954_v0, %v2564_v47  ;;  %v7494_v53 = vpop.permute.xlu1 %4296 }
 0x42c   : > { %v2617_v54 = vsel %vm1050_vm7, %v9953_v24, %v2565_v31  ;;  %v9955_v28 = vrot.slane %v7411_v57, 7  ;;  %v2567_v24 = vrot.slane %v7473_v33, 7  ;;  %9956 = vst [vmem:[#allocation108_spill] sm:$0xff] %v7494_v53  ;;  %v2660_v52 = vmul.f32 %v6785_v40, %v2616_v3  ;;  %v2172_v38 = vpop.f32.mrb[58].mxu1  ;;  %v2285_v25 = vpop.f32.mrb[58].mxu0  ;;  %v9964_v3 = vld [vmem:[#allocation57_spill] sm:$0xff] }
 0x42d   : > { %v2661_v16 = vmul.f32 %v6781_v9, %v2617_v54  ;;  %v7496_v22 = vadd.f32 %v2659_v14, %v2435_v32  ;;  %v2569_v59 = vrot.slane %v2441_v20, 7  ;;  %v2568_v57 = vrot.slane %v7482_v6, 7  ;;  %v2174_v53 = vpop.f32.mrb[59].mxu1 }
 0x42e   : > { %v2618_v30 = vsel %vm1050_vm7, %v9955_v28, %v2566_v49  ;;  %v2611_v0 = vsel %vm1050_vm7, %v2563_v46, %v2567_v24  ;;  %v7506_v28 = vmul.f32 %v2281_v50, %v7001_v8  ;;  %v7509_v14 = vadd.f32 %v2660_v52, %v2436_v11 }
 0x42f   : > { %9957 = vst [vmem:[#allocation109_spill] sm:$0xff] %v7496_v22  ;;  %v2662_v9 = vmul.f32 %v6790_v35, %v2618_v30  ;;  %v7500_v54 = vadd.f32 %v2661_v16, %v2437_v27  ;;  %v9676_v32 = vrot.slane %v7496_v22, 6  ;;  %v2663_v35 = vmul.f32 %v6801_v43, %v2611_v0  ;;  %v2287_v16 = vpop.f32.mrb[59].mxu0  ;;  %v2178_v30 = vpop.f32.mrb[60].mxu1 }
 0x430   : > { %9959 = vst [vmem:[#allocation111_spill] sm:$0xff] %v7509_v14  ;;  %v2613_v46 = vsel %vm1050_vm7, %v2565_v31, %v2569_v59  ;;  %v2612_v8 = vsel %vm1050_vm7, %v2564_v47, %v2568_v57  ;;  %v9675_v50 = vrot.slane %v7506_v28, 7  ;;  %v7532_v47 = vmul.f32 %v2172_v38, %v7047_v2  ;;  %v7537_v11 = vpop.f32.mrb[60].mxu0 }
 0x431   : > { %9958 = vst [vmem:[#allocation110_spill] sm:$0xff] %v7500_v54  ;;  %v7511_v40 = vadd.f32 %v2662_v9, %v2438_v61  ;;  %v7523_v61 = vadd.f32 %v2663_v35, %v7473_v33  ;;  %v2665_v43 = vmul.f32 %v6810_v26, %v2613_v46  ;;  %v2664_v52 = vmul.f32 %v6814_v13, %v2612_v8  ;;  %v9961_v9 = vld [vmem:[#allocation56_spill] sm:$0xff]  ;;  %v7539_v33 = vpop.f32.mrb[61].mxu1  ;;  %v7541_v35 = vpop.permute.xlu1 %4120 }
 0x432   : > { %v2614_v31 = vsel %vm1050_vm7, %v2566_v49, %v9675_v50  ;;  %v7535_v0 = vmul.f32 %v2285_v25, %v9961_v9  ;;  %9962 = vst [vmem:[#allocation56_spill] sm:$0xff] %v7541_v35  ;;  %v9963_v46 = vld [vmem:[#allocation24_spill] sm:$0xff]  ;;  %v7546_v27 = vmul.f32 %v2174_v53, %v9964_v3  ;;  %v7548_v49 = vpop.f32.mrb[61].mxu0  ;;  %v9680_v25 = vrot.slane %v7532_v47, 7  ;;  %v9965_v9 = vld [vmem:[#allocation59_spill] sm:$0xff]  ;;  %v9968_v35 = vld [vmem:[#allocation25_spill] sm:$0xff] }
 0x433   : > { %9960 = vst [vmem:[#allocation112_spill] sm:$0xff] %v7511_v40  ;;  %v2855_v26 = vrot.slane %v7523_v61, 6  ;;  %v2697_v13 = vadd.f32 %v2665_v43, %v2441_v20  ;;  %v2666_v8 = vmul.f32 %v9963_v46, %v2614_v31  ;;  %v7551_v2 = vadd.f32 %v2664_v52, %v7482_v6  ;;  %v7566_v6 = vpop.f32.mrb[62].mxu1  ;;  %v9966_v52 = vld [vmem:[#allocation27_spill] sm:$0xff] }
 0x434   : > { %v9682_v38 = vrot.slane %v7535_v0, 7  ;;  %v7556_v50 = vmul.f32 %v2287_v16, %v9965_v9  ;;  %v2607_v16 = vsel %vm1050_vm7, %v2567_v24, %v9680_v25  ;;  %v9967_v3 = vrot.slane %v7500_v54, 6 }
 0x435   : > { %v2899_v20 = vsel %vm981_vm6, %v9676_v32, %v2855_v26  ;;  %v2857_v43 = vrot.slane %v2697_v13, 6  ;;  %v7563_v53 = vadd.f32 %v2666_v8, %v7506_v28  ;;  %v2856_v46 = vrot.slane %v7551_v2, 6  ;;  %v7578_v8 = vpop.f32.mrb[62].mxu0  ;;  %v7580_v32 = vpop.f32.mrb[63].mxu1 }
 0x436   : > { %v2951_v31 = vmul.f32 %v2899_v20, %v9966_v52  ;;  %v2609_v9 = vsel %vm1050_vm7, %v2569_v59, %v9682_v38  ;;  %v2667_v22 = vmul.f32 %v9968_v35, %v2607_v16  ;;  %v7589_v25 = vpop.f32.mrb[63].mxu0  ;;  %v9971_v59 = vld [vmem:[#allocation28_spill] sm:$0xff]  ;;  %v9972_v42 = vrot.slane %v7509_v14, 6  ;;  %v7603_v35 = vpop.permute.xlu1 %4248  ;;  %v9985_v14 = vld [vmem:[#allocation51_spill] sm:$0xff] }
 0x437   : > { %v2901_v20 = vsel %vm981_vm6, %v9967_v3, %v2857_v43  ;;  %v2669_v24 = vmul.f32 %v9969_v63, %v2609_v9  ;;  %v9973_v3 = vrot.slane %v7546_v27, 7  ;;  %9974 = vst [vmem:[#allocation57_spill] sm:$0xff] %v7603_v35  ;;  %v9975_v16 = vrot.slane %v7563_v53, 6  ;;  %v7625_v35 = vpop.f32.mrb[64].mxu0 }
 0x438   : > { %v7592_v55 = vadd.f32 %v2951_v31, %v7523_v61  ;;  %v2953_v38 = vmul.f32 %v2901_v20, %v9971_v59  ;;  %v2900_v54 = vsel %vm981_vm6, %v9972_v42, %v2856_v46  ;;  %v9976_v61 = vrot.slane %v7511_v40, 6  ;;  %v7618_v20 = vpop.f32.mrb[64].mxu1 }
 0x439   : > { %v2608_v52 = vsel %vm1050_vm7, %v2568_v57, %v9973_v3  ;;  %v2952_v63 = vmul.f32 %v2900_v54, %v6918_v51  ;;  %v7613_v9 = vadd.f32 %v2667_v22, %v7532_v47  ;;  %v7616_v42 = vadd.f32 %v2669_v24, %v7535_v0  ;;  %v9978_v54 = vld [vmem:[#allocation29_spill] sm:$0xff]  ;;  %v7627_v40 = vpop.f32.mrb[65].mxu1  ;;  %v7635_v57 = vpop.f32.mrb[65].mxu0 }
 0x43a   : > { %9970 = vst [vmem:[#allocation24_spill] sm:$0xff] %v7592_v55  ;;  %v2902_v31 = vsel %vm981_vm6, %v9976_v61, %v9975_v16  ;;  %v7621_v59 = vadd.f32 %v2953_v38, %v2697_v13  ;;  %v2668_v3 = vmul.f32 %v9978_v54, %v2608_v52  ;;  %9979 = vst [vmem:[#allocation27_spill] sm:$0xff] %v7627_v40  ;;  %v9691_v61 = vrot.slane %v7556_v50, 7  ;;  %v9982_v52 = vld [vmem:[#allocation63_spill] sm:$0xff]  ;;  %v7660_v13 = vpop.f32.mrb[66].mxu1  ;;  %v7666_v40 = vpop.f32.mrb[66].mxu0 }
 0x43b   : > { %v2954_v51 = vmul.f32 %v2902_v31, %v6969_v37  ;;  %v7630_v22 = vadd.f32 %v2952_v63, %v7551_v2  ;;  %v2859_v24 = vrot.slane %v7613_v9, 6  ;;  %v9690_v16 = vrot.slane %v7616_v42, 6  ;;  %9980 = vst [vmem:[#allocation25_spill] sm:$0xff] %v7635_v57 }
 0x43c   : > { %9977 = vst [vmem:[#allocation59_spill] sm:$0xff] %v7621_v59  ;;  %v7642_v38 = vadd.f32 %v2668_v3, %v7546_v27  ;;  %v7645_v31 = vmul.f32 %v2178_v30, %v9982_v52  ;;  %v9984_v52 = vld [vmem:[#allocation48_spill] sm:$0xff] }
 0x43d   : > { %v7639_v37 = vadd.f32 %v2954_v51, %v7563_v53  ;;  %v2895_v63 = vsel %vm981_vm6, %v2855_v26, %v2859_v24  ;;  %v2897_v54 = vsel %vm981_vm6, %v2857_v43, %v9690_v16  ;;  %v9983_v51 = vrot.slane %v7506_v28, 7  ;;  %v7668_v43 = vpop.f32.mrb[67].mxu1 }
 0x43e   : > { %v2955_v2 = vmul.f32 %v2895_v63, %v9984_v52  ;;  %v2957_v26 = vmul.f32 %v2897_v54, %v9985_v14  ;;  %v9693_v57 = vrot.slane %v7642_v38, 6  ;;  %9986 = vst [vmem:[#allocation28_spill] sm:$0xff] %v7668_v43  ;;  %v9692_v28 = vrot.slane %v7645_v31, 7  ;;  %v7680_v63 = vpop.f32.mrb[67].mxu0  ;;  %v7682_v14 = vpop.permute.xlu1 %4052 }
 0x43f   : > { %9981 = vst [vmem:[#allocation26_spill] sm:$0xff] %v7639_v37  ;;  %v2610_v3 = vsel %vm1050_vm7, %v9983_v51, %v9691_v61  ;;  %v7674_v51 = vmul.f32 %v7537_v11, %v7116_v44  ;;  %v9987_v61 = vld [vmem:[#allocation64_spill] sm:$0xff]  ;;  %9988 = vst [vmem:[#allocation29_spill] sm:$0xff] %v7680_v63  ;;  %v7696_v44 = vmul.f32 %v7548_v49, %v7134_v48  ;;  %v9992_v48 = vld [vmem:[#allocation30_spill] sm:$0xff]  ;;  %v10000_v63 = vrot.slane %v7563_v53, 6 }
 0x440   : > { %v2670_v16 = vmul.f32 %v6846_v62, %v2610_v3  ;;  %v7678_v30 = vmul.f32 %v7539_v33, %v9987_v61  ;;  %9989 = vst [vmem:[#allocation63_spill] sm:$0xff] %v7682_v14  ;;  %v7685_v54 = vadd.f32 %v2955_v2, %v7613_v9  ;;  %v7688_v52 = vadd.f32 %v2957_v26, %v7616_v42  ;;  %v9990_v11 = vld [vmem:[#allocation60_spill] sm:$0xff] }
 0x441   : > { %v2896_v62 = vsel %vm981_vm6, %v2856_v46, %v9693_v57  ;;  %v9991_v9 = vrot.slane %v7532_v47, 7  ;;  %v9694_v3 = vrot.slane %v7674_v51, 7  ;;  %v9993_v47 = vrot.slane %v7535_v0, 7  ;;  %v9996_v0 = vld [vmem:[#allocation31_spill] sm:$0xff] }
 0x442   : > { %v2956_v33 = vmul.f32 %v2896_v62, %v9990_v11  ;;  %v7700_v61 = vadd.f32 %v2670_v16, %v7556_v50  ;;  %v3172_v46 = vrot.slane %v7685_v54, 4  ;;  %v9701_v26 = vrot.slane %v7688_v52, 4  ;;  %v7747_v43 = vpop.permute.xlu1 %4180 }
 0x443   : > { %v2603_v2 = vsel %vm1050_vm7, %v9991_v9, %v9692_v28  ;;  %v2605_v9 = vsel %vm1050_vm7, %v9993_v47, %v9694_v3  ;;  %v9994_v57 = vrot.slane %v7592_v55, 4  ;;  %v9997_v47 = vld [vmem:[#allocation58_spill] sm:$0xff]  ;;  %v9998_v28 = vld [vmem:[#allocation61_spill] sm:$0xff]  ;;  %10001 = vst [vmem:[#allocation48_spill] sm:$0xff] %v7747_v43 }
 0x444   : > { %v2671_v49 = vmul.f32 %v9992_v48, %v2603_v2  ;;  %v7714_v16 = vadd.f32 %v2956_v33, %v7642_v38  ;;  %v9995_v33 = vrot.slane %v7621_v59, 4  ;;  %v2673_v11 = vmul.f32 %v9996_v0, %v2605_v9 }
 0x445   : > { %v3208_v2 = vsel %vm3079_vm12, %v9994_v57, %v3172_v46  ;;  %v9999_v57 = vrot.slane %v7700_v61, 6 }
 0x446   : > { %v3210_v48 = vsel %vm3079_vm12, %v9995_v33, %v9701_v26  ;;  %v7735_v62 = vadd.f32 %v2671_v49, %v7645_v31  ;;  %v3268_v3 = vmul.f32 %v3208_v2, %v9997_v47  ;;  %v9700_v55 = vrot.slane %v7714_v16, 4 }
 0x447   : > { %v3270_v14 = vmul.f32 %v3210_v48, %v9998_v28  ;;  %v2898_v59 = vsel %vm981_vm6, %v10000_v63, %v9999_v57  ;;  %v7752_v9 = vadd.f32 %v2673_v11, %v7674_v51  ;;  %v10002_v28 = vrot.slane %v7678_v30, 7  ;;  %v10007_v11 = vld [vmem:[#allocation32_spill] sm:$0xff] }
 0x448   : > { %v2958_v49 = vmul.f32 %v2898_v59, %v7151_v7  ;;  %v9699_v33 = vrot.slane %v7735_v62, 6  ;;  %v10003_v2 = vrot.slane %v7546_v27, 7  ;;  %v7761_v53 = vadd.f32 %v3268_v3, %v7685_v54  ;;  %v10008_v3 = vld [vmem:[#allocation66_spill] sm:$0xff] }
 0x449   : > { %v7764_v63 = vadd.f32 %v3270_v14, %v7688_v52  ;;  %v10006_v7 = vrot.slane %v7630_v22, 4  ;;  %v9702_v54 = vrot.slane %v7752_v9, 6 }
 0x44a   : > { %v2604_v48 = vsel %vm1050_vm7, %v10003_v2, %v10002_v28  ;;  %10004 = vst [vmem:[#allocation51_spill] sm:$0xff] %v7761_v53  ;;  %v7775_v47 = vadd.f32 %v2958_v49, %v7700_v61  ;;  %v2891_v14 = vsel %vm981_vm6, %v2859_v24, %v9699_v33  ;;  %v3456_v57 = vmul.f32 %v10008_v3, %v7761_v53  ;;  %v10009_v28 = vld [vmem:[#allocation73_spill] sm:$0xff]  ;;  %v10116_v3 = vld [vmem:[#allocation44_spill] sm:$0xff] }
 0x44b   : > { %10005 = vst [vmem:[#allocation64_spill] sm:$0xff] %v7764_v63  ;;  %v3209_v59 = vsel %vm3079_vm12, %v10006_v7, %v9700_v55  ;;  %v2672_v0 = vmul.f32 %v10007_v11, %v2604_v48  ;;  %v3458_v2 = vmul.f32 %v10009_v28, %v7764_v63  ;;  %v10010_v7 = vld [vmem:[#allocation47_spill] sm:$0xff]  ;;  %v10012_v24 = vrot.slane %v7616_v42, 6  ;;  %v7812_v42 = vpop.permute.xlu1 %4308  ;;  %v10096_v28 = vld [vmem:[#allocation25_spill] sm:$0xff] }
 0x44c   : > { %v3269_v27 = vmul.f32 %v3209_v59, %v7142_v18  ;;  %v2959_v48 = vmul.f32 %v2891_v14, %v10010_v7  ;;  %v10013_v33 = vrot.slane %v7696_v44, 7  ;;  %v10014_v55 = vrot.slane %v7556_v50, 7  ;;  %v10016_v59 = vld [vmem:[#allocation34_spill] sm:$0xff]  ;;  %10017 = vst [vmem:[#allocation30_spill] sm:$0xff] %v7812_v42 }
 0x44d   : > { %v7788_v18 = vadd.f32 %v2672_v0, %v7678_v30  ;;  %v2893_v11 = vsel %vm981_vm6, %v10012_v24, %v9702_v54  ;;  %v10018_v24 = vld [vmem:[#allocation76_spill] sm:$0xff]  ;;  %v10019_v63 = vrot.slane %v7775_v47, 4  ;;  %v10020_v50 = vrot.slane %v7639_v37, 4 }
 0x44e   : > { %v7791_v49 = vadd.f32 %v3269_v27, %v7714_v16  ;;  %v2606_v0 = vsel %vm1050_vm7, %v10014_v55, %v10013_v33  ;;  %v7807_v14 = vadd.f32 %v2959_v48, %v7735_v62  ;;  %v10015_v27 = vld [vmem:[#allocation52_spill] sm:$0xff]  ;;  %v10021_v33 = vld [vmem:[#allocation69_spill] sm:$0xff] }
 0x44f   : > { %v2961_v7 = vmul.f32 %v2893_v11, %v10015_v27  ;;  %v2674_v43 = vmul.f32 %v10016_v59, %v2606_v0  ;;  %v3211_v55 = vsel %vm3079_vm12, %v10020_v50, %v10019_v63  ;;  %v7824_v48 = vmul.f32 %v7566_v6, %v10021_v33  ;;  %v10022_v11 = vld [vmem:[#allocation71_spill] sm:$0xff] }
 0x450   : > { %10011 = vst [vmem:[#allocation60_spill] sm:$0xff] %v7791_v49  ;;  %v3457_v54 = vmul.f32 %v10018_v24, %v7791_v49  ;;  %v7828_v27 = vmul.f32 %v7578_v8, %v10022_v11  ;;  %v3271_v59 = vmul.f32 %v3211_v55, %v7222_v56  ;;  %v9708_v0 = vrot.slane %v7807_v14, 4 }
 0x451   : > { %v7833_v26 = vadd.f32 %v2961_v7, %v7752_v9  ;;  %v10023_v42 = vrot.slane %v7788_v18, 6  ;;  %v10024_v49 = vrot.slane %v7642_v38, 6  ;;  %v7843_v50 = vadd.f32 %v2674_v43, %v7696_v44 }
 0x452   : > { %v9705_v8 = vrot.slane %v7824_v48, 7  ;;  %v9707_v56 = vrot.slane %v7828_v27, 7  ;;  %v7848_v55 = vadd.f32 %v3271_v59, %v7775_v47  ;;  %v3204_v38 = vsel %vm3079_vm12, %v3172_v46, %v9708_v0  ;;  %v10029_v59 = vld [vmem:[#allocation35_spill] sm:$0xff]  ;;  %v10035_v0 = vld [vmem:[#allocation72_spill] sm:$0xff] }
 0x453   : > { %v2892_v63 = vsel %vm981_vm6, %v10024_v49, %v10023_v42  ;;  %v9706_v7 = vrot.slane %v7833_v26, 4  ;;  %v3272_v43 = vmul.f32 %v3204_v38, %v7068_v17  ;;  %v9712_v42 = vrot.slane %v7843_v50, 6  ;;  %v7885_v38 = vpop.permute.xlu1 %3872 }
 0x454   : > { %v2960_v6 = vmul.f32 %v2892_v63, %v7041_v60  ;;  %10025 = vst [vmem:[#allocation31_spill] sm:$0xff] %v7848_v55  ;;  %v7857_v60 = vmul.f32 %v7457_v21, %v7429_v1  ;;  %v10027_v33 = vrot.slane %v7645_v31, 7  ;;  %v3459_v11 = vmul.f32 %v7296_v23, %v7848_v55  ;;  %10031 = vst [vmem:[#allocation61_spill] sm:$0xff] %v7885_v38  ;;  %v10063_v38 = vld [vmem:[#allocation84_spill] sm:$0xff] }
 0x455   : > { %v10028_v21 = vrot.slane %v7688_v52, 4  ;;  %v10101_v53 = vrot.slane %v7828_v27, 7 }
 0x456   : > { %10026 = vst [vmem:[#allocation58_spill] sm:$0xff] %v7857_v60  ;;  %v7861_v49 = vadd.f32 %v2960_v6, %v7788_v18  ;;  %v2599_v46 = vsel %vm1050_vm7, %v10027_v33, %v9705_v8  ;;  %v10030_v6 = vrot.slane %v7674_v51, 7  ;;  %v3304_v33 = vadd.f32 %v3272_v43, %v7807_v14 }
 0x457   : > { %v3206_v17 = vsel %vm3079_vm12, %v10028_v21, %v9706_v7  ;;  %v2675_v63 = vmul.f32 %v10029_v59, %v2599_v46  ;;  %v10032_v21 = vrot.slane %v7700_v61, 6  ;;  %v10033_v59 = vld [vmem:[#allocation62_spill] sm:$0xff]  ;;  %v7903_v43 = vmul.f32 %v7580_v32, %v10035_v0 }
 0x458   : > { %v2601_v31 = vsel %vm1050_vm7, %v10030_v6, %v9707_v56  ;;  %v3274_v8 = vmul.f32 %v3206_v17, %v7113_v19  ;;  %v9709_v52 = vrot.slane %v7861_v49, 4  ;;  %v10034_v6 = vld [vmem:[#allocation36_spill] sm:$0xff]  ;;  %v7906_v19 = vmul.f32 %v7308_v12, %v3304_v33  ;;  %v10095_v12 = vld [vmem:[#allocation83_spill] sm:$0xff] }
 0x459   : > { %v2894_v46 = vsel %vm981_vm6, %v10032_v21, %v9712_v42  ;;  %v7898_v7 = vadd.f32 %v2675_v63, %v7824_v48  ;;  %v2677_v56 = vmul.f32 %v10034_v6, %v2601_v31  ;;  %v7908_v17 = vadd.f32 %v3456_v57, %v3304_v33  ;;  %v7944_v6 = vpop.permute.xlu1 %4004 }
 0x45a   : > { %v2962_v51 = vmul.f32 %v2894_v46, %v10033_v59  ;;  %v3306_v61 = vadd.f32 %v3274_v8, %v7833_v26  ;;  %v10037_v21 = vrot.slane %v7714_v16, 4  ;;  %v9710_v16 = vrot.slane %v7903_v43, 7  ;;  %10040 = vst [vmem:[#allocation52_spill] sm:$0xff] %v7944_v6 }
 0x45b   : > { %10036 = vst [vmem:[#allocation32_spill] sm:$0xff] %v7908_v17  ;;  %v9711_v32 = vrot.slane %v7898_v7, 6  ;;  %v7923_v0 = vadd.f32 %v2677_v56, %v7828_v27  ;;  %v7933_v33 = vmul.f32 %v7463_v36, %v7366_v5  ;;  %v10039_v56 = vrot.slane %v7735_v62, 6  ;;  %v10098_v17 = vld [vmem:[#allocation87_spill] sm:$0xff] }
 0x45c   : > { %v3205_v63 = vsel %vm3079_vm12, %v10037_v21, %v9709_v52  ;;  %v7919_v46 = vadd.f32 %v2962_v51, %v7843_v50  ;;  %v7926_v57 = vmul.f32 %v7339_v4, %v3306_v61  ;;  %v7928_v8 = vadd.f32 %v3458_v2, %v3306_v61  ;;  %v10041_v61 = vld [vmem:[#allocation70_spill] sm:$0xff] }
 0x45d   : > { %v3273_v31 = vmul.f32 %v3205_v63, %v7145_v39  ;;  %v2887_v51 = vsel %vm981_vm6, %v10039_v56, %v9711_v32  ;;  %v9714_v2 = vrot.slane %v7923_v0, 6  ;;  %v10042_v36 = vrot.slane %v7678_v30, 7 }
 0x45e   : > { %10038 = vst [vmem:[#allocation47_spill] sm:$0xff] %v7928_v8  ;;  %v9713_v59 = vrot.slane %v7919_v46, 4  ;;  %v2963_v21 = vmul.f32 %v2887_v51, %v10041_v61  ;;  %v10044_v51 = vrot.slane %v7775_v47, 4  ;;  %v10045_v30 = vrot.slane %v7752_v9, 6 }
 0x45f   : > { %v3305_v39 = vadd.f32 %v3273_v31, %v7861_v49  ;;  %v2600_v63 = vsel %vm1050_vm7, %v10042_v36, %v9710_v16  ;;  %v3072_v31 = vrot.slane %v7933_v33, 4  ;;  %v10046_v16 = vld [vmem:[#allocation78_spill] sm:$0xff]  ;;  %v10048_v47 = vrot.slane %v7466_v10, 4 }
 0x460   : > { %v3207_v61 = vsel %vm3079_vm12, %v10044_v51, %v9713_v59  ;;  %v2889_v36 = vsel %vm981_vm6, %v10045_v30, %v9714_v2  ;;  %v7974_v42 = vadd.f32 %v2963_v21, %v7898_v7  ;;  %v10049_v59 = vrot.slane %v7330_v45, 4  ;;  %v10050_v30 = vld [vmem:[#allocation74_spill] sm:$0xff]  ;;  %v10056_v2 = vld [vmem:[#allocation81_spill] sm:$0xff] }
 0x461   : > { %v7956_v52 = vmul.f32 %v7404_v34, %v3305_v39  ;;  %v7958_v56 = vadd.f32 %v3457_v54, %v3305_v39  ;;  %v3275_v32 = vmul.f32 %v3207_v61, %v10046_v16  ;;  %v2965_v54 = vmul.f32 %v2889_v36, %v7205_v29  ;;  %v10047_v39 = vld [vmem:[#allocation38_spill] sm:$0xff] }
 0x462   : > { %v2676_v62 = vmul.f32 %v10047_v39, %v2600_v63  ;;  %v3081_v51 = vsel %vm3079_vm12, %v3072_v31, %v10048_v47  ;;  %v3085_v9 = vsel %vm3079_vm12, %v10049_v59, %v3072_v31  ;;  %v7988_v16 = vmul.f32 %v7589_v25, %v10050_v30  ;;  %v8007_v47 = vpop.permute.xlu1 %4132 }
 0x463   : > { %10043 = vst [vmem:[#allocation34_spill] sm:$0xff] %v7958_v56  ;;  %v2778_v21 = vrot.slane %v7440_v15, 6  ;;  %v3307_v29 = vadd.f32 %v3275_v32, %v7919_v46  ;;  %v9715_v63 = vrot.slane %v7974_v42, 4  ;;  %v7994_v61 = vadd.f32 %v2965_v54, %v7923_v0  ;;  %10052 = vst [vmem:[#allocation69_spill] sm:$0xff] %v8007_v47  ;;  %v10053_v32 = vld [vmem:[#allocation104_spill] sm:$0xff] }
 0x464   : > { %v7997_v36 = vadd.f32 %v2676_v62, %v7903_v43  ;;  %v8000_v39 = vmul.f32 %v3085_v9, %v7933_v33  ;;  %v8003_v59 = vmul.f32 %v3081_v51, %v7466_v10  ;;  %v10055_v62 = vrot.slane %v7807_v14, 4 }
 0x465   : > { %v8010_v30 = vmul.f32 %v10053_v32, %v3307_v29  ;;  %v8012_v54 = vadd.f32 %v3459_v11, %v3307_v29  ;;  %v9718_v51 = vrot.slane %v7994_v61, 4  ;;  %v10058_v11 = vrot.slane %v7988_v16, 7 }
 0x466   : > { %10051 = vst [vmem:[#allocation76_spill] sm:$0xff] %v8000_v39  ;;  %v3200_v9 = vsel %vm3079_vm12, %v10055_v62, %v9715_v63  ;;  %v8025_v47 = vmul.f32 %v8003_v59, %v8000_v39  ;;  %v10059_v29 = vrot.slane %v7696_v44, 7  ;;  %v10060_v62 = vrot.slane %v7833_v26, 4 }
 0x467   : > { %10054 = vst [vmem:[#allocation71_spill] sm:$0xff] %v8012_v54  ;;  %v3276_v25 = vmul.f32 %v3200_v9, %v10056_v2  ;;  %v10061_v9 = vld [vmem:[#allocation40_spill] sm:$0xff]  ;;  %v10062_v31 = vrot.slane %v7443_v41, 6  ;;  %v10064_v54 = vrot.slane %v10063_v38, 6  ;;  %v10066_v26 = vrot.slane %v7997_v36, 6 }
 0x468   : > { %10057 = vst [vmem:[#allocation35_spill] sm:$0xff] %v8025_v47  ;;  %v2602_v14 = vsel %vm1050_vm7, %v10059_v29, %v10058_v11  ;;  %v3202_v2 = vsel %vm3079_vm12, %v10060_v62, %v9718_v51  ;;  %v10065_v29 = vld [vmem:[#allocation86_spill] sm:$0xff]  ;;  %v10067_v62 = vrot.slane %v7788_v18, 6 }
 0x469   : > { %v2678_v63 = vmul.f32 %v10061_v9, %v2602_v14  ;;  %v2786_v6 = vsel %vm981_vm6, %v2778_v21, %v10062_v31  ;;  %v2790_v44 = vsel %vm981_vm6, %v10064_v54, %v2778_v21  ;;  %v3308_v11 = vadd.f32 %v3276_v25, %v7974_v42  ;;  %v10068_v31 = vld [vmem:[#allocation82_spill] sm:$0xff]  ;;  %v10069_v25 = vld [vmem:[#allocation77_spill] sm:$0xff] }
 0x46a   : > { %v3278_v55 = vmul.f32 %v3202_v2, %v10065_v29  ;;  %v2888_v14 = vsel %vm981_vm6, %v10067_v62, %v10066_v26  ;;  %v8057_v9 = vmul.f32 %v2790_v44, %v7440_v15  ;;  %v8064_v21 = vmul.f32 %v2786_v6, %v7443_v41  ;;  %v10070_v2 = vld [vmem:[#allocation106_spill] sm:$0xff]  ;;  %v8078_v62 = vpop.permute.xlu1 %4260 }
 0x46b   : > { %v2964_v51 = vmul.f32 %v2888_v14, %v10068_v31  ;;  %v8061_v4 = vadd.f32 %v2678_v63, %v7988_v16  ;;  %v8068_v54 = vmul.f32 %v7618_v20, %v10069_v25  ;;  %v8071_v18 = vmul.f32 %v10070_v2, %v3308_v11  ;;  %10072 = vst [vmem:[#allocation36_spill] sm:$0xff] %v8078_v62  ;;  %v10073_v14 = vld [vmem:[#allocation49_spill] sm:$0xff]  ;;  %v10093_v2 = vld [vmem:[#allocation42_spill] sm:$0xff] }
 0x46c   : > { %v8074_v29 = vadd.f32 %v7906_v19, %v3308_v11  ;;  %v3310_v44 = vadd.f32 %v3278_v55, %v7994_v61  ;;  %v3074_v26 = vrot.slane %v8057_v9, 4  ;;  %v10075_v55 = vld [vmem:[#allocation94_spill] sm:$0xff]  ;;  %v10077_v20 = vrot.slane %v7843_v50, 6 }
 0x46d   : > { %v8081_v63 = vadd.f32 %v2964_v51, %v7997_v36  ;;  %v9725_v6 = vrot.slane %v8061_v4, 6  ;;  %v10076_v11 = vrot.slane %v10075_v55, 4  ;;  %v10080_v56 = vrot.slane %v10073_v14, 7 }
 0x46e   : > { %10071 = vst [vmem:[#allocation62_spill] sm:$0xff] %v8074_v29  ;;  %v8087_v25 = vmul.f32 %v7857_v60, %v3310_v44  ;;  %v8090_v19 = vadd.f32 %v7926_v57, %v3310_v44  ;;  %v10078_v60 = vrot.slane %v8064_v21, 4  ;;  %v10084_v29 = vrot.slane %v7824_v48, 7 }
 0x46f   : > { %v3087_v62 = vsel %vm3079_vm12, %v10076_v11, %v3074_v26  ;;  %v2890_v31 = vsel %vm981_vm6, %v10077_v20, %v9725_v6  ;;  %v10083_v6 = vrot.slane %v8068_v54, 7  ;;  %v10094_v8 = vrot.slane %v10093_v2, 7 }
 0x470   : > { %10074 = vst [vmem:[#allocation72_spill] sm:$0xff] %v8090_v19  ;;  %v3083_v57 = vsel %vm3079_vm12, %v3074_v26, %v10078_v60  ;;  %v8109_v44 = vmul.f32 %v3087_v62, %v8057_v9  ;;  %v2966_v11 = vmul.f32 %v2890_v31, %v10063_v38  ;;  %v10081_v19 = vld [vmem:[#allocation41_spill] sm:$0xff]  ;;  %v10085_v26 = vrot.slane %v8081_v63, 4 }
 0x471   : > { %v8113_v51 = vmul.f32 %v3083_v57, %v8064_v21  ;;  %v10082_v50 = vrot.slane %v10081_v19, 7  ;;  %v2595_v60 = vsel %vm1050_vm7, %v10084_v29, %v10083_v6  ;;  %v10086_v38 = vrot.slane %v7861_v49, 4  ;;  %v10089_v6 = vld [vmem:[#allocation50_spill] sm:$0xff] }
 0x472   : > { %10079 = vst [vmem:[#allocation70_spill] sm:$0xff] %v8109_v44  ;;  %v2679_v31 = vmul.f32 %v10081_v19, %v2595_v60  ;;  %v8143_v29 = vadd.f32 %v2966_v11, %v8061_v4  ;;  %v10091_v60 = vld [vmem:[#allocation80_spill] sm:$0xff] }
 0x473   : > { %v2495_v20 = vsel %vm1050_vm7, %v10082_v50, %v10080_v56  ;;  %v3201_v62 = vsel %vm3079_vm12, %v10086_v38, %v10085_v26  ;;  %v10087_v56 = vld [vmem:[#allocation79_spill] sm:$0xff]  ;;  %v8147_v49 = vmul.f32 %v8113_v51, %v8109_v44  ;;  %v9732_v26 = vrot.slane %v10089_v6, 7  ;;  %v8150_v38 = vpop.permute.xlu1 %3920 }
 0x474   : > { %v8135_v57 = vmul.f32 %v10073_v14, %v2495_v20  ;;  %v8139_v50 = vmul.f32 %v7625_v35, %v10087_v56  ;;  %v3277_v48 = vmul.f32 %v3201_v62, %v7330_v45  ;;  %10090 = vst [vmem:[#allocation38_spill] sm:$0xff] %v8150_v38  ;;  %v8153_v19 = vadd.f32 %v2679_v31, %v8068_v54  ;;  %v10092_v45 = vld [vmem:[#allocation27_spill] sm:$0xff] }
 0x475   : > { %10088 = vst [vmem:[#allocation78_spill] sm:$0xff] %v8147_v49  ;;  %v8159_v62 = vmul.f32 %v10092_v45, %v10091_v60  ;;  %v2497_v31 = vsel %vm1050_vm7, %v10094_v8, %v9732_v26  ;;  %v8171_v20 = vmul.f32 %v10096_v28, %v10095_v12  ;;  %v10099_v60 = vrot.slane %v10098_v17, 6 }
 0x476   : > { %v3309_v11 = vadd.f32 %v3277_v48, %v8081_v63  ;;  %v10097_v35 = vrot.slane %v8135_v57, 6  ;;  %v10100_v56 = vrot.slane %v8139_v50, 7  ;;  %v8187_v26 = vmul.f32 %v10089_v6, %v2497_v31 }
 0x477   : > { %v10106_v31 = vrot.slane %v7898_v7, 6  ;;  %v10117_v37 = vrot.slane %v8171_v20, 7 }
 0x478   : > { %v2783_v48 = vsel %vm981_vm6, %v10099_v60, %v10097_v35  ;;  %v2597_v8 = vsel %vm1050_vm7, %v10101_v53, %v10100_v56  ;;  %v8190_v12 = vmul.f32 %v8000_v39, %v3309_v11  ;;  %v8193_v28 = vadd.f32 %v7956_v52, %v3309_v11 }
 0x479   : > { %v10103_v35 = vrot.slane %v8143_v29, 4  ;;  %v10104_v60 = vrot.slane %v7919_v46, 4  ;;  %v8202_v27 = vmul.f32 %v2783_v48, %v8135_v57  ;;  %v10105_v56 = vrot.slane %v8153_v19, 6 }
 0x47a   : > { %10102 = vst [vmem:[#allocation74_spill] sm:$0xff] %v8193_v28  ;;  %v2681_v11 = vmul.f32 %v10093_v2, %v2597_v8  ;;  %v9736_v39 = vrot.slane %v8187_v26, 6  ;;  %v8215_v46 = vmul.f32 %v8025_v47, %v8193_v28  ;;  %v10108_v2 = vld [vmem:[#allocation95_spill] sm:$0xff]  ;;  %v10112_v47 = vrot.slane %v8159_v62, 7 }
 0x47b   : > { %v3203_v45 = vsel %vm3079_vm12, %v10104_v60, %v10103_v35  ;;  %v2883_v52 = vsel %vm981_vm6, %v10106_v31, %v10105_v56  ;;  %v9737_v35 = vrot.slane %v8202_v27, 4  ;;  %v10109_v8 = vrot.slane %v10108_v2, 6  ;;  %v8233_v31 = vpop.permute.xlu0 %3916 }
 0x47c   : > { %v3279_v53 = vmul.f32 %v3203_v45, %v10075_v55  ;;  %v2967_v48 = vmul.f32 %v2883_v52, %v10098_v17  ;;  %v8220_v45 = vpop.permute.xlu1 %4048  ;;  %v8224_v60 = vadd.f32 %v2681_v11, %v8139_v50 }
 0x47d   : > { %10107 = vst [vmem:[#allocation104_spill] sm:$0xff] %v8220_v45  ;;  %v2785_v56 = vsel %vm981_vm6, %v10109_v8, %v9736_v39  ;;  %v10113_v8 = vrot.slane %v7903_v43, 7  ;;  %v10138_v45 = vrot.slane %v7994_v61, 4 }
 0x47e   : > { %v3311_v7 = vadd.f32 %v3279_v53, %v8143_v29  ;;  %v8236_v52 = vadd.f32 %v2967_v48, %v8153_v19  ;;  %v10110_v53 = vld [vmem:[#allocation98_spill] sm:$0xff]  ;;  %v8245_v28 = vmul.f32 %v2785_v56, %v8187_v26 }
 0x47f   : > { %v10111_v55 = vrot.slane %v10110_v53, 4  ;;  %v2596_v39 = vsel %vm1050_vm7, %v10113_v8, %v10112_v47  ;;  %v10118_v47 = vrot.slane %v7988_v16, 7 }
 0x480   : > { %v8254_v48 = vmul.f32 %v8109_v44, %v3311_v7  ;;  %v8257_v17 = vadd.f32 %v8010_v30, %v3311_v7  ;;  %v2680_v43 = vmul.f32 %v10116_v3, %v2596_v39  ;;  %v10119_v7 = vrot.slane %v7923_v0, 6  ;;  %v10121_v39 = vld [vmem:[#allocation88_spill] sm:$0xff] }
 0x481   : > { %v3080_v11 = vsel %vm3079_vm12, %v10111_v55, %v9737_v35  ;;  %v9742_v55 = vrot.slane %v8224_v60, 6  ;;  %v2598_v8 = vsel %vm1050_vm7, %v10118_v47, %v10117_v37  ;;  %v10120_v35 = vld [vmem:[#allocation46_spill] sm:$0xff]  ;;  %v2459_v56 = vmul.f32 %v7660_v13, %v10121_v39  ;;  %v8301_v13 = vpop.permute.xlu1 %4176 }
 0x482   : > { %10114 = vst [vmem:[#allocation81_spill] sm:$0xff] %v8257_v17  ;;  %v8260_v38 = vmul.f32 %v3080_v11, %v8202_v27  ;;  %v8274_v30 = vmul.f32 %v8147_v49, %v8257_v17  ;;  %v2682_v3 = vmul.f32 %v10120_v35, %v2598_v8  ;;  %v10122_v16 = vrot.slane %v8236_v52, 4 }
 0x483   : > { %v2885_v11 = vsel %vm981_vm6, %v10119_v7, %v9742_v55  ;;  %v10123_v37 = vrot.slane %v7974_v42, 4  ;;  %v10124_v17 = vrot.slane %v8245_v28, 4  ;;  %v10125_v0 = vrot.slane %v7429_v1, 4 }
 0x484   : > { %10115 = vst [vmem:[#allocation40_spill] sm:$0xff] %v8260_v38  ;;  %v2969_v44 = vmul.f32 %v2885_v11, %v10108_v2  ;;  %v8299_v35 = vadd.f32 %v2680_v43, %v8159_v62  ;;  %v8308_v39 = vadd.f32 %v2682_v3, %v8171_v20  ;;  %v10127_v2 = vld [vmem:[#allocation18_spill] sm:$0xff]  ;;  %v10132_v49 = vrot.slane %v8068_v54, 7 }
 0x485   : > { %v3196_v47 = vsel %vm3079_vm12, %v10123_v37, %v10122_v16  ;;  %v3082_v7 = vsel %vm3079_vm12, %v10125_v0, %v10124_v17  ;;  %v10128_v11 = vrot.slane %v10127_v2, 7  ;;  %v10129_v16 = vrot.slane %v10073_v14, 7  ;;  %v8316_v37 = vpop.permute.xlu0 %4172 }
 0x486   : > { %v3280_v8 = vmul.f32 %v3196_v47, %v10110_v53  ;;  %v8305_v42 = vmul.f32 %v3082_v7, %v8245_v28  ;;  %10130 = vst [vmem:[#allocation86_spill] sm:$0xff] %v8316_v37  ;;  %v8319_v43 = vadd.f32 %v2969_v44, %v8224_v60  ;;  %v9744_v53 = vrot.slane %v8299_v35, 6 }
 0x487   : > { %v2523_v17 = vsel %vm1050_vm7, %v10129_v16, %v10128_v11  ;;  %v2587_v0 = vrot.slane %v2459_v56, 7  ;;  %v10131_v44 = vrot.slane %v7997_v36, 6  ;;  %v10136_v54 = vrot.slane %v8061_v4, 6 }
 0x488   : > { %10126 = vst [vmem:[#allocation84_spill] sm:$0xff] %v8305_v42  ;;  %v2527_v47 = vsel %vm1059_vm10, %v2523_v17, 1.0  ;;  %v3312_v3 = vadd.f32 %v3280_v8, %v8236_v52  ;;  %v10133_v8 = vld [vmem:[#allocation100_spill] sm:$0xff] }
 0x489   : > { %v8327_v55 = vmul.f32 %v10127_v2, %v2527_v47  ;;  %v2884_v16 = vsel %vm981_vm6, %v10131_v44, %v9744_v53  ;;  %v2591_v17 = vsel %vm1050_vm7, %v10132_v49, %v2587_v0  ;;  %v10134_v37 = vrot.slane %v10133_v8, 7 }
 0x48a   : > { %v8345_v7 = vmul.f32 %v8260_v38, %v3312_v3  ;;  %v8348_v11 = vadd.f32 %v8071_v18, %v3312_v3  ;;  %v2968_v36 = vmul.f32 %v2884_v16, %v7366_v5  ;;  %v10135_v44 = vrot.slane %v8308_v39, 6  ;;  %v8367_v3 = vpop.permute.xlu1 %3867 }
 0x48b   : > { %v2619_v47 = vsel %vm1050_vm7, %v2587_v0, %v10134_v37  ;;  %v10137_v53 = vrot.slane %v8319_v43, 4  ;;  %v2683_v5 = vmul.f32 %v10073_v14, %v2591_v17  ;;  %10139 = vst [vmem:[#allocation82_spill] sm:$0xff] %v8367_v3  ;;  %v9745_v61 = vrot.slane %v8327_v55, 6  ;;  %v10141_v17 = vld [vmem:[#allocation19_spill] sm:$0xff] }
 0x48c   : > { %v2886_v49 = vsel %vm981_vm6, %v10136_v54, %v10135_v44  ;;  %v2623_v18 = vsel %vm1059_vm10, %v2619_v47, 0.0  ;;  %v8371_v16 = vadd.f32 %v2968_v36, %v8299_v35  ;;  %v8375_v54 = vpop.permute.xlu0 %4300  ;;  %v10142_v47 = vrot.slane %v10141_v17, 7 }
 0x48d   : > { %v3198_v37 = vsel %vm3079_vm12, %v10138_v45, %v10137_v53  ;;  %v2970_v0 = vmul.f32 %v2886_v49, %v7440_v15  ;;  %v2655_v44 = vmul.f32 %v10127_v2, %v2623_v18  ;;  %v2715_v45 = vadd.f32 %v2683_v5, %v2459_v56  ;;  %v10140_v53 = vld [vmem:[#allocation90_spill] sm:$0xff] }
 0x48e   : > { %v3282_v4 = vmul.f32 %v3198_v37, %v7429_v1  ;;  %v2461_v14 = vmul.f32 %v7666_v40, %v10140_v53  ;;  %v10143_v1 = vrot.slane %v10089_v6, 7  ;;  %v9748_v49 = vrot.slane %v8371_v16, 4 }
 0x48f   : > { %v8378_v15 = vadd.f32 %v2970_v0, %v8308_v39  ;;  %v8391_v37 = vadd.f32 %v2655_v44, %v10133_v8  ;;  %v10144_v56 = vrot.slane %v8135_v57, 6  ;;  %v2875_v5 = vrot.slane %v2715_v45, 6 }
 0x490   : > { %v2525_v36 = vsel %vm1050_vm7, %v10143_v1, %v10142_v47  ;;  %v3314_v2 = vadd.f32 %v3282_v4, %v8319_v43  ;;  %v10146_v44 = vrot.slane %v8081_v63, 4 }
 0x491   : > { %v2811_v40 = vsel %vm981_vm6, %v10144_v56, %v9745_v61  ;;  %v9746_v0 = vrot.slane %v8378_v15, 4  ;;  %v2529_v4 = vsel %vm1059_vm10, %v2525_v36, 1.0  ;;  %v9747_v1 = vrot.slane %v8391_v37, 6 }
 0x492   : > { %v2815_v18 = vsel %vm990_vm9, %v2811_v40, 1.0  ;;  %v8405_v53 = vmul.f32 %v8305_v42, %v3314_v2  ;;  %v8408_v8 = vadd.f32 %v8087_v25, %v3314_v2  ;;  %v3197_v47 = vsel %vm3079_vm12, %v10146_v44, %v9748_v49  ;;  %v8431_v44 = vpop.permute.xlu1 %4000  ;;  %v10181_v42 = vld [vmem:[#allocation55_spill] sm:$0xff] }
 0x493   : > { %v3281_v56 = vmul.f32 %v3197_v47, %v7933_v33  ;;  %v10147_v36 = vrot.slane %v8143_v29, 4  ;;  %v10148_v25 = vrot.slane %v8153_v19, 6  ;;  %v8429_v63 = vmul.f32 %v2815_v18, %v8327_v55  ;;  %10149 = vst [vmem:[#allocation49_spill] sm:$0xff] %v8431_v44  ;;  %v8440_v47 = vpop.permute.xlu0 %4124 }
 0x494   : > { %10145 = vst [vmem:[#allocation77_spill] sm:$0xff] %v8408_v8  ;;  %v2907_v33 = vsel %vm981_vm6, %v2875_v5, %v9747_v1  ;;  %v2589_v19 = vrot.slane %v2461_v14, 7  ;;  %10150 = vst [vmem:[#allocation94_spill] sm:$0xff] %v8440_v47  ;;  %v10153_v1 = vrot.slane %v8139_v50, 7 }
 0x495   : > { %v3199_v40 = vsel %vm3079_vm12, %v10147_v36, %v9746_v0  ;;  %v2879_v2 = vsel %vm981_vm6, %v10148_v25, %v2875_v5  ;;  %v3313_v36 = vadd.f32 %v3281_v56, %v8371_v16  ;;  %v2911_v18 = vsel %vm990_vm9, %v2907_v33, 0.0 }
 0x496   : > { %v3283_v61 = vmul.f32 %v3199_v40, %v8057_v9  ;;  %v2971_v29 = vmul.f32 %v2879_v2, %v8135_v57  ;;  %v8446_v25 = vmul.f32 %v10141_v17, %v2529_v4  ;;  %v10151_v9 = vld [vmem:[#allocation91_spill] sm:$0xff]  ;;  %v10152_v40 = vld [vmem:[#allocation28_spill] sm:$0xff]  ;;  %v2943_v57 = vmul.f32 %v2911_v18, %v8327_v55  ;;  %v10155_v4 = vld [vmem:[#allocation101_spill] sm:$0xff] }
 0x497   : > { %v2460_v0 = vmul.f32 %v10152_v40, %v10151_v9  ;;  %v2593_v49 = vsel %vm1050_vm7, %v10153_v1, %v2589_v19  ;;  %v8457_v56 = vmul.f32 %v8003_v59, %v3313_v36  ;;  %v8460_v33 = vadd.f32 %v8190_v12, %v3313_v36  ;;  %v10158_v18 = vld [vmem:[#allocation20_spill] sm:$0xff] }
 0x498   : > { %v3315_v5 = vadd.f32 %v3283_v61, %v8378_v15  ;;  %v3003_v2 = vadd.f32 %v2971_v29, %v2715_v45  ;;  %v10156_v44 = vrot.slane %v10155_v4, 7  ;;  %v2685_v61 = vmul.f32 %v10089_v6, %v2593_v49  ;;  %v8485_v49 = vpop.permute.xlu1 %3932 }
 0x499   : > { %10154 = vst [vmem:[#allocation41_spill] sm:$0xff] %v8460_v33  ;;  %v8474_v1 = vadd.f32 %v2943_v57, %v8391_v37  ;;  %v9749_v36 = vrot.slane %v8446_v25, 6  ;;  %10162 = vst [vmem:[#allocation50_spill] sm:$0xff] %v8485_v49  ;;  %v10163_v40 = vrot.slane %v8236_v52, 4 }
 0x49a   : > { %v2621_v9 = vsel %vm1050_vm7, %v2589_v19, %v10156_v44  ;;  %v8468_v45 = vmul.f32 %v8113_v51, %v3315_v5  ;;  %v8471_v50 = vadd.f32 %v8254_v48, %v3315_v5  ;;  %v3188_v59 = vrot.slane %v3003_v2, 4  ;;  %v10160_v19 = vld [vmem:[#allocation53_spill] sm:$0xff] }
 0x49b   : > { %v2625_v12 = vsel %vm1059_vm10, %v2621_v9, 0.0  ;;  %v2717_v29 = vadd.f32 %v2685_v61, %v2461_v14  ;;  %v10159_v44 = vrot.slane %v10158_v18, 7  ;;  %v10161_v6 = vrot.slane %v10160_v19, 7  ;;  %v8495_v9 = vpop.permute.xlu0 %4252 }
 0x49c   : > { %10157 = vst [vmem:[#allocation79_spill] sm:$0xff] %v8471_v50  ;;  %v3192_v5 = vsel %vm3079_vm12, %v10163_v40, %v3188_v59  ;;  %v2657_v14 = vmul.f32 %v10141_v17, %v2625_v12  ;;  %10164 = vst [vmem:[#allocation80_spill] sm:$0xff] %v8495_v9  ;;  %v2588_v48 = vrot.slane %v2460_v0, 7  ;;  %v10166_v40 = vrot.slane %v8474_v1, 4 }
 0x49d   : > { %v2524_v51 = vsel %vm1050_vm7, %v10161_v6, %v10159_v44  ;;  %v3284_v61 = vmul.f32 %v3192_v5, %v8202_v27  ;;  %v10165_v44 = vrot.slane %v8187_v26, 6  ;;  %v2877_v52 = vrot.slane %v2717_v29, 6 }
 0x49e   : > { %v2528_v57 = vsel %vm1059_vm10, %v2524_v51, 1.0  ;;  %v3220_v17 = vsel %vm3079_vm12, %v3188_v59, %v10166_v40  ;;  %v2689_v12 = vadd.f32 %v2657_v14, %v10155_v4 }
 0x49f   : > { %v2813_v6 = vsel %vm981_vm6, %v10165_v44, %v9749_v36  ;;  %v8512_v5 = vmul.f32 %v10158_v18, %v2528_v57  ;;  %v3224_v9 = vsel %vm3039_vm13, %v3220_v17, 0.0  ;;  %v3316_v3 = vadd.f32 %v3284_v61, %v3003_v2 }
 0x4a0   : > { %v2817_v51 = vsel %vm990_vm9, %v2813_v6, 1.0  ;;  %v10167_v44 = vrot.slane %v8224_v60, 6  ;;  %v3256_v4 = vmul.f32 %v3224_v9, %v8429_v63  ;;  %v2849_v59 = vrot.slane %v2689_v12, 6  ;;  %v10170_v60 = vld [vmem:[#allocation102_spill] sm:$0xff] }
 0x4a1   : > { %v8521_v47 = vmul.f32 %v2817_v51, %v8446_v25  ;;  %v10168_v57 = vrot.slane %v8159_v62, 7  ;;  %v8530_v2 = vadd.f32 %v8345_v7, %v3316_v3  ;;  %v10171_v61 = vrot.slane %v10170_v60, 7  ;;  %v8538_v51 = vpop.permute.xlu1 %4060 }
 0x4a2   : > { %v2881_v36 = vsel %vm981_vm6, %v10167_v44, %v2877_v52  ;;  %v9751_v9 = vrot.slane %v8512_v5, 6  ;;  %10172 = vst [vmem:[#allocation42_spill] sm:$0xff] %v8538_v51  ;;  %v2909_v7 = vsel %vm981_vm6, %v2877_v52, %v2849_v59 }
 0x4a3   : > { %v2973_v14 = vmul.f32 %v2881_v36, %v8187_v26  ;;  %v2592_v6 = vsel %vm1050_vm7, %v10168_v57, %v2588_v48  ;;  %10169 = vst [vmem:[#allocation27_spill] sm:$0xff] %v8530_v2  ;;  %v2620_v40 = vsel %vm1050_vm7, %v2588_v48, %v10171_v61  ;;  %v10173_v26 = vld [vmem:[#allocation110_spill] sm:$0xff]  ;;  %v8550_v48 = vpop.permute.xlu0 %3912  ;;  %v10175_v61 = vld [vmem:[#allocation99_spill] sm:$0xff]  ;;  %v10184_v2 = vrot.slane %v8299_v35, 6 }
 0x4a4   : > { %v2684_v17 = vmul.f32 %v10160_v19, %v2592_v6  ;;  %v10174_v36 = vrot.slane %v10173_v26, 6  ;;  %v2624_v44 = vsel %vm1059_vm10, %v2620_v40, 0.0  ;;  %v2913_v19 = vsel %vm990_vm9, %v2909_v7, 0.0  ;;  %v10178_v40 = vld [vmem:[#allocation29_spill] sm:$0xff] }
 0x4a5   : > { %v3005_v3 = vadd.f32 %v2973_v14, %v2717_v29  ;;  %v2656_v57 = vmul.f32 %v10158_v18, %v2624_v44  ;;  %v2945_v29 = vmul.f32 %v2913_v19, %v8446_v25  ;;  %v10177_v14 = vld [vmem:[#allocation93_spill] sm:$0xff] }
 0x4a6   : > { %v8544_v62 = vsel %vm981_vm6, %v2849_v59, %v10174_v36  ;;  %v2716_v6 = vadd.f32 %v2684_v17, %v2460_v0  ;;  %v10176_v36 = vrot.slane %v10175_v61, 6  ;;  %v2462_v8 = vmul.f32 %v10178_v40, %v10177_v14  ;;  %v10179_v17 = vld [vmem:[#allocation21_spill] sm:$0xff] }
 0x4a7   : > { %v3190_v52 = vrot.slane %v3005_v3, 4  ;;  %v8567_v7 = vadd.f32 %v2656_v57, %v10170_v60  ;;  %v10180_v44 = vrot.slane %v10179_v17, 7  ;;  %v8605_v33 = vpop.permute.xlu0 %4168 }
 0x4a8   : > { %v2812_v50 = vsel %vm981_vm6, %v10176_v36, %v9751_v9  ;;  %v2876_v0 = vrot.slane %v2716_v6, 6  ;;  %v10182_v36 = vrot.slane %v10181_v42, 7  ;;  %v8578_v9 = vadd.f32 %v2945_v29, %v2689_v12  ;;  %v8593_v29 = vpop.permute.xlu1 %4316 }
 0x4a9   : > { %v2816_v59 = vsel %vm990_vm9, %v2812_v50, 1.0  ;;  %v10183_v50 = vrot.slane %v8319_v43, 4  ;;  %v2590_v57 = vrot.slane %v2462_v8, 7  ;;  %10185 = vst [vmem:[#allocation83_spill] sm:$0xff] %v8593_v29  ;;  %v10225_v29 = vrot.slane %v7466_v10, 4 }
 0x4aa   : > { %v8570_v18 = vmul.f32 %v2816_v59, %v8512_v5  ;;  %v2526_v19 = vsel %vm1050_vm7, %v10182_v36, %v10180_v44  ;;  %v2880_v44 = vsel %vm981_vm6, %v10184_v2, %v2876_v0  ;;  %v10228_v51 = vrot.slane %v8567_v7, 6 }
 0x4ab   : > { %v3194_v14 = vsel %vm3079_vm12, %v10183_v50, %v3190_v52  ;;  %v2530_v60 = vsel %vm1059_vm10, %v2526_v19, 1.0  ;;  %v2972_v36 = vmul.f32 %v2880_v44, %v10175_v61  ;;  %v10186_v19 = vrot.slane %v8171_v20, 7 }
 0x4ac   : > { %v3286_v59 = vmul.f32 %v3194_v14, %v8245_v28  ;;  %v2722_v12 = vmul.f32 %v10179_v17, %v2530_v60  ;;  %v10187_v14 = vld [vmem:[#allocation105_spill] sm:$0xff]  ;;  %v10189_v60 = vrot.slane %v8567_v7, 6  ;;  %v10190_v44 = vrot.slane %v8578_v9, 4 }
 0x4ad   : > { %v2594_v50 = vsel %vm1050_vm7, %v10186_v19, %v2590_v57  ;;  %v10188_v40 = vrot.slane %v10187_v14, 7 }
 0x4ae   : > { %v3318_v2 = vadd.f32 %v3286_v59, %v3005_v3  ;;  %v2908_v43 = vsel %vm981_vm6, %v2876_v0, %v10189_v60  ;;  %v2686_v20 = vmul.f32 %v10181_v42, %v2594_v50  ;;  %v3222_v19 = vsel %vm3079_vm12, %v3190_v52, %v10190_v44 }
 0x4af   : > { %v2622_v35 = vsel %vm1050_vm7, %v2590_v57, %v10188_v40  ;;  %v2912_v57 = vsel %vm990_vm9, %v2908_v43, 0.0  ;;  %v3004_v40 = vadd.f32 %v2972_v36, %v2716_v6  ;;  %v3226_v59 = vsel %vm3039_vm13, %v3222_v19, 0.0 }
 0x4b0   : > { %v2626_v61 = vsel %vm1059_vm10, %v2622_v35, 0.0  ;;  %v8624_v0 = vadd.f32 %v8405_v53, %v3318_v2  ;;  %v2944_v35 = vmul.f32 %v2912_v57, %v8512_v5  ;;  %v2718_v42 = vadd.f32 %v2686_v20, %v2462_v8  ;;  %v8638_v53 = vpop.permute.xlu1 %4012 }
 0x4b1   : > { %v2658_v3 = vmul.f32 %v10179_v17, %v2626_v61  ;;  %v3258_v50 = vmul.f32 %v3226_v59, %v8521_v47  ;;  %v3189_v60 = vrot.slane %v3004_v40, 4  ;;  %v2754_v44 = vrot.slane %v2722_v12, 6  ;;  %10192 = vst [vmem:[#allocation87_spill] sm:$0xff] %v8638_v53  ;;  %v10194_v61 = vld [vmem:[#allocation43_spill] sm:$0xff] }
 0x4b2   : > { %10191 = vst [vmem:[#allocation25_spill] sm:$0xff] %v8624_v0  ;;  %v8632_v6 = vadd.f32 %v2944_v35, %v8567_v7  ;;  %v2878_v17 = vrot.slane %v2718_v42, 6  ;;  %v3047_v43 = vrot.slane %v8429_v63, 4  ;;  %v8636_v36 = vadd.f32 %v3256_v4, %v8474_v1  ;;  %v10226_v0 = vld [vmem:[#allocation111_spill] sm:$0xff] }
 0x4b3   : > { %v8629_v52 = vadd.f32 %v2658_v3, %v10187_v14  ;;  %v10193_v8 = vrot.slane %v8371_v16, 4  ;;  %v10195_v14 = vrot.slane %v10194_v61, 6  ;;  %v10196_v19 = vrot.slane %v7443_v41, 6  ;;  %v8655_v3 = vpop.permute.xlu0 %3857 }
 0x4b4   : > { %10197 = vst [vmem:[#allocation95_spill] sm:$0xff] %v8655_v3  ;;  %v10199_v16 = vrot.slane %v8202_v27, 4 }
 0x4b5   : > { %v3193_v2 = vsel %vm3079_vm12, %v10193_v8, %v3189_v60  ;;  %v8648_v20 = vsel %vm981_vm6, %v2754_v44, %v10195_v14  ;;  %v2814_v57 = vsel %vm981_vm6, %v10196_v19, %v2754_v44  ;;  %v9752_v4 = vrot.slane %v8629_v52, 6 }
 0x4b6   : > { %v3285_v59 = vmul.f32 %v3193_v2, %v7466_v10  ;;  %v2818_v35 = vsel %vm990_vm9, %v2814_v57, 1.0  ;;  %v10198_v8 = vrot.slane %v8308_v39, 6  ;;  %v3108_v2 = vsel %vm3079_vm12, %v10199_v16, %v3047_v43 }
 0x4b7   : > { %v2910_v44 = vsel %vm981_vm6, %v2878_v17, %v9752_v4  ;;  %v8670_v53 = vmul.f32 %v2818_v35, %v2722_v12  ;;  %v10200_v57 = vrot.slane %v8632_v6, 4 }
 0x4b8   : > { %v2882_v14 = vsel %vm981_vm6, %v10198_v8, %v2878_v17  ;;  %v3317_v8 = vadd.f32 %v3285_v59, %v3004_v40  ;;  %v2914_v3 = vsel %vm990_vm9, %v2910_v44, 0.0  ;;  %v3128_v17 = vsel %vm3039_vm13, %v3108_v2, 1.0  ;;  %v10204_v2 = vld [vmem:[#allocation109_spill] sm:$0xff] }
 0x4b9   : > { %v2974_v19 = vmul.f32 %v2882_v14, %v7443_v41  ;;  %v3221_v39 = vsel %vm3079_vm12, %v3189_v60, %v10200_v57  ;;  %v2946_v35 = vmul.f32 %v2914_v3, %v2722_v12  ;;  %v8687_v14 = vmul.f32 %v3128_v17, %v8429_v63  ;;  %v10201_v60 = vld [vmem:[#allocation22_spill] sm:$0xff]  ;;  %v8703_v63 = vpop.permute.xlu1 %4268 }
 0x4ba   : > { %v3225_v41 = vsel %vm3039_vm13, %v3221_v39, 0.0  ;;  %v3501_v4 = vadd.f32 %v8457_v56, %v3317_v8  ;;  %v10202_v40 = vrot.slane %v10201_v60, 6  ;;  %v10203_v59 = vrot.slane %v8327_v55, 6  ;;  %10207 = vst [vmem:[#allocation98_spill] sm:$0xff] %v8703_v63 }
 0x4bb   : > { %v3006_v27 = vadd.f32 %v2974_v19, %v2718_v42  ;;  %v3257_v16 = vmul.f32 %v3225_v41, %v8570_v18  ;;  %v10205_v57 = vrot.slane %v10204_v2, 6  ;;  %v10206_v39 = vrot.slane %v8391_v37, 6  ;;  %v8710_v19 = vpop.permute.xlu0 %3992 }
 0x4bc   : > { %v2807_v44 = vsel %vm981_vm6, %v10203_v59, %v10202_v40  ;;  %v8706_v42 = vadd.f32 %v2946_v35, %v8629_v52  ;;  %v3440_v3 = vmul.f32 0.0, %v8687_v14  ;;  %10208 = vst [vmem:[#allocation44_spill] sm:$0xff] %v8710_v19  ;;  %v8713_v8 = vadd.f32 %v8215_v46, %v3501_v4  ;;  %v10223_v19 = vld [vmem:[#allocation37_spill] sm:$0xff] }
 0x4bd   : > { %v2903_v12 = vsel %vm981_vm6, %v10206_v39, %v10205_v57  ;;  %v3191_v56 = vrot.slane %v3006_v27, 4  ;;  %v8716_v37 = vmul.f32 %v2807_v44, %v10201_v60  ;;  %v3049_v17 = vrot.slane %v8521_v47, 4  ;;  %v10212_v39 = vld [vmem:[#allocation23_spill] sm:$0xff] }
 0x4be   : > { %v2947_v55 = vmul.f32 %v2903_v12, %v10201_v60  ;;  %10209 = vst [vmem:[#allocation46_spill] sm:$0xff] %v8713_v8  ;;  %v8720_v41 = vadd.f32 %v3258_v50, %v8578_v9  ;;  %v9753_v35 = vrot.slane %v8706_v42, 4  ;;  %v10210_v40 = vrot.slane %v8378_v15, 4 }
 0x4bf   : > { %v8728_v57 = vadd.f32 %v3440_v3, %v8636_v36  ;;  %v9754_v60 = vrot.slane %v8716_v37, 4  ;;  %v10211_v50 = vrot.slane %v8245_v28, 4  ;;  %v10213_v15 = vrot.slane %v10212_v39, 6 }
 0x4c0   : > { %v3195_v59 = vsel %vm3079_vm12, %v10210_v40, %v3191_v56  ;;  %v8731_v46 = vadd.f32 %v2947_v55, %v10204_v2  ;;  %v10214_v12 = vrot.slane %v8446_v25, 6  ;;  %v3223_v2 = vsel %vm3079_vm12, %v3191_v56, %v9753_v35  ;;  %v8764_v56 = vpop.permute.xlu1 %4184 }
 0x4c1   : > { %v3287_v4 = vmul.f32 %v3195_v59, %v8064_v21  ;;  %v3110_v44 = vsel %vm3079_vm12, %v10211_v50, %v3049_v17  ;;  %v8750_v55 = vadd.f32 %v8728_v57, %v3440_v3  ;;  %v3227_v50 = vsel %vm3039_vm13, %v3223_v2, 0.0 }
 0x4c2   : > { %v2809_v40 = vsel %vm981_vm6, %v10214_v12, %v10213_v15  ;;  %v3130_v59 = vsel %vm3039_vm13, %v3110_v44, 1.0  ;;  %v3104_v15 = vsel %vm3079_vm12, %v3047_v43, %v9754_v60  ;;  %v8767_v35 = vmul.f32 %v3227_v50, %v8670_v53 }
 0x4c3   : > { %v3319_v25 = vadd.f32 %v3287_v4, %v3006_v27  ;;  %v8762_v12 = vmul.f32 %v3130_v59, %v8521_v47  ;;  %v8770_v28 = vadd.f32 %v8750_v55, %v3440_v3  ;;  %v10216_v44 = vrot.slane %v8731_v46, 4  ;;  %v8781_v47 = vpop.permute.xlu0 %3924 }
 0x4c4   : > { %v10217_v27 = vrot.slane %v8474_v1, 4  ;;  %v8779_v43 = vmul.f32 %v3104_v15, %v8716_v37  ;;  %v2949_v3 = vmul.f32 %v8544_v62, %v10212_v39  ;;  %v3048_v60 = vrot.slane %v8570_v18, 4 }
 0x4c5   : > { %10215 = vst [vmem:[#allocation88_spill] sm:$0xff] %v8770_v28  ;;  %v3503_v2 = vadd.f32 %v8468_v45, %v3319_v25  ;;  %v3442_v50 = vmul.f32 0.0, %v8762_v12  ;;  %v3943_v1 = vmul.f32 %v8550_v48, %v8770_v28  ;;  %v10224_v28 = vrot.slane %v10223_v19, 4 }
 0x4c6   : > { %v3216_v4 = vsel %vm3079_vm12, %v10217_v27, %v10216_v44  ;;  %v3444_v44 = vmul.f32 %v8779_v43, %v8636_v36  ;;  %v8794_v15 = vmul.f32 %v8779_v43, %v8687_v14  ;;  %v3013_v27 = vmul.f32 %v2809_v40, %v10212_v39 }
 0x4c7   : > { %v3260_v59 = vmul.f32 %v3216_v4, %v8716_v37  ;;  %v8798_v45 = vadd.f32 %v8274_v30, %v3503_v2  ;;  %v3474_v62 = vadd.f32 %v3442_v50, %v8720_v41  ;;  %v2981_v4 = vadd.f32 %v2949_v3, %v10173_v26  ;;  %3959 = vrot.lane.b32.xlu1 %v3943_v1, %s5667_s16  ;;  %v8822_v1 = vpop.permute.xlu1 %4008 }
 0x4c8   : > { %v3628_v48 = vmul.f32 0.0, %v8794_v15  ;;  %v3053_v36 = vrot.slane %v3013_v27, 4  ;;  %v8809_v39 = vadd.f32 %v3257_v16, %v8632_v6  ;;  %v10221_v26 = vrot.slane %v8512_v5, 6  ;;  %10222 = vst [vmem:[#allocation100_spill] sm:$0xff] %v8822_v1 }
 0x4c9   : > { %10218 = vst [vmem:[#allocation18_spill] sm:$0xff] %v8798_v45  ;;  %v8801_v25 = vadd.f32 %v3260_v59, %v8731_v46  ;;  %v8814_v40 = vadd.f32 %v3474_v62, %v3442_v50  ;;  %v3166_v2 = vrot.slane %v2981_v4, 4  ;;  %v10219_v59 = vld [vmem:[#allocation39_spill] sm:$0xff]  ;;  %v3109_v45 = vsel %vm3079_vm12, %v10225_v29, %v3048_v60 }
 0x4ca   : > { %v10220_v63 = vrot.slane %v10219_v59, 6  ;;  %v3102_v16 = vsel %vm3079_vm12, %v3053_v36, %v10224_v28  ;;  %v10227_v5 = vrot.slane %v10226_v0, 6 }
 0x4cb   : > { %v8812_v30 = vadd.f32 %v3444_v44, %v8801_v25  ;;  %v3106_v44 = vsel %vm3079_vm12, %v3049_v17, %v3053_v36  ;;  %v8846_v28 = vadd.f32 %v8814_v40, %v3442_v50  ;;  %v10230_v17 = vld [vmem:[#allocation59_spill] sm:$0xff]  ;;  %v10232_v36 = vrot.slane %v8578_v9, 4 }
 0x4cc   : > { %v2808_v3 = vsel %vm981_vm6, %v10221_v26, %v10220_v63  ;;  %v2904_v63 = vsel %vm981_vm6, %v10228_v51, %v10227_v5  ;;  %v8840_v26 = vpop.permute.xlu0 %4304  ;;  %v10231_v10 = vrot.slane %v10230_v17, 4  ;;  %v8857_v5 = vmul.f32 %v3106_v44, %v3013_v27 }
 0x4cd   : > { %v8843_v1 = vadd.f32 %v3628_v48, %v8812_v30  ;;  %10229 = vst [vmem:[#allocation90_spill] sm:$0xff] %v8846_v28  ;;  %v3218_v7 = vsel %vm3079_vm12, %v10232_v36, %v3166_v2  ;;  %v8860_v38 = vmul.f32 %v3102_v16, %v10223_v19  ;;  %v4199_v49 = vmul.f32 %v8605_v33, %v8846_v28 }
 0x4ce   : > { %v3214_v29 = vsel %vm3079_vm12, %v3166_v2, %v10231_v10  ;;  %v3262_v8 = vmul.f32 %v3218_v7, %v3013_v27  ;;  %v3129_v9 = vsel %vm3039_vm13, %v3109_v45, 1.0  ;;  %v2948_v10 = vmul.f32 %v2904_v63, %v10219_v59 }
 0x4cf   : > { %v3266_v51 = vmul.f32 %v3214_v29, %v10223_v19  ;;  %10233 = vst [vmem:[#allocation19_spill] sm:$0xff] %v8860_v38  ;;  %v8863_v50 = vadd.f32 %v8843_v1, %v3628_v48  ;;  %v8877_v19 = vmul.f32 %v8860_v38, %v8857_v5  ;;  %v8880_v27 = vmul.f32 %v3129_v9, %v8570_v18  ;;  %v8891_v48 = vpop.permute.xlu1 %4136 }
 0x4d0   : > { %v8870_v2 = vadd.f32 %v3262_v8, %v2981_v4  ;;  %4215 = vrot.lane.b32.xlu1 %v4199_v49, %s5667_s16  ;;  %v2980_v45 = vadd.f32 %v2948_v10, %v10226_v0  ;;  %v3012_v8 = vmul.f32 %v2808_v3, %v10219_v59  ;;  %v8889_v4 = vmul.f32 %v7404_v34, %v10018_v24  ;;  %v8899_v44 = vpop.permute.xlu0 %4128 }
 0x4d1   : > { %10234 = vst [vmem:[#allocation91_spill] sm:$0xff] %v8863_v50  ;;  %v8873_v29 = vadd.f32 %v3266_v51, %v10230_v17  ;;  %v3944_v33 = vmul.f32 %v8233_v31, %v8863_v50  ;;  %10237 = vst [vmem:[#allocation20_spill] sm:$0xff] %v8891_v48  ;;  %v3634_v18 = vmul.f32 %v8877_v19, %v3474_v62  ;;  %v3441_v49 = vmul.f32 0.0, %v8880_v27  ;;  %v10239_v51 = vld [vmem:[#allocation45_spill] sm:$0xff] }
 0x4d2   : > { %10236 = vst [vmem:[#allocation101_spill] sm:$0xff] %v8889_v4  ;;  %v3450_v16 = vmul.f32 %v8860_v38, %v8870_v2  ;;  %v3698_v31 = vmul.f32 %v8877_v19, %v8762_v12  ;;  %10238 = vst [vmem:[#allocation53_spill] sm:$0xff] %v8899_v44  ;;  %v3052_v0 = vrot.slane %v3012_v8, 4  ;;  %v3165_v59 = vrot.slane %v2980_v45, 4 }
 0x4d3   : > { %10235 = vst [vmem:[#allocation28_spill] sm:$0xff] %v8873_v29  ;;  %3961 = vrot.lane.b32.xlu0 %v3944_v33, %s5667_s16  ;;  %v8904_v3 = vmul.f32 %v8648_v20, %v10194_v61  ;;  %v3050_v63 = vrot.slane %v8670_v53, 4  ;;  %v3473_v36 = vadd.f32 %v3441_v49, %v8809_v39  ;;  %v3291_v7 = vadd.f32 %v8767_v35, %v8706_v42 }
 0x4d4   : > { %v8908_v17 = vadd.f32 %v3450_v16, %v8873_v29  ;;  %v3786_v62 = vmul.f32 0.0, %v3698_v31  ;;  %v10240_v9 = vrot.slane %v10239_v51, 4  ;;  %v3105_v20 = vsel %vm3079_vm12, %v3048_v60, %v3052_v0 }
 0x4d5   : > { %v10241_v33 = vrot.slane %v8632_v6, 4  ;;  %v3054_v31 = vrot.slane %v8904_v3, 4  ;;  %v8927_v44 = vadd.f32 %v3473_v36, %v3441_v49  ;;  %v3325_v28 = vmul.f32 %v3105_v20, %v3012_v8 }
 0x4d6   : > { %v3101_v10 = vsel %vm3079_vm12, %v3052_v0, %v10240_v9  ;;  %v8925_v48 = vadd.f32 %v3634_v18, %v8908_v17  ;;  %v10243_v9 = vld [vmem:[#allocation54_spill] sm:$0xff]  ;;  %v10245_v0 = vrot.slane %v8064_v21, 4  ;;  %v10251_v21 = vld [vmem:[#allocation75_spill] sm:$0xff] }
 0x4d7   : > { %v3217_v16 = vsel %vm3079_vm12, %v10241_v33, %v3165_v59  ;;  %v3329_v50 = vmul.f32 %v3101_v10, %v10239_v51  ;;  %v10244_v34 = vrot.slane %v10243_v9, 4  ;;  %v3107_v6 = vsel %vm3079_vm12, %v3050_v63, %v3054_v31  ;;  %v8940_v33 = vpop.permute.xlu1 %4068 }
 0x4d8   : > { %10242 = vst [vmem:[#allocation102_spill] sm:$0xff] %v8925_v48  ;;  %v3261_v35 = vmul.f32 %v3217_v16, %v3012_v8  ;;  %v3111_v18 = vsel %vm3079_vm12, %v10245_v0, %v3050_v63  ;;  %10246 = vst [vmem:[#allocation110_spill] sm:$0xff] %v8940_v33  ;;  %v8943_v16 = vadd.f32 %v3786_v62, %v8925_v48  ;;  %v10258_v48 = vld [vmem:[#allocation33_spill] sm:$0xff] }
 0x4d9   : > { %v3103_v60 = vsel %vm3079_vm12, %v3054_v31, %v10244_v34  ;;  %v8946_v8 = vadd.f32 %v8927_v44, %v3441_v49  ;;  %v3445_v20 = vmul.f32 %v3325_v28, %v8809_v39  ;;  %v8949_v34 = vpop.permute.xlu0 %4256  ;;  %v8952_v31 = vmul.f32 %v3325_v28, %v8880_v27 }
 0x4da   : > { %10247 = vst [vmem:[#allocation99_spill] sm:$0xff] %v8943_v16  ;;  %v3293_v10 = vadd.f32 %v3261_v35, %v2980_v45  ;;  %10249 = vst [vmem:[#allocation29_spill] sm:$0xff] %v8949_v34  ;;  %v8955_v38 = vmul.f32 %v10251_v21, %v3329_v50  ;;  %v3131_v63 = vsel %vm3039_vm13, %v3111_v18, 1.0  ;;  %v3327_v62 = vmul.f32 %v3107_v6, %v8904_v3  ;;  %v10253_v45 = vld [vmem:[#allocation107_spill] sm:$0xff] }
 0x4db   : > { %10248 = vst [vmem:[#allocation93_spill] sm:$0xff] %v8946_v8  ;;  %10250 = vst [vmem:[#allocation21_spill] sm:$0xff] %v8952_v31  ;;  %v4201_v49 = vmul.f32 %v8301_v13, %v8943_v16  ;;  %v4071_v35 = vmul.f32 %v10253_v45, %v8946_v8  ;;  %v3629_v0 = vmul.f32 0.0, %v8952_v31  ;;  %v8970_v33 = vmul.f32 %v3131_v63, %v8670_v53  ;;  %v10255_v13 = vld [vmem:[#allocation89_spill] sm:$0xff]  ;;  %v8989_v8 = vpop.permute.xlu1 %4196 }
 0x4dc   : > { %10252 = vst [vmem:[#allocation55_spill] sm:$0xff] %v8955_v38  ;;  %v8964_v39 = vadd.f32 %v3445_v20, %v3293_v10  ;;  %v3709_v34 = vmul.f32 %v8889_v4, %v8955_v38  ;;  %v8973_v18 = vmul.f32 %v3103_v60, %v10243_v9  ;;  %v8979_v6 = vmul.f32 %v7296_v23, %v10255_v13 }
 0x4dd   : > { %4219 = vrot.lane.b32.xlu0 %v4201_v49, %s5667_s16  ;;  %4087 = vrot.lane.b32.xlu1 %v4071_v35, %s5667_s16  ;;  %v10256_v20 = vrot.slane %v7630_v22, 4  ;;  %v3449_v16 = vmul.f32 %v3329_v50, %v3293_v10  ;;  %v3443_v63 = vmul.f32 0.0, %v8970_v33  ;;  %10257 = vst [vmem:[#allocation43_spill] sm:$0xff] %v8989_v8  ;;  %v8991_v35 = vmul.f32 %v3329_v50, %v3325_v28  ;;  %v10261_v10 = vld [vmem:[#allocation24_spill] sm:$0xff]  ;;  %v9011_v50 = vpop.permute.xlu0 %4188 }
 0x4de   : > { %10254 = vst [vmem:[#allocation105_spill] sm:$0xff] %v8964_v39  ;;  %v3661_v53 = vadd.f32 %v3629_v0, %v8964_v39  ;;  %v3515_v60 = vmul.f32 %v8973_v18, %v3327_v62  ;;  %v10259_v29 = vrot.slane %v10258_v48, 4  ;;  %v10260_v4 = vrot.slane %v8716_v37, 4  ;;  %v10264_v39 = vld [vmem:[#allocation112_spill] sm:$0xff]  ;;  %10267 = vst [vmem:[#allocation22_spill] sm:$0xff] %v9011_v50 }
 0x4df   : > { %v3213_v45 = vsel %vm3079_vm12, %v3165_v59, %v10256_v20  ;;  %v10262_v20 = vrot.slane %v10261_v10, 4  ;;  %v10263_v31 = vrot.slane %v8731_v46, 4 }
 0x4e0   : > { %v3265_v49 = vmul.f32 %v3213_v45, %v10239_v51  ;;  %v3100_v59 = vsel %vm3079_vm12, %v10260_v4, %v10259_v29  ;;  %v10265_v51 = vrot.slane %v10264_v39, 6  ;;  %v10266_v45 = vrot.slane %v8629_v52, 6 }
 0x4e1   : > { %v3212_v38 = vsel %vm3079_vm12, %v10263_v31, %v10262_v20  ;;  %v9013_v37 = vadd.f32 %v3661_v53, %v3629_v0  ;;  %v9015_v8 = vmul.f32 %v3709_v34, %v3661_v53  ;;  %v3475_v29 = vadd.f32 %v3443_v63, %v3291_v7 }
 0x4e2   : > { %v2906_v28 = vsel %vm981_vm6, %v10266_v45, %v10265_v51  ;;  %v3707_v4 = vmul.f32 %v8979_v6, %v3515_v60  ;;  %v9019_v46 = vadd.f32 %v3265_v49, %v7630_v22  ;;  %v3633_v31 = vmul.f32 %v8991_v35, %v3473_v36  ;;  %v10269_v51 = vld [vmem:[#allocation68_spill] sm:$0xff] }
 0x4e3   : > { %10268 = vst [vmem:[#allocation109_spill] sm:$0xff] %v9013_v37  ;;  %v3697_v52 = vmul.f32 %v8991_v35, %v8880_v27  ;;  %v3264_v20 = vmul.f32 %v3212_v38, %v10258_v48  ;;  %v4072_v45 = vmul.f32 %v10269_v51, %v9013_v37  ;;  %v3659_v0 = vadd.f32 %v3475_v29, %v3443_v63 }
 0x4e4   : > { %v3328_v34 = vmul.f32 %v3100_v59, %v10258_v48  ;;  %v2950_v53 = vmul.f32 %v2906_v28, %v10194_v61  ;;  %v9030_v50 = vadd.f32 %v3449_v16, %v9019_v46  ;;  %v3447_v36 = vmul.f32 %v3327_v62, %v3291_v7  ;;  %v9040_v48 = vpop.permute.xlu1 %4324 }
 0x4e5   : > { %v3785_v22 = vmul.f32 0.0, %v3697_v52  ;;  %v3296_v49 = vadd.f32 %v3264_v20, %v10261_v10  ;;  %4089 = vrot.lane.b32.xlu0 %v4072_v45, %s5667_s16  ;;  %v9034_v27 = vmul.f32 %v3707_v4, %v3659_v0  ;;  %v9036_v38 = vadd.f32 %v3659_v0, %v3443_v63  ;;  %v9053_v63 = vpop.permute.xlu0 %3882  ;;  %v10273_v0 = vld [vmem:[#allocation104_spill] sm:$0xff] }
 0x4e6   : > { %v3448_v51 = vmul.f32 %v3328_v34, %v8801_v25  ;;  %v3512_v37 = vmul.f32 %v3328_v34, %v8779_v43  ;;  %v9043_v61 = vadd.f32 %v3633_v31, %v9030_v50  ;;  %v2982_v16 = vadd.f32 %v2950_v53, %v10264_v39  ;;  %10270 = vst [vmem:[#allocation23_spill] sm:$0xff] %v9053_v63  ;;  %v10271_v25 = vld [vmem:[#allocation108_spill] sm:$0xff] }
 0x4e7   : > { %v9047_v59 = vmul.f32 %v3327_v62, %v8970_v33  ;;  %v9051_v7 = vmul.f32 %v10255_v13, %v8973_v18  ;;  %v4327_v10 = vmul.f32 %v10271_v25, %v9036_v38  ;;  %v9064_v62 = vmul.f32 %v10053_v32, %v7296_v23  ;;  %v10275_v25 = vld [vmem:[#allocation26_spill] sm:$0xff] }
 0x4e8   : > { %v3480_v43 = vadd.f32 %v3448_v51, %v3296_v49  ;;  %v3632_v28 = vmul.f32 %v3512_v37, %v8728_v57  ;;  %v3696_v4 = vmul.f32 %v3512_v37, %v8687_v14  ;;  %v9060_v31 = vadd.f32 %v3785_v22, %v9043_v61 }
 0x4e9   : > { %v3167_v39 = vrot.slane %v2982_v16, 4  ;;  %v3631_v52 = vmul.f32 0.0, %v9047_v59  ;;  %4343 = vrot.lane.b32.xlu1 %v4327_v10, %s5667_s16  ;;  %v3446_v57 = vmul.f32 %v8857_v5, %v8720_v41  ;;  %v9074_v14 = vmul.f32 %v8857_v5, %v8762_v12  ;;  %v9103_v63 = vpop.permute.xlu0 %4140 }
 0x4ea   : > { %10272 = vst [vmem:[#allocation39_spill] sm:$0xff] %v9060_v31  ;;  %v9068_v20 = vadd.f32 %v3632_v28, %v3480_v43  ;;  %v3784_v45 = vmul.f32 0.0, %v3696_v4  ;;  %v4073_v53 = vmul.f32 %v10273_v0, %v9060_v31  ;;  %v10274_v23 = vrot.slane %v8706_v42, 4  ;;  %v9096_v4 = vpop.permute.xlu1 %4020  ;;  %10280 = vst [vmem:[#allocation111_spill] sm:$0xff] %v9103_v63  ;;  %v10283_v31 = vld [vmem:[#allocation32_spill] sm:$0xff] }
 0x4eb   : > { %v3711_v51 = vmul.f32 %v9064_v62, %v9051_v7  ;;  %v10276_v10 = vrot.slane %v10275_v25, 4  ;;  %v9093_v5 = vadd.f32 %v3446_v57, %v8870_v2  ;;  %v3630_v42 = vmul.f32 0.0, %v9074_v14  ;;  %10277 = vst [vmem:[#allocation37_spill] sm:$0xff] %v9096_v4 }
 0x4ec   : > { %v3219_v22 = vsel %vm3079_vm12, %v10274_v23, %v3167_v39  ;;  %v9089_v28 = vadd.f32 %v3784_v45, %v9068_v20  ;;  %4091 = vrot.lane.b32.xlu0 %v4073_v53, %s5667_s16  ;;  %v3635_v23 = vmul.f32 %v3515_v60, %v3475_v29  ;;  %v3699_v58 = vmul.f32 %v3515_v60, %v8970_v33 }
 0x4ed   : > { %v3215_v41 = vsel %vm3079_vm12, %v3167_v39, %v10276_v10  ;;  %v3263_v12 = vmul.f32 %v3219_v22, %v8904_v3  ;;  %v10278_v39 = vld [vmem:[#allocation65_spill] sm:$0xff]  ;;  %v10279_v10 = vld [vmem:[#allocation66_spill] sm:$0xff]  ;;  %v9108_v22 = vadd.f32 %v3630_v42, %v9093_v5 }
 0x4ee   : > { %v3267_v0 = vmul.f32 %v3215_v41, %v10243_v9  ;;  %v3520_v45 = vmul.f32 %v10279_v10, %v10278_v39  ;;  %v10281_v3 = vld [vmem:[#allocation38_spill] sm:$0xff]  ;;  %v3452_v4 = vmul.f32 %v10278_v39, %v3296_v49  ;;  %v3787_v9 = vmul.f32 0.0, %v3699_v58 }
 0x4ef   : > { %v3945_v2 = vmul.f32 %v10281_v3, %v9089_v28  ;;  %v3295_v57 = vadd.f32 %v3263_v12, %v2982_v16  ;;  %v9114_v60 = vadd.f32 %v9108_v22, %v3630_v42  ;;  %v10282_v3 = vld [vmem:[#allocation51_spill] sm:$0xff]  ;;  %v10284_v42 = vld [vmem:[#allocation86_spill] sm:$0xff] }
 0x4f0   : > { %v3299_v53 = vadd.f32 %v3267_v0, %v10275_v25  ;;  %v3640_v29 = vmul.f32 %v3520_v45, %v3480_v43  ;;  %v3704_v41 = vmul.f32 %v3520_v45, %v3512_v37  ;;  %v3484_v16 = vadd.f32 %v3452_v4, %v10282_v3 }
 0x4f1   : > { %3963 = vrot.lane.b32.xlu1 %v3945_v2, %s5667_s16  ;;  %v3479_v33 = vadd.f32 %v3447_v36, %v3295_v57  ;;  %v3451_v63 = vmul.f32 %v8973_v18, %v3295_v57  ;;  %v3516_v43 = vmul.f32 %v10278_v39, %v3328_v34  ;;  %v4200_v0 = vmul.f32 %v10284_v42, %v9114_v60  ;;  %v9129_v18 = vpop.permute.xlu1 %4148  ;;  %v10285_v57 = vld [vmem:[#allocation67_spill] sm:$0xff]  ;;  %v3929_v34 = vpop.permute.xlu0 %3928 }
 0x4f2   : > { %v9119_v12 = vmul.f32 %v10255_v13, %v3299_v53  ;;  %v3672_v49 = vadd.f32 %v3640_v29, %v10283_v31  ;;  %v3792_v25 = vmul.f32 %v3704_v41, %v8750_v55  ;;  %v10286_v55 = vld [vmem:[#allocation73_spill] sm:$0xff]  ;;  %v10288_v42 = vld [vmem:[#allocation47_spill] sm:$0xff] }
 0x4f3   : > { %v9125_v37 = vmul.f32 %v9051_v7, %v3479_v33  ;;  %v3663_v36 = vadd.f32 %v3631_v52, %v3479_v33  ;;  %v3483_v58 = vadd.f32 %v3451_v63, %v3299_v53  ;;  %v3636_v13 = vmul.f32 %v3516_v43, %v8812_v30 }
 0x4f4   : > { %v9131_v4 = vadd.f32 %v3792_v25, %v3672_v49  ;;  %v3700_v2 = vmul.f32 %v3516_v43, %v8794_v15  ;;  %v9137_v29 = vmul.f32 %v10286_v55, %v10285_v57 }
 0x4f5   : > { %v9139_v39 = vmul.f32 %v3711_v51, %v3663_v36  ;;  %v9141_v41 = vadd.f32 %v3663_v36, %v3631_v52  ;;  %4217 = vrot.lane.b32.xlu1 %v4200_v0, %s5667_s16  ;;  %v9145_v63 = vmul.f32 %v8979_v6, %v3483_v58  ;;  %v9147_v53 = vadd.f32 %v3635_v23, %v3483_v58  ;;  %v10287_v23 = vld [vmem:[#allocation92_spill] sm:$0xff] }
 0x4f6   : > { %v3947_v30 = vmul.f32 %v3929_v34, %v9131_v4  ;;  %v9150_v33 = vadd.f32 %v3636_v13, %v3484_v16  ;;  %v3788_v15 = vmul.f32 0.0, %v3700_v2  ;;  %v3642_v3 = vmul.f32 %v9137_v29, %v8908_v17  ;;  %v9181_v13 = vpop.permute.xlu1 %4276 }
 0x4f7   : > { %v4328_v51 = vmul.f32 %v8375_v54, %v9141_v41  ;;  %v9157_v52 = vadd.f32 %v3787_v9, %v9147_v53  ;;  %v3706_v49 = vmul.f32 %v9137_v29, %v8877_v19  ;;  %v9163_v25 = vmul.f32 %v10287_v23, %v10279_v10  ;;  %v10289_v54 = vld [vmem:[#allocation106_spill] sm:$0xff] }
 0x4f8   : > { %v9166_v36 = vadd.f32 %v3788_v15, %v9150_v33  ;;  %v3674_v0 = vadd.f32 %v3642_v3, %v10288_v42  ;;  %v9171_v17 = vmul.f32 %v10018_v24, %v10251_v21  ;;  %v3528_v9 = vmul.f32 %v10289_v54, %v10287_v23 }
 0x4f9   : > { %4345 = vrot.lane.b32.xlu0 %v4328_v51, %s5667_s16  ;;  %v4329_v19 = vmul.f32 %v8840_v26, %v9157_v52  ;;  %3967 = vrot.lane.b32.xlu1 %v3947_v30, %s5667_s16  ;;  %v3794_v10 = vmul.f32 %v3706_v49, %v8814_v40  ;;  %v3644_v58 = vmul.f32 %v9163_v25, %v3484_v16  ;;  %v10290_v30 = vld [vmem:[#allocation62_spill] sm:$0xff] }
 0x4fa   : > { %v3946_v24 = vmul.f32 %v8781_v47, %v9166_v36  ;;  %v3708_v2 = vmul.f32 %v9163_v25, %v3516_v43  ;;  %v3641_v34 = vmul.f32 %v9171_v17, %v9030_v50  ;;  %v3705_v15 = vmul.f32 %v9171_v17, %v8991_v35  ;;  %v10291_v49 = vld [vmem:[#allocation34_spill] sm:$0xff] }
 0x4fb   : > { %v9190_v26 = vadd.f32 %v3794_v10, %v3674_v0  ;;  %v3676_v3 = vadd.f32 %v3644_v58, %v10290_v30  ;;  %v3648_v40 = vmul.f32 %v3528_v9, %v10283_v31  ;;  %v3712_v16 = vmul.f32 %v3528_v9, %v3520_v45  ;;  %v10292_v31 = vld [vmem:[#allocation105_spill] sm:$0xff]  ;;  %v10293_v45 = vld [vmem:[#allocation55_spill] sm:$0xff] }
 0x4fc   : > { %v3796_v51 = vmul.f32 %v3708_v2, %v8843_v1  ;;  %v3673_v23 = vadd.f32 %v3641_v34, %v10291_v49  ;;  %v3793_v47 = vmul.f32 %v3705_v15, %v8927_v44  ;;  %v3453_v43 = vmul.f32 %v10251_v21, %v9019_v46  ;;  %v4057_v1 = vpop.permute.xlu0 %4056  ;;  %v10294_v44 = vld [vmem:[#allocation60_spill] sm:$0xff]  ;;  %v10295_v21 = vld [vmem:[#allocation21_spill] sm:$0xff] }
 0x4fd   : > { %4347 = vrot.lane.b32.xlu0 %v4329_v19, %s5667_s16  ;;  %v4203_v35 = vmul.f32 %v8764_v56, %v9190_v26  ;;  %v3680_v50 = vadd.f32 %v3648_v40, %v8348_v11  ;;  %v3800_v0 = vmul.f32 %v3712_v16, %v9068_v20  ;;  %v3637_v9 = vmul.f32 %v10293_v45, %v10292_v31  ;;  %v10296_v11 = vld [vmem:[#allocation101_spill] sm:$0xff]  ;;  %v10297_v19 = vld [vmem:[#allocation35_spill] sm:$0xff]  ;;  %v10298_v34 = vld [vmem:[#allocation28_spill] sm:$0xff]  ;;  %v3937_v16 = vpop.permute.xlu1 %3936 }
 0x4fe   : > { %v9206_v10 = vadd.f32 %v3796_v51, %v3676_v3  ;;  %v9208_v58 = vadd.f32 %v3793_v47, %v3673_v23  ;;  %v3485_v2 = vadd.f32 %v3453_v43, %v10294_v44  ;;  %v3701_v46 = vmul.f32 %v10293_v45, %v10295_v21  ;;  %v10299_v40 = vld [vmem:[#allocation19_spill] sm:$0xff]  ;;  %v10300_v51 = vld [vmem:[#allocation50_spill] sm:$0xff] }
 0x4ff   : > { %4223 = vrot.lane.b32.xlu1 %v4203_v35, %s5667_s16  ;;  %v9214_v56 = vadd.f32 %v3800_v0, %v3680_v50  ;;  %v3717_v20 = vmul.f32 %v10297_v19, %v10296_v11  ;;  %v3454_v15 = vmul.f32 %v10285_v57, %v10298_v34  ;;  %v3518_v3 = vmul.f32 %v10285_v57, %v10299_v40  ;;  %v10301_v0 = vld [vmem:[#allocation64_spill] sm:$0xff]  ;;  %v10302_v57 = vld [vmem:[#allocation74_spill] sm:$0xff] }
 0x500   : > { %v3948_v23 = vmul.f32 %v10300_v51, %v9206_v10  ;;  %v3645_v47 = vmul.f32 %v10296_v11, %v3485_v2  ;;  %v3669_v43 = vadd.f32 %v3637_v9, %v3485_v2  ;;  %v4075_v35 = vmul.f32 %v4057_v1, %v9208_v58  ;;  %v10303_v34 = vld [vmem:[#allocation96_spill] sm:$0xff]  ;;  %v10304_v2 = vld [vmem:[#allocation31_spill] sm:$0xff] }
 0x501   : > { %3965 = vrot.lane.b32.xlu0 %v3946_v24, %s5667_s16  ;;  %v3789_v50 = vmul.f32 0.0, %v3701_v46  ;;  %v3486_v31 = vadd.f32 %v3454_v15, %v10301_v0  ;;  %v3638_v45 = vmul.f32 %v3518_v3, %v9093_v5  ;;  %v3702_v21 = vmul.f32 %v3518_v3, %v9074_v14  ;;  %v4313_v5 = vpop.permute.xlu0 %4312  ;;  %v4065_v0 = vpop.permute.xlu1 %4064 }
 0x502   : > { %v3805_v44 = vmul.f32 %v3717_v20, %v3669_v43  ;;  %v3677_v19 = vadd.f32 %v3645_v47, %v10302_v57  ;;  %v3526_v40 = vmul.f32 %v10303_v34, %v10286_v55  ;;  %v3487_v1 = vadd.f32 %v9119_v12, %v10304_v2  ;;  %v10305_v55 = vld [vmem:[#allocation63_spill] sm:$0xff]  ;;  %v10307_v12 = vld [vmem:[#allocation76_spill] sm:$0xff] }
 0x503   : > { %4095 = vrot.lane.b32.xlu1 %v4075_v35, %s5667_s16  ;;  %v9234_v9 = vadd.f32 %v3789_v50, %v3669_v43  ;;  %v3670_v24 = vadd.f32 %v3638_v45, %v3486_v31  ;;  %v3703_v46 = vmul.f32 %v9051_v7, %v9047_v59  ;;  %v3790_v11 = vmul.f32 0.0, %v3702_v21  ;;  %v10306_v35 = vld [vmem:[#allocation103_spill] sm:$0xff] }
 0x504   : > { %v9241_v14 = vadd.f32 %v9015_v8, %v3677_v19  ;;  %v3646_v20 = vmul.f32 %v3526_v40, %v3486_v31  ;;  %v3710_v15 = vmul.f32 %v3526_v40, %v3518_v3  ;;  %v3671_v47 = vadd.f32 %v9125_v37, %v3487_v1  ;;  %v10308_v8 = vld [vmem:[#allocation72_spill] sm:$0xff]  ;;  %v10309_v21 = vld [vmem:[#allocation71_spill] sm:$0xff] }
 0x505   : > { %3969 = vrot.lane.b32.xlu0 %v3948_v23, %s5667_s16  ;;  %v4074_v51 = vmul.f32 %v10305_v55, %v9234_v9  ;;  %v3791_v43 = vmul.f32 0.0, %v3703_v46  ;;  %v3529_v50 = vmul.f32 %v10307_v12, %v10306_v35  ;;  %v3949_v59 = vmul.f32 %v3937_v16, %v9214_v56  ;;  %v10310_v16 = vld [vmem:[#allocation40_spill] sm:$0xff]  ;;  %v10311_v46 = vld [vmem:[#allocation46_spill] sm:$0xff] }
 0x506   : > { %v9250_v7 = vadd.f32 %v3790_v11, %v3670_v24  ;;  %v3678_v45 = vadd.f32 %v3646_v20, %v10308_v8  ;;  %v3798_v3 = vmul.f32 %v3710_v15, %v9108_v22  ;;  %v3675_v57 = vadd.f32 %v9145_v63, %v10309_v21  ;;  %v10312_v22 = vld [vmem:[#allocation42_spill] sm:$0xff]  ;;  %v10313_v15 = vld [vmem:[#allocation41_spill] sm:$0xff]  ;;  %v9276_v63 = vpop.permute.xlu0 %3877 }
 0x507   : > { %4093 = vrot.lane.b32.xlu1 %v4074_v51, %s5667_s16  ;;  %v9255_v23 = vadd.f32 %v3791_v43, %v3671_v47  ;;  %v3649_v31 = vmul.f32 %v3529_v50, %v10291_v49  ;;  %v3713_v37 = vmul.f32 %v3529_v50, %v9171_v17  ;;  %v3532_v2 = vmul.f32 %v10310_v16, %v10289_v54  ;;  %v10314_v51 = vld [vmem:[#allocation48_spill] sm:$0xff]  ;;  %v10315_v35 = vld [vmem:[#allocation30_spill] sm:$0xff] }
 0x508   : > { %v9261_v19 = vadd.f32 %v3798_v3, %v3678_v45  ;;  %v9266_v11 = vadd.f32 %v3805_v44, %v10311_v46  ;;  %v4076_v20 = vmul.f32 %v10312_v22, %v9241_v14  ;;  %v9274_v55 = vadd.f32 %v9034_v27, %v3675_v57  ;;  %v4193_v45 = vpop.permute.xlu1 %4192  ;;  %v10317_v3 = vld [vmem:[#allocation27_spill] sm:$0xff]  ;;  %v10319_v57 = vld [vmem:[#allocation78_spill] sm:$0xff]  ;;  %v10321_v22 = vld [vmem:[#allocation81_spill] sm:$0xff] }
 0x509   : > { %3971 = vrot.lane.b32.xlu0 %v3949_v59, %s5667_s16  ;;  %v3681_v49 = vadd.f32 %v3649_v31, %v10313_v15  ;;  %v3801_v17 = vmul.f32 %v3713_v37, %v9043_v61  ;;  %v4202_v54 = vmul.f32 %v10314_v51, %v9250_v7  ;;  %v3652_v44 = vmul.f32 %v3532_v2, %v10290_v30  ;;  %v10316_v61 = vld [vmem:[#allocation58_spill] sm:$0xff]  ;;  %v10318_v30 = vld [vmem:[#allocation84_spill] sm:$0xff] }
 0x50a   : > { %v3716_v43 = vmul.f32 %v3532_v2, %v9163_v25  ;;  %v4330_v12 = vmul.f32 %v10315_v35, %v9255_v23  ;;  %v3530_v27 = vmul.f32 %v10316_v61, %v10303_v34  ;;  %v3647_v59 = vmul.f32 %v9064_v62, %v3487_v1  ;;  %v10320_v2 = vld [vmem:[#allocation22_spill] sm:$0xff]  ;;  %v9313_v35 = vpop.permute.xlu0 %4264 }
 0x50b   : > { %4097 = vrot.lane.b32.xlu1 %v4076_v20, %s5667_s16  ;;  %v9285_v50 = vadd.f32 %v3801_v17, %v3681_v49  ;;  %v3684_v31 = vadd.f32 %v3652_v44, %v10317_v3  ;;  %v3534_v25 = vmul.f32 %v10318_v30, %v10316_v61  ;;  %v3719_v16 = vmul.f32 %v10319_v57, %v9064_v62  ;;  %v10322_v62 = vld [vmem:[#allocation77_spill] sm:$0xff]  ;;  %v4440_v30 = vld [vmem:[%s9540_s13 + $0x8] sm:$0xff] }
 0x50c   : > { %v3804_v37 = vmul.f32 %v3716_v43, %v9150_v33  ;;  %v4204_v46 = vmul.f32 %v10320_v2, %v9261_v19  ;;  %v3650_v34 = vmul.f32 %v3530_v27, %v10288_v42  ;;  %v3714_v1 = vmul.f32 %v3530_v27, %v9137_v29  ;;  %v10324_v42 = vld [vmem:[#allocation70_spill] sm:$0xff]  ;;  %v10325_v27 = vld [vmem:[#allocation25_spill] sm:$0xff]  ;;  %v10328_v57 = vld [vmem:[#allocation79_spill] sm:$0xff] }
 0x50d   : > { %4221 = vrot.lane.b32.xlu0 %v4202_v54, %s5667_s16  ;;  %v3679_v20 = vadd.f32 %v3647_v59, %v10321_v22  ;;  %v3654_v33 = vmul.f32 %v3534_v25, %v10308_v8  ;;  %v3718_v49 = vmul.f32 %v3534_v25, %v3526_v40  ;;  %v3807_v17 = vmul.f32 %v3719_v16, %v3671_v47  ;;  %v10323_v54 = vld [vmem:[#allocation102_spill] sm:$0xff]  ;;  %v4441_v16 = vld [vmem:[%s9540_s13 + $0x10] sm:$0xff]  ;;  %v4442_v2 = vld [vmem:[%s9540_s13 + $0x18] sm:$0xff] }
 0x50e   : > { %v9302_v15 = vadd.f32 %v3804_v37, %v3684_v31  ;;  %v3682_v51 = vadd.f32 %v3650_v34, %v10322_v62  ;;  %v3802_v44 = vmul.f32 %v3714_v1, %v10323_v54  ;;  %v3531_v29 = vmul.f32 %v10324_v42, %v10053_v32  ;;  %v10326_v47 = vld [vmem:[#allocation18_spill] sm:$0xff]  ;;  %v9327_v37 = vpop.permute.xlu1 %3887  ;;  %v3941_v22 = vpop.permute.xlu0 %3940  ;;  %v4446_v54 = vld [vmem:[%s9540_s13 + $0x38] sm:$0xff] }
 0x50f   : > { %4349 = vrot.lane.b32.xlu1 %v4330_v12, %s5667_s16  ;;  %v9309_v43 = vadd.f32 %v9139_v39, %v3679_v20  ;;  %v4331_v61 = vmul.f32 %v4313_v5, %v9274_v55  ;;  %v3686_v8 = vadd.f32 %v3654_v33, %v10325_v27  ;;  %v3806_v40 = vmul.f32 %v3718_v49, %v3670_v24  ;;  %v10327_v39 = vld [vmem:[#allocation83_spill] sm:$0xff]  ;;  %v4439_v24 = vld [vmem:[%s9540_s13] sm:$0xff] }
 0x510   : > { %v9318_v59 = vadd.f32 %v3807_v17, %v10326_v47  ;;  %v9321_v12 = vadd.f32 %v3802_v44, %v3682_v51  ;;  %v3651_v31 = vmul.f32 %v3531_v29, %v10309_v21  ;;  %v3715_v32 = vmul.f32 %v3531_v29, %v8979_v6  ;;  %v4444_v33 = vld [vmem:[%s9540_s13 + $0x28] sm:$0xff]  ;;  %v4445_v51 = vld [vmem:[%s9540_s13 + $0x30] sm:$0xff] }
 0x511   : > { %4225 = vrot.lane.b32.xlu0 %v4204_v46, %s5667_s16  ;;  %v4332_v3 = vmul.f32 %v10327_v39, %v9309_v43  ;;  %v9329_v5 = vadd.f32 %v3806_v40, %v3686_v8  ;;  %v4077_v25 = vmul.f32 %v4065_v0, %v9285_v50  ;;  %v10329_v46 = vld [vmem:[#allocation110_spill] sm:$0xff]  ;;  %v5361_v1 = vpack.c.bf16 %v4440_v30, %v4439_v24  ;;  %v10330_v8 = vld [vmem:[#allocation43_spill] sm:$0xff]  ;;  %v10333_v30 = vld [vmem:[#allocation85_spill] sm:$0xff] }
 0x512   : > { %v3683_v21 = vadd.f32 %v3651_v31, %v10328_v57  ;;  %v3803_v6 = vmul.f32 %v3715_v32, %v9147_v53  ;;  %v4078_v34 = vmul.f32 %v10329_v46, %v9266_v11  ;;  %v5365_v20 = vpack.c.bf16 %v4442_v2, %v4441_v16  ;;  %v4443_v53 = vld [vmem:[%s9540_s13 + $0x20] sm:$0xff]  ;;  %v9358_v17 = vpop.permute.xlu1 %4016  ;;  %v9369_v42 = vpop.permute.xlu0 %3892  ;;  %v10332_v24 = vld [vmem:[#allocation91_spill] sm:$0xff] }
 0x513   : > { %4351 = vrot.lane.b32.xlu1 %v4331_v61, %s5667_s16  ;;  %v3950_v49 = vmul.f32 %v3941_v22, %v9302_v15  ;;  %5362 = vmatprep.subr.bf16.mxu1 %v5361_v1  ;;  %v5369_v62 = vpack.c.bf16 %v4444_v33, %v4443_v53  ;;  %v4205_v44 = vmul.f32 %v4193_v45, %v9321_v12  ;;  %v9385_v32 = vld [vmem:[%s9539_s12] ss:$0 sm:$0xff]  ;;  %v10335_v2 = vld [vmem:[#allocation11_spill] sm:$0xff] }
 0x514   : > { %v3835_v0 = vadd.f32 %v3803_v6, %v3683_v21  ;;  %5364 = vmatpush3.bf16.msra.mxu1 %v5361_v1  ;;  %v4334_v29 = vmul.f32 %v9040_v48, %v9318_v59  ;;  %v5373_v61 = vpack.c.bf16 %v4446_v54, %v4445_v51  ;;  %v4206_v40 = vmul.f32 %v10330_v8, %v9329_v5  ;;  %v10331_v48 = vld [vmem:[#allocation3_spill] sm:$0xff]  ;;  %v10334_v57 = vld [vmem:[#allocation2_spill] sm:$0xff]  ;;  %v10339_v51 = vld [vmem:[#allocation5_spill] sm:$0xff] }
 0x515   : > { %4099 = vrot.lane.b32.xlu0 %v4077_v25, %s5667_s16  ;;  %5366 = vmatprep.subr.bf16.mxu1 %v5365_v20  ;;  %v3896_v25 = vmul.f32 %v10333_v30, %v10332_v24  ;;  %v4376_v21 = vsub.f32 0.0, %v10334_v57  ;;  %v3848_v46 = vmul.f32 %v9385_v32, %v10335_v2  ;;  %v10338_v53 = vld [vmem:[#allocation10_spill] sm:$0xff]  ;;  %v4377_v54 = vsub.f32 0.0, %v10339_v51  ;;  %v10342_v24 = vld [vmem:[#allocation93_spill] sm:$0xff]  ;;  %v10343_v30 = vld [vmem:[#allocation44_spill] sm:$0xff] }
 0x516   : > { %v4273_v27 = vpop.permute.xlu1 %4272  ;;  %v4321_v45 = vpop.permute.xlu0 %4320  ;;  %v3847_v33 = vmul.f32 %v9385_v32, %v10338_v53 }
 0x517   : > { %4101 = vrot.lane.b32.xlu1 %v4078_v34, %s5667_s16  ;;  %v9377_v47 = vmul.f32 %v4273_v27, %v3835_v0  ;;  %v4333_v39 = vmul.f32 %v4321_v45, %v3835_v0  ;;  %v10336_v34 = vld [vmem:[#allocation88_spill] sm:$0xff]  ;;  %v10337_v0 = vld [vmem:[#allocation95_spill] sm:$0xff]  ;;  %v3904_v22 = vadd.f32 %v3896_v25, %v3848_v46  ;;  %v4023_v25 = vmul.f32 %v10343_v30, %v10342_v24 }
 0x518   : > { %5368 = vmatpush3.bf16.msra.mxu1 %v5365_v20  ;;  %v3895_v1 = vmul.f32 %v10337_v0, %v10336_v34  ;;  %v4385_v20 = vmul.f32 1.442695, %v4376_v21  ;;  %v10344_v34 = vld [vmem:[#allocation90_spill] sm:$0xff]  ;;  %v10345_v0 = vld [vmem:[#allocation56_spill] sm:$0xff] }
 0x519   : > { %3973 = vrot.lane.b32.xlu0 %v3950_v49, %s5667_s16  ;;  %5370 = vmatprep.subr.bf16.mxu1 %v5369_v62 }
 0x51a   : > { %v9390_v6 = vpop.permute.xlu0 %4144  ;;  %v3903_v8 = vadd.f32 %v3895_v1, %v3847_v33  ;;  %v10346_v33 = vld [vmem:[#allocation57_spill] sm:$0xff] }
 0x51b   : > { %4353 = vrot.lane.b32.xlu1 %v4332_v3, %s5667_s16  ;;  %v4375_v3 = vsub.f32 0.0, %v10331_v48 }
 0x51c   : > { %5372 = vmatpush3.bf16.msra.mxu1 %v5369_v62 }
 0x51d   : > { %4227 = vrot.lane.b32.xlu0 %v4205_v44, %s5667_s16  ;;  %5374 = vmatprep.subr.bf16.mxu1 %v5373_v61  ;;  %v4383_v31 = vmul.f32 1.442695, %v4375_v3 }
 0x51f   : > { %4357 = vrot.lane.b32.xlu1 %v4334_v29, %s5667_s16  ;;  %5601 = vpow2.f32 %v4383_v31  ;;  %v10340_v29 = vld [vmem:[#allocation109_spill] sm:$0xff]  ;;  %v4387_v31 = vmul.f32 1.442695, %v4377_v54 }
 0x520   : > { %5376 = vmatpush3.bf16.msra.mxu1 %v5373_v61  ;;  %v10341_v61 = vld [vmem:[#allocation97_spill] sm:$0xff]  ;;  %5603 = vpow2.f32 %v4385_v20  ;;  %v4279_v20 = vmul.f32 %v10346_v33, %v9036_v38  ;;  %v10349_v38 = vld [vmem:[#allocation82_spill] sm:$0xff] }
 0x521   : > { %4229 = vrot.lane.b32.xlu0 %v4206_v40, %s5667_s16  ;;  %v4024_v27 = vmul.f32 %v10341_v61, %v10340_v29  ;;  %v10347_v61 = vld [vmem:[#allocation94_spill] sm:$0xff] }
 0x525   : > { %4355 = vrot.lane.b32.xlu0 %v4333_v39, %s5667_s16 }
 0x529   : > { %v5602_v62 = vpop.eup %5601 }
 0x52a   : > { %v4399_v39 = vadd.f32 1.0, %v5602_v62  ;;  %v5604_v1 = vpop.eup %5603 }
 0x52c   : > { %5605 = vrcp.f32 %v4399_v39 }
 0x52d   : > { %5607 = vpow2.f32 %v4387_v31 }
 0x539   : > { %v3960_v16 = vpop.permute.xlu1 %3959 }
 0x53a   : > { %v3983_v3 = vadd.f32 %v3960_v16, %v3903_v8  ;;  %v5606_v8 = vpop.eup %5605 }
 0x53b   : > { %v5608_v39 = vpop.eup %5607 }
 0x53c   : > { %v4031_v21 = vadd.f32 %v4023_v25, %v3983_v3  ;;  %v10348_v3 = vld [vmem:[#allocation4_spill] sm:$0xff]  ;;  %v4423_v25 = vmul.f32 %v5606_v8, %v10331_v48  ;;  %v10355_v8 = vld [vmem:[#allocation14_spill] sm:$0xff] }
 0x53d   : > { %v4378_v31 = vsub.f32 0.0, %v10348_v3 }
 0x542   : > { %v4216_v40 = vpop.permute.xlu1 %4215 }
 0x545   : > { %v3962_v49 = vpop.permute.xlu0 %3961 }
 0x546   : > { %v3984_v44 = vadd.f32 %v3962_v49, %v3904_v22  ;;  %v4151_v22 = vmul.f32 %v10345_v0, %v10344_v34  ;;  %v10350_v34 = vld [vmem:[#allocation7_spill] sm:$0xff] }
 0x547   : > { %v4379_v0 = vsub.f32 0.0, %v10350_v34 }
 0x548   : > { %v4032_v45 = vadd.f32 %v4024_v27, %v3984_v44  ;;  %v4400_v44 = vadd.f32 1.0, %v5604_v1  ;;  %v4152_v27 = vmul.f32 %v10347_v61, %v9114_v60 }
 0x549   : > { %v4391_v1 = vmul.f32 1.442695, %v4379_v0 }
 0x54a   : > { %5609 = vrcp.f32 %v4400_v44  ;;  %v3899_v44 = vmul.f32 %v9276_v63, %v9131_v4 }
 0x54f   : > { %v4088_v2 = vpop.permute.xlu1 %4087  ;;  %v4220_v46 = vpop.permute.xlu0 %4219 }
 0x550   : > { %v4111_v53 = vadd.f32 %v4088_v2, %v4031_v21  ;;  %v4401_v2 = vadd.f32 1.0, %v5608_v39  ;;  %v3851_v39 = vmul.f32 %v9385_v32, %v10355_v8 }
 0x552   : > { %v4159_v49 = vadd.f32 %v4151_v22, %v4111_v53  ;;  %v10351_v53 = vld [vmem:[#allocation12_spill] sm:$0xff]  ;;  %5611 = vrcp.f32 %v4401_v2 }
 0x553   : > { %v3849_v60 = vmul.f32 %v9385_v32, %v10351_v53  ;;  %v3907_v53 = vadd.f32 %v3899_v44, %v3851_v39  ;;  %v10361_v44 = vld [vmem:[#allocation61_spill] sm:$0xff] }
 0x554   : > { %v4239_v62 = vadd.f32 %v4216_v40, %v4159_v49  ;;  %v3897_v40 = vmul.f32 %v10349_v38, %v9089_v28  ;;  %v3898_v8 = vmul.f32 %v10361_v44, %v9166_v36 }
 0x556   : > { %v4287_v54 = vadd.f32 %v4279_v20, %v4239_v62  ;;  %v3905_v49 = vadd.f32 %v3897_v40, %v3849_v60  ;;  %v10352_v20 = vld [vmem:[#allocation39_spill] sm:$0xff]  ;;  %v10353_v62 = vld [vmem:[#allocation49_spill] sm:$0xff]  ;;  %v10358_v40 = vld [vmem:[#allocation80_spill] sm:$0xff] }
 0x557   : > { %v4090_v16 = vpop.permute.xlu0 %4089  ;;  %v4280_v2 = vmul.f32 %v10358_v40, %v9141_v41 }
 0x558   : > { %v4112_v29 = vadd.f32 %v4090_v16, %v4032_v45  ;;  %v4389_v45 = vmul.f32 1.442695, %v4378_v31  ;;  %v4025_v16 = vmul.f32 %v10353_v62, %v10352_v20  ;;  %v5610_v31 = vpop.eup %5609 }
 0x559   : > { %v4424_v4 = vmul.f32 %v5610_v31, %v10334_v57 }
 0x55a   : > { %v4160_v24 = vadd.f32 %v4152_v27, %v4112_v29  ;;  %5613 = vpow2.f32 %v4389_v45  ;;  %v10354_v29 = vld [vmem:[#allocation6_spill] sm:$0xff] }
 0x55b   : > { %v4344_v30 = vpop.permute.xlu1 %4343  ;;  %v4380_v61 = vsub.f32 0.0, %v10354_v29  ;;  %5615 = vpow2.f32 %v4391_v1 }
 0x55c   : > { %v4367_v21 = vadd.f32 %v4344_v30, %v4287_v54  ;;  %v10356_v30 = vld [vmem:[#allocation99_spill] sm:$0xff] }
 0x55d   : > { %v4393_v63 = vmul.f32 1.442695, %v4380_v61  ;;  %v10362_v61 = vld [vmem:[#allocation8_spill] sm:$0xff] }
 0x55e   : > { %v4431_v22 = vmul.f32 %v4423_v25, %v4367_v21  ;;  %v4092_v28 = vpop.permute.xlu0 %4091  ;;  %v10357_v25 = vld [vmem:[#allocation53_spill] sm:$0xff]  ;;  %v4382_v39 = vsub.f32 0.0, %v10362_v61 }
 0x55f   : > { %v4153_v21 = vmul.f32 %v10357_v25, %v10356_v30  ;;  %5617 = vpow2.f32 %v4393_v63 }
 0x560   : > { %5179 = vmatprep.mubr.msk.f32.mxu1 %vm1197_vm11, %v4431_v22 }
 0x563   : > { %v3964_v33 = vpop.permute.xlu1 %3963 }
 0x564   : > { %v3985_v48 = vadd.f32 %v3964_v33, %v3905_v49  ;;  %v10359_v49 = vld [vmem:[#allocation29_spill] sm:$0xff] }
 0x565   : > { %v4281_v1 = vmul.f32 %v10359_v49, %v9157_v52 }
 0x566   : > { %v4033_v54 = vadd.f32 %v4025_v16, %v3985_v48  ;;  %v10360_v16 = vld [vmem:[#allocation100_spill] sm:$0xff] }
 0x567   : > { %v4218_v27 = vpop.permute.xlu1 %4217 }
 0x568   : > { %v4113_v38 = vadd.f32 %v4092_v28, %v4033_v54  ;;  %v4240_v0 = vadd.f32 %v4218_v27, %v4160_v24  ;;  %v4027_v28 = vmul.f32 %v10360_v16, %v9208_v58  ;;  %v5612_v54 = vpop.eup %5611 }
 0x569   : > { %v5614_v41 = vpop.eup %5613  ;;  %v4425_v52 = vmul.f32 %v5612_v54, %v10339_v51 }
 0x56a   : > { %v4288_v45 = vadd.f32 %v4280_v2, %v4240_v0  ;;  %v4161_v22 = vadd.f32 %v4153_v21, %v4113_v38  ;;  %v5616_v58 = vpop.eup %5615  ;;  %v4402_v21 = vadd.f32 1.0, %v5614_v41  ;;  %v10364_v38 = vld [vmem:[#allocation9_spill] sm:$0xff] }
 0x56b   : > { %v4346_v60 = vpop.permute.xlu0 %4345  ;;  %v3968_v33 = vpop.permute.xlu1 %3967  ;;  %v4381_v40 = vsub.f32 0.0, %v10364_v38  ;;  %v4403_v51 = vadd.f32 1.0, %v5616_v58  ;;  %v4283_v58 = vmul.f32 %v9313_v35, %v9274_v55  ;;  %v10373_v55 = vld [vmem:[#allocation36_spill] sm:$0xff] }
 0x56c   : > { %v4368_v48 = vadd.f32 %v4346_v60, %v4288_v45  ;;  %v4241_v20 = vadd.f32 %v4220_v46, %v4161_v22  ;;  %v3987_v62 = vadd.f32 %v3968_v33, %v3907_v53  ;;  %v10363_v46 = vld [vmem:[#allocation13_spill] sm:$0xff]  ;;  %v10365_v45 = vld [vmem:[#allocation23_spill] sm:$0xff]  ;;  %v4397_v53 = vmul.f32 1.442695, %v4382_v39 }
 0x56d   : > { %v3850_v25 = vmul.f32 %v9385_v32, %v10363_v46  ;;  %v3900_v22 = vmul.f32 %v10365_v45, %v9206_v10  ;;  %v10366_v60 = vld [vmem:[#allocation15_spill] sm:$0xff]  ;;  %5619 = vrcp.f32 %v4402_v21  ;;  %v10368_v10 = vld [vmem:[#allocation20_spill] sm:$0xff]  ;;  %v4282_v35 = vmul.f32 %v10373_v55, %v9255_v23 }
 0x56e   : > { %v4432_v24 = vmul.f32 %v4424_v4, %v4368_v48  ;;  %v4289_v27 = vadd.f32 %v4281_v1, %v4241_v20  ;;  %v4035_v57 = vadd.f32 %v4027_v28, %v3987_v62  ;;  %v3852_v49 = vmul.f32 %v9385_v32, %v10366_v60  ;;  %v10367_v1 = vld [vmem:[#allocation52_spill] sm:$0xff]  ;;  %v10370_v39 = vld [vmem:[#allocation87_spill] sm:$0xff] }
 0x56f   : > { %v4348_v31 = vpop.permute.xlu0 %4347  ;;  %v3906_v36 = vadd.f32 %v3898_v8, %v3850_v25  ;;  %v4026_v33 = vmul.f32 %v10367_v1, %v9234_v9  ;;  %v4395_v48 = vmul.f32 1.442695, %v4381_v40  ;;  %v3901_v62 = vmul.f32 %v9327_v37, %v9214_v56  ;;  %v10371_v37 = vld [vmem:[#allocation69_spill] sm:$0xff] }
 0x570   : > { %v4369_v30 = vadd.f32 %v4348_v31, %v4289_v27  ;;  %5180 = vmatmul.mubr.msk.f32.vlgmr.msra.gmra.mrb[68].mxu1 %vm1197_vm11, %v4432_v24  ;;  %v3908_v16 = vadd.f32 %v3900_v22, %v3852_v49  ;;  %v4155_v28 = vmul.f32 %v10368_v10, %v9190_v26  ;;  %5621 = vpow2.f32 %v4397_v53  ;;  %v10369_v27 = vld [vmem:[#allocation16_spill] sm:$0xff]  ;;  %v5618_v26 = vpop.eup %5617 }
 0x571   : > { %v4224_v2 = vpop.permute.xlu1 %4223  ;;  %v3853_v44 = vmul.f32 %v9385_v32, %v10369_v27  ;;  %5623 = vrcp.f32 %v4403_v51  ;;  %v4028_v31 = vmul.f32 %v10370_v39, %v9241_v14  ;;  %v4404_v45 = vadd.f32 1.0, %v5618_v26 }
 0x572   : > { %v4433_v0 = vmul.f32 %v4425_v52, %v4369_v30  ;;  %5625 = vpow2.f32 %v4395_v48  ;;  %v4154_v30 = vmul.f32 %v10371_v37, %v9250_v7 }
 0x573   : > { %v3966_v4 = vpop.permute.xlu0 %3965  ;;  %v3909_v52 = vadd.f32 %v3901_v62, %v3853_v44  ;;  %5627 = vrcp.f32 %v4404_v45  ;;  %v3902_v44 = vmul.f32 %v9369_v42, %v9302_v15 }
 0x574   : > { %v3986_v63 = vadd.f32 %v3966_v4, %v3906_v36  ;;  %5182 = vmatprep.mubr.msk.f32.mxu1 %vm1197_vm11, %v4433_v0  ;;  %v4029_v36 = vmul.f32 %v9358_v17, %v9285_v50  ;;  %v10372_v4 = vld [vmem:[#allocation111_spill] sm:$0xff] }
 0x575   : > { %v4096_v20 = vpop.permute.xlu1 %4095  ;;  %v4156_v7 = vmul.f32 %v10372_v4, %v9261_v19  ;;  %v10374_v19 = vld [vmem:[#allocation98_spill] sm:$0xff] }
 0x576   : > { %v4115_v54 = vadd.f32 %v4096_v20, %v4035_v57  ;;  %v4034_v41 = vadd.f32 %v4026_v33, %v3986_v63 }
 0x577   : > { %v3970_v24 = vpop.permute.xlu0 %3969  ;;  %v5620_v63 = vpop.eup %5619 }
 0x578   : > { %v3988_v8 = vadd.f32 %v3970_v24, %v3908_v16  ;;  %v4163_v9 = vadd.f32 %v4155_v28, %v4115_v54  ;;  %v4426_v62 = vmul.f32 %v5620_v63, %v10348_v3  ;;  %v4284_v28 = vmul.f32 %v10374_v19, %v9309_v43  ;;  %v10375_v3 = vld [vmem:[#allocation17_spill] sm:$0xff] }
 0x579   : > { %v4094_v56 = vpop.permute.xlu1 %4093  ;;  %v4157_v43 = vmul.f32 %v9390_v6, %v9321_v12 }
 0x57a   : > { %v4114_v57 = vadd.f32 %v4094_v56, %v4034_v41  ;;  %v4036_v46 = vadd.f32 %v4028_v31, %v3988_v8  ;;  %v4243_v25 = vadd.f32 %v4224_v2, %v4163_v9  ;;  %v5622_v1 = vpop.eup %5621  ;;  %v3854_v56 = vmul.f32 %v9385_v32, %v10375_v3 }
 0x57b   : > { %v3972_v21 = vpop.permute.xlu0 %3971  ;;  %v5624_v48 = vpop.eup %5623  ;;  %v4406_v41 = vadd.f32 1.0, %v5622_v1 }
 0x57c   : > { %v3989_v40 = vadd.f32 %v3972_v21, %v3909_v52  ;;  %v4162_v0 = vadd.f32 %v4154_v30, %v4114_v57  ;;  %v4291_v14 = vadd.f32 %v4283_v58, %v4243_v25  ;;  %v5626_v17 = vpop.eup %5625  ;;  %v4427_v54 = vmul.f32 %v5624_v48, %v10350_v34  ;;  %v10376_v57 = vld [vmem:[#allocation37_spill] sm:$0xff] }
 0x57d   : > { %v4098_v22 = vpop.permute.xlu1 %4097  ;;  %v4405_v9 = vadd.f32 1.0, %v5626_v17  ;;  %5629 = vrcp.f32 %v4406_v41  ;;  %v3910_v37 = vadd.f32 %v3902_v44, %v3854_v56  ;;  %v5628_v15 = vpop.eup %5627 }
 0x57e   : > { %v4116_v53 = vadd.f32 %v4098_v22, %v4036_v46  ;;  %v4037_v51 = vadd.f32 %v4029_v36, %v3989_v40  ;;  %v4030_v46 = vmul.f32 %v10376_v57, %v9266_v11  ;;  %v4428_v58 = vmul.f32 %v5628_v15, %v10354_v29 }
 0x57f   : > { %v4222_v60 = vpop.permute.xlu0 %4221  ;;  %5631 = vrcp.f32 %v4405_v9  ;;  %v4158_v36 = vmul.f32 %v9129_v18, %v9329_v5  ;;  %v4286_v29 = vmul.f32 %v9181_v13, %v9318_v59  ;;  %v4632_v13 = vld [vmem:[%s9541_s14] sm:$0xff]  ;;  %v4633_v59 = vld [vmem:[%s9541_s14 + $0x8] sm:$0xff] }
 0x580   : > { %v4242_v2 = vadd.f32 %v4222_v60, %v4162_v0  ;;  %v4164_v49 = vadd.f32 %v4156_v7, %v4116_v53 }
 0x581   : > { %v4350_v33 = vpop.permute.xlu1 %4349 }
 0x582   : > { %v4290_v50 = vadd.f32 %v4282_v35, %v4242_v2 }
 0x583   : > { %v4226_v20 = vpop.permute.xlu0 %4225 }
 0x584   : > { %v4244_v16 = vadd.f32 %v4226_v20, %v4164_v49  ;;  %v4370_v10 = vadd.f32 %v4350_v33, %v4290_v50 }
 0x585   : > { %v4352_v24 = vpop.permute.xlu1 %4351 }
 0x586   : > { %v4434_v27 = vmul.f32 %v4426_v62, %v4370_v10  ;;  %v4371_v23 = vadd.f32 %v4352_v24, %v4291_v14  ;;  %v4292_v8 = vadd.f32 %v4284_v28, %v4244_v16 }
 0x587   : > { %v4100_v39 = vpop.permute.xlu0 %4099  ;;  %v5630_v53 = vpop.eup %5629 }
 0x588   : > { %v4117_v31 = vadd.f32 %v4100_v39, %v4037_v51  ;;  %v4435_v52 = vmul.f32 %v4427_v54, %v4371_v23  ;;  %5183 = vmatmul.mubr.msk.f32.gmra.mrb[70].mxu1 %vm1197_vm11, %v4434_v27  ;;  %v4430_v60 = vmul.f32 %v5630_v53, %v10362_v61  ;;  %v5377_v61 = vpack.c.bf16 %v4633_v59, %v4632_v13 }
 0x589   : > { %v4102_v34 = vpop.permute.xlu1 %4101  ;;  %v5632_v4 = vpop.eup %5631 }
 0x58a   : > { %5185 = vmatprep.mubr.msk.f32.mxu1 %vm1197_vm11, %v4435_v52  ;;  %v4165_v30 = vadd.f32 %v4157_v43, %v4117_v31  ;;  %v4429_v2 = vmul.f32 %v5632_v4, %v10364_v38  ;;  %v4635_v38 = vld [vmem:[%s9541_s14 + $0x18] sm:$0xff]  ;;  %5378 = vmatprep.subr.bf16.mxu0 %v5377_v61 }
 0x58b   : > { %v3974_v42 = vpop.permute.xlu0 %3973  ;;  %5380 = vmatpush3.bf16.msra.mxu0 %v5377_v61 }
 0x58c   : > { %v3990_v26 = vadd.f32 %v3974_v42, %v3910_v37 }
 0x58d   : > { %v4354_v25 = vpop.permute.xlu1 %4353 }
 0x58e   : > { %v4038_v32 = vadd.f32 %v4030_v46, %v3990_v26  ;;  %v4372_v21 = vadd.f32 %v4354_v25, %v4292_v8 }
 0x58f   : > { %v4228_v40 = vpop.permute.xlu0 %4227 }
 0x590   : > { %v4118_v12 = vadd.f32 %v4102_v34, %v4038_v32  ;;  %v4245_v6 = vadd.f32 %v4228_v40, %v4165_v30  ;;  %v4436_v0 = vmul.f32 %v4428_v58, %v4372_v21 }
 0x591   : > { %v4358_v51 = vpop.permute.xlu1 %4357 }
 0x592   : > { %v4166_v14 = vadd.f32 %v4158_v36, %v4118_v12  ;;  %5186 = vmatmul.mubr.msk.f32.gmra.mrb[72].mxu1 %vm1197_vm11, %v4436_v0  ;;  %v4293_v45 = vadd.f32 %v9377_v47, %v4245_v6  ;;  %v4634_v47 = vld [vmem:[%s9541_s14 + $0x10] sm:$0xff] }
 0x593   : > { %v4230_v22 = vpop.permute.xlu0 %4229  ;;  %v5381_v35 = vpack.c.bf16 %v4635_v38, %v4634_v47 }
 0x594   : > { %v4246_v11 = vadd.f32 %v4230_v22, %v4166_v14 }
 0x595   : > { %5382 = vmatprep.subr.bf16.mxu0 %v5381_v35 }
 0x596   : > { %v4294_v7 = vadd.f32 %v4286_v29, %v4246_v11  ;;  %5384 = vmatpush3.bf16.msra.mxu0 %v5381_v35 }
 0x597   : > { %v4356_v63 = vpop.permute.xlu0 %4355 }
 0x598   : > { %v4374_v18 = vadd.f32 %v4358_v51, %v4294_v7  ;;  %v4373_v5 = vadd.f32 %v4356_v63, %v4293_v45 }
 0x59a   : > { %v4438_v49 = vmul.f32 %v4430_v60, %v4374_v18  ;;  %v4437_v55 = vmul.f32 %v4429_v2, %v4373_v5 }
 0x59c   : > { %5188 = vmatprep.mubr.msk.f32.mxu1 %vm1197_vm11, %v4437_v55 }
 0x59d   : > { %5189 = vmatmul.mubr.msk.f32.gmra.mrb[74].mxu1 %vm1197_vm11, %v4438_v49 }
 0x643   : > { %v5181_v1 = vpop.f32.mrb[68].mxu1 }
 0x644   : > { %v4586_v33 = vmul.f32 1.442695, %v5181_v1  ;;  %v4537_v48 = vpop.f32.mrb[69].mxu1  ;;  %vm4577_vm14 = vcmp.gt.f32.partialorder %v5181_v1, 0.0 }
 0x645   : > { %v4584_v50 = vmul.f32 1.442695, %v4537_v48  ;;  %vm4576_vm15 = vcmp.gt.f32.partialorder %v4537_v48, 0.0 }
 0x646   : > { %5633 = vpow2.f32 %v4586_v33 }
 0x647   : > { %5635 = vpow2.f32 %v4584_v50 }
 0x650   : > { %v5634_v17 = vpop.eup %5633 }
 0x651   : > { %v5636_v20 = vpop.eup %5635  ;;  %v4938_v62 = vadd.f32 -1.0, %v5634_v17 }
 0x652   : > { %v4937_v16 = vadd.f32 -1.0, %v5636_v20 }
 0x653   : > { %v4609_v10 = vmul.f32 1.6732632, %v4938_v62 }
 0x654   : > { %v4608_v19 = vmul.f32 1.6732632, %v4937_v16 }
 0x655   : > { %v4617_v28 = vsel %vm4577_vm14, %v5181_v1, %v4609_v10 }
 0x656   : > { %v4616_v54 = vsel %vm4576_vm15, %v4537_v48, %v4608_v19  ;;  %v4625_v24 = vmul.f32 1.050701, %v4617_v28 }
 0x657   : > { %v4624_v41 = vmul.f32 1.050701, %v4616_v54 }
 0x659   : > { %5199 = vmatprep.mubr.msk.f32.mxu0 %vm643_vm4, %v4624_v41 }
 0x65a   : > { %5200 = vmatmul.mubr.msk.f32.vlgmr.msra.gmra.mrb[68].mxu0 %vm643_vm4, %v4625_v24 }
 0x65b   : > { %v5184_v27 = vpop.f32.mrb[70].mxu1 }
 0x65c   : > { %v4590_v23 = vmul.f32 1.442695, %v5184_v27  ;;  %v4547_v44 = vpop.f32.mrb[71].mxu1  ;;  %vm4579_vm0 = vcmp.gt.f32.partialorder %v5184_v27, 0.0 }
 0x65d   : > { %v4588_v8 = vmul.f32 1.442695, %v4547_v44  ;;  %vm4578_vm1 = vcmp.gt.f32.partialorder %v4547_v44, 0.0 }
 0x65e   : > { %5637 = vpow2.f32 %v4590_v23 }
 0x65f   : > { %5639 = vpow2.f32 %v4588_v8 }
 0x665   : > { %v5187_v9 = vpop.f32.mrb[72].mxu1 }
 0x666   : > { %v4594_v39 = vmul.f32 1.442695, %v5187_v9  ;;  %v4557_v31 = vpop.f32.mrb[73].mxu1  ;;  %vm4581_vm2 = vcmp.gt.f32.partialorder %v5187_v9, 0.0 }
 0x667   : > { %v4592_v52 = vmul.f32 1.442695, %v4557_v31  ;;  %vm4580_vm5 = vcmp.gt.f32.partialorder %v4557_v31, 0.0 }
 0x668   : > { %v5638_v3 = vpop.eup %5637  ;;  %5641 = vpow2.f32 %v4594_v39 }
 0x669   : > { %v5640_v56 = vpop.eup %5639  ;;  %v4940_v43 = vadd.f32 -1.0, %v5638_v3  ;;  %5643 = vpow2.f32 %v4592_v52 }
 0x66a   : > { %v4939_v34 = vadd.f32 -1.0, %v5640_v56 }
 0x66b   : > { %v4611_v37 = vmul.f32 1.6732632, %v4940_v43 }
 0x66c   : > { %v4610_v30 = vmul.f32 1.6732632, %v4939_v34 }
 0x66d   : > { %v4619_v15 = vsel %vm4579_vm0, %v5184_v27, %v4611_v37 }
 0x66e   : > { %v4618_v42 = vsel %vm4578_vm1, %v4547_v44, %v4610_v30  ;;  %v4627_v57 = vmul.f32 1.050701, %v4619_v15 }
 0x66f   : > { %v4626_v26 = vmul.f32 1.050701, %v4618_v42 }
 0x670   : > { %v5190_v46 = vpop.f32.mrb[74].mxu1 }
 0x671   : > { %v4598_v25 = vmul.f32 1.442695, %v5190_v46  ;;  %v4567_v58 = vpop.f32.mrb[75].mxu1  ;;  %5202 = vmatprep.mubr.msk.f32.mxu0 %vm643_vm4, %v4626_v26  ;;  %vm4583_vm6 = vcmp.gt.f32.partialorder %v5190_v46, 0.0 }
 0x672   : > { %v5642_v32 = vpop.eup %5641  ;;  %v4596_v21 = vmul.f32 1.442695, %v4567_v58  ;;  %5203 = vmatmul.mubr.msk.f32.gmra.mrb[70].mxu0 %vm643_vm4, %v4627_v57  ;;  %vm4582_vm7 = vcmp.gt.f32.partialorder %v4567_v58, 0.0 }
 0x673   : > { %v5644_v40 = vpop.eup %5643  ;;  %v4942_v12 = vadd.f32 -1.0, %v5642_v32  ;;  %5645 = vpow2.f32 %v4598_v25 }
 0x674   : > { %v4941_v6 = vadd.f32 -1.0, %v5644_v40  ;;  %5647 = vpow2.f32 %v4596_v21 }
 0x675   : > { %v4613_v0 = vmul.f32 1.6732632, %v4942_v12 }
 0x676   : > { %v4612_v36 = vmul.f32 1.6732632, %v4941_v6 }
 0x677   : > { %v4621_v14 = vsel %vm4581_vm2, %v5187_v9, %v4613_v0 }
 0x678   : > { %v4620_v45 = vsel %vm4580_vm5, %v4557_v31, %v4612_v36  ;;  %v4629_v53 = vmul.f32 1.050701, %v4621_v14 }
 0x679   : > { %v4628_v22 = vmul.f32 1.050701, %v4620_v45 }
 0x67b   : > { %5205 = vmatprep.mubr.msk.f32.mxu0 %vm643_vm4, %v4628_v22 }
 0x67c   : > { %5206 = vmatmul.mubr.msk.f32.gmra.mrb[72].mxu0 %vm643_vm4, %v4629_v53 }
 0x67d   : > { %v5646_v11 = vpop.eup %5645 }
 0x67e   : > { %v5648_v29 = vpop.eup %5647  ;;  %v4944_v4 = vadd.f32 -1.0, %v5646_v11 }
 0x67f   : > { %v4943_v7 = vadd.f32 -1.0, %v5648_v29 }
 0x680   : > { %v4615_v51 = vmul.f32 1.6732632, %v4944_v4 }
 0x681   : > { %v4614_v63 = vmul.f32 1.6732632, %v4943_v7 }
 0x682   : > { %v4623_v60 = vsel %vm4583_vm6, %v5190_v46, %v4615_v51 }
 0x683   : > { %v4622_v2 = vsel %vm4582_vm7, %v4567_v58, %v4614_v63  ;;  %v4631_v5 = vmul.f32 1.050701, %v4623_v60 }
 0x684   : > { %v4630_v18 = vmul.f32 1.050701, %v4622_v2 }
 0x686   : > { %5208 = vmatprep.mubr.msk.f32.mxu0 %vm643_vm4, %v4630_v18 }
 0x687   : > { %5209 = vmatmul.mubr.msk.f32.gmra.mrb[74].mxu0 %vm643_vm4, %v4631_v5 }
 0x72d   : > { %v5201_v49 = vpop.f32.mrb[68].mxu0 }
 0x72e   : > { %4766 = vst.msk [vmem:[%s494_s25 + $0x8] sm:$0xff] %vm505_vm3, %v5201_v49  ;;  %v4726_v55 = vpop.f32.mrb[69].mxu0 }
 0x72f   : > { %4765 = vst.msk [vmem:[%s494_s25] sm:$0xff] %vm505_vm3, %v4726_v55 }
 0x745   : > { %v5204_v13 = vpop.f32.mrb[70].mxu0 }
 0x746   : > { %4768 = vst.msk [vmem:[%s494_s25 + $0x18] sm:$0xff] %vm505_vm3, %v5204_v13  ;;  %v4736_v59 = vpop.f32.mrb[71].mxu0 }
 0x747   : > { %4767 = vst.msk [vmem:[%s494_s25 + $0x10] sm:$0xff] %vm505_vm3, %v4736_v59 }
 0x74f   : > { %v5207_v47 = vpop.f32.mrb[72].mxu0 }
 0x750   : > { %4770 = vst.msk [vmem:[%s494_s25 + $0x28] sm:$0xff] %vm505_vm3, %v5207_v47  ;;  %v4746_v61 = vpop.f32.mrb[73].mxu0 }
 0x751   : > { %4769 = vst.msk [vmem:[%s494_s25 + $0x20] sm:$0xff] %vm505_vm3, %v4746_v61 }
 0x75a   : > { %v5210_v38 = vpop.f32.mrb[74].mxu0 }
 0x75b   : > { %4772 = vst.msk [vmem:[%s494_s25 + $0x38] sm:$0xff] %vm505_vm3, %v5210_v38  ;;  %v4756_v35 = vpop.f32.mrb[75].mxu0 }
 0x75c   : > { %4771 = vst.msk [vmem:[%s494_s25 + $0x30] sm:$0xff] %vm505_vm3, %v4756_v35 }
 0x75d PF: > { %s25_s18 = sadd.s32 1, %s5655_s18  }
 0x75e   : > { %p22_p4 = scmp.ge.s32.totalorder %s25_s18, 4  }
 0x760   :  { %24 = sbr.rel (!%p22_p4) target bundleno = 1 (0x1), region = 110 }

// kernel: mamba_class_forward.3
= control target key start
LH: loop header
LB: loop body
LE: loop exit
PB: predicated region body
PF: predicated region fallthrough
CT: control target
= control target key end

     0   :  { %s3860_s0 = inlined_call_operand.vmem [shape: f32[2,768], index: 0, kind: input, shape index: {}]   ;;  %s3861_s1 = inlined_call_operand.vmem [shape: f32[768,512], index: 1, kind: input, shape index: {}]   ;;  %s3862_s2 = inlined_call_operand.vmem [shape: f32[1,512], index: 2, kind: input, shape index: {}]   ;;  %s3863_s3 = inlined_call_operand.vmem [shape: f32[512,256], index: 3, kind: input, shape index: {}]   ;;  %s3864_s4 = inlined_call_operand.vmem [shape: f32[1,256], index: 4, kind: input, shape index: {}]   ;;  %s3865_s5 = inlined_call_operand.vmem [shape: f32[256,64], index: 5, kind: input, shape index: {}]   ;;  %s3866_s6 = inlined_call_operand.vmem [shape: f32[1,64], index: 6, kind: input, shape index: {}]   ;;  %s3867_s7 = inlined_call_operand.vmem [shape: f32[64,4], index: 7, kind: input, shape index: {}]   ;;  %s3868_s8 = inlined_call_operand.vmem [shape: f32[1,4], index: 8, kind: input, shape index: {}]   ;;  %s3869_s9 = inlined_call_operand.hbm [shape: f32[2,4], index: 9, kind: output, shape index: {}]  }
   0x1   :  { %v36_v0 = vld [vmem:[%s3861_s1 + $0x8] sm:$0xff]  ;;  %v35_v5 = vld [vmem:[%s3861_s1] sm:$0xff] }
   0x2   :  { %v40_v1 = vld [vmem:[%s3861_s1 + $0x28] sm:$0xff]  ;;  %v39_v6 = vld [vmem:[%s3861_s1 + $0x20] sm:$0xff] }
   0x3   :  { %v164_v2 = vld [vmem:[%s3861_s1 + $0x408] sm:$0xff]  ;;  %v1463_v3 = vpack.c.bf16 %v40_v1, %v36_v0  ;;  %v1465_v8 = vpack.c.bf16 %v39_v6, %v35_v5  ;;  %v163_v9 = vld [vmem:[%s3861_s1 + $0x400] sm:$0xff] }
   0x4   :  { %v168_v4 = vld [vmem:[%s3861_s1 + $0x428] sm:$0xff]  ;;  %v167_v10 = vld [vmem:[%s3861_s1 + $0x420] sm:$0xff] }
   0x5   :  { %v1527_v7 = vpack.c.bf16 %v168_v4, %v164_v2  ;;  %v44_v11 = vld [vmem:[%s3861_s1 + $0x48] sm:$0xff]  ;;  %1464 = vmatprep.subr.bf16.mxu1 %v1463_v3  ;;  %v1529_v12 = vpack.c.bf16 %v167_v10, %v163_v9  ;;  %v43_v18 = vld [vmem:[%s3861_s1 + $0x40] sm:$0xff] }
   0x6   :  { %v48_v13 = vld [vmem:[%s3861_s1 + $0x68] sm:$0xff]  ;;  %1466 = vmatpush1.bf16.msra.mxu1 %v1465_v8  ;;  %v47_v19 = vld [vmem:[%s3861_s1 + $0x60] sm:$0xff] }
   0x7   :  { %v172_v14 = vld [vmem:[%s3861_s1 + $0x448] sm:$0xff]  ;;  %1528 = vmatprep.subr.bf16.mxu0 %v1527_v7  ;;  %v1467_v16 = vpack.c.bf16 %v48_v13, %v44_v11  ;;  %v171_v20 = vld [vmem:[%s3861_s1 + $0x440] sm:$0xff]  ;;  %v1469_v21 = vpack.c.bf16 %v47_v19, %v43_v18 }
   0x8   :  { %v176_v15 = vld [vmem:[%s3861_s1 + $0x468] sm:$0xff]  ;;  %1530 = vmatpush1.bf16.msra.mxu0 %v1529_v12  ;;  %v175_v22 = vld [vmem:[%s3861_s1 + $0x460] sm:$0xff] }
   0x9   :  { %v1531_v17 = vpack.c.bf16 %v176_v15, %v172_v14  ;;  %v52_v23 = vld [vmem:[%s3861_s1 + $0x88] sm:$0xff]  ;;  %1468 = vmatprep.subr.bf16.mxu1 %v1467_v16  ;;  %v1533_v25 = vpack.c.bf16 %v175_v22, %v171_v20  ;;  %v51_v29 = vld [vmem:[%s3861_s1 + $0x80] sm:$0xff] }
   0xa   :  { %v56_v24 = vld [vmem:[%s3861_s1 + $0xa8] sm:$0xff]  ;;  %v55_v31 = vld [vmem:[%s3861_s1 + $0xa0] sm:$0xff]  ;;  %1470 = vmatpush1.bf16.msra.mxu1 %v1469_v21 }
   0xb   :  { %1532 = vmatprep.subr.bf16.mxu0 %v1531_v17  ;;  %v1471_v26 = vpack.c.bf16 %v56_v24, %v52_v23  ;;  %v180_v27 = vld [vmem:[%s3861_s1 + $0x488] sm:$0xff]  ;;  %v179_v32 = vld [vmem:[%s3861_s1 + $0x480] sm:$0xff]  ;;  %v1473_v34 = vpack.c.bf16 %v55_v31, %v51_v29 }
   0xc   :  { %v184_v28 = vld [vmem:[%s3861_s1 + $0x4a8] sm:$0xff]  ;;  %v183_v33 = vld [vmem:[%s3861_s1 + $0x4a0] sm:$0xff]  ;;  %1534 = vmatpush1.bf16.msra.mxu0 %v1533_v25 }
   0xd   :  { %v1535_v30 = vpack.c.bf16 %v184_v28, %v180_v27  ;;  %v60_v35 = vld [vmem:[%s3861_s1 + $0xc8] sm:$0xff]  ;;  %1472 = vmatprep.subr.bf16.mxu1 %v1471_v26  ;;  %v1537_v38 = vpack.c.bf16 %v183_v33, %v179_v32  ;;  %v59_v41 = vld [vmem:[%s3861_s1 + $0xc0] sm:$0xff] }
   0xe   :  { %v64_v36 = vld [vmem:[%s3861_s1 + $0xe8] sm:$0xff]  ;;  %v63_v42 = vld [vmem:[%s3861_s1 + $0xe0] sm:$0xff]  ;;  %1474 = vmatpush1.bf16.msra.mxu1 %v1473_v34 }
   0xf   :  { %v188_v37 = vld [vmem:[%s3861_s1 + $0x4c8] sm:$0xff]  ;;  %v1475_v39 = vpack.c.bf16 %v64_v36, %v60_v35  ;;  %1536 = vmatprep.subr.bf16.mxu0 %v1535_v30  ;;  %v187_v44 = vld [vmem:[%s3861_s1 + $0x4c0] sm:$0xff]  ;;  %v1477_v50 = vpack.c.bf16 %v63_v42, %v59_v41 }
  0x10   :  { %v192_v40 = vld [vmem:[%s3861_s1 + $0x4e8] sm:$0xff]  ;;  %v191_v45 = vld [vmem:[%s3861_s1 + $0x4e0] sm:$0xff]  ;;  %1538 = vmatpush1.bf16.msra.mxu0 %v1537_v38 }
  0x11   :  { %v1539_v43 = vpack.c.bf16 %v192_v40, %v188_v37  ;;  %v68_v46 = vld [vmem:[%s3861_s1 + $0x108] sm:$0xff]  ;;  %1476 = vmatprep.subr.bf16.mxu1 %v1475_v39  ;;  %v1541_v51 = vpack.c.bf16 %v191_v45, %v187_v44  ;;  %v67_v53 = vld [vmem:[%s3861_s1 + $0x100] sm:$0xff] }
  0x12   :  { %v72_v47 = vld [vmem:[%s3861_s1 + $0x128] sm:$0xff]  ;;  %v71_v54 = vld [vmem:[%s3861_s1 + $0x120] sm:$0xff]  ;;  %1478 = vmatpush1.bf16.msra.mxu1 %v1477_v50 }
  0x13   :  { %v196_v48 = vld [vmem:[%s3861_s1 + $0x508] sm:$0xff]  ;;  %v1479_v52 = vpack.c.bf16 %v72_v47, %v68_v46  ;;  %v195_v55 = vld [vmem:[%s3861_s1 + $0x500] sm:$0xff]  ;;  %1540 = vmatprep.subr.bf16.mxu0 %v1539_v43  ;;  %v1481_v62 = vpack.c.bf16 %v71_v54, %v67_v53  ;;  %v421_v46 = vlaneseq  ;;  %v2066_v47 = vmov 1983009808  }
  0x14   :  { %v200_v49 = vld [vmem:[%s3861_s1 + $0x528] sm:$0xff]  ;;  %v199_v57 = vld [vmem:[%s3861_s1 + $0x520] sm:$0xff]  ;;  %1542 = vmatpush1.bf16.msra.mxu0 %v1541_v51 }
  0x15   :  { %v1543_v56 = vpack.c.bf16 %v200_v49, %v196_v48  ;;  %v76_v58 = vld [vmem:[%s3861_s1 + $0x148] sm:$0xff]  ;;  %1480 = vmatprep.subr.bf16.mxu1 %v1479_v52  ;;  %v1545_v63 = vpack.c.bf16 %v199_v57, %v195_v55  ;;  %v75_v1 = vld [vmem:[%s3861_s1 + $0x140] sm:$0xff]  ;;  %v445_v48 = vunpack.c.l.s4 %v2066_v47 }
  0x16   :  { %v80_v59 = vld [vmem:[%s3861_s1 + $0x168] sm:$0xff]  ;;  %v79_v2 = vld [vmem:[%s3861_s1 + $0x160] sm:$0xff]  ;;  %1482 = vmatpush1.bf16.msra.mxu1 %v1481_v62 }
  0x17   :  { %v204_v60 = vld [vmem:[%s3861_s1 + $0x548] sm:$0xff]  ;;  %v1483_v0 = vpack.c.bf16 %v80_v59, %v76_v58  ;;  %v203_v3 = vld [vmem:[%s3861_s1 + $0x540] sm:$0xff]  ;;  %1544 = vmatprep.subr.bf16.mxu0 %v1543_v56  ;;  %v1485_v10 = vpack.c.bf16 %v79_v2, %v75_v1  ;;  %v446_v62 = vunpack.c.0.s8 %v445_v48 }
  0x18   :  { %v208_v61 = vld [vmem:[%s3861_s1 + $0x568] sm:$0xff]  ;;  %v207_v5 = vld [vmem:[%s3861_s1 + $0x560] sm:$0xff]  ;;  %1546 = vmatpush1.bf16.msra.mxu0 %v1545_v63 }
  0x19   :  { %v1547_v4 = vpack.c.bf16 %v208_v61, %v204_v60  ;;  %v84_v6 = vld [vmem:[%s3861_s1 + $0x188] sm:$0xff]  ;;  %1484 = vmatprep.subr.bf16.mxu1 %v1483_v0  ;;  %v1549_v11 = vpack.c.bf16 %v207_v5, %v203_v3  ;;  %v83_v13 = vld [vmem:[%s3861_s1 + $0x180] sm:$0xff]  ;;  %v2373_v61 = vshrl.u32 %v421_v46, 7 }
  0x1a   :  { %v88_v7 = vld [vmem:[%s3861_s1 + $0x1a8] sm:$0xff]  ;;  %v87_v14 = vld [vmem:[%s3861_s1 + $0x1a0] sm:$0xff]  ;;  %1486 = vmatpush1.bf16.msra.mxu1 %v1485_v10 }
  0x1b   :  { %v212_v8 = vld [vmem:[%s3861_s1 + $0x588] sm:$0xff]  ;;  %v1487_v12 = vpack.c.bf16 %v88_v7, %v84_v6  ;;  %v211_v15 = vld [vmem:[%s3861_s1 + $0x580] sm:$0xff]  ;;  %1548 = vmatprep.subr.bf16.mxu0 %v1547_v4  ;;  %v1489_v22 = vpack.c.bf16 %v87_v14, %v83_v13 }
  0x1c   :  { %v216_v9 = vld [vmem:[%s3861_s1 + $0x5a8] sm:$0xff]  ;;  %v215_v17 = vld [vmem:[%s3861_s1 + $0x5a0] sm:$0xff]  ;;  %1550 = vmatpush1.bf16.msra.mxu0 %v1549_v11  ;;  %v449_v11 = vsub.s32 %v446_v62, %v2373_v61 }
  0x1d   :  { %v1551_v16 = vpack.c.bf16 %v216_v9, %v212_v8  ;;  %v92_v18 = vld [vmem:[%s3861_s1 + $0x1c8] sm:$0xff]  ;;  %1488 = vmatprep.subr.bf16.mxu1 %v1487_v12  ;;  %v1553_v23 = vpack.c.bf16 %v215_v17, %v211_v15  ;;  %v91_v25 = vld [vmem:[%s3861_s1 + $0x1c0] sm:$0xff] }
  0x1e   :  { %v96_v19 = vld [vmem:[%s3861_s1 + $0x1e8] sm:$0xff]  ;;  %v95_v26 = vld [vmem:[%s3861_s1 + $0x1e0] sm:$0xff]  ;;  %1490 = vmatpush1.bf16.msra.mxu1 %v1489_v22 }
  0x1f   :  { %v220_v20 = vld [vmem:[%s3861_s1 + $0x5c8] sm:$0xff]  ;;  %v1491_v24 = vpack.c.bf16 %v96_v19, %v92_v18  ;;  %v219_v27 = vld [vmem:[%s3861_s1 + $0x5c0] sm:$0xff]  ;;  %1552 = vmatprep.subr.bf16.mxu0 %v1551_v16  ;;  %v1493_v34 = vpack.c.bf16 %v95_v26, %v91_v25 }
  0x20   :  { %v224_v21 = vld [vmem:[%s3861_s1 + $0x5e8] sm:$0xff]  ;;  %v223_v29 = vld [vmem:[%s3861_s1 + $0x5e0] sm:$0xff]  ;;  %1554 = vmatpush1.bf16.msra.mxu0 %v1553_v23 }
  0x21   :  { %v1555_v28 = vpack.c.bf16 %v224_v21, %v220_v20  ;;  %v100_v30 = vld [vmem:[%s3861_s1 + $0x208] sm:$0xff]  ;;  %1492 = vmatprep.subr.bf16.mxu1 %v1491_v24  ;;  %v1557_v35 = vpack.c.bf16 %v223_v29, %v219_v27  ;;  %v99_v37 = vld [vmem:[%s3861_s1 + $0x200] sm:$0xff] }
  0x22   :  { %v104_v31 = vld [vmem:[%s3861_s1 + $0x228] sm:$0xff]  ;;  %v103_v38 = vld [vmem:[%s3861_s1 + $0x220] sm:$0xff]  ;;  %1494 = vmatpush1.bf16.msra.mxu1 %v1493_v34 }
  0x23   :  { %v228_v32 = vld [vmem:[%s3861_s1 + $0x608] sm:$0xff]  ;;  %v1495_v36 = vpack.c.bf16 %v104_v31, %v100_v30  ;;  %v227_v39 = vld [vmem:[%s3861_s1 + $0x600] sm:$0xff]  ;;  %1556 = vmatprep.subr.bf16.mxu0 %v1555_v28  ;;  %v1497_v49 = vpack.c.bf16 %v103_v38, %v99_v37 }
  0x24   :  { %v232_v33 = vld [vmem:[%s3861_s1 + $0x628] sm:$0xff]  ;;  %v231_v41 = vld [vmem:[%s3861_s1 + $0x620] sm:$0xff]  ;;  %1558 = vmatpush1.bf16.msra.mxu0 %v1557_v35 }
  0x25   :  { %v1559_v40 = vpack.c.bf16 %v232_v33, %v228_v32  ;;  %v108_v42 = vld [vmem:[%s3861_s1 + $0x248] sm:$0xff]  ;;  %1496 = vmatprep.subr.bf16.mxu1 %v1495_v36  ;;  %v1561_v50 = vpack.c.bf16 %v231_v41, %v227_v39  ;;  %v107_v52 = vld [vmem:[%s3861_s1 + $0x240] sm:$0xff] }
  0x26   :  { %v112_v43 = vld [vmem:[%s3861_s1 + $0x268] sm:$0xff]  ;;  %v111_v53 = vld [vmem:[%s3861_s1 + $0x260] sm:$0xff]  ;;  %1498 = vmatpush1.bf16.msra.mxu1 %v1497_v49 }
  0x27   :  { %v236_v44 = vld [vmem:[%s3861_s1 + $0x648] sm:$0xff]  ;;  %v1499_v51 = vpack.c.bf16 %v112_v43, %v108_v42  ;;  %v235_v54 = vld [vmem:[%s3861_s1 + $0x640] sm:$0xff]  ;;  %1560 = vmatprep.subr.bf16.mxu0 %v1559_v40  ;;  %v1501_v63 = vpack.c.bf16 %v111_v53, %v107_v52 }
  0x28   :  { %v240_v45 = vld [vmem:[%s3861_s1 + $0x668] sm:$0xff]  ;;  %v239_v56 = vld [vmem:[%s3861_s1 + $0x660] sm:$0xff]  ;;  %1562 = vmatpush1.bf16.msra.mxu0 %v1561_v50 }
  0x29   :  { %v1563_v55 = vpack.c.bf16 %v240_v45, %v236_v44  ;;  %v116_v57 = vld [vmem:[%s3861_s1 + $0x288] sm:$0xff]  ;;  %1500 = vmatprep.subr.bf16.mxu1 %v1499_v51  ;;  %v1565_v0 = vpack.c.bf16 %v239_v56, %v235_v54  ;;  %v115_v2 = vld [vmem:[%s3861_s1 + $0x280] sm:$0xff] }
  0x2a   :  { %v120_v58 = vld [vmem:[%s3861_s1 + $0x2a8] sm:$0xff]  ;;  %v119_v3 = vld [vmem:[%s3861_s1 + $0x2a0] sm:$0xff]  ;;  %1502 = vmatpush1.bf16.msra.mxu1 %v1501_v63 }
  0x2b   :  { %v244_v59 = vld [vmem:[%s3861_s1 + $0x688] sm:$0xff]  ;;  %v1503_v1 = vpack.c.bf16 %v120_v58, %v116_v57  ;;  %v243_v4 = vld [vmem:[%s3861_s1 + $0x680] sm:$0xff]  ;;  %1564 = vmatprep.subr.bf16.mxu0 %v1563_v55  ;;  %v1505_v12 = vpack.c.bf16 %v119_v3, %v115_v2 }
  0x2c   :  { %v248_v60 = vld [vmem:[%s3861_s1 + $0x6a8] sm:$0xff]  ;;  %v247_v6 = vld [vmem:[%s3861_s1 + $0x6a0] sm:$0xff]  ;;  %1566 = vmatpush1.bf16.msra.mxu0 %v1565_v0 }
  0x2d   :  { %v1567_v5 = vpack.c.bf16 %v248_v60, %v244_v59  ;;  %v124_v7 = vld [vmem:[%s3861_s1 + $0x2c8] sm:$0xff]  ;;  %v123_v13 = vld [vmem:[%s3861_s1 + $0x2c0] sm:$0xff]  ;;  %1504 = vmatprep.subr.bf16.mxu1 %v1503_v1  ;;  %v1569_v14 = vpack.c.bf16 %v247_v6, %v243_v4 }
  0x2e   :  { %v128_v8 = vld [vmem:[%s3861_s1 + $0x2e8] sm:$0xff]  ;;  %v127_v16 = vld [vmem:[%s3861_s1 + $0x2e0] sm:$0xff]  ;;  %1506 = vmatpush1.bf16.msra.mxu1 %v1505_v12  ;;  %v42_v12 = vld [vmem:[%s3861_s1 + $0x38] sm:$0xff] }
  0x2f   :  { %v252_v9 = vld [vmem:[%s3861_s1 + $0x6c8] sm:$0xff]  ;;  %v1507_v15 = vpack.c.bf16 %v128_v8, %v124_v7  ;;  %v251_v17 = vld [vmem:[%s3861_s1 + $0x6c0] sm:$0xff]  ;;  %1568 = vmatprep.subr.bf16.mxu0 %v1567_v5  ;;  %v1509_v27 = vpack.c.bf16 %v127_v16, %v123_v13 }
  0x30   :  { %v256_v10 = vld [vmem:[%s3861_s1 + $0x6e8] sm:$0xff]  ;;  %v255_v18 = vld [vmem:[%s3861_s1 + $0x6e0] sm:$0xff]  ;;  %1570 = vmatpush1.bf16.msra.mxu0 %v1569_v14 }
  0x31   :  { %v1571_v19 = vpack.c.bf16 %v256_v10, %v252_v9  ;;  %v132_v20 = vld [vmem:[%s3861_s1 + $0x308] sm:$0xff]  ;;  %v33_v22 = vld [vmem:[%s3860_s0] sm:$0xff]  ;;  %v1573_v28 = vpack.c.bf16 %v255_v18, %v251_v17  ;;  %1508 = vmatprep.subr.bf16.mxu1 %v1507_v15 }
  0x32   :  { %v136_v21 = vld [vmem:[%s3861_s1 + $0x328] sm:$0xff]  ;;  %v2427_v25 = vrot.slane %v33_v22, %v449_v11  ;;  %v443_v26 = vcombine.high %v33_v22, %v33_v22  ;;  %v131_v30 = vld [vmem:[%s3861_s1 + $0x300] sm:$0xff]  ;;  %1510 = vmatpush1.bf16.msra.mxu1 %v1509_v27 }
  0x33   :  { %v260_v23 = vld [vmem:[%s3861_s1 + $0x708] sm:$0xff]  ;;  %v1511_v29 = vpack.c.bf16 %v136_v21, %v132_v20  ;;  %v135_v31 = vld [vmem:[%s3861_s1 + $0x320] sm:$0xff]  ;;  %1572 = vmatprep.subr.bf16.mxu0 %v1571_v19  ;;  %v37_v19 = vld [vmem:[%s3861_s1 + $0x10] sm:$0xff] }
  0x34   :  { %v264_v24 = vld [vmem:[%s3861_s1 + $0x728] sm:$0xff]  ;;  %v259_v32 = vld [vmem:[%s3861_s1 + $0x700] sm:$0xff]  ;;  %v2440_v33 = vcombine.high %v2427_v25, %v2427_v25  ;;  %v2442_v34 = vrot.slane %v443_v26, %v449_v11  ;;  %v1513_v42 = vpack.c.bf16 %v135_v31, %v131_v30  ;;  %1574 = vmatpush1.bf16.msra.mxu0 %v1573_v28  ;;  %v38_v11 = vld [vmem:[%s3861_s1 + $0x18] sm:$0xff] }
  0x35   :  { %v1575_v35 = vpack.c.bf16 %v264_v24, %v260_v23  ;;  %v263_v36 = vld [vmem:[%s3861_s1 + $0x720] sm:$0xff]  ;;  %v140_v37 = vld [vmem:[%s3861_s1 + $0x348] sm:$0xff]  ;;  %1512 = vmatprep.subr.bf16.mxu1 %v1511_v29  ;;  %v1655_v17 = vpack.c.bf16 %v42_v12, %v38_v11  ;;  %v41_v20 = vld [vmem:[%s3861_s1 + $0x30] sm:$0xff] }
  0x36   :  { %v144_v38 = vld [vmem:[%s3861_s1 + $0x368] sm:$0xff]  ;;  %538 = vmatprep.mubr.f32.mxu1 %v2440_v33  ;;  %v2462_v41 = vcombine.high %v2442_v34, %v2442_v34  ;;  %v1577_v43 = vpack.c.bf16 %v263_v36, %v259_v32  ;;  %v139_v45 = vld [vmem:[%s3861_s1 + $0x340] sm:$0xff]  ;;  %1514 = vmatpush1.bf16.msra.mxu1 %v1513_v42  ;;  %v46_v23 = vld [vmem:[%s3861_s1 + $0x58] sm:$0xff]  ;;  %v1657_v28 = vpack.c.bf16 %v41_v20, %v37_v19 }
  0x37   :  { %v268_v39 = vld [vmem:[%s3861_s1 + $0x748] sm:$0xff]  ;;  %v1515_v44 = vpack.c.bf16 %v144_v38, %v140_v37  ;;  %v143_v46 = vld [vmem:[%s3861_s1 + $0x360] sm:$0xff]  ;;  %1576 = vmatprep.subr.bf16.mxu0 %v1575_v35  ;;  %v50_v24 = vld [vmem:[%s3861_s1 + $0x78] sm:$0xff] }
  0x38   :  { %v272_v40 = vld [vmem:[%s3861_s1 + $0x768] sm:$0xff]  ;;  %v267_v47 = vld [vmem:[%s3861_s1 + $0x740] sm:$0xff]  ;;  %609 = vmatprep.mubr.f32.mxu0 %v2462_v41  ;;  %v1517_v54 = vpack.c.bf16 %v143_v46, %v139_v45  ;;  %1578 = vmatpush1.bf16.msra.mxu0 %v1577_v43  ;;  %v1659_v30 = vpack.c.bf16 %v50_v24, %v46_v23  ;;  %v45_v32 = vld [vmem:[%s3861_s1 + $0x50] sm:$0xff] }
  0x39   :  { %v1579_v48 = vpack.c.bf16 %v272_v40, %v268_v39  ;;  %v271_v49 = vld [vmem:[%s3861_s1 + $0x760] sm:$0xff]  ;;  %v148_v50 = vld [vmem:[%s3861_s1 + $0x388] sm:$0xff]  ;;  %1516 = vmatprep.subr.bf16.mxu1 %v1515_v44  ;;  %v49_v35 = vld [vmem:[%s3861_s1 + $0x70] sm:$0xff] }
  0x3a   :  { %v152_v51 = vld [vmem:[%s3861_s1 + $0x3a8] sm:$0xff]  ;;  %v1581_v55 = vpack.c.bf16 %v271_v49, %v267_v47  ;;  %v147_v57 = vld [vmem:[%s3861_s1 + $0x380] sm:$0xff]  ;;  %1518 = vmatpush1.bf16.msra.mxu1 %v1517_v54  ;;  %v54_v38 = vld [vmem:[%s3861_s1 + $0x98] sm:$0xff]  ;;  %v1661_v43 = vpack.c.bf16 %v49_v35, %v45_v32 }
  0x3b   :  { %v276_v52 = vld [vmem:[%s3861_s1 + $0x788] sm:$0xff]  ;;  %v1519_v56 = vpack.c.bf16 %v152_v51, %v148_v50  ;;  %v151_v58 = vld [vmem:[%s3861_s1 + $0x3a0] sm:$0xff]  ;;  %1580 = vmatprep.subr.bf16.mxu0 %v1579_v48  ;;  %v58_v39 = vld [vmem:[%s3861_s1 + $0xb8] sm:$0xff] }
  0x3c   :  { %v280_v53 = vld [vmem:[%s3861_s1 + $0x7a8] sm:$0xff]  ;;  %v275_v59 = vld [vmem:[%s3861_s1 + $0x780] sm:$0xff]  ;;  %v1521_v3 = vpack.c.bf16 %v151_v58, %v147_v57  ;;  %1582 = vmatpush1.bf16.msra.mxu0 %v1581_v55  ;;  %v1663_v45 = vpack.c.bf16 %v58_v39, %v54_v38  ;;  %v53_v47 = vld [vmem:[%s3861_s1 + $0x90] sm:$0xff] }
  0x3d   :  { %v1583_v60 = vpack.c.bf16 %v280_v53, %v276_v52  ;;  %v279_v62 = vld [vmem:[%s3861_s1 + $0x7a0] sm:$0xff]  ;;  %v156_v63 = vld [vmem:[%s3861_s1 + $0x3c8] sm:$0xff]  ;;  %1520 = vmatprep.subr.bf16.mxu1 %v1519_v56  ;;  %v57_v48 = vld [vmem:[%s3861_s1 + $0xb0] sm:$0xff] }
  0x3e   :  { %v160_v0 = vld [vmem:[%s3861_s1 + $0x3e8] sm:$0xff]  ;;  %v1585_v4 = vpack.c.bf16 %v279_v62, %v275_v59  ;;  %v155_v6 = vld [vmem:[%s3861_s1 + $0x3c0] sm:$0xff]  ;;  %1522 = vmatpush1.bf16.msra.mxu1 %v1521_v3  ;;  %v62_v51 = vld [vmem:[%s3861_s1 + $0xd8] sm:$0xff]  ;;  %v1665_v55 = vpack.c.bf16 %v57_v48, %v53_v47 }
  0x3f   :  { %v284_v1 = vld [vmem:[%s3861_s1 + $0x7c8] sm:$0xff]  ;;  %v1523_v5 = vpack.c.bf16 %v160_v0, %v156_v63  ;;  %v159_v7 = vld [vmem:[%s3861_s1 + $0x3e0] sm:$0xff]  ;;  %1584 = vmatprep.subr.bf16.mxu0 %v1583_v60  ;;  %v66_v52 = vld [vmem:[%s3861_s1 + $0xf8] sm:$0xff] }
  0x40   :  { %v288_v2 = vld [vmem:[%s3861_s1 + $0x7e8] sm:$0xff]  ;;  %v283_v8 = vld [vmem:[%s3861_s1 + $0x7c0] sm:$0xff]  ;;  %v1525_v15 = vpack.c.bf16 %v159_v7, %v155_v6  ;;  %1586 = vmatpush1.bf16.msra.mxu0 %v1585_v4  ;;  %v1667_v57 = vpack.c.bf16 %v66_v52, %v62_v51  ;;  %v65_v59 = vld [vmem:[%s3861_s1 + $0xf0] sm:$0xff] }
  0x41   :  { %v1587_v9 = vpack.c.bf16 %v288_v2, %v284_v1  ;;  %v287_v10 = vld [vmem:[%s3861_s1 + $0x7e0] sm:$0xff]  ;;  %v292_v13 = vld [vmem:[%s3861_s1 + $0x808] sm:$0xff]  ;;  %1524 = vmatprep.subr.bf16.mxu1 %v1523_v5  ;;  %v70_v63 = vld [vmem:[%s3861_s1 + $0x118] sm:$0xff] }
  0x42   :  { %v296_v14 = vld [vmem:[%s3861_s1 + $0x828] sm:$0xff]  ;;  %v1589_v16 = vpack.c.bf16 %v287_v10, %v283_v8  ;;  %v291_v18 = vld [vmem:[%s3861_s1 + $0x800] sm:$0xff]  ;;  %1526 = vmatpush1.bf16.msra.mxu1 %v1525_v15  ;;  %v74_v0 = vld [vmem:[%s3861_s1 + $0x138] sm:$0xff] }
  0x43   :  { %1588 = vmatprep.subr.bf16.mxu0 %v1587_v9  ;;  %v1591_v21 = vpack.c.bf16 %v296_v14, %v292_v13  ;;  %v295_v22 = vld [vmem:[%s3861_s1 + $0x820] sm:$0xff]  ;;  %v300_v26 = vld [vmem:[%s3861_s1 + $0x848] sm:$0xff]  ;;  %1656 = vmatprep.subr.bf16.mxu1 %v1655_v17  ;;  %v1671_v5 = vpack.c.bf16 %v74_v0, %v70_v63  ;;  %v69_v7 = vld [vmem:[%s3861_s1 + $0x110] sm:$0xff] }
  0x44   :  { %v304_v27 = vld [vmem:[%s3861_s1 + $0x868] sm:$0xff]  ;;  %1590 = vmatpush1.bf16.msra.mxu0 %v1589_v16  ;;  %v1593_v29 = vpack.c.bf16 %v295_v22, %v291_v18  ;;  %v299_v31 = vld [vmem:[%s3861_s1 + $0x840] sm:$0xff]  ;;  %v73_v8 = vld [vmem:[%s3861_s1 + $0x130] sm:$0xff] }
  0x45   :  { %1592 = vmatprep.subr.bf16.mxu0 %v1591_v21  ;;  %v1595_v36 = vpack.c.bf16 %v304_v27, %v300_v26  ;;  %v303_v37 = vld [vmem:[%s3861_s1 + $0x860] sm:$0xff]  ;;  %539 = vmatmul.mubr.f32.vlgmr.msra.gmra.mrb[0].mxu1 %v2427_v25  ;;  %v308_v40 = vld [vmem:[%s3861_s1 + $0x888] sm:$0xff]  ;;  %v78_v11 = vld [vmem:[%s3861_s1 + $0x158] sm:$0xff]  ;;  %v1673_v15 = vpack.c.bf16 %v73_v8, %v69_v7 }
  0x46   :  { %v312_v42 = vld [vmem:[%s3861_s1 + $0x8a8] sm:$0xff]  ;;  %1658 = vmatpush1.bf16.msra.mxu1 %v1657_v28  ;;  %v1597_v44 = vpack.c.bf16 %v303_v37, %v299_v31  ;;  %v307_v46 = vld [vmem:[%s3861_s1 + $0x880] sm:$0xff]  ;;  %751 = vmatprep.mubr.f32.mxu1 %v2440_v33  ;;  %v61_v33 = vld [vmem:[%s3861_s1 + $0xd0] sm:$0xff] }
  0x47   :  { %610 = vmatmul.mubr.f32.vlgmr.msra.gmra.mrb[0].mxu0 %v2442_v34  ;;  %1660 = vmatprep.subr.bf16.mxu1 %v1659_v30  ;;  %v1599_v49 = vpack.c.bf16 %v312_v42, %v308_v40  ;;  %v311_v50 = vld [vmem:[%s3861_s1 + $0x8a0] sm:$0xff]  ;;  %v316_v53 = vld [vmem:[%s3861_s1 + $0x8c8] sm:$0xff]  ;;  %v1669_v3 = vpack.c.bf16 %v65_v59, %v61_v33  ;;  %v82_v12 = vld [vmem:[%s3861_s1 + $0x178] sm:$0xff] }
  0x48   :  { %1594 = vmatpush1.bf16.msra.mxu0 %v1593_v29  ;;  %v320_v54 = vld [vmem:[%s3861_s1 + $0x8e8] sm:$0xff]  ;;  %v1601_v56 = vpack.c.bf16 %v311_v50, %v307_v46  ;;  %v315_v58 = vld [vmem:[%s3861_s1 + $0x8c0] sm:$0xff]  ;;  %v1675_v17 = vpack.c.bf16 %v82_v12, %v78_v11  ;;  %v77_v19 = vld [vmem:[%s3861_s1 + $0x150] sm:$0xff] }
  0x49   :  { %1596 = vmatprep.subr.bf16.mxu0 %v1595_v36  ;;  %v1603_v60 = vpack.c.bf16 %v320_v54, %v316_v53  ;;  %v319_v62 = vld [vmem:[%s3861_s1 + $0x8e0] sm:$0xff]  ;;  %v324_v1 = vld [vmem:[%s3861_s1 + $0x908] sm:$0xff]  ;;  %v81_v20 = vld [vmem:[%s3861_s1 + $0x170] sm:$0xff] }
  0x4a   :  { %1662 = vmatpush1.bf16.msra.mxu1 %v1661_v43  ;;  %v328_v2 = vld [vmem:[%s3861_s1 + $0x928] sm:$0xff]  ;;  %v1605_v4 = vpack.c.bf16 %v319_v62, %v315_v58  ;;  %v323_v6 = vld [vmem:[%s3861_s1 + $0x900] sm:$0xff]  ;;  %v86_v23 = vld [vmem:[%s3861_s1 + $0x198] sm:$0xff]  ;;  %v1677_v28 = vpack.c.bf16 %v81_v20, %v77_v19 }
  0x4b   :  { %1664 = vmatprep.subr.bf16.mxu1 %v1663_v45  ;;  %v1607_v9 = vpack.c.bf16 %v328_v2, %v324_v1  ;;  %v327_v10 = vld [vmem:[%s3861_s1 + $0x920] sm:$0xff]  ;;  %v332_v13 = vld [vmem:[%s3861_s1 + $0x948] sm:$0xff]  ;;  %v90_v24 = vld [vmem:[%s3861_s1 + $0x1b8] sm:$0xff] }
  0x4c   :  { %1598 = vmatpush1.bf16.msra.mxu0 %v1597_v44  ;;  %v336_v14 = vld [vmem:[%s3861_s1 + $0x968] sm:$0xff]  ;;  %v1609_v16 = vpack.c.bf16 %v327_v10, %v323_v6  ;;  %v331_v18 = vld [vmem:[%s3861_s1 + $0x940] sm:$0xff]  ;;  %v1679_v31 = vpack.c.bf16 %v90_v24, %v86_v23  ;;  %v85_v32 = vld [vmem:[%s3861_s1 + $0x190] sm:$0xff] }
  0x4d   :  { %1600 = vmatprep.subr.bf16.mxu0 %v1599_v49  ;;  %v1611_v21 = vpack.c.bf16 %v336_v14, %v332_v13  ;;  %v335_v22 = vld [vmem:[%s3861_s1 + $0x960] sm:$0xff]  ;;  %v340_v26 = vld [vmem:[%s3861_s1 + $0x988] sm:$0xff]  ;;  %v89_v35 = vld [vmem:[%s3861_s1 + $0x1b0] sm:$0xff] }
  0x4e   :  { %1666 = vmatpush1.bf16.msra.mxu1 %v1665_v55  ;;  %v344_v27 = vld [vmem:[%s3861_s1 + $0x9a8] sm:$0xff]  ;;  %v339_v29 = vld [vmem:[%s3861_s1 + $0x980] sm:$0xff]  ;;  %v1613_v30 = vpack.c.bf16 %v335_v22, %v331_v18  ;;  %v94_v39 = vld [vmem:[%s3861_s1 + $0x1d8] sm:$0xff]  ;;  %v1681_v45 = vpack.c.bf16 %v89_v35, %v85_v32 }
  0x4f   :  { %1668 = vmatprep.subr.bf16.mxu1 %v1667_v57  ;;  %v2696_v36 = vld.sshfl [vmem:[%s3860_s0 + $0x8] sm:$0x33 pattern:$0x76325410]  ;;  %v1615_v37 = vpack.c.bf16 %v344_v27, %v340_v26  ;;  %v343_v38 = vld [vmem:[%s3861_s1 + $0x9a0] sm:$0xff]  ;;  %v98_v40 = vld [vmem:[%s3861_s1 + $0x1f8] sm:$0xff] }
  0x50   :  { %1602 = vmatpush1.bf16.msra.mxu0 %v1601_v56  ;;  %v2709_v42 = vcombine.high %v2696_v36, %v2696_v36  ;;  %v348_v43 = vld [vmem:[%s3861_s1 + $0x9c8] sm:$0xff]  ;;  %v1617_v46 = vpack.c.bf16 %v343_v38, %v339_v29  ;;  %v1683_v47 = vpack.c.bf16 %v98_v40, %v94_v39  ;;  %v347_v48 = vld [vmem:[%s3861_s1 + $0x9c0] sm:$0xff]  ;;  %v93_v49 = vld [vmem:[%s3861_s1 + $0x1d0] sm:$0xff] }
  0x51   :  { %1604 = vmatprep.subr.bf16.mxu0 %v1603_v60  ;;  %v352_v44 = vld [vmem:[%s3861_s1 + $0x9e8] sm:$0xff]  ;;  %v97_v50 = vld [vmem:[%s3861_s1 + $0x1f0] sm:$0xff]  ;;  %v351_v52 = vld [vmem:[%s3861_s1 + $0x9e0] sm:$0xff] }
  0x52   :  { %1670 = vmatpush1.bf16.msra.mxu1 %v1669_v3  ;;  %680 = vmatprep.mubr.f32.mxu0 %v2709_v42  ;;  %v1619_v51 = vpack.c.bf16 %v352_v44, %v348_v43  ;;  %v102_v53 = vld [vmem:[%s3861_s1 + $0x218] sm:$0xff]  ;;  %v356_v55 = vld [vmem:[%s3861_s1 + $0xa08] sm:$0xff]  ;;  %v1685_v57 = vpack.c.bf16 %v97_v50, %v93_v49  ;;  %v1621_v58 = vpack.c.bf16 %v351_v52, %v347_v48  ;;  %v355_v59 = vld [vmem:[%s3861_s1 + $0xa00] sm:$0xff] }
  0x53   :  { %1672 = vmatprep.subr.bf16.mxu1 %v1671_v5  ;;  %v106_v54 = vld [vmem:[%s3861_s1 + $0x238] sm:$0xff]  ;;  %v360_v56 = vld [vmem:[%s3861_s1 + $0xa28] sm:$0xff]  ;;  %v101_v60 = vld [vmem:[%s3861_s1 + $0x210] sm:$0xff] }
  0x54   :  { %1606 = vmatpush1.bf16.msra.mxu0 %v1605_v4  ;;  %v1687_v33 = vpack.c.bf16 %v106_v54, %v102_v53  ;;  %v105_v62 = vld [vmem:[%s3861_s1 + $0x230] sm:$0xff]  ;;  %v1623_v63 = vpack.c.bf16 %v360_v56, %v356_v55  ;;  %v359_v0 = vld [vmem:[%s3861_s1 + $0xa20] sm:$0xff]  ;;  %v110_v1 = vld [vmem:[%s3861_s1 + $0x258] sm:$0xff] }
  0x55   :  { %1608 = vmatprep.subr.bf16.mxu0 %v1607_v9  ;;  %v114_v2 = vld [vmem:[%s3861_s1 + $0x278] sm:$0xff]  ;;  %v364_v3 = vld [vmem:[%s3861_s1 + $0xa48] sm:$0xff]  ;;  %v1689_v5 = vpack.c.bf16 %v105_v62, %v101_v60  ;;  %v1625_v6 = vpack.c.bf16 %v359_v0, %v355_v59  ;;  %v363_v8 = vld [vmem:[%s3861_s1 + $0xa40] sm:$0xff] }
  0x56   :  { %1674 = vmatpush1.bf16.msra.mxu1 %v1673_v15  ;;  %v368_v4 = vld [vmem:[%s3861_s1 + $0xa68] sm:$0xff]  ;;  %v1691_v7 = vpack.c.bf16 %v114_v2, %v110_v1  ;;  %v109_v9 = vld [vmem:[%s3861_s1 + $0x250] sm:$0xff]  ;;  %v367_v12 = vld [vmem:[%s3861_s1 + $0xa60] sm:$0xff] }
  0x57   :  { %1676 = vmatprep.subr.bf16.mxu1 %v1675_v17  ;;  %v113_v10 = vld [vmem:[%s3861_s1 + $0x270] sm:$0xff]  ;;  %v1627_v11 = vpack.c.bf16 %v368_v4, %v364_v3  ;;  %v118_v13 = vld [vmem:[%s3861_s1 + $0x298] sm:$0xff]  ;;  %v372_v15 = vld [vmem:[%s3861_s1 + $0xa88] sm:$0xff]  ;;  %v1629_v18 = vpack.c.bf16 %v367_v12, %v363_v8 }
  0x58   :  { %1610 = vmatpush1.bf16.msra.mxu0 %v1609_v16  ;;  %v122_v14 = vld [vmem:[%s3861_s1 + $0x2b8] sm:$0xff]  ;;  %v376_v16 = vld [vmem:[%s3861_s1 + $0xaa8] sm:$0xff]  ;;  %v1693_v17 = vpack.c.bf16 %v113_v10, %v109_v9  ;;  %v371_v20 = vld [vmem:[%s3861_s1 + $0xa80] sm:$0xff] }
  0x59   :  { %1612 = vmatprep.subr.bf16.mxu0 %v1611_v21  ;;  %v1695_v19 = vpack.c.bf16 %v122_v14, %v118_v13  ;;  %v117_v21 = vld [vmem:[%s3861_s1 + $0x290] sm:$0xff]  ;;  %v1631_v23 = vpack.c.bf16 %v376_v16, %v372_v15  ;;  %v375_v24 = vld [vmem:[%s3861_s1 + $0xaa0] sm:$0xff]  ;;  %v126_v26 = vld [vmem:[%s3861_s1 + $0x2d8] sm:$0xff] }
  0x5a   :  { %1678 = vmatpush1.bf16.msra.mxu1 %v1677_v28  ;;  %v121_v22 = vld [vmem:[%s3861_s1 + $0x2b0] sm:$0xff]  ;;  %v130_v27 = vld [vmem:[%s3861_s1 + $0x2f8] sm:$0xff]  ;;  %v380_v28 = vld [vmem:[%s3861_s1 + $0xac8] sm:$0xff] }
  0x5b   :  { %1680 = vmatprep.subr.bf16.mxu1 %v1679_v31  ;;  %v384_v29 = vld [vmem:[%s3861_s1 + $0xae8] sm:$0xff]  ;;  %v1633_v31 = vpack.c.bf16 %v375_v24, %v371_v20  ;;  %v1699_v32 = vpack.c.bf16 %v130_v27, %v126_v26  ;;  %v379_v35 = vld [vmem:[%s3861_s1 + $0xac0] sm:$0xff]  ;;  %v129_v38 = vld [vmem:[%s3861_s1 + $0x2f0] sm:$0xff] }
  0x5c   :  { %1614 = vmatpush1.bf16.msra.mxu0 %v1613_v30  ;;  %v1697_v30 = vpack.c.bf16 %v121_v22, %v117_v21  ;;  %v1635_v39 = vpack.c.bf16 %v384_v29, %v380_v28  ;;  %v383_v40 = vld [vmem:[%s3861_s1 + $0xae0] sm:$0xff]  ;;  %v134_v43 = vld [vmem:[%s3861_s1 + $0x318] sm:$0xff]  ;;  %v137_v52 = vld [vmem:[%s3861_s1 + $0x330] sm:$0xff] }
  0x5d   :  { %1616 = vmatprep.subr.bf16.mxu0 %v1615_v37  ;;  %v125_v37 = vld [vmem:[%s3861_s1 + $0x2d0] sm:$0xff]  ;;  %v138_v44 = vld [vmem:[%s3861_s1 + $0x338] sm:$0xff]  ;;  %v1637_v48 = vpack.c.bf16 %v383_v40, %v379_v35  ;;  %v387_v50 = vld [vmem:[%s3861_s1 + $0xb00] sm:$0xff] }
  0x5e   :  { %1682 = vmatpush1.bf16.msra.mxu1 %v1681_v45  ;;  %v388_v45 = vld [vmem:[%s3861_s1 + $0xb08] sm:$0xff]  ;;  %v1703_v49 = vpack.c.bf16 %v138_v44, %v134_v43  ;;  %v391_v54 = vld [vmem:[%s3861_s1 + $0xb20] sm:$0xff]  ;;  %v142_v55 = vld [vmem:[%s3861_s1 + $0x358] sm:$0xff] }
  0x5f   :  { %1684 = vmatprep.subr.bf16.mxu1 %v1683_v47  ;;  %v1701_v47 = vpack.c.bf16 %v129_v38, %v125_v37  ;;  %v146_v56 = vld [vmem:[%s3861_s1 + $0x378] sm:$0xff]  ;;  %v1641_v59 = vpack.c.bf16 %v391_v54, %v387_v50  ;;  %v395_v62 = vld [vmem:[%s3861_s1 + $0xb40] sm:$0xff]  ;;  %v145_v0 = vld [vmem:[%s3861_s1 + $0x370] sm:$0xff] }
  0x60   :  { %1618 = vmatpush1.bf16.msra.mxu0 %v1617_v46  ;;  %v392_v46 = vld [vmem:[%s3861_s1 + $0xb28] sm:$0xff]  ;;  %v1707_v60 = vpack.c.bf16 %v146_v56, %v142_v55  ;;  %v399_v2 = vld [vmem:[%s3861_s1 + $0xb60] sm:$0xff]  ;;  %v150_v3 = vld [vmem:[%s3861_s1 + $0x398] sm:$0xff] }
  0x61   :  { %1620 = vmatprep.subr.bf16.mxu0 %v1619_v51  ;;  %v133_v51 = vld [vmem:[%s3861_s1 + $0x310] sm:$0xff]  ;;  %v1639_v53 = vpack.c.bf16 %v392_v46, %v388_v45  ;;  %v154_v4 = vld [vmem:[%s3861_s1 + $0x3b8] sm:$0xff]  ;;  %v1645_v8 = vpack.c.bf16 %v399_v2, %v395_v62  ;;  %v403_v10 = vld [vmem:[%s3861_s1 + $0xb80] sm:$0xff] }
  0x62   :  { %1686 = vmatpush1.bf16.msra.mxu1 %v1685_v57  ;;  %v396_v57 = vld [vmem:[%s3861_s1 + $0xb48] sm:$0xff]  ;;  %v1711_v9 = vpack.c.bf16 %v154_v4, %v150_v3  ;;  %v153_v12 = vld [vmem:[%s3861_s1 + $0x3b0] sm:$0xff]  ;;  %v407_v14 = vld [vmem:[%s3861_s1 + $0xba0] sm:$0xff] }
  0x63   :  { %1688 = vmatprep.subr.bf16.mxu1 %v1687_v33  ;;  %v1705_v33 = vpack.c.bf16 %v137_v52, %v133_v51  ;;  %v158_v15 = vld [vmem:[%s3861_s1 + $0x3d8] sm:$0xff]  ;;  %v1649_v20 = vpack.c.bf16 %v407_v14, %v403_v10  ;;  %v411_v22 = vld [vmem:[%s3861_s1 + $0xbc0] sm:$0xff]  ;;  %v161_v24 = vld [vmem:[%s3861_s1 + $0x3f0] sm:$0xff] }
  0x64   :  { %1622 = vmatpush1.bf16.msra.mxu0 %v1621_v58  ;;  %v400_v58 = vld [vmem:[%s3861_s1 + $0xb68] sm:$0xff]  ;;  %v162_v16 = vld [vmem:[%s3861_s1 + $0x3f8] sm:$0xff]  ;;  %v415_v27 = vld [vmem:[%s3861_s1 + $0xbe0] sm:$0xff] }
  0x65   :  { %1624 = vmatprep.subr.bf16.mxu0 %v1623_v63  ;;  %v141_v63 = vld [vmem:[%s3861_s1 + $0x350] sm:$0xff]  ;;  %v1643_v1 = vpack.c.bf16 %v400_v58, %v396_v57  ;;  %v1715_v21 = vpack.c.bf16 %v162_v16, %v158_v15  ;;  %v166_v28 = vld [vmem:[%s3861_s1 + $0x418] sm:$0xff] }
  0x66   :  { %1690 = vmatpush1.bf16.msra.mxu1 %v1689_v5  ;;  %v404_v5 = vld [vmem:[%s3861_s1 + $0xb88] sm:$0xff]  ;;  %v170_v29 = vld [vmem:[%s3861_s1 + $0x438] sm:$0xff]  ;;  %v165_v35 = vld [vmem:[%s3861_s1 + $0x410] sm:$0xff] }
  0x67   :  { %1692 = vmatprep.subr.bf16.mxu1 %v1691_v7  ;;  %v1709_v7 = vpack.c.bf16 %v145_v0, %v141_v63  ;;  %v169_v37 = vld [vmem:[%s3861_s1 + $0x430] sm:$0xff]  ;;  %v174_v38 = vld [vmem:[%s3861_s1 + $0x458] sm:$0xff] }
  0x68   :  { %1626 = vmatpush1.bf16.msra.mxu0 %v1625_v6  ;;  %v408_v6 = vld [vmem:[%s3861_s1 + $0xba8] sm:$0xff]  ;;  %v1721_v40 = vpack.c.bf16 %v169_v37, %v165_v35 }
  0x69   :  { %1628 = vmatprep.subr.bf16.mxu0 %v1627_v11  ;;  %v149_v11 = vld [vmem:[%s3861_s1 + $0x390] sm:$0xff]  ;;  %v1647_v13 = vpack.c.bf16 %v408_v6, %v404_v5 }
  0x6a   :  { %1694 = vmatpush1.bf16.msra.mxu1 %v1693_v17  ;;  %v412_v17 = vld [vmem:[%s3861_s1 + $0xbc8] sm:$0xff] }
  0x6b   :  { %1696 = vmatprep.subr.bf16.mxu1 %v1695_v19  ;;  %v1713_v19 = vpack.c.bf16 %v153_v12, %v149_v11 }
  0x6c   :  { %1630 = vmatpush1.bf16.msra.mxu0 %v1629_v18  ;;  %v416_v18 = vld [vmem:[%s3861_s1 + $0xbe8] sm:$0xff] }
  0x6d   :  { %1632 = vmatprep.subr.bf16.mxu0 %v1631_v23  ;;  %v157_v23 = vld [vmem:[%s3861_s1 + $0x3d0] sm:$0xff]  ;;  %v1651_v26 = vpack.c.bf16 %v416_v18, %v412_v17 }
  0x6e   :  { %1698 = vmatpush1.bf16.msra.mxu1 %v1697_v30  ;;  %v1717_v30 = vpack.c.bf16 %v161_v24, %v157_v23 }
  0x6f   :  { %1700 = vmatprep.subr.bf16.mxu1 %v1699_v32  ;;  %v1719_v32 = vpack.c.bf16 %v170_v29, %v166_v28 }
  0x70   :  { %1634 = vmatpush1.bf16.msra.mxu0 %v1633_v31  ;;  %v1653_v31 = vpack.c.bf16 %v415_v27, %v411_v22 }
  0x71   :  { %1636 = vmatprep.subr.bf16.mxu0 %v1635_v39  ;;  %v178_v39 = vld [vmem:[%s3861_s1 + $0x478] sm:$0xff] }
  0x72   :  { %1702 = vmatpush1.bf16.msra.mxu1 %v1701_v47 }
  0x73   :  { %1704 = vmatprep.subr.bf16.mxu1 %v1703_v49 }
  0x74   :  { %1638 = vmatpush1.bf16.msra.mxu0 %v1637_v48 }
  0x75   :  { %1640 = vmatprep.subr.bf16.mxu0 %v1639_v53 }
  0x76   :  { %1706 = vmatpush1.bf16.msra.mxu1 %v1705_v33 }
  0x77   :  { %1708 = vmatprep.subr.bf16.mxu1 %v1707_v60 }
  0x78   :  { %1642 = vmatpush1.bf16.msra.mxu0 %v1641_v59 }
  0x79   :  { %1644 = vmatprep.subr.bf16.mxu0 %v1643_v1 }
  0x7a   :  { %1710 = vmatpush1.bf16.msra.mxu1 %v1709_v7 }
  0x7b   :  { %1712 = vmatprep.subr.bf16.mxu1 %v1711_v9 }
  0x7c   :  { %1646 = vmatpush1.bf16.msra.mxu0 %v1645_v8 }
  0x7d   :  { %1648 = vmatprep.subr.bf16.mxu0 %v1647_v13 }
  0x7e   :  { %1714 = vmatpush1.bf16.msra.mxu1 %v1713_v19 }
  0x7f   :  { %1716 = vmatprep.subr.bf16.mxu1 %v1715_v21 }
  0x80   :  { %1650 = vmatpush1.bf16.msra.mxu0 %v1649_v20 }
  0x81   :  { %1652 = vmatprep.subr.bf16.mxu0 %v1651_v26 }
  0x82   :  { %1718 = vmatpush1.bf16.msra.mxu1 %v1717_v30 }
  0x83   :  { %14 = vsyncpa [#allocation3], 0  ;;  %1720 = vmatprep.subr.bf16.mxu1 %v1719_v32  ;;  %v1723_v43 = vpack.c.bf16 %v178_v39, %v174_v38  ;;  %v173_v44 = vld [vmem:[%s3861_s1 + $0x450] sm:$0xff]  ;;  %v182_v46 = vld [vmem:[%s3861_s1 + $0x498] sm:$0xff]  ;;  %vm2068_vm0 = vmmov 0   ;;  %vm1306_vm1 = vcmask 523264  }
  0x84   :  { %1654 = vmatpush1.bf16.msra.mxu0 %v1653_v31  ;;  %v177_v45 = vld [vmem:[%s3861_s1 + $0x470] sm:$0xff]  ;;  %v186_v47 = vld [vmem:[%s3861_s1 + $0x4b8] sm:$0xff]  ;;  %v901_v16 = vld [vmem:[%s3863_s3 + $0x8] sm:$0xff]  ;;  %vm1380_vm2 = vcmask 25600  }
  0x85   :  { %752 = vmatmul.mubr.f32.vlgmr.msra.gmra.mrb[2].mxu1 %v2427_v25  ;;  %v1725_v48 = vpack.c.bf16 %v177_v45, %v173_v44  ;;  %v1727_v49 = vpack.c.bf16 %v186_v47, %v182_v46  ;;  %v181_v50 = vld [vmem:[%s3861_s1 + $0x490] sm:$0xff]  ;;  %v190_v25 = vld [vmem:[%s3861_s1 + $0x4d8] sm:$0xff]  ;;  %v900_v18 = vld [vmem:[%s3863_s3] sm:$0xff] }
  0x86   :  { %1722 = vmatpush1.bf16.msra.mxu1 %v1721_v40  ;;  %v185_v51 = vld [vmem:[%s3861_s1 + $0x4b0] sm:$0xff]  ;;  %822 = vmatprep.mubr.f32.mxu1 %v2462_v41  ;;  %v198_v55 = vld [vmem:[%s3861_s1 + $0x518] sm:$0xff]  ;;  %v905_v22 = vld [vmem:[%s3863_s3 + $0x28] sm:$0xff] }
  0x87   :  { %681 = vmatmul.mubr.f32.vlgmr.msra.gmra.mrb[0].mxu0 %v2696_v36  ;;  %1724 = vmatprep.subr.bf16.mxu1 %v1723_v43  ;;  %v194_v36 = vld [vmem:[%s3861_s1 + $0x4f8] sm:$0xff]  ;;  %v1729_v52 = vpack.c.bf16 %v185_v51, %v181_v50  ;;  %v189_v54 = vld [vmem:[%s3861_s1 + $0x4d0] sm:$0xff]  ;;  %v904_v27 = vld [vmem:[%s3863_s3 + $0x20] sm:$0xff] }
  0x88   :  { %v1731_v53 = vpack.c.bf16 %v194_v36, %v190_v25  ;;  %v193_v41 = vld [vmem:[%s3861_s1 + $0x4f0] sm:$0xff]  ;;  %v202_v56 = vld [vmem:[%s3861_s1 + $0x538] sm:$0xff]  ;;  %v909_v29 = vld [vmem:[%s3863_s3 + $0x48] sm:$0xff] }
  0x89   :  { %v1733_v57 = vpack.c.bf16 %v193_v41, %v189_v54  ;;  %v1735_v58 = vpack.c.bf16 %v202_v56, %v198_v55  ;;  %v197_v33 = vld [vmem:[%s3861_s1 + $0x510] sm:$0xff]  ;;  %v206_v60 = vld [vmem:[%s3861_s1 + $0x558] sm:$0xff]  ;;  %v908_v43 = vld [vmem:[%s3863_s3 + $0x40] sm:$0xff] }
  0x8a   :  { %1726 = vmatpush1.bf16.msra.mxu1 %v1725_v48  ;;  %v201_v59 = vld [vmem:[%s3861_s1 + $0x530] sm:$0xff]  ;;  %v210_v62 = vld [vmem:[%s3861_s1 + $0x578] sm:$0xff]  ;;  %v913_v46 = vld [vmem:[%s3863_s3 + $0x68] sm:$0xff] }
  0x8b   :  { %1728 = vmatprep.subr.bf16.mxu1 %v1727_v49  ;;  %v1737_v63 = vpack.c.bf16 %v201_v59, %v197_v33  ;;  %v1739_v0 = vpack.c.bf16 %v210_v62, %v206_v60  ;;  %v205_v1 = vld [vmem:[%s3861_s1 + $0x550] sm:$0xff]  ;;  %v214_v3 = vld [vmem:[%s3861_s1 + $0x598] sm:$0xff]  ;;  %v917_v55 = vld [vmem:[%s3863_s3 + $0x88] sm:$0xff] }
  0x8c   :  { %v209_v2 = vld [vmem:[%s3861_s1 + $0x570] sm:$0xff]  ;;  %v218_v4 = vld [vmem:[%s3861_s1 + $0x5b8] sm:$0xff] }
  0x8d   :  { %v1741_v5 = vpack.c.bf16 %v209_v2, %v205_v1  ;;  %v1743_v6 = vpack.c.bf16 %v218_v4, %v214_v3  ;;  %v213_v7 = vld [vmem:[%s3861_s1 + $0x590] sm:$0xff]  ;;  %v222_v9 = vld [vmem:[%s3861_s1 + $0x5d8] sm:$0xff]  ;;  %v921_v3 = vld [vmem:[%s3863_s3 + $0xa8] sm:$0xff] }
  0x8e   :  { %1730 = vmatpush1.bf16.msra.mxu1 %v1729_v52  ;;  %v217_v8 = vld [vmem:[%s3861_s1 + $0x5b0] sm:$0xff]  ;;  %v226_v10 = vld [vmem:[%s3861_s1 + $0x5f8] sm:$0xff] }
  0x8f   :  { %1732 = vmatprep.subr.bf16.mxu1 %v1731_v53  ;;  %v221_v11 = vld [vmem:[%s3861_s1 + $0x5d0] sm:$0xff]  ;;  %v1745_v13 = vpack.c.bf16 %v217_v8, %v213_v7  ;;  %v230_v14 = vld [vmem:[%s3861_s1 + $0x618] sm:$0xff]  ;;  %v1747_v19 = vpack.c.bf16 %v226_v10, %v222_v9  ;;  %v912_v53 = vld [vmem:[%s3863_s3 + $0x60] sm:$0xff] }
  0x90   :  { %v225_v12 = vld [vmem:[%s3861_s1 + $0x5f0] sm:$0xff]  ;;  %v234_v15 = vld [vmem:[%s3861_s1 + $0x638] sm:$0xff] }
  0x91   :  { %v903_v17 = vld [vmem:[%s3863_s3 + $0x18] sm:$0xff]  ;;  %v902_v21 = vld [vmem:[%s3863_s3 + $0x10] sm:$0xff]  ;;  %v1749_v31 = vpack.c.bf16 %v225_v12, %v221_v11  ;;  %v1751_v38 = vpack.c.bf16 %v234_v15, %v230_v14  ;;  %v920_v12 = vld [vmem:[%s3863_s3 + $0xa0] sm:$0xff] }
  0x92   :  { %1734 = vmatpush1.bf16.msra.mxu1 %v1733_v57  ;;  %v1847_v20 = vpack.c.bf16 %v903_v17, %v901_v16  ;;  %v907_v23 = vld [vmem:[%s3863_s3 + $0x38] sm:$0xff]  ;;  %v1849_v24 = vpack.c.bf16 %v902_v21, %v900_v18  ;;  %v906_v28 = vld [vmem:[%s3863_s3 + $0x30] sm:$0xff]  ;;  %v925_v15 = vld [vmem:[%s3863_s3 + $0xc8] sm:$0xff] }
  0x93   :  { %1736 = vmatprep.subr.bf16.mxu1 %v1735_v58  ;;  %v1851_v26 = vpack.c.bf16 %v907_v23, %v905_v22  ;;  %v911_v30 = vld [vmem:[%s3863_s3 + $0x58] sm:$0xff]  ;;  %v229_v32 = vld [vmem:[%s3861_s1 + $0x610] sm:$0xff]  ;;  %v1853_v37 = vpack.c.bf16 %v906_v28, %v904_v27  ;;  %v929_v28 = vld [vmem:[%s3863_s3 + $0xe8] sm:$0xff] }
  0x94   :  { %1848 = vmatprep.subr.bf16.mxu0 %v1847_v20  ;;  %v233_v35 = vld [vmem:[%s3861_s1 + $0x630] sm:$0xff]  ;;  %v238_v39 = vld [vmem:[%s3861_s1 + $0x658] sm:$0xff]  ;;  %v1855_v40 = vpack.c.bf16 %v911_v30, %v909_v29 }
  0x95   :  { %1850 = vmatpush1.bf16.msra.mxu0 %v1849_v24  ;;  %v910_v44 = vld [vmem:[%s3863_s3 + $0x50] sm:$0xff]  ;;  %v242_v45 = vld [vmem:[%s3861_s1 + $0x678] sm:$0xff]  ;;  %v1753_v48 = vpack.c.bf16 %v233_v35, %v229_v32  ;;  %v924_v24 = vld [vmem:[%s3863_s3 + $0xc0] sm:$0xff] }
  0x96   :  { %1738 = vmatpush1.bf16.msra.mxu1 %v1737_v63  ;;  %1852 = vmatprep.subr.bf16.mxu0 %v1851_v26  ;;  %v915_v47 = vld [vmem:[%s3863_s3 + $0x78] sm:$0xff]  ;;  %v237_v49 = vld [vmem:[%s3861_s1 + $0x650] sm:$0xff]  ;;  %v1857_v51 = vpack.c.bf16 %v910_v44, %v908_v43  ;;  %v1755_v25 = vpack.c.bf16 %v242_v45, %v238_v39  ;;  %v933_v45 = vld [vmem:[%s3863_s3 + $0x108] sm:$0xff] }
  0x97   :  { %1740 = vmatprep.subr.bf16.mxu1 %v1739_v0  ;;  %v241_v50 = vld [vmem:[%s3861_s1 + $0x670] sm:$0xff]  ;;  %v246_v36 = vld [vmem:[%s3861_s1 + $0x698] sm:$0xff]  ;;  %v1859_v52 = vpack.c.bf16 %v915_v47, %v913_v46  ;;  %v916_v0 = vld [vmem:[%s3863_s3 + $0x80] sm:$0xff] }
  0x98   :  { %v914_v54 = vld [vmem:[%s3863_s3 + $0x70] sm:$0xff]  ;;  %v250_v41 = vld [vmem:[%s3861_s1 + $0x6b8] sm:$0xff]  ;;  %v1757_v57 = vpack.c.bf16 %v241_v50, %v237_v49 }
  0x99   :  { %1854 = vmatpush1.bf16.msra.mxu0 %v1853_v37  ;;  %v919_v56 = vld [vmem:[%s3863_s3 + $0x98] sm:$0xff]  ;;  %v245_v58 = vld [vmem:[%s3861_s1 + $0x690] sm:$0xff]  ;;  %v1861_v59 = vpack.c.bf16 %v914_v54, %v912_v53  ;;  %v1759_v60 = vpack.c.bf16 %v250_v41, %v246_v36  ;;  %v937_v41 = vld [vmem:[%s3863_s3 + $0x128] sm:$0xff] }
  0x9a   :  { %1742 = vmatpush1.bf16.msra.mxu1 %v1741_v5  ;;  %1856 = vmatprep.subr.bf16.mxu0 %v1855_v40  ;;  %v249_v33 = vld [vmem:[%s3861_s1 + $0x6b0] sm:$0xff]  ;;  %v254_v62 = vld [vmem:[%s3861_s1 + $0x6d8] sm:$0xff]  ;;  %v1863_v63 = vpack.c.bf16 %v919_v56, %v917_v55  ;;  %v928_v40 = vld [vmem:[%s3863_s3 + $0xe0] sm:$0xff] }
  0x9b   :  { %1744 = vmatprep.subr.bf16.mxu1 %v1743_v6  ;;  %v918_v1 = vld [vmem:[%s3863_s3 + $0x90] sm:$0xff]  ;;  %v258_v2 = vld [vmem:[%s3861_s1 + $0x6f8] sm:$0xff]  ;;  %v1761_v5 = vpack.c.bf16 %v249_v33, %v245_v58 }
  0x9c   :  { %v923_v4 = vld [vmem:[%s3863_s3 + $0xb8] sm:$0xff]  ;;  %v253_v6 = vld [vmem:[%s3861_s1 + $0x6d0] sm:$0xff]  ;;  %v1865_v8 = vpack.c.bf16 %v918_v1, %v916_v0  ;;  %v1763_v9 = vpack.c.bf16 %v258_v2, %v254_v62  ;;  %v941_v2 = vld [vmem:[%s3863_s3 + $0x148] sm:$0xff] }
  0x9d   :  { %1858 = vmatpush1.bf16.msra.mxu0 %v1857_v51  ;;  %v257_v7 = vld [vmem:[%s3861_s1 + $0x6f0] sm:$0xff]  ;;  %v262_v10 = vld [vmem:[%s3861_s1 + $0x718] sm:$0xff]  ;;  %v1867_v11 = vpack.c.bf16 %v923_v4, %v921_v3 }
  0x9e   :  { %1746 = vmatpush1.bf16.msra.mxu1 %v1745_v13  ;;  %1860 = vmatprep.subr.bf16.mxu0 %v1859_v52  ;;  %v922_v13 = vld [vmem:[%s3863_s3 + $0xb0] sm:$0xff]  ;;  %v266_v14 = vld [vmem:[%s3861_s1 + $0x738] sm:$0xff]  ;;  %v1765_v17 = vpack.c.bf16 %v257_v7, %v253_v6  ;;  %v932_v52 = vld [vmem:[%s3863_s3 + $0x100] sm:$0xff] }
  0x9f   :  { %1748 = vmatprep.subr.bf16.mxu1 %v1747_v19  ;;  %v927_v16 = vld [vmem:[%s3863_s3 + $0xd8] sm:$0xff]  ;;  %v261_v18 = vld [vmem:[%s3861_s1 + $0x710] sm:$0xff]  ;;  %v1869_v20 = vpack.c.bf16 %v922_v13, %v920_v12  ;;  %v1767_v21 = vpack.c.bf16 %v266_v14, %v262_v10  ;;  %v940_v12 = vld [vmem:[%s3863_s3 + $0x140] sm:$0xff] }
  0xa0   :  { %v265_v19 = vld [vmem:[%s3861_s1 + $0x730] sm:$0xff]  ;;  %v270_v22 = vld [vmem:[%s3861_s1 + $0x758] sm:$0xff]  ;;  %v1871_v23 = vpack.c.bf16 %v927_v16, %v925_v15  ;;  %v945_v14 = vld [vmem:[%s3863_s3 + $0x168] sm:$0xff] }
  0xa1   :  { %1862 = vmatpush1.bf16.msra.mxu0 %v1861_v59  ;;  %v926_v26 = vld [vmem:[%s3863_s3 + $0xd0] sm:$0xff]  ;;  %v274_v27 = vld [vmem:[%s3861_s1 + $0x778] sm:$0xff]  ;;  %v1769_v30 = vpack.c.bf16 %v265_v19, %v261_v18 }
  0xa2   :  { %1750 = vmatpush1.bf16.msra.mxu1 %v1749_v31  ;;  %1864 = vmatprep.subr.bf16.mxu0 %v1863_v63  ;;  %v931_v29 = vld [vmem:[%s3863_s3 + $0xf8] sm:$0xff]  ;;  %v269_v31 = vld [vmem:[%s3861_s1 + $0x750] sm:$0xff]  ;;  %v1873_v35 = vpack.c.bf16 %v926_v26, %v924_v24  ;;  %v1771_v37 = vpack.c.bf16 %v274_v27, %v270_v22  ;;  %v936_v63 = vld [vmem:[%s3863_s3 + $0x120] sm:$0xff] }
  0xa3   :  { %1752 = vmatprep.subr.bf16.mxu1 %v1751_v38  ;;  %v273_v32 = vld [vmem:[%s3861_s1 + $0x770] sm:$0xff]  ;;  %v278_v38 = vld [vmem:[%s3861_s1 + $0x798] sm:$0xff]  ;;  %v1875_v39 = vpack.c.bf16 %v931_v29, %v929_v28  ;;  %v944_v24 = vld [vmem:[%s3863_s3 + $0x160] sm:$0xff] }
  0xa4   :  { %v930_v43 = vld [vmem:[%s3863_s3 + $0xf0] sm:$0xff]  ;;  %v282_v44 = vld [vmem:[%s3861_s1 + $0x7b8] sm:$0xff]  ;;  %v1773_v47 = vpack.c.bf16 %v273_v32, %v269_v31  ;;  %v949_v27 = vld [vmem:[%s3863_s3 + $0x188] sm:$0xff] }
  0xa5   :  { %1866 = vmatpush1.bf16.msra.mxu0 %v1865_v8  ;;  %v935_v46 = vld [vmem:[%s3863_s3 + $0x118] sm:$0xff]  ;;  %v281_v49 = vld [vmem:[%s3861_s1 + $0x7b0] sm:$0xff]  ;;  %v1877_v50 = vpack.c.bf16 %v930_v43, %v928_v40  ;;  %v1775_v51 = vpack.c.bf16 %v282_v44, %v278_v38  ;;  %v948_v38 = vld [vmem:[%s3863_s3 + $0x180] sm:$0xff] }
  0xa6   :  { %1754 = vmatpush1.bf16.msra.mxu1 %v1753_v48  ;;  %1868 = vmatprep.subr.bf16.mxu0 %v1867_v11  ;;  %v277_v48 = vld [vmem:[%s3861_s1 + $0x790] sm:$0xff]  ;;  %v1879_v36 = vpack.c.bf16 %v935_v46, %v933_v45  ;;  %v290_v54 = vld [vmem:[%s3861_s1 + $0x7f8] sm:$0xff]  ;;  %v953_v40 = vld [vmem:[%s3863_s3 + $0x1a8] sm:$0xff] }
  0xa7   :  { %1756 = vmatprep.subr.bf16.mxu1 %v1755_v25  ;;  %v286_v25 = vld [vmem:[%s3861_s1 + $0x7d8] sm:$0xff]  ;;  %v934_v53 = vld [vmem:[%s3863_s3 + $0x110] sm:$0xff]  ;;  %v1777_v56 = vpack.c.bf16 %v281_v49, %v277_v48 }
  0xa8   :  { %v939_v55 = vld [vmem:[%s3863_s3 + $0x138] sm:$0xff]  ;;  %v289_v58 = vld [vmem:[%s3861_s1 + $0x7f0] sm:$0xff]  ;;  %v1881_v33 = vpack.c.bf16 %v934_v53, %v932_v52  ;;  %v1779_v59 = vpack.c.bf16 %v290_v54, %v286_v25  ;;  %v952_v25 = vld [vmem:[%s3863_s3 + $0x1a0] sm:$0xff] }
  0xa9   :  { %1870 = vmatpush1.bf16.msra.mxu0 %v1869_v20  ;;  %v1883_v62 = vpack.c.bf16 %v939_v55, %v937_v41  ;;  %v938_v0 = vld [vmem:[%s3863_s3 + $0x130] sm:$0xff]  ;;  %v298_v1 = vld [vmem:[%s3861_s1 + $0x838] sm:$0xff]  ;;  %v957_v52 = vld [vmem:[%s3863_s3 + $0x1c8] sm:$0xff] }
  0xaa   :  { %1758 = vmatpush1.bf16.msra.mxu1 %v1757_v57  ;;  %1872 = vmatprep.subr.bf16.mxu0 %v1871_v23  ;;  %v285_v57 = vld [vmem:[%s3861_s1 + $0x7d0] sm:$0xff]  ;;  %v943_v3 = vld [vmem:[%s3863_s3 + $0x158] sm:$0xff] }
  0xab   :  { %1760 = vmatprep.subr.bf16.mxu1 %v1759_v60  ;;  %v294_v60 = vld [vmem:[%s3861_s1 + $0x818] sm:$0xff]  ;;  %v1781_v4 = vpack.c.bf16 %v289_v58, %v285_v57  ;;  %v293_v7 = vld [vmem:[%s3861_s1 + $0x810] sm:$0xff]  ;;  %v1887_v10 = vpack.c.bf16 %v943_v3, %v941_v2 }
  0xac   :  { %v1783_v6 = vpack.c.bf16 %v298_v1, %v294_v60  ;;  %v297_v8 = vld [vmem:[%s3861_s1 + $0x830] sm:$0xff]  ;;  %v306_v11 = vld [vmem:[%s3861_s1 + $0x878] sm:$0xff]  ;;  %v956_v60 = vld [vmem:[%s3863_s3 + $0x1c0] sm:$0xff] }
  0xad   :  { %1874 = vmatpush1.bf16.msra.mxu0 %v1873_v35  ;;  %v942_v13 = vld [vmem:[%s3863_s3 + $0x150] sm:$0xff]  ;;  %v947_v15 = vld [vmem:[%s3863_s3 + $0x178] sm:$0xff]  ;;  %v1785_v16 = vpack.c.bf16 %v297_v8, %v293_v7 }
  0xae   :  { %1762 = vmatpush1.bf16.msra.mxu1 %v1761_v5  ;;  %1876 = vmatprep.subr.bf16.mxu0 %v1875_v39  ;;  %v1885_v5 = vpack.c.bf16 %v938_v0, %v936_v63  ;;  %v301_v18 = vld [vmem:[%s3861_s1 + $0x850] sm:$0xff]  ;;  %v310_v20 = vld [vmem:[%s3861_s1 + $0x898] sm:$0xff]  ;;  %v1891_v23 = vpack.c.bf16 %v947_v15, %v945_v14  ;;  %v960_v15 = vld [vmem:[%s3863_s3 + $0x1e0] sm:$0xff] }
  0xaf   :  { %1764 = vmatprep.subr.bf16.mxu1 %v1763_v9  ;;  %v302_v9 = vld [vmem:[%s3861_s1 + $0x858] sm:$0xff]  ;;  %v305_v19 = vld [vmem:[%s3861_s1 + $0x870] sm:$0xff] }
  0xb0   :  { %v314_v22 = vld [vmem:[%s3861_s1 + $0x8b8] sm:$0xff]  ;;  %v946_v26 = vld [vmem:[%s3863_s3 + $0x170] sm:$0xff]  ;;  %v1789_v29 = vpack.c.bf16 %v305_v19, %v301_v18 }
  0xb1   :  { %1878 = vmatpush1.bf16.msra.mxu0 %v1877_v50  ;;  %v951_v28 = vld [vmem:[%s3863_s3 + $0x198] sm:$0xff]  ;;  %v309_v31 = vld [vmem:[%s3861_s1 + $0x890] sm:$0xff]  ;;  %v1893_v35 = vpack.c.bf16 %v946_v26, %v944_v24  ;;  %v965_v26 = vld [vmem:[%s3863_s3 + $0x208] sm:$0xff] }
  0xb2   :  { %1766 = vmatpush1.bf16.msra.mxu1 %v1765_v17  ;;  %1880 = vmatprep.subr.bf16.mxu0 %v1879_v36  ;;  %v1787_v17 = vpack.c.bf16 %v306_v11, %v302_v9  ;;  %v318_v32 = vld [vmem:[%s3861_s1 + $0x8d8] sm:$0xff]  ;;  %v950_v39 = vld [vmem:[%s3863_s3 + $0x190] sm:$0xff]  ;;  %v961_v11 = vld [vmem:[%s3863_s3 + $0x1e8] sm:$0xff] }
  0xb3   :  { %1768 = vmatprep.subr.bf16.mxu1 %v1767_v21  ;;  %v1889_v21 = vpack.c.bf16 %v942_v13, %v940_v12  ;;  %v955_v43 = vld [vmem:[%s3863_s3 + $0x1b8] sm:$0xff]  ;;  %v317_v46 = vld [vmem:[%s3861_s1 + $0x8d0] sm:$0xff]  ;;  %v1897_v49 = vpack.c.bf16 %v950_v39, %v948_v38 }
  0xb4   :  { %v326_v48 = vld [vmem:[%s3861_s1 + $0x918] sm:$0xff]  ;;  %v954_v36 = vld [vmem:[%s3863_s3 + $0x1b0] sm:$0xff] }
  0xb5   :  { %1882 = vmatpush1.bf16.msra.mxu0 %v1881_v33  ;;  %v330_v50 = vld [vmem:[%s3861_s1 + $0x938] sm:$0xff]  ;;  %v325_v55 = vld [vmem:[%s3861_s1 + $0x910] sm:$0xff]  ;;  %v1901_v58 = vpack.c.bf16 %v954_v36, %v952_v25 }
  0xb6   :  { %1770 = vmatpush1.bf16.msra.mxu1 %v1769_v30  ;;  %1884 = vmatprep.subr.bf16.mxu0 %v1883_v62  ;;  %v1791_v30 = vpack.c.bf16 %v314_v22, %v310_v20  ;;  %v959_v53 = vld [vmem:[%s3863_s3 + $0x1d8] sm:$0xff]  ;;  %v1799_v41 = vpack.c.bf16 %v330_v50, %v326_v48  ;;  %v958_v62 = vld [vmem:[%s3863_s3 + $0x1d0] sm:$0xff] }
  0xb7   :  { %1772 = vmatprep.subr.bf16.mxu1 %v1771_v37  ;;  %v1895_v37 = vpack.c.bf16 %v951_v28, %v949_v27  ;;  %v334_v57 = vld [vmem:[%s3861_s1 + $0x958] sm:$0xff]  ;;  %v333_v1 = vld [vmem:[%s3861_s1 + $0x950] sm:$0xff]  ;;  %v1905_v3 = vpack.c.bf16 %v958_v62, %v956_v60 }
  0xb8   :  { %v338_v33 = vld [vmem:[%s3861_s1 + $0x978] sm:$0xff]  ;;  %v337_v2 = vld [vmem:[%s3861_s1 + $0x970] sm:$0xff] }
  0xb9   :  { %1886 = vmatpush1.bf16.msra.mxu0 %v1885_v5  ;;  %v1803_v0 = vpack.c.bf16 %v338_v33, %v334_v57  ;;  %v346_v5 = vld [vmem:[%s3861_s1 + $0x9b8] sm:$0xff]  ;;  %v341_v7 = vld [vmem:[%s3861_s1 + $0x990] sm:$0xff] }
  0xba   :  { %1774 = vmatpush1.bf16.msra.mxu1 %v1773_v47  ;;  %1888 = vmatprep.subr.bf16.mxu0 %v1887_v10  ;;  %v321_v47 = vld [vmem:[%s3861_s1 + $0x8f0] sm:$0xff]  ;;  %v350_v10 = vld [vmem:[%s3861_s1 + $0x9d8] sm:$0xff] }
  0xbb   :  { %1776 = vmatprep.subr.bf16.mxu1 %v1775_v51  ;;  %v1899_v51 = vpack.c.bf16 %v955_v43, %v953_v40  ;;  %v1797_v54 = vpack.c.bf16 %v321_v47, %v317_v46  ;;  %v345_v8 = vld [vmem:[%s3861_s1 + $0x9b0] sm:$0xff]  ;;  %v963_v12 = vld [vmem:[%s3863_s3 + $0x1f8] sm:$0xff] }
  0xbc   :  { %v354_v13 = vld [vmem:[%s3861_s1 + $0x9f8] sm:$0xff]  ;;  %v1907_v14 = vpack.c.bf16 %v963_v12, %v961_v11  ;;  %v1809_v18 = vpack.c.bf16 %v345_v8, %v341_v7  ;;  %v349_v20 = vld [vmem:[%s3861_s1 + $0x9d0] sm:$0xff]  ;;  %v2041_v11 = vld.sshfl [vmem:[%s3860_s0 + $0x8] sm:$0x33 pattern:$0x76325410] }
  0xbd   :  { %1890 = vmatpush1.bf16.msra.mxu0 %v1889_v21  ;;  %v1811_v19 = vpack.c.bf16 %v354_v13, %v350_v10  ;;  %v353_v21 = vld [vmem:[%s3861_s1 + $0x9f0] sm:$0xff]  ;;  %v358_v22 = vld [vmem:[%s3861_s1 + $0xa18] sm:$0xff] }
  0xbe   :  { %1778 = vmatpush1.bf16.msra.mxu1 %v1777_v56  ;;  %1892 = vmatprep.subr.bf16.mxu0 %v1891_v23  ;;  %v329_v56 = vld [vmem:[%s3861_s1 + $0x930] sm:$0xff]  ;;  %v362_v23 = vld [vmem:[%s3861_s1 + $0xa38] sm:$0xff]  ;;  %v1813_v24 = vpack.c.bf16 %v353_v21, %v349_v20  ;;  %v964_v20 = vld [vmem:[%s3863_s3 + $0x200] sm:$0xff] }
  0xbf   :  { %1780 = vmatprep.subr.bf16.mxu1 %v1779_v59  ;;  %v1903_v59 = vpack.c.bf16 %v959_v53, %v957_v52  ;;  %v1801_v63 = vpack.c.bf16 %v329_v56, %v325_v55  ;;  %v967_v27 = vld [vmem:[%s3863_s3 + $0x218] sm:$0xff]  ;;  %v1815_v28 = vpack.c.bf16 %v362_v23, %v358_v22  ;;  %v369_v38 = vld [vmem:[%s3861_s1 + $0xa70] sm:$0xff] }
  0xc0   :  { %v374_v39 = vld [vmem:[%s3861_s1 + $0xa98] sm:$0xff]  ;;  %v377_v46 = vld [vmem:[%s3861_s1 + $0xab0] sm:$0xff] }
  0xc1   :  { %1894 = vmatpush1.bf16.msra.mxu0 %v1893_v35  ;;  %v378_v40 = vld [vmem:[%s3861_s1 + $0xab8] sm:$0xff]  ;;  %v385_v25 = vld [vmem:[%s3861_s1 + $0xaf0] sm:$0xff] }
  0xc2   :  { %1782 = vmatpush1.bf16.msra.mxu1 %v1781_v4  ;;  %1896 = vmatprep.subr.bf16.mxu0 %v1895_v37  ;;  %v342_v4 = vld [vmem:[%s3861_s1 + $0x998] sm:$0xff]  ;;  %v365_v37 = vld [vmem:[%s3861_s1 + $0xa50] sm:$0xff] }
  0xc3   :  { %1784 = vmatprep.subr.bf16.mxu1 %v1783_v6  ;;  %v1805_v6 = vpack.c.bf16 %v337_v2, %v333_v1  ;;  %v1807_v9 = vpack.c.bf16 %v346_v5, %v342_v4  ;;  %v1821_v43 = vpack.c.bf16 %v369_v38, %v365_v37  ;;  %v382_v47 = vld [vmem:[%s3861_s1 + $0xad8] sm:$0xff]  ;;  %v393_v55 = vld [vmem:[%s3861_s1 + $0xb30] sm:$0xff] }
  0xc4   :  { %v386_v48 = vld [vmem:[%s3861_s1 + $0xaf8] sm:$0xff]  ;;  %v401_v60 = vld [vmem:[%s3861_s1 + $0xb70] sm:$0xff] }
  0xc5   :  { %823 = vmatmul.mubr.f32.vlgmr.msra.gmra.mrb[2].mxu1 %v2442_v34  ;;  %v313_v34 = vld [vmem:[%s3861_s1 + $0x8b0] sm:$0xff]  ;;  %1898 = vmatpush1.bf16.msra.mxu0 %v1897_v49  ;;  %v1827_v50 = vpack.c.bf16 %v386_v48, %v382_v47  ;;  %v390_v36 = vld [vmem:[%s3861_s1 + $0xb18] sm:$0xff]  ;;  %v976_v47 = vld [vmem:[%s3863_s3 + $0x260] sm:$0xff] }
  0xc6   :  { %1786 = vmatpush1.bf16.msra.mxu1 %v1785_v16  ;;  %893 = vmatprep.mubr.f32.mxu1 %v2709_v42  ;;  %v322_v42 = vld [vmem:[%s3861_s1 + $0x8f8] sm:$0xff]  ;;  %v1793_v44 = vpack.c.bf16 %v313_v34, %v309_v31  ;;  %v962_v16 = vld [vmem:[%s3863_s3 + $0x1f0] sm:$0xff]  ;;  %v1911_v31 = vpack.c.bf16 %v967_v27, %v965_v26 }
  0xc7   :  { %1788 = vmatprep.subr.bf16.mxu1 %v1787_v17  ;;  %v1795_v45 = vpack.c.bf16 %v322_v42, %v318_v32  ;;  %1900 = vmatprep.subr.bf16.mxu0 %v1899_v51  ;;  %v1909_v17 = vpack.c.bf16 %v962_v16, %v960_v15  ;;  %v366_v34 = vld [vmem:[%s3861_s1 + $0xa58] sm:$0xff]  ;;  %v381_v51 = vld [vmem:[%s3861_s1 + $0xad0] sm:$0xff]  ;;  %v3516_v15 = vld [vmem:[%s3862_s2] sm:$0xf]  ;;  %v427_v16 = vsub.s32 1, %v2373_v61 }
  0xc8   :  { %v370_v32 = vld [vmem:[%s3861_s1 + $0xa78] sm:$0xff]  ;;  %v1829_v53 = vpack.c.bf16 %v385_v25, %v381_v51  ;;  %v405_v2 = vld [vmem:[%s3861_s1 + $0xb90] sm:$0xff] }
  0xc9   :  { %1902 = vmatpush1.bf16.msra.mxu0 %v1901_v58  ;;  %v1819_v42 = vpack.c.bf16 %v370_v32, %v366_v34  ;;  %v394_v52 = vld [vmem:[%s3861_s1 + $0xb38] sm:$0xff]  ;;  %v413_v8 = vld [vmem:[%s3861_s1 + $0xbd0] sm:$0xff]  ;;  %v968_v34 = vld [vmem:[%s3863_s3 + $0x220] sm:$0xff] }
  0xca   :  { %1790 = vmatpush1.bf16.msra.mxu1 %v1789_v29  ;;  %1904 = vmatprep.subr.bf16.mxu0 %v1903_v59  ;;  %v357_v29 = vld [vmem:[%s3861_s1 + $0xa10] sm:$0xff]  ;;  %v398_v56 = vld [vmem:[%s3861_s1 + $0xb58] sm:$0xff] }
  0xcb   :  { %1792 = vmatprep.subr.bf16.mxu1 %v1791_v30  ;;  %v361_v30 = vld [vmem:[%s3861_s1 + $0xa30] sm:$0xff]  ;;  %v402_v57 = vld [vmem:[%s3861_s1 + $0xb78] sm:$0xff] }
  0xcc   :  { %v1817_v35 = vpack.c.bf16 %v361_v30, %v357_v29  ;;  %v1835_v33 = vpack.c.bf16 %v402_v57, %v398_v56  ;;  %v397_v59 = vld [vmem:[%s3861_s1 + $0xb50] sm:$0xff]  ;;  %v406_v62 = vld [vmem:[%s3861_s1 + $0xb98] sm:$0xff]  ;;  %v984_v56 = vld [vmem:[%s3863_s3 + $0x2a0] sm:$0xff] }
  0xcd   :  { %1906 = vmatpush1.bf16.msra.mxu0 %v1905_v3  ;;  %v409_v3 = vld [vmem:[%s3861_s1 + $0xbb0] sm:$0xff]  ;;  %v414_v4 = vld [vmem:[%s3861_s1 + $0xbd8] sm:$0xff] }
  0xce   :  { %1794 = vmatpush1.bf16.msra.mxu1 %v1793_v44  ;;  %1908 = vmatprep.subr.bf16.mxu0 %v1907_v14  ;;  %v1823_v44 = vpack.c.bf16 %v378_v40, %v374_v39  ;;  %v418_v5 = vld [vmem:[%s3861_s1 + $0xbf8] sm:$0xff]  ;;  %v423_v14 = vsub.s32 0, %v2373_v61  ;;  %v966_v21 = vld [vmem:[%s3863_s3 + $0x210] sm:$0xff]  ;;  %v972_v39 = vld [vmem:[%s3863_s3 + $0x240] sm:$0xff] }
  0xcf   :  { %1796 = vmatprep.subr.bf16.mxu1 %v1795_v45  ;;  %v373_v45 = vld [vmem:[%s3861_s1 + $0xa90] sm:$0xff]  ;;  %v1843_v7 = vpack.c.bf16 %v418_v5, %v414_v4  ;;  %v971_v26 = vld [vmem:[%s3863_s3 + $0x238] sm:$0xff]  ;;  %v1913_v30 = vpack.c.bf16 %v966_v21, %v964_v20  ;;  %v992_v4 = vld [vmem:[%s3863_s3 + $0x2e0] sm:$0xff] }
  0xd0   :  { %v1825_v49 = vpack.c.bf16 %v377_v46, %v373_v45  ;;  %v970_v32 = vld [vmem:[%s3863_s3 + $0x230] sm:$0xff]  ;;  %v1005_v21 = vld [vmem:[%s3863_s3 + $0x348] sm:$0xff] }
  0xd1   :  { %1910 = vmatpush1.bf16.msra.mxu0 %v1909_v17  ;;  %v424_v17 = vrot.slane %v3516_v15, %v423_v14  ;;  %v1917_v37 = vpack.c.bf16 %v970_v32, %v968_v34  ;;  %v974_v40 = vld [vmem:[%s3863_s3 + $0x250] sm:$0xff]  ;;  %v1008_v34 = vld [vmem:[%s3863_s3 + $0x360] sm:$0xff] }
  0xd2   :  { %1798 = vmatpush1.bf16.msra.mxu1 %v1797_v54  ;;  %1912 = vmatprep.subr.bf16.mxu0 %v1911_v31  ;;  %v1831_v54 = vpack.c.bf16 %v394_v52, %v390_v36  ;;  %v1921_v45 = vpack.c.bf16 %v974_v40, %v972_v39  ;;  %v978_v48 = vld [vmem:[%s3863_s3 + $0x270] sm:$0xff]  ;;  %v980_v36 = vld [vmem:[%s3863_s3 + $0x280] sm:$0xff] }
  0xd3   :  { %1800 = vmatprep.subr.bf16.mxu1 %v1799_v41  ;;  %v389_v41 = vld [vmem:[%s3861_s1 + $0xb10] sm:$0xff]  ;;  %v1925_v51 = vpack.c.bf16 %v978_v48, %v976_v47  ;;  %v1012_v39 = vld [vmem:[%s3863_s3 + $0x380] sm:$0xff] }
  0xd4   :  { %v1833_v58 = vpack.c.bf16 %v393_v55, %v389_v41  ;;  %v982_v52 = vld [vmem:[%s3863_s3 + $0x290] sm:$0xff]  ;;  %v1016_v47 = vld [vmem:[%s3863_s3 + $0x3a0] sm:$0xff] }
  0xd5   :  { %v1929_v41 = vpack.c.bf16 %v982_v52, %v980_v36  ;;  %v986_v57 = vld [vmem:[%s3863_s3 + $0x2b0] sm:$0xff]  ;;  %v1020_v36 = vld [vmem:[%s3863_s3 + $0x3c0] sm:$0xff] }
  0xd6   :  { %1802 = vmatpush1.bf16.msra.mxu1 %v1801_v63  ;;  %v410_v63 = vld [vmem:[%s3861_s1 + $0xbb8] sm:$0xff]  ;;  %v994_v5 = vld [vmem:[%s3863_s3 + $0x2f0] sm:$0xff] }
  0xd7   :  { %1804 = vmatprep.subr.bf16.mxu1 %v1803_v0  ;;  %v1837_v0 = vpack.c.bf16 %v401_v60, %v397_v59  ;;  %v1839_v1 = vpack.c.bf16 %v410_v63, %v406_v62  ;;  %v1933_v59 = vpack.c.bf16 %v986_v57, %v984_v56  ;;  %v988_v62 = vld [vmem:[%s3863_s3 + $0x2c0] sm:$0xff]  ;;  %v990_v63 = vld [vmem:[%s3863_s3 + $0x2d0] sm:$0xff] }
  0xd8   :  { %v1002_v20 = vld [vmem:[%s3863_s3 + $0x330] sm:$0xff]  ;;  %v1024_v56 = vld [vmem:[%s3863_s3 + $0x3e0] sm:$0xff] }
  0xd9   :  { %v1010_v32 = vld [vmem:[%s3863_s3 + $0x370] sm:$0xff] }
  0xda   :  { %1806 = vmatpush1.bf16.msra.mxu1 %v1805_v6  ;;  %v1841_v6 = vpack.c.bf16 %v409_v3, %v405_v2  ;;  %v1937_v2 = vpack.c.bf16 %v990_v63, %v988_v62  ;;  %v1014_v40 = vld [vmem:[%s3863_s3 + $0x390] sm:$0xff]  ;;  %v435_v62 = vsub.s32 3, %v2373_v61  ;;  %v431_v63 = vsub.s32 2, %v2373_v61 }
  0xdb   :  { %1808 = vmatprep.subr.bf16.mxu1 %v1807_v9  ;;  %v417_v9 = vld [vmem:[%s3861_s1 + $0xbf0] sm:$0xff] }
  0xdc   :  { %v1845_v10 = vpack.c.bf16 %v417_v9, %v413_v8  ;;  %v1941_v8 = vpack.c.bf16 %v994_v5, %v992_v4  ;;  %v1018_v48 = vld [vmem:[%s3863_s3 + $0x3b0] sm:$0xff] }
  0xdd   :  { %v1022_v52 = vld [vmem:[%s3863_s3 + $0x3d0] sm:$0xff] }
  0xde   :  { %1810 = vmatpush1.bf16.msra.mxu1 %v1809_v18  ;;  %v428_v18 = vrot.slane %v3516_v15, %v427_v16  ;;  %v1026_v57 = vld [vmem:[%s3863_s3 + $0x3f0] sm:$0xff] }
  0xdf   :  { %1812 = vmatprep.subr.bf16.mxu1 %v1811_v19  ;;  %v1200_v5 = vld [vmem:[%s3865_s5 + $0x90] sm:$0xff] }
  0xe2   :  { %1814 = vmatpush1.bf16.msra.mxu1 %v1813_v24  ;;  %v969_v24 = vld [vmem:[%s3863_s3 + $0x228] sm:$0xff] }
  0xe3   :  { %1816 = vmatprep.subr.bf16.mxu1 %v1815_v28  ;;  %v1915_v31 = vpack.c.bf16 %v971_v26, %v969_v24  ;;  %v1004_v26 = vld [vmem:[%s3863_s3 + $0x340] sm:$0xff] }
  0xe6   :  { %1818 = vmatpush1.bf16.msra.mxu1 %v1817_v35  ;;  %v973_v35 = vld [vmem:[%s3863_s3 + $0x248] sm:$0xff] }
  0xe7   :  { %1820 = vmatprep.subr.bf16.mxu1 %v1819_v42  ;;  %v975_v42 = vld [vmem:[%s3863_s3 + $0x258] sm:$0xff] }
  0xe8   :  { %v1919_v38 = vpack.c.bf16 %v975_v42, %v973_v35  ;;  %v1013_v35 = vld [vmem:[%s3863_s3 + $0x388] sm:$0xff]  ;;  %v1015_v42 = vld [vmem:[%s3863_s3 + $0x398] sm:$0xff] }
  0xea   :  { %1822 = vmatpush1.bf16.msra.mxu1 %v1821_v43  ;;  %v977_v43 = vld [vmem:[%s3863_s3 + $0x268] sm:$0xff] }
  0xeb   :  { %1824 = vmatprep.subr.bf16.mxu1 %v1823_v44  ;;  %v979_v44 = vld [vmem:[%s3863_s3 + $0x278] sm:$0xff] }
  0xec   :  { %v1923_v46 = vpack.c.bf16 %v979_v44, %v977_v43  ;;  %v1017_v43 = vld [vmem:[%s3863_s3 + $0x3a8] sm:$0xff]  ;;  %v1019_v44 = vld [vmem:[%s3863_s3 + $0x3b8] sm:$0xff] }
  0xee   :  { %1826 = vmatpush1.bf16.msra.mxu1 %v1825_v49  ;;  %v981_v49 = vld [vmem:[%s3863_s3 + $0x288] sm:$0xff] }
  0xef   :  { %1828 = vmatprep.subr.bf16.mxu1 %v1827_v50  ;;  %v983_v50 = vld [vmem:[%s3863_s3 + $0x298] sm:$0xff] }
  0xf0   :  { %v1927_v25 = vpack.c.bf16 %v983_v50, %v981_v49  ;;  %v1021_v49 = vld [vmem:[%s3863_s3 + $0x3c8] sm:$0xff]  ;;  %v1023_v50 = vld [vmem:[%s3863_s3 + $0x3d8] sm:$0xff] }
  0xf2   :  { %1830 = vmatpush1.bf16.msra.mxu1 %v1829_v53  ;;  %v985_v53 = vld [vmem:[%s3863_s3 + $0x2a8] sm:$0xff] }
  0xf3   :  { %1832 = vmatprep.subr.bf16.mxu1 %v1831_v54  ;;  %v987_v54 = vld [vmem:[%s3863_s3 + $0x2b8] sm:$0xff] }
  0xf4   :  { %v1931_v55 = vpack.c.bf16 %v987_v54, %v985_v53  ;;  %v1025_v53 = vld [vmem:[%s3863_s3 + $0x3e8] sm:$0xff]  ;;  %v1027_v54 = vld [vmem:[%s3863_s3 + $0x3f8] sm:$0xff] }
  0xf6   :  { %1834 = vmatpush1.bf16.msra.mxu1 %v1833_v58  ;;  %v989_v58 = vld [vmem:[%s3863_s3 + $0x2c8] sm:$0xff] }
  0xf7   :  { %1836 = vmatprep.subr.bf16.mxu1 %v1835_v33  ;;  %v991_v33 = vld [vmem:[%s3863_s3 + $0x2d8] sm:$0xff] }
  0xf8   :  { %v1935_v60 = vpack.c.bf16 %v991_v33, %v989_v58  ;;  %v1198_v58 = vld [vmem:[%s3865_s5 + $0x80] sm:$0xff]  ;;  %v1199_v33 = vld [vmem:[%s3865_s5 + $0x88] sm:$0xff] }
  0xfa   :  { %1838 = vmatpush1.bf16.msra.mxu1 %v1837_v0  ;;  %v993_v0 = vld [vmem:[%s3863_s3 + $0x2e8] sm:$0xff] }
  0xfb   :  { %1840 = vmatprep.subr.bf16.mxu1 %v1839_v1  ;;  %v995_v1 = vld [vmem:[%s3863_s3 + $0x2f8] sm:$0xff] }
  0xfc   :  { %v1939_v3 = vpack.c.bf16 %v995_v1, %v993_v0  ;;  %v436_v0 = vrot.slane %v3516_v15, %v435_v62  ;;  %v432_v1 = vrot.slane %v3516_v15, %v431_v63  ;;  %v1296_v62 = vld [vmem:[%s3867_s7 + $0x28] sm:$0xff] }
  0xfe   :  { %1842 = vmatpush1.bf16.msra.mxu1 %v1841_v6  ;;  %v997_v6 = vld [vmem:[%s3863_s3 + $0x308] sm:$0xff] }
  0xff   :  { %1844 = vmatprep.subr.bf16.mxu1 %v1843_v7  ;;  %v999_v7 = vld [vmem:[%s3863_s3 + $0x318] sm:$0xff] }
 0x100   :  { %v1943_v9 = vpack.c.bf16 %v999_v7, %v997_v6  ;;  %v1201_v6 = vld [vmem:[%s3865_s5 + $0x98] sm:$0xff] }
 0x102   :  { %1846 = vmatpush1.bf16.msra.mxu1 %v1845_v10  ;;  %v996_v10 = vld [vmem:[%s3863_s3 + $0x300] sm:$0xff] }
 0x105   :  { %894 = vmatmul.mubr.f32.vlgmr.msra.gmra.mrb[2].mxu1 %v2041_v11  ;;  %v998_v11 = vld [vmem:[%s3863_s3 + $0x310] sm:$0xff] }
 0x118   :  { %v540_v12 = vpop.f32.mrb[0].mxu1 }
 0x119   :  { %v542_v13 = vpop.f32.mrb[1].mxu1  ;;  %v541_v19 = vadd.f32 %v540_v12, %v424_v17  ;;  %v1001_v12 = vld [vmem:[%s3863_s3 + $0x328] sm:$0xff]  ;;  %v1945_v17 = vpack.c.bf16 %v998_v11, %v996_v10  ;;  %v1979_v10 = vpack.c.bf16 %v1201_v6, %v1200_v5  ;;  %v1184_v11 = vld [vmem:[%s3865_s5 + $0x10] sm:$0xff] }
 0x11a   :  { %v543_v22 = vadd.f32 %v542_v13, %v428_v18  ;;  %v1003_v13 = vld [vmem:[%s3863_s3 + $0x338] sm:$0xff] }
 0x11b   :  { %v1947_v18 = vpack.c.bf16 %v1003_v13, %v1001_v12  ;;  %v1185_v12 = vld [vmem:[%s3865_s5 + $0x18] sm:$0xff]  ;;  %v1202_v13 = vld [vmem:[%s3865_s5 + $0xa0] sm:$0xff] }
 0x15a   :  { %v682_v23 = vpop.f32.mrb[0].mxu0 }
 0x15b   :  { %v2020_v27 = vadd.f32 %v682_v23, %v541_v19  ;;  %v684_v28 = vpop.f32.mrb[1].mxu0  ;;  %v1000_v19 = vld [vmem:[%s3863_s3 + $0x320] sm:$0xff] }
 0x15c   :  { %v2022_v29 = vadd.f32 %v684_v28, %v543_v22  ;;  %v1007_v22 = vld [vmem:[%s3863_s3 + $0x358] sm:$0xff]  ;;  %v1949_v23 = vpack.c.bf16 %v1002_v20, %v1000_v19  ;;  %v1009_v28 = vld [vmem:[%s3863_s3 + $0x368] sm:$0xff]  ;;  %v1186_v20 = vld [vmem:[%s3865_s5 + $0x20] sm:$0xff] }
 0x15d   :  { %v1951_v24 = vpack.c.bf16 %v1007_v22, %v1005_v21  ;;  %v1187_v21 = vld [vmem:[%s3865_s5 + $0x28] sm:$0xff]  ;;  %v1204_v22 = vld [vmem:[%s3865_s5 + $0xb0] sm:$0xff] }
 0x15e   :  { %1104 = vmatprep.mubr.f32.mxu0 %v2022_v29  ;;  %v1011_v29 = vld [vmem:[%s3863_s3 + $0x378] sm:$0xff] }
 0x15f   :  { %1105 = vmatmul.mubr.f32.vlgmr.msra.gmra.mrb[2].mxu0 %v2020_v27  ;;  %v1006_v27 = vld [vmem:[%s3863_s3 + $0x350] sm:$0xff] }
 0x160   :  { %1914 = vmatpush1.bf16.msra.mxu0 %v1913_v30  ;;  %v1953_v30 = vpack.c.bf16 %v1006_v27, %v1004_v26  ;;  %v1188_v27 = vld [vmem:[%s3865_s5 + $0x30] sm:$0xff] }
 0x161   :  { %1916 = vmatprep.subr.bf16.mxu0 %v1915_v31  ;;  %v1955_v31 = vpack.c.bf16 %v1011_v29, %v1009_v28  ;;  %v1189_v28 = vld [vmem:[%s3865_s5 + $0x38] sm:$0xff]  ;;  %v1206_v29 = vld [vmem:[%s3865_s5 + $0xc0] sm:$0xff] }
 0x164   :  { %1918 = vmatpush1.bf16.msra.mxu0 %v1917_v37  ;;  %v1957_v37 = vpack.c.bf16 %v1010_v32, %v1008_v34  ;;  %v1190_v32 = vld [vmem:[%s3865_s5 + $0x40] sm:$0xff] }
 0x165   :  { %1920 = vmatprep.subr.bf16.mxu0 %v1919_v38  ;;  %v1959_v38 = vpack.c.bf16 %v1015_v42, %v1013_v35  ;;  %v1191_v35 = vld [vmem:[%s3865_s5 + $0x48] sm:$0xff]  ;;  %v1208_v42 = vld [vmem:[%s3865_s5 + $0xd0] sm:$0xff] }
 0x168   :  { %1922 = vmatpush1.bf16.msra.mxu0 %v1921_v45  ;;  %v1961_v45 = vpack.c.bf16 %v1014_v40, %v1012_v39  ;;  %v1192_v40 = vld [vmem:[%s3865_s5 + $0x50] sm:$0xff] }
 0x169   :  { %1924 = vmatprep.subr.bf16.mxu0 %v1923_v46  ;;  %v1963_v46 = vpack.c.bf16 %v1019_v44, %v1017_v43  ;;  %v1193_v43 = vld [vmem:[%s3865_s5 + $0x58] sm:$0xff]  ;;  %v1210_v44 = vld [vmem:[%s3865_s5 + $0xe0] sm:$0xff] }
 0x16c   :  { %1926 = vmatpush1.bf16.msra.mxu0 %v1925_v51  ;;  %v1965_v51 = vpack.c.bf16 %v1018_v48, %v1016_v47  ;;  %v1194_v48 = vld [vmem:[%s3865_s5 + $0x60] sm:$0xff] }
 0x16d   :  { %1928 = vmatprep.subr.bf16.mxu0 %v1927_v25  ;;  %v1967_v25 = vpack.c.bf16 %v1023_v50, %v1021_v49  ;;  %v1195_v49 = vld [vmem:[%s3865_s5 + $0x68] sm:$0xff] }
 0x16e   :  { %v2001_v50 = vpack.c.bf16 %v1195_v49, %v1194_v48 }
 0x170   :  { %1930 = vmatpush1.bf16.msra.mxu0 %v1929_v41  ;;  %v1969_v41 = vpack.c.bf16 %v1022_v52, %v1020_v36  ;;  %v1196_v52 = vld [vmem:[%s3865_s5 + $0x70] sm:$0xff] }
 0x171   :  { %1932 = vmatprep.subr.bf16.mxu0 %v1931_v55  ;;  %v1971_v55 = vpack.c.bf16 %v1027_v54, %v1025_v53  ;;  %v1197_v53 = vld [vmem:[%s3865_s5 + $0x78] sm:$0xff] }
 0x172   :  { %v2005_v54 = vpack.c.bf16 %v1197_v53, %v1196_v52 }
 0x174   :  { %1934 = vmatpush1.bf16.msra.mxu0 %v1933_v59  ;;  %v1973_v59 = vpack.c.bf16 %v1026_v57, %v1024_v56  ;;  %v1293_v56 = vld [vmem:[%s3867_s7 + $0x10] sm:$0xff]  ;;  %v2067_v57 = vmov 0.0|0.0  }
 0x175   :  { %1936 = vmatprep.subr.bf16.mxu0 %v1935_v60  ;;  %v1975_v60 = vpack.c.bf16 %v1199_v33, %v1198_v58  ;;  %2007 = vmatprep.subr.bf16.mxu1 %v2067_v57  ;;  %v1294_v33 = vld [vmem:[%s3867_s7 + $0x18] sm:$0xff] }
 0x178   :  { %1938 = vmatpush1.bf16.msra.mxu0 %v1937_v2  ;;  %v1182_v2 = vld [vmem:[%s3865_s5] sm:$0xff] }
 0x179   :  { %1940 = vmatprep.subr.bf16.mxu0 %v1939_v3  ;;  %v1183_v3 = vld [vmem:[%s3865_s5 + $0x8] sm:$0xff] }
 0x17a   :  { %v1977_v15 = vpack.c.bf16 %v1183_v3, %v1182_v2 }
 0x17c   :  { %1942 = vmatpush1.bf16.msra.mxu0 %v1941_v8 }
 0x17d   :  { %1944 = vmatprep.subr.bf16.mxu0 %v1943_v9 }
 0x180   :  { %1946 = vmatpush1.bf16.msra.mxu0 %v1945_v17  ;;  %v1203_v17 = vld [vmem:[%s3865_s5 + $0xa8] sm:$0xff] }
 0x181   :  { %1948 = vmatprep.subr.bf16.mxu0 %v1947_v18  ;;  %v1981_v18 = vpack.c.bf16 %v1185_v12, %v1184_v11  ;;  %v1983_v19 = vpack.c.bf16 %v1203_v17, %v1202_v13  ;;  %v1398_v12 = vld [vmem:[%s3868_s8] ss:$0 sm:$0xff] }
 0x184   :  { %1950 = vmatpush1.bf16.msra.mxu0 %v1949_v23  ;;  %v1205_v23 = vld [vmem:[%s3865_s5 + $0xb8] sm:$0xff] }
 0x185   :  { %1952 = vmatprep.subr.bf16.mxu0 %v1951_v24  ;;  %v1985_v24 = vpack.c.bf16 %v1187_v21, %v1186_v20  ;;  %v1987_v26 = vpack.c.bf16 %v1205_v23, %v1204_v22 }
 0x188   :  { %1954 = vmatpush1.bf16.msra.mxu0 %v1953_v30  ;;  %v1207_v30 = vld [vmem:[%s3865_s5 + $0xc8] sm:$0xff] }
 0x189   :  { %1956 = vmatprep.subr.bf16.mxu0 %v1955_v31  ;;  %v1989_v31 = vpack.c.bf16 %v1189_v28, %v1188_v27  ;;  %v1991_v34 = vpack.c.bf16 %v1207_v30, %v1206_v29 }
 0x18c   :  { %1958 = vmatpush1.bf16.msra.mxu0 %v1957_v37  ;;  %v1209_v37 = vld [vmem:[%s3865_s5 + $0xd8] sm:$0xff] }
 0x18d   :  { %1960 = vmatprep.subr.bf16.mxu0 %v1959_v38  ;;  %v1993_v38 = vpack.c.bf16 %v1191_v35, %v1190_v32  ;;  %v1995_v39 = vpack.c.bf16 %v1209_v37, %v1208_v42 }
 0x190   :  { %1962 = vmatpush1.bf16.msra.mxu0 %v1961_v45  ;;  %v1211_v45 = vld [vmem:[%s3865_s5 + $0xe8] sm:$0xff] }
 0x191   :  { %1964 = vmatprep.subr.bf16.mxu0 %v1963_v46  ;;  %v1997_v46 = vpack.c.bf16 %v1193_v43, %v1192_v40  ;;  %v1999_v47 = vpack.c.bf16 %v1211_v45, %v1210_v44 }
 0x194   :  { %1966 = vmatpush1.bf16.msra.mxu0 %v1965_v51  ;;  %v1212_v51 = vld [vmem:[%s3865_s5 + $0xf0] sm:$0xff] }
 0x195   :  { %1968 = vmatprep.subr.bf16.mxu0 %v1967_v25  ;;  %v1213_v25 = vld [vmem:[%s3865_s5 + $0xf8] sm:$0xff] }
 0x196   :  { %v2003_v36 = vpack.c.bf16 %v1213_v25, %v1212_v51 }
 0x198   :  { %1970 = vmatpush1.bf16.msra.mxu0 %v1969_v41  ;;  %v1291_v41 = vld [vmem:[%s3867_s7] sm:$0xff] }
 0x199   :  { %1972 = vmatprep.subr.bf16.mxu0 %v1971_v55  ;;  %v1292_v55 = vld [vmem:[%s3867_s7 + $0x8] sm:$0xff] }
 0x19a   :  { %v2008_v58 = vpack.c.bf16 %v1292_v55, %v1291_v41 }
 0x19c   :  { %1974 = vmatpush1.bf16.msra.mxu0 %v1973_v59  ;;  %2009 = vmatpush3.bf16.msra.mxu1 %v2008_v58  ;;  %v2011_v59 = vpack.c.bf16 %v1294_v33, %v1293_v56 }
 0x19d   :  { %1976 = vmatprep.subr.bf16.mxu0 %v1975_v60  ;;  %2010 = vmatprep.subr.bf16.mxu1 %v2067_v57  ;;  %v1295_v60 = vld [vmem:[%s3867_s7 + $0x20] sm:$0xff] }
 0x19e   :  { %v2014_v63 = vpack.c.bf16 %v1296_v62, %v1295_v60 }
 0x1a0   :  { %2012 = vmatpush3.bf16.msra.mxu1 %v2011_v59 }
 0x1a1   :  { %2013 = vmatprep.subr.bf16.mxu1 %v2067_v57 }
 0x1a4   :  { %2015 = vmatpush3.bf16.msra.mxu1 %v2014_v63 }
 0x1a5   :  { %2016 = vmatprep.subr.bf16.mxu1 %v2067_v57 }
 0x1d8   :  { %v895_v4 = vpop.f32.mrb[2].mxu1 }
 0x1d9   :  { %v897_v7 = vpop.f32.mrb[3].mxu1  ;;  %v2023_v9 = vadd.f32 %v895_v4, %v432_v1 }
 0x1da   :  { %v2024_v8 = vadd.f32 %v897_v7, %v436_v0  ;;  %v1028_v0 = vld [vmem:[%s3864_s4] sm:$0x3]  ;;  %v1297_v7 = vld [vmem:[%s3867_s7 + $0x30] sm:$0xff] }
 0x1db   :  { %v1037_v1 = vrot.slane %v1028_v0, %v427_v16  ;;  %v1033_v2 = vrot.slane %v1028_v0, %v423_v14  ;;  %v2069_v16 = vmov 0.0   ;;  %v1397_v14 = vld [vmem:[%s3866_s6] ss:$0 sm:$0xff] }
 0x1dc   :  { %1175 = vmatprep.mubr.f32.mxu0 %v2024_v8  ;;  %v1298_v8 = vld [vmem:[%s3867_s7 + $0x38] sm:$0xff]  ;;  %1460 = vmatprep.mubr.msk.f32.mxu1 %vm2068_vm0, %v2069_v16  ;;  %s2070_s7 = smov [#allocation2]  }
 0x1dd   :  { %1176 = vmatmul.mubr.f32.vlgmr.msra.gmra.mrb[2].mxu0 %v2023_v9  ;;  %s1388_s23 = sshll.u32 %s2070_s7, 4  ;;  %s1389_s23 = int_to_ptr.vmem [resolvable:$true] %s1388_s23 }
 0x1de   :  { %1978 = vmatpush3.bf16.msra.mxu0 %v1977_v15  ;;  %v2017_v15 = vpack.c.bf16 %v1298_v8, %v1297_v7  ;;  %s2042_s24 = scalar_lea.vmem %s1389_s23, 32  ;;  %p2047_p1 = scmp.lt.s32.totalorder %s1389_s23, %s1389_s23 }
 0x1df   :  { %1980 = vmatprep.subr.bf16.mxu0 %v1979_v10  ;;  %p2043_p0 = scmp.ne.s32.totalorder %s1389_s23, %s2042_s24  ;;  %p2048_p2 = scmp.lt.s32.totalorder %s2042_s24, %s2042_s24 }
 0x1e0   :  { %2018 = vmatpush3.bf16.msra.mxu1 %v2017_v15 }
 0x1e1   :  { %p2049_p3 = por %p2048_p2, %p2047_p1 }
 0x1e2   :  { %1982 = vmatpush3.bf16.msra.mxu0 %v1981_v18 }
 0x1e3   :  { %1984 = vmatprep.subr.bf16.mxu0 %v1983_v19  ;;  %p2050_p4 = pnand %p2049_p3, %p2043_p0 }
 0x1e6   :  { %1986 = vmatpush3.bf16.msra.mxu0 %v1985_v24 }
 0x1e7   :  { %1988 = vmatprep.subr.bf16.mxu0 %v1987_v26 }
 0x1ea   :  { %1990 = vmatpush3.bf16.msra.mxu0 %v1989_v31 }
 0x1eb   :  { %1992 = vmatprep.subr.bf16.mxu0 %v1991_v34 }
 0x1ee   :  { %1994 = vmatpush3.bf16.msra.mxu0 %v1993_v38 }
 0x1ef   :  { %1996 = vmatprep.subr.bf16.mxu0 %v1995_v39 }
 0x1f2   :  { %1998 = vmatpush3.bf16.msra.mxu0 %v1997_v46 }
 0x1f3   :  { %2000 = vmatprep.subr.bf16.mxu0 %v1999_v47 }
 0x1f6   :  { %2002 = vmatpush3.bf16.msra.mxu0 %v2001_v50 }
 0x1f7   :  { %2004 = vmatprep.subr.bf16.mxu0 %v2003_v36 }
 0x1fa   :  { %2006 = vmatpush3.bf16.msra.mxu0 %v2005_v54 }
 0x2b0   :  { %v1177_v3 = vpop.f32.mrb[2].mxu0 }
 0x2b1   :  { %v1179_v4 = vpop.f32.mrb[3].mxu0  ;;  %v2025_v6 = vadd.f32 %v1177_v3, %v1033_v2 }
 0x2b2   :  { %v2026_v5 = vadd.f32 %v1179_v4, %v1037_v1 }
 0x2b4   :  { %1285 = vmatprep.mubr.f32.mxu0 %v2026_v5 }
 0x2b5   :  { %1286 = vmatmul.mubr.f32.vlgmr.msra.gmra.mrb[4].mxu0 %v2025_v6 }
 0x388   :  { %v1432_v61 = vpop.f32.mrb[4].mxu0 }
 0x389   :  { %v1433_v9 = vpop.f32.mrb[5].mxu0 }
 0x38a   :  { %v1434_v10 = vadd.f32 %v1433_v9, %v1432_v61 }
 0x38c   :  { %v1288_v11 = vadd.f32 %v1434_v10, %v1397_v14 }
 0x38e   :  { %1461 = vmatmul.mubr.msk.f32.vlgmr.msra.gmra.mrb[4].mxu1 %vm1306_vm1, %v1288_v11 }
 0x461   :  { %v1376_v13 = vpop.f32.mrb[4].mxu1 }
 0x462   :  { %v1377_v17 = vadd.f32 %v1398_v12, %v1376_v13  ;;  %v1462_v18 = vpop.f32.mrb[5].mxu1 }
 0x464   :  { %1381 = vst.msk [vmem:[#allocation2] sm:$0x3] %vm1380_vm2, %v1377_v17 }
 0x465   :  { %2053 = shalt.err (!%p2050_p4)
}
 0x466   :  { %s2054_s26 = scalar_lea.hbm %s3869_s9, 32 }
 0x467   :  { %p2055_p5 = scmp.ne.s32.totalorder %s3869_s9, %s2054_s26  ;;  %p2058_p6 = scmp.lt.u32.totalorder %s2054_s26, %s3869_s9 }
 0x469   :  { %p2060_p7 = pnand %p2058_p6, %p2055_p5 }
 0x46b   :  { %2063 = shalt.err (!%p2060_p7)
}
 0x46c   :  { %1391 = dma.vmem_to_hbm [thread:$0]  %s1389_s23, 32, %s3869_s9, [#allocation3]  }
 0x46d   :  { %2064 = dma.done.wait [#allocation3], 32  }
 0x46e   :  { %2065 = vsyncadd [#allocation3], 4294967264 }
 0x46f   :  { %1395 = vsyncpa [#allocation3], 1 }

</bundles_post_ra>
